<compile_context>
chip_gen: v7x
topology: tpu7x:2x2x1
jax: 0.10.0
libtpu: 0.0.40
codegen_flags: <defaults>
</compile_context>

<pallas_src>
import functools

import jax
import jax.numpy as jnp
from jax.experimental import pallas as pl
from jax.experimental.pallas import tpu as pltpu

LANE = 128                 # conv outputs lane-padded to this (unmasked 128-wide stores)
K_ALIGN = 16               # conv K (input channels) padded only to the bf16 packed tile
EPS = 1e-5
VMEM_LIMIT = 32 * 1024 * 1024


def _round_up(x, m):
    return (x + m - 1) // m * m


# ---------------------------------------------------------------------------
# Kernel 1: (optional fused BN+ReLU prologue) -> halo in VMEM -> 9 accumulated
#           MXU matmuls -> raw conv output + per-image BN partials (sum, M2)
# ---------------------------------------------------------------------------
def _conv_kernel(*refs, fuse_bn_relu):
    if fuse_bn_relu:
        x_ref, sc_ref, sh_ref, w_ref, y_ref, sum_ref, m2_ref, zpad_ref = refs
    else:
        x_ref, w_ref, y_ref, sum_ref, m2_ref, zpad_ref = refs
        sc_ref = sh_ref = None

    H, W, cout = y_ref.shape[1], y_ref.shape[2], y_ref.shape[3]
    cin = w_ref.shape[1]                      # K-aligned real input channels

    # ---- optional fused BN1+ReLU prologue on the previous conv's raw output ----
    x = x_ref[0]                              # (H, W, cin_store) bf16
    if x.shape[-1] != cin:
        x = x[:, :, :cin]                     # drop lane padding of stored activation
    if fuse_bn_relu:
        scale = sc_ref[...].reshape(1, 1, cin)
        shift = sh_ref[...].reshape(1, 1, cin)
        z = jnp.maximum(x.astype(jnp.float32) * scale + shift, 0.0).astype(jnp.bfloat16)
    else:
        z = x                                 # already bf16

    # ---- 1-pixel halo built in VMEM; only the border is (re)zeroed ----
    zero_row = jnp.zeros((W + 2, cin), zpad_ref.dtype)
    zero_col = jnp.zeros((H, 1, cin), z.dtype)
    zpad_ref[0, :, :] = zero_row
    zpad_ref[H + 1, :, :] = zero_row
    # interior rows written full-width (left/right halo columns folded into the store)
    zpad_ref[1:H + 1, :, :] = jnp.concatenate([zero_col, z, zero_col], axis=1)

    # ---- 3x3 conv = 9 accumulated matmuls, taps sliced straight off the Ref ----
    acc = jnp.zeros((H * W, cout), jnp.float32)
    for t in range(9):
        ky, kx = t // 3, t % 3
        tap = zpad_ref[ky:ky + H, kx:kx + W, :]                # (H, W, cin) bf16
        acc = acc + jnp.dot(tap.reshape(H * W, cin), w_ref[t],
                            preferred_element_type=jnp.float32)

    y_ref[0] = acc.reshape(H, W, cout).astype(y_ref.dtype)

    # ---- per-image BN partials: sum and mean-centred M2 (stable combine later) ----
    s = jnp.sum(acc, axis=0, keepdims=True)                    # (1, cout)
    centered = acc - s * (1.0 / (H * W))
    m2 = jnp.sum(centered * centered, axis=0, keepdims=True)
    sum_ref[...] = s.reshape(1, 1, cout)
    m2_ref[...] = m2.reshape(1, 1, cout)


def _conv(x, scale, shift, w_packed, *, fuse_bn_relu):
    """x: (N,H,W,cin_store) bf16; scale/shift: (1,cin) f32 (only if fused);
       w_packed: (9, cin, cout_p) bf16."""
    N, H, W, cin_store = x.shape
    _, cin, cout_p = w_packed.shape
    kernel = functools.partial(_conv_kernel, fuse_bn_relu=fuse_bn_relu)

    args = [x]
    in_specs = [pl.BlockSpec((1, H, W, cin_store), lambda n: (n, 0, 0, 0))]
    if fuse_bn_relu:
        args += [scale, shift]
        in_specs += [pl.BlockSpec((1, cin), lambda n: (0, 0)),
                     pl.BlockSpec((1, cin), lambda n: (0, 0))]
    args.append(w_packed)
    in_specs.append(pl.BlockSpec((9, cin, cout_p), lambda n: (0, 0, 0)))

    return pl.pallas_call(
        kernel,
        out_shape=(jax.ShapeDtypeStruct((N, H, W, cout_p), jnp.bfloat16),
                   jax.ShapeDtypeStruct((N, 1, cout_p), jnp.float32),
                   jax.ShapeDtypeStruct((N, 1, cout_p), jnp.float32)),
        grid=(N,),
        in_specs=in_specs,
        out_specs=(pl.BlockSpec((1, H, W, cout_p), lambda n: (n, 0, 0, 0)),
                   pl.BlockSpec((1, 1, cout_p), lambda n: (n, 0, 0)),
                   pl.BlockSpec((1, 1, cout_p), lambda n: (n, 0, 0))),
        scratch_shapes=[pltpu.VMEM((H + 2, W + 2, cin), jnp.bfloat16)],
        compiler_params=pltpu.CompilerParams(
            dimension_semantics=("parallel",),
            vmem_limit_bytes=VMEM_LIMIT),
    )(*args)


# ---------------------------------------------------------------------------
# Kernel 2: final BatchNorm (scale/shift) + ReLU, elementwise, row-tiled,
#           writing only the real Cout channels.
# ---------------------------------------------------------------------------
def _bn_relu_kernel(y_ref, sc_ref, sh_ref, o_ref):
    cout = o_ref.shape[3]
    y = y_ref[0]
    if y.shape[-1] != cout:
        y = y[:, :, :cout]
    scale = sc_ref[...].reshape(1, 1, cout)
    shift = sh_ref[...].reshape(1, 1, cout)
    o_ref[0] = jnp.maximum(y.astype(jnp.float32) * scale + shift, 0.0)


def _pick_tile_h(H, W, c, bytes_per_elem=2, budget=2 * 1024 * 1024):
    rows = max(1, budget // max(1, W * c * bytes_per_elem))
    th = min(H, rows)
    while H % th:
        th -= 1
    return th


def _bn_relu(y, scale, shift, cout):
    N, H, W, cp = y.shape
    th = _pick_tile_h(H, W, cp)
    return pl.pallas_call(
        _bn_relu_kernel,
        out_shape=jax.ShapeDtypeStruct((N, H, W, cout), jnp.float32),
        grid=(N, H // th),
        in_specs=[pl.BlockSpec((1, th, W, cp), lambda n, h: (n, h, 0, 0)),
                  pl.BlockSpec((1, cout), lambda n, h: (0, 0)),
                  pl.BlockSpec((1, cout), lambda n, h: (0, 0))],
        out_specs=pl.BlockSpec((1, th, W, cout), lambda n, h: (n, h, 0, 0)),
        compiler_params=pltpu.CompilerParams(
            dimension_semantics=("parallel", "parallel"),
            vmem_limit_bytes=VMEM_LIMIT),
    )(y, scale, shift)


# ---------------------------------------------------------------------------
# Host-side helpers (tiny arrays only)
# ---------------------------------------------------------------------------
def _finalize_bn(sums, m2s, gamma, beta, n_per_image, c_real, pad_to):
    """Combine per-image (sum, M2) partials via the parallel-variance formula and fold
    gamma/beta into one affine scale/shift (training-mode batch statistics)."""
    n_images = sums.shape[0]
    total = n_per_image * n_images
    s = sums[:, 0, :c_real]                                   # (N, C)
    m2 = m2s[:, 0, :c_real]                                   # (N, C)
    mean_i = s / n_per_image
    mean = jnp.sum(s, axis=0) / total
    m2_tot = jnp.sum(m2, axis=0) + n_per_image * jnp.sum((mean_i - mean) ** 2, axis=0)
    var = m2_tot / total                                      # biased, as PyTorch normalises with
    inv = jax.lax.rsqrt(var + EPS)
    scale = gamma.astype(jnp.float32) * inv
    shift = beta.astype(jnp.float32) - mean * scale
    if pad_to > c_real:                                       # padded channels -> scale=shift=0
        scale = jnp.pad(scale, (0, pad_to - c_real))
        shift = jnp.pad(shift, (0, pad_to - c_real))
    return scale.reshape(1, -1), shift.reshape(1, -1)
    # TODO(synk): BatchNorm running_mean / running_var buffer updates are not emitted
    #             (stateful bookkeeping; does not affect this forward output).


def _pack_weight(w, cin_k, cout_p):
    """(3,3,Cin,Cout) f32 -> (9, cin_k, cout_p) bf16; K padded to 16, N lane-padded."""
    _, _, cin, cout = w.shape
    wp = jnp.pad(w, ((0, 0), (0, 0), (0, cin_k - cin), (0, cout_p - cout)))
    return wp.reshape(9, cin_k, cout_p).astype(jnp.bfloat16)


# ---------------------------------------------------------------------------
# DoubleConv forward (input/output in PyTorch NCHW)
# ---------------------------------------------------------------------------
def double_conv_forward(x_nchw, params):
    w1, w2 = params["w1"], params["w2"]
    N, Cin, H, W = x_nchw.shape
    Cmid, Cout = w1.shape[-1], w2.shape[-1]
    cin_k = _round_up(Cin, K_ALIGN)           # conv K dims: small alignment only
    cmid_k = _round_up(Cmid, K_ALIGN)
    cmid_p = _round_up(Cmid, LANE)            # conv output channels: lane-dense
    cout_p = _round_up(Cout, LANE)

    # NCHW -> NHWC, bf16 compute dtype; only a small K-alignment channel pad.  The
    # spatial halo is built inside the kernel (no whole-tensor pad in HBM).
    x = jnp.transpose(x_nchw, (0, 2, 3, 1)).astype(jnp.bfloat16)
    x = jnp.pad(x, ((0, 0), (0, 0), (0, 0), (0, cin_k - Cin)))

    w1p = _pack_weight(w1, cin_k, cmid_p)
    w2p = _pack_weight(w2, cmid_k, cout_p)

    # conv1: raw conv output (lane-padded bf16) + per-image BN1 partials.
    y1, s1, m21 = _conv(x, None, None, w1p, fuse_bn_relu=False)
    scale1, shift1 = _finalize_bn(s1, m21, params["gamma1"], params["beta1"],
                                  H * W, Cmid, cmid_k)

    # conv2 with BN1+ReLU fused into its prologue (y1 crosses HBM exactly once).
    y2, s2, m22 = _conv(y1, scale1, shift1, w2p, fuse_bn_relu=True)
    scale2, shift2 = _finalize_bn(s2, m22, params["gamma2"], params["beta2"],
                                  H * W, Cout, Cout)

    # Final BN2 + ReLU; writes only the real Cout channels (f32 NHWC).
    out = _bn_relu(y2, scale2, shift2, Cout)                  # (N, H, W, Cout)
    # TODO(synk): emit NCHW directly from the tail kernel to drop this transpose.
    return jnp.transpose(out, (0, 3, 1, 2))


# ---------------------------------------------------------------------------
# Pure-JAX reference mirroring the kernel numerics (bf16 matmul inputs / bf16
# activation storage, f32 accumulation and f32 BN statistics).  Relative to an
# all-f32 PyTorch DoubleConv the only difference is bf16 rounding; the Conv2d
# bias is omitted since it cancels exactly under training-mode BatchNorm.
# ---------------------------------------------------------------------------
def _ref_conv(z_bf16, w):
    return jax.lax.conv_general_dilated(
        z_bf16.astype(jnp.bfloat16), w.astype(jnp.bfloat16),
        window_strides=(1, 1), padding=((1, 1), (1, 1)),
        dimension_numbers=("NHWC", "HWIO", "NHWC"),
        preferred_element_type=jnp.float32)


def _ref_bn_relu(y_f32, gamma, beta):
    mean = jnp.mean(y_f32, axis=(0, 1, 2))
    var = jnp.mean((y_f32 - mean) ** 2, axis=(0, 1, 2))
    inv = jax.lax.rsqrt(var + EPS)
    scale = gamma * inv
    shift = beta - mean * scale
    yb = y_f32.astype(jnp.bfloat16).astype(jnp.float32)   # kernels store activations in bf16
    return jnp.maximum(yb * scale + shift, 0.0)


def _ref_double_conv(x_nchw, params):
    x = jnp.transpose(x_nchw, (0, 2, 3, 1)).astype(jnp.bfloat16)
    y1 = _ref_conv(x, params["w1"])
    z1 = _ref_bn_relu(y1, params["gamma1"], params["beta1"]).astype(jnp.bfloat16)
    y2 = _ref_conv(z1, params["w2"])
    out = _ref_bn_relu(y2, params["gamma2"], params["beta2"])
    return jnp.transpose(out, (0, 3, 1, 2))


if __name__ == "__main__":
    key = jax.random.PRNGKey(0)
    N, Cin, H, W = 2, 4, 16, 16
    mid, Cout = 8, 8                  # mid_channels defaults to out_channels

    k = jax.random.split(key, 7)
    x = jax.random.normal(k[0], (N, Cin, H, W), jnp.float32)

    params = {
        "w1": jax.random.normal(k[1], (3, 3, Cin, mid), jnp.float32) * 0.1,
        "gamma1": 1.0 + 0.1 * jax.random.normal(k[2], (mid,), jnp.float32),
        "beta1": 0.1 * jax.random.normal(k[3], (mid,), jnp.float32),
        "w2": jax.random.normal(k[4], (3, 3, mid, Cout), jnp.float32) * 0.1,
        "gamma2": 1.0 + 0.1 * jax.random.normal(k[5], (Cout,), jnp.float32),
        "beta2": 0.1 * jax.random.normal(k[6], (Cout,), jnp.float32),
    }

    fwd = jax.jit(double_conv_forward)
    out = jax.block_until_ready(fwd(x, params))
    ref = jax.block_until_ready(_ref_double_conv(x, params))

    assert out.shape == (N, Cout, H, W), out.shape
    assert jnp.allclose(out, ref, rtol=1e-2, atol=1e-2), \
        float(jnp.max(jnp.abs(out - ref)))

    print("KERNEL_OK")
</pallas_src>

<mosaic_0001>
module attributes {stable_mosaic.version = 11 : i64} {
  func.func @_conv_kernel(%arg0: i32, %arg1: memref<1x16x16x16xbf16, #tpu.memory_space<vmem>>, %arg2: memref<9x16x128xbf16, #tpu.memory_space<vmem>>, %arg3: memref<1x16x16x128xbf16, #tpu.memory_space<vmem>>, %arg4: memref<1x1x128xf32, #tpu.memory_space<vmem>>, %arg5: memref<1x1x128xf32, #tpu.memory_space<vmem>>, %arg6: memref<18x18x16xbf16, #tpu.memory_space<vmem>>) attributes {dimension_semantics = [#tpu.dimension_semantics<parallel>], iteration_bounds = array<i64: 2>, scalar_prefetch = 0 : i64, scratch_operands = 1 : i64, tpu.core_type = #tpu.core_type<tc>, window_params = [{transform_indices = @transform_0, window_bounds = array<i64: 1, 16, 16, 16>}, {pipeline_mode = #tpu.pipeline_mode<synchronous>, transform_indices = @transform_1, window_bounds = array<i64: 9, 16, 128>}, {transform_indices = @transform_2, window_bounds = array<i64: 1, 16, 16, 128>}, {transform_indices = @transform_3, window_bounds = array<i64: 1, 1, 128>}, {transform_indices = @transform_4, window_bounds = array<i64: 1, 1, 128>}]} {
    %c0 = arith.constant 0 : index
    %c0_0 = arith.constant 0 : index
    %c0_1 = arith.constant 0 : index
    %c0_2 = arith.constant 0 : index
    %0 = vector.load %arg1[%c0, %c0_0, %c0_1, %c0_2] : memref<1x16x16x16xbf16, #tpu.memory_space<vmem>>, vector<1x16x16x16xbf16>
    %1 = vector.shape_cast %0 : vector<1x16x16x16xbf16> to vector<16x16x16xbf16>
    %cst = arith.constant 0.000000e+00 : bf16
    %2 = vector.broadcast %cst : bf16 to vector<18x16xbf16>
    %cst_3 = arith.constant 0.000000e+00 : bf16
    %3 = vector.broadcast %cst_3 : bf16 to vector<16x1x16xbf16>
    %c0_4 = arith.constant 0 : index
    %c0_5 = arith.constant 0 : index
    %c0_6 = arith.constant 0 : index
    %4 = vector.load %arg6[%c0_4, %c0_5, %c0_6] : memref<18x18x16xbf16, #tpu.memory_space<vmem>>, vector<1x18x16xbf16>
    %5 = vector.shape_cast %4 : vector<1x18x16xbf16> to vector<18x16xbf16>
    %6 = vector.shape_cast %2 : vector<18x16xbf16> to vector<1x18x16xbf16>
    tpu.vector_store %arg6[%c0_4, %c0_5, %c0_6], %6 {strides = array<i32>} : memref<18x18x16xbf16, #tpu.memory_space<vmem>>, vector<1x18x16xbf16>,
    %c17 = arith.constant 17 : index
    %c0_7 = arith.constant 0 : index
    %c0_8 = arith.constant 0 : index
    %7 = vector.load %arg6[%c17, %c0_7, %c0_8] : memref<18x18x16xbf16, #tpu.memory_space<vmem>>, vector<1x18x16xbf16>
    %8 = vector.shape_cast %7 : vector<1x18x16xbf16> to vector<18x16xbf16>
    %9 = vector.shape_cast %2 : vector<18x16xbf16> to vector<1x18x16xbf16>
    tpu.vector_store %arg6[%c17, %c0_7, %c0_8], %9 {strides = array<i32>} : memref<18x18x16xbf16, #tpu.memory_space<vmem>>, vector<1x18x16xbf16>,
    %10 = tpu.concatenate %3, %1, %3 in 1 : vector<16x1x16xbf16>, vector<16x16x16xbf16>, vector<16x1x16xbf16> -> vector<16x18x16xbf16>
    %c1 = arith.constant 1 : index
    %c0_9 = arith.constant 0 : index
    %c0_10 = arith.constant 0 : index
    %11 = vector.load %arg6[%c1, %c0_9, %c0_10] : memref<18x18x16xbf16, #tpu.memory_space<vmem>>, vector<16x18x16xbf16>
    tpu.vector_store %arg6[%c1, %c0_9, %c0_10], %10 {strides = array<i32>} : memref<18x18x16xbf16, #tpu.memory_space<vmem>>, vector<16x18x16xbf16>,
    %cst_11 = arith.constant 0.000000e+00 : f32
    %12 = vector.broadcast %cst_11 : f32 to vector<256x128xf32>
    %c0_12 = arith.constant 0 : index
    %c0_13 = arith.constant 0 : index
    %c0_14 = arith.constant 0 : index
    %13 = vector.load %arg6[%c0_12, %c0_13, %c0_14] : memref<18x18x16xbf16, #tpu.memory_space<vmem>>, vector<16x16x16xbf16>
    %14 = vector.shape_cast %13 : vector<16x16x16xbf16> to vector<256x16xbf16>
    %c0_15 = arith.constant 0 : index
    %c0_16 = arith.constant 0 : index
    %c0_17 = arith.constant 0 : index
    %15 = vector.load %arg2[%c0_15, %c0_16, %c0_17] : memref<9x16x128xbf16, #tpu.memory_space<vmem>>, vector<1x16x128xbf16>
    %16 = vector.shape_cast %15 : vector<1x16x128xbf16> to vector<16x128xbf16>
    %cst_18 = arith.constant dense<0.000000e+00> : vector<256x128xf32>
    %17 = tpu.matmul %14, %16, %cst_18 {dimension_numbers = #tpu.dot_dimension_numbers<[1], [0], [0], [1], [0, 0, 1, 1], [], []>} : vector<256x16xbf16>, vector<16x128xbf16>, vector<256x128xf32> -> vector<256x128xf32>
    %18 = arith.addf %12, %17 : vector<256x128xf32>
    %c0_19 = arith.constant 0 : index
    %c1_20 = arith.constant 1 : index
    %c0_21 = arith.constant 0 : index
    %19 = vector.load %arg6[%c0_19, %c1_20, %c0_21] : memref<18x18x16xbf16, #tpu.memory_space<vmem>>, vector<16x16x16xbf16>
    %20 = vector.shape_cast %19 : vector<16x16x16xbf16> to vector<256x16xbf16>
    %c1_22 = arith.constant 1 : index
    %c0_23 = arith.constant 0 : index
    %c0_24 = arith.constant 0 : index
    %21 = vector.load %arg2[%c1_22, %c0_23, %c0_24] : memref<9x16x128xbf16, #tpu.memory_space<vmem>>, vector<1x16x128xbf16>
    %22 = vector.shape_cast %21 : vector<1x16x128xbf16> to vector<16x128xbf16>
    %cst_25 = arith.constant dense<0.000000e+00> : vector<256x128xf32>
    %23 = tpu.matmul %20, %22, %cst_25 {dimension_numbers = #tpu.dot_dimension_numbers<[1], [0], [0], [1], [0, 0, 1, 1], [], []>} : vector<256x16xbf16>, vector<16x128xbf16>, vector<256x128xf32> -> vector<256x128xf32>
    %24 = arith.addf %18, %23 : vector<256x128xf32>
    %c0_26 = arith.constant 0 : index
    %c2 = arith.constant 2 : index
    %c0_27 = arith.constant 0 : index
    %25 = vector.load %arg6[%c0_26, %c2, %c0_27] : memref<18x18x16xbf16, #tpu.memory_space<vmem>>, vector<16x16x16xbf16>
    %26 = vector.shape_cast %25 : vector<16x16x16xbf16> to vector<256x16xbf16>
    %c2_28 = arith.constant 2 : index
    %c0_29 = arith.constant 0 : index
    %c0_30 = arith.constant 0 : index
    %27 = vector.load %arg2[%c2_28, %c0_29, %c0_30] : memref<9x16x128xbf16, #tpu.memory_space<vmem>>, vector<1x16x128xbf16>
    %28 = vector.shape_cast %27 : vector<1x16x128xbf16> to vector<16x128xbf16>
    %cst_31 = arith.constant dense<0.000000e+00> : vector<256x128xf32>
    %29 = tpu.matmul %26, %28, %cst_31 {dimension_numbers = #tpu.dot_dimension_numbers<[1], [0], [0], [1], [0, 0, 1, 1], [], []>} : vector<256x16xbf16>, vector<16x128xbf16>, vector<256x128xf32> -> vector<256x128xf32>
    %30 = arith.addf %24, %29 : vector<256x128xf32>
    %c1_32 = arith.constant 1 : index
    %c0_33 = arith.constant 0 : index
    %c0_34 = arith.constant 0 : index
    %31 = vector.load %arg6[%c1_32, %c0_33, %c0_34] : memref<18x18x16xbf16, #tpu.memory_space<vmem>>, vector<16x16x16xbf16>
    %32 = vector.shape_cast %31 : vector<16x16x16xbf16> to vector<256x16xbf16>
    %c3 = arith.constant 3 : index
    %c0_35 = arith.constant 0 : index
    %c0_36 = arith.constant 0 : index
    %33 = vector.load %arg2[%c3, %c0_35, %c0_36] : memref<9x16x128xbf16, #tpu.memory_space<vmem>>, vector<1x16x128xbf16>
    %34 = vector.shape_cast %33 : vector<1x16x128xbf16> to vector<16x128xbf16>
    %cst_37 = arith.constant dense<0.000000e+00> : vector<256x128xf32>
    %35 = tpu.matmul %32, %34, %cst_37 {dimension_numbers = #tpu.dot_dimension_numbers<[1], [0], [0], [1], [0, 0, 1, 1], [], []>} : vector<256x16xbf16>, vector<16x128xbf16>, vector<256x128xf32> -> vector<256x128xf32>
    %36 = arith.addf %30, %35 : vector<256x128xf32>
    %c1_38 = arith.constant 1 : index
    %c1_39 = arith.constant 1 : index
    %c0_40 = arith.constant 0 : index
    %37 = vector.load %arg6[%c1_38, %c1_39, %c0_40] : memref<18x18x16xbf16, #tpu.memory_space<vmem>>, vector<16x16x16xbf16>
    %38 = vector.shape_cast %37 : vector<16x16x16xbf16> to vector<256x16xbf16>
    %c4 = arith.constant 4 : index
    %c0_41 = arith.constant 0 : index
    %c0_42 = arith.constant 0 : index
    %39 = vector.load %arg2[%c4, %c0_41, %c0_42] : memref<9x16x128xbf16, #tpu.memory_space<vmem>>, vector<1x16x128xbf16>
    %40 = vector.shape_cast %39 : vector<1x16x128xbf16> to vector<16x128xbf16>
    %cst_43 = arith.constant dense<0.000000e+00> : vector<256x128xf32>
    %41 = tpu.matmul %38, %40, %cst_43 {dimension_numbers = #tpu.dot_dimension_numbers<[1], [0], [0], [1], [0, 0, 1, 1], [], []>} : vector<256x16xbf16>, vector<16x128xbf16>, vector<256x128xf32> -> vector<256x128xf32>
    %42 = arith.addf %36, %41 : vector<256x128xf32>
    %c1_44 = arith.constant 1 : index
    %c2_45 = arith.constant 2 : index
    %c0_46 = arith.constant 0 : index
    %43 = vector.load %arg6[%c1_44, %c2_45, %c0_46] : memref<18x18x16xbf16, #tpu.memory_space<vmem>>, vector<16x16x16xbf16>
    %44 = vector.shape_cast %43 : vector<16x16x16xbf16> to vector<256x16xbf16>
    %c5 = arith.constant 5 : index
    %c0_47 = arith.constant 0 : index
    %c0_48 = arith.constant 0 : index
    %45 = vector.load %arg2[%c5, %c0_47, %c0_48] : memref<9x16x128xbf16, #tpu.memory_space<vmem>>, vector<1x16x128xbf16>
    %46 = vector.shape_cast %45 : vector<1x16x128xbf16> to vector<16x128xbf16>
    %cst_49 = arith.constant dense<0.000000e+00> : vector<256x128xf32>
    %47 = tpu.matmul %44, %46, %cst_49 {dimension_numbers = #tpu.dot_dimension_numbers<[1], [0], [0], [1], [0, 0, 1, 1], [], []>} : vector<256x16xbf16>, vector<16x128xbf16>, vector<256x128xf32> -> vector<256x128xf32>
    %48 = arith.addf %42, %47 : vector<256x128xf32>
    %c2_50 = arith.constant 2 : index
    %c0_51 = arith.constant 0 : index
    %c0_52 = arith.constant 0 : index
    %49 = vector.load %arg6[%c2_50, %c0_51, %c0_52] : memref<18x18x16xbf16, #tpu.memory_space<vmem>>, vector<16x16x16xbf16>
    %50 = vector.shape_cast %49 : vector<16x16x16xbf16> to vector<256x16xbf16>
    %c6 = arith.constant 6 : index
    %c0_53 = arith.constant 0 : index
    %c0_54 = arith.constant 0 : index
    %51 = vector.load %arg2[%c6, %c0_53, %c0_54] : memref<9x16x128xbf16, #tpu.memory_space<vmem>>, vector<1x16x128xbf16>
    %52 = vector.shape_cast %51 : vector<1x16x128xbf16> to vector<16x128xbf16>
    %cst_55 = arith.constant dense<0.000000e+00> : vector<256x128xf32>
    %53 = tpu.matmul %50, %52, %cst_55 {dimension_numbers = #tpu.dot_dimension_numbers<[1], [0], [0], [1], [0, 0, 1, 1], [], []>} : vector<256x16xbf16>, vector<16x128xbf16>, vector<256x128xf32> -> vector<256x128xf32>
    %54 = arith.addf %48, %53 : vector<256x128xf32>
    %c2_56 = arith.constant 2 : index
    %c1_57 = arith.constant 1 : index
    %c0_58 = arith.constant 0 : index
    %55 = vector.load %arg6[%c2_56, %c1_57, %c0_58] : memref<18x18x16xbf16, #tpu.memory_space<vmem>>, vector<16x16x16xbf16>
    %56 = vector.shape_cast %55 : vector<16x16x16xbf16> to vector<256x16xbf16>
    %c7 = arith.constant 7 : index
    %c0_59 = arith.constant 0 : index
    %c0_60 = arith.constant 0 : index
    %57 = vector.load %arg2[%c7, %c0_59, %c0_60] : memref<9x16x128xbf16, #tpu.memory_space<vmem>>, vector<1x16x128xbf16>
    %58 = vector.shape_cast %57 : vector<1x16x128xbf16> to vector<16x128xbf16>
    %cst_61 = arith.constant dense<0.000000e+00> : vector<256x128xf32>
    %59 = tpu.matmul %56, %58, %cst_61 {dimension_numbers = #tpu.dot_dimension_numbers<[1], [0], [0], [1], [0, 0, 1, 1], [], []>} : vector<256x16xbf16>, vector<16x128xbf16>, vector<256x128xf32> -> vector<256x128xf32>
    %60 = arith.addf %54, %59 : vector<256x128xf32>
    %c2_62 = arith.constant 2 : index
    %c2_63 = arith.constant 2 : index
    %c0_64 = arith.constant 0 : index
    %61 = vector.load %arg6[%c2_62, %c2_63, %c0_64] : memref<18x18x16xbf16, #tpu.memory_space<vmem>>, vector<16x16x16xbf16>
    %62 = vector.shape_cast %61 : vector<16x16x16xbf16> to vector<256x16xbf16>
    %c8 = arith.constant 8 : index
    %c0_65 = arith.constant 0 : index
    %c0_66 = arith.constant 0 : index
    %63 = vector.load %arg2[%c8, %c0_65, %c0_66] : memref<9x16x128xbf16, #tpu.memory_space<vmem>>, vector<1x16x128xbf16>
    %64 = vector.shape_cast %63 : vector<1x16x128xbf16> to vector<16x128xbf16>
    %cst_67 = arith.constant dense<0.000000e+00> : vector<256x128xf32>
    %65 = tpu.matmul %62, %64, %cst_67 {dimension_numbers = #tpu.dot_dimension_numbers<[1], [0], [0], [1], [0, 0, 1, 1], [], []>} : vector<256x16xbf16>, vector<16x128xbf16>, vector<256x128xf32> -> vector<256x128xf32>
    %66 = arith.addf %60, %65 : vector<256x128xf32>
    %67 = vector.shape_cast %66 : vector<256x128xf32> to vector<16x16x128xf32>
    %68 = arith.truncf %67 : vector<16x16x128xf32> to vector<16x16x128xbf16>
    %c0_68 = arith.constant 0 : index
    %c0_69 = arith.constant 0 : index
    %c0_70 = arith.constant 0 : index
    %c0_71 = arith.constant 0 : index
    %69 = vector.load %arg3[%c0_68, %c0_69, %c0_70, %c0_71] : memref<1x16x16x128xbf16, #tpu.memory_space<vmem>>, vector<1x16x16x128xbf16>
    %70 = vector.shape_cast %69 : vector<1x16x16x128xbf16> to vector<16x16x128xbf16>
    %71 = vector.shape_cast %68 : vector<16x16x128xbf16> to vector<1x16x16x128xbf16>
    tpu.vector_store %arg3[%c0_68, %c0_69, %c0_70, %c0_71], %71 {strides = array<i32>} : memref<1x16x16x128xbf16, #tpu.memory_space<vmem>>, vector<1x16x16x128xbf16>,
    %cst_72 = arith.constant dense<0.000000e+00> : vector<128xf32>
    %72 = vector.multi_reduction <add>, %66, %cst_72 [0] : vector<256x128xf32> to vector<128xf32>
    %73 = vector.shape_cast %72 : vector<128xf32> to vector<1x128xf32>
    %cst_73 = arith.constant 3.906250e-03 : f32
    %74 = vector.broadcast %cst_73 : f32 to vector<1x128xf32>
    %75 = arith.mulf %73, %74 : vector<1x128xf32>
    %76 = vector.broadcast %75 : vector<1x128xf32> to vector<256x128xf32>
    %77 = arith.subf %66, %76 : vector<256x128xf32>
    %78 = arith.mulf %77, %77 : vector<256x128xf32>
    %cst_74 = arith.constant dense<0.000000e+00> : vector<128xf32>
    %79 = vector.multi_reduction <add>, %78, %cst_74 [0] : vector<256x128xf32> to vector<128xf32>
    %80 = vector.shape_cast %79 : vector<128xf32> to vector<1x128xf32>
    %81 = vector.shape_cast %73 : vector<1x128xf32> to vector<1x1x128xf32>
    %c0_75 = arith.constant 0 : index
    %c0_76 = arith.constant 0 : index
    %c0_77 = arith.constant 0 : index
    %82 = vector.load %arg4[%c0_75, %c0_76, %c0_77] : memref<1x1x128xf32, #tpu.memory_space<vmem>>, vector<1x1x128xf32>
    tpu.vector_store %arg4[%c0_75, %c0_76, %c0_77], %81 {strides = array<i32>} : memref<1x1x128xf32, #tpu.memory_space<vmem>>, vector<1x1x128xf32>,
    %83 = vector.shape_cast %80 : vector<1x128xf32> to vector<1x1x128xf32>
    %c0_78 = arith.constant 0 : index
    %c0_79 = arith.constant 0 : index
    %c0_80 = arith.constant 0 : index
    %84 = vector.load %arg5[%c0_78, %c0_79, %c0_80] : memref<1x1x128xf32, #tpu.memory_space<vmem>>, vector<1x1x128xf32>
    tpu.vector_store %arg5[%c0_78, %c0_79, %c0_80], %83 {strides = array<i32>} : memref<1x1x128xf32, #tpu.memory_space<vmem>>, vector<1x1x128xf32>,
    return
  }
  func.func @transform_0(%arg0: i32) -> (i32, i32, i32, i32) {
    %c0_i32 = arith.constant 0 : i32
    %c0_i32_0 = arith.constant 0 : i32
    %c0_i32_1 = arith.constant 0 : i32
    %c0_i32_2 = arith.constant 0 : i32
    return %arg0, %c0_i32, %c0_i32_0, %c0_i32_1 : i32, i32, i32, i32
  }
  func.func @transform_1(%arg0: i32) -> (i32, i32, i32) {
    %c0_i32 = arith.constant 0 : i32
    %c0_i32_0 = arith.constant 0 : i32
    %c0_i32_1 = arith.constant 0 : i32
    %c0_i32_2 = arith.constant 0 : i32
    return %c0_i32, %c0_i32_0, %c0_i32_1 : i32, i32, i32
  }
  func.func @transform_2(%arg0: i32) -> (i32, i32, i32, i32) {
    %c0_i32 = arith.constant 0 : i32
    %c0_i32_0 = arith.constant 0 : i32
    %c0_i32_1 = arith.constant 0 : i32
    %c0_i32_2 = arith.constant 0 : i32
    return %arg0, %c0_i32, %c0_i32_0, %c0_i32_1 : i32, i32, i32, i32
  }
  func.func @transform_3(%arg0: i32) -> (i32, i32, i32) {
    %c0_i32 = arith.constant 0 : i32
    %c0_i32_0 = arith.constant 0 : i32
    %c0_i32_1 = arith.constant 0 : i32
    return %arg0, %c0_i32, %c0_i32_0 : i32, i32, i32
  }
  func.func @transform_4(%arg0: i32) -> (i32, i32, i32) {
    %c0_i32 = arith.constant 0 : i32
    %c0_i32_0 = arith.constant 0 : i32
    %c0_i32_1 = arith.constant 0 : i32
    return %arg0, %c0_i32, %c0_i32_0 : i32, i32, i32
  }
}

module attributes {stable_mosaic.version = 11 : i64} {
  func.func @_conv_kernel(%arg0: i32, %arg1: memref<1x16x16x128xbf16, #tpu.memory_space<vmem>>, %arg2: memref<1x16xf32, #tpu.memory_space<vmem>>, %arg3: memref<1x16xf32, #tpu.memory_space<vmem>>, %arg4: memref<9x16x128xbf16, #tpu.memory_space<vmem>>, %arg5: memref<1x16x16x128xbf16, #tpu.memory_space<vmem>>, %arg6: memref<1x1x128xf32, #tpu.memory_space<vmem>>, %arg7: memref<1x1x128xf32, #tpu.memory_space<vmem>>, %arg8: memref<18x18x16xbf16, #tpu.memory_space<vmem>>) attributes {dimension_semantics = [#tpu.dimension_semantics<parallel>], iteration_bounds = array<i64: 2>, scalar_prefetch = 0 : i64, scratch_operands = 1 : i64, tpu.core_type = #tpu.core_type<tc>, window_params = [{transform_indices = @transform_0, window_bounds = array<i64: 1, 16, 16, 128>}, {pipeline_mode = #tpu.pipeline_mode<synchronous>, transform_indices = @transform_1, window_bounds = array<i64: 1, 16>}, {pipeline_mode = #tpu.pipeline_mode<synchronous>, transform_indices = @transform_2, window_bounds = array<i64: 1, 16>}, {pipeline_mode = #tpu.pipeline_mode<synchronous>, transform_indices = @transform_3, window_bounds = array<i64: 9, 16, 128>}, {transform_indices = @transform_4, window_bounds = array<i64: 1, 16, 16, 128>}, {transform_indices = @transform_5, window_bounds = array<i64: 1, 1, 128>}, {transform_indices = @transform_6, window_bounds = array<i64: 1, 1, 128>}]} {
    %c0 = arith.constant 0 : index
    %c0_0 = arith.constant 0 : index
    %c0_1 = arith.constant 0 : index
    %c0_2 = arith.constant 0 : index
    %0 = vector.load %arg1[%c0, %c0_0, %c0_1, %c0_2] : memref<1x16x16x128xbf16, #tpu.memory_space<vmem>>, vector<1x16x16x128xbf16>
    %1 = vector.shape_cast %0 : vector<1x16x16x128xbf16> to vector<16x16x128xbf16>
    %2 = vector.extract_strided_slice %1 {offsets = [0, 0, 0], sizes = [16, 16, 16], strides = [1, 1, 1]} : vector<16x16x128xbf16> to vector<16x16x16xbf16>
    %c0_3 = arith.constant 0 : index
    %c0_4 = arith.constant 0 : index
    %3 = vector.load %arg2[%c0_3, %c0_4] : memref<1x16xf32, #tpu.memory_space<vmem>>, vector<1x16xf32>
    %4 = vector.shape_cast %3 : vector<1x16xf32> to vector<1x1x16xf32>
    %c0_5 = arith.constant 0 : index
    %c0_6 = arith.constant 0 : index
    %5 = vector.load %arg3[%c0_5, %c0_6] : memref<1x16xf32, #tpu.memory_space<vmem>>, vector<1x16xf32>
    %6 = vector.shape_cast %5 : vector<1x16xf32> to vector<1x1x16xf32>
    %7 = arith.extf %2 : vector<16x16x16xbf16> to vector<16x16x16xf32>
    %8 = vector.broadcast %4 : vector<1x1x16xf32> to vector<16x16x16xf32>
    %9 = arith.mulf %7, %8 : vector<16x16x16xf32>
    %10 = vector.broadcast %6 : vector<1x1x16xf32> to vector<16x16x16xf32>
    %11 = arith.addf %9, %10 : vector<16x16x16xf32>
    %cst = arith.constant 0.000000e+00 : f32
    %12 = vector.broadcast %cst : f32 to vector<16x16x16xf32>
    %13 = arith.maximumf %11, %12 : vector<16x16x16xf32>
    %14 = arith.truncf %13 : vector<16x16x16xf32> to vector<16x16x16xbf16>
    %cst_7 = arith.constant 0.000000e+00 : bf16
    %15 = vector.broadcast %cst_7 : bf16 to vector<18x16xbf16>
    %cst_8 = arith.constant 0.000000e+00 : bf16
    %16 = vector.broadcast %cst_8 : bf16 to vector<16x1x16xbf16>
    %c0_9 = arith.constant 0 : index
    %c0_10 = arith.constant 0 : index
    %c0_11 = arith.constant 0 : index
    %17 = vector.load %arg8[%c0_9, %c0_10, %c0_11] : memref<18x18x16xbf16, #tpu.memory_space<vmem>>, vector<1x18x16xbf16>
    %18 = vector.shape_cast %17 : vector<1x18x16xbf16> to vector<18x16xbf16>
    %19 = vector.shape_cast %15 : vector<18x16xbf16> to vector<1x18x16xbf16>
    tpu.vector_store %arg8[%c0_9, %c0_10, %c0_11], %19 {strides = array<i32>} : memref<18x18x16xbf16, #tpu.memory_space<vmem>>, vector<1x18x16xbf16>,
    %c17 = arith.constant 17 : index
    %c0_12 = arith.constant 0 : index
    %c0_13 = arith.constant 0 : index
    %20 = vector.load %arg8[%c17, %c0_12, %c0_13] : memref<18x18x16xbf16, #tpu.memory_space<vmem>>, vector<1x18x16xbf16>
    %21 = vector.shape_cast %20 : vector<1x18x16xbf16> to vector<18x16xbf16>
    %22 = vector.shape_cast %15 : vector<18x16xbf16> to vector<1x18x16xbf16>
    tpu.vector_store %arg8[%c17, %c0_12, %c0_13], %22 {strides = array<i32>} : memref<18x18x16xbf16, #tpu.memory_space<vmem>>, vector<1x18x16xbf16>,
    %23 = tpu.concatenate %16, %14, %16 in 1 : vector<16x1x16xbf16>, vector<16x16x16xbf16>, vector<16x1x16xbf16> -> vector<16x18x16xbf16>
    %c1 = arith.constant 1 : index
    %c0_14 = arith.constant 0 : index
    %c0_15 = arith.constant 0 : index
    %24 = vector.load %arg8[%c1, %c0_14, %c0_15] : memref<18x18x16xbf16, #tpu.memory_space<vmem>>, vector<16x18x16xbf16>
    tpu.vector_store %arg8[%c1, %c0_14, %c0_15], %23 {strides = array<i32>} : memref<18x18x16xbf16, #tpu.memory_space<vmem>>, vector<16x18x16xbf16>,
    %cst_16 = arith.constant 0.000000e+00 : f32
    %25 = vector.broadcast %cst_16 : f32 to vector<256x128xf32>
    %c0_17 = arith.constant 0 : index
    %c0_18 = arith.constant 0 : index
    %c0_19 = arith.constant 0 : index
    %26 = vector.load %arg8[%c0_17, %c0_18, %c0_19] : memref<18x18x16xbf16, #tpu.memory_space<vmem>>, vector<16x16x16xbf16>
    %27 = vector.shape_cast %26 : vector<16x16x16xbf16> to vector<256x16xbf16>
    %c0_20 = arith.constant 0 : index
    %c0_21 = arith.constant 0 : index
    %c0_22 = arith.constant 0 : index
    %28 = vector.load %arg4[%c0_20, %c0_21, %c0_22] : memref<9x16x128xbf16, #tpu.memory_space<vmem>>, vector<1x16x128xbf16>
    %29 = vector.shape_cast %28 : vector<1x16x128xbf16> to vector<16x128xbf16>
    %cst_23 = arith.constant dense<0.000000e+00> : vector<256x128xf32>
    %30 = tpu.matmul %27, %29, %cst_23 {dimension_numbers = #tpu.dot_dimension_numbers<[1], [0], [0], [1], [0, 0, 1, 1], [], []>} : vector<256x16xbf16>, vector<16x128xbf16>, vector<256x128xf32> -> vector<256x128xf32>
    %31 = arith.addf %25, %30 : vector<256x128xf32>
    %c0_24 = arith.constant 0 : index
    %c1_25 = arith.constant 1 : index
    %c0_26 = arith.constant 0 : index
    %32 = vector.load %arg8[%c0_24, %c1_25, %c0_26] : memref<18x18x16xbf16, #tpu.memory_space<vmem>>, vector<16x16x16xbf16>
    %33 = vector.shape_cast %32 : vector<16x16x16xbf16> to vector<256x16xbf16>
    %c1_27 = arith.constant 1 : index
    %c0_28 = arith.constant 0 : index
    %c0_29 = arith.constant 0 : index
    %34 = vector.load %arg4[%c1_27, %c0_28, %c0_29] : memref<9x16x128xbf16, #tpu.memory_space<vmem>>, vector<1x16x128xbf16>
    %35 = vector.shape_cast %34 : vector<1x16x128xbf16> to vector<16x128xbf16>
    %cst_30 = arith.constant dense<0.000000e+00> : vector<256x128xf32>
    %36 = tpu.matmul %33, %35, %cst_30 {dimension_numbers = #tpu.dot_dimension_numbers<[1], [0], [0], [1], [0, 0, 1, 1], [], []>} : vector<256x16xbf16>, vector<16x128xbf16>, vector<256x128xf32> -> vector<256x128xf32>
    %37 = arith.addf %31, %36 : vector<256x128xf32>
    %c0_31 = arith.constant 0 : index
    %c2 = arith.constant 2 : index
    %c0_32 = arith.constant 0 : index
    %38 = vector.load %arg8[%c0_31, %c2, %c0_32] : memref<18x18x16xbf16, #tpu.memory_space<vmem>>, vector<16x16x16xbf16>
    %39 = vector.shape_cast %38 : vector<16x16x16xbf16> to vector<256x16xbf16>
    %c2_33 = arith.constant 2 : index
    %c0_34 = arith.constant 0 : index
    %c0_35 = arith.constant 0 : index
    %40 = vector.load %arg4[%c2_33, %c0_34, %c0_35] : memref<9x16x128xbf16, #tpu.memory_space<vmem>>, vector<1x16x128xbf16>
    %41 = vector.shape_cast %40 : vector<1x16x128xbf16> to vector<16x128xbf16>
    %cst_36 = arith.constant dense<0.000000e+00> : vector<256x128xf32>
    %42 = tpu.matmul %39, %41, %cst_36 {dimension_numbers = #tpu.dot_dimension_numbers<[1], [0], [0], [1], [0, 0, 1, 1], [], []>} : vector<256x16xbf16>, vector<16x128xbf16>, vector<256x128xf32> -> vector<256x128xf32>
    %43 = arith.addf %37, %42 : vector<256x128xf32>
    %c1_37 = arith.constant 1 : index
    %c0_38 = arith.constant 0 : index
    %c0_39 = arith.constant 0 : index
    %44 = vector.load %arg8[%c1_37, %c0_38, %c0_39] : memref<18x18x16xbf16, #tpu.memory_space<vmem>>, vector<16x16x16xbf16>
    %45 = vector.shape_cast %44 : vector<16x16x16xbf16> to vector<256x16xbf16>
    %c3 = arith.constant 3 : index
    %c0_40 = arith.constant 0 : index
    %c0_41 = arith.constant 0 : index
    %46 = vector.load %arg4[%c3, %c0_40, %c0_41] : memref<9x16x128xbf16, #tpu.memory_space<vmem>>, vector<1x16x128xbf16>
    %47 = vector.shape_cast %46 : vector<1x16x128xbf16> to vector<16x128xbf16>
    %cst_42 = arith.constant dense<0.000000e+00> : vector<256x128xf32>
    %48 = tpu.matmul %45, %47, %cst_42 {dimension_numbers = #tpu.dot_dimension_numbers<[1], [0], [0], [1], [0, 0, 1, 1], [], []>} : vector<256x16xbf16>, vector<16x128xbf16>, vector<256x128xf32> -> vector<256x128xf32>
    %49 = arith.addf %43, %48 : vector<256x128xf32>
    %c1_43 = arith.constant 1 : index
    %c1_44 = arith.constant 1 : index
    %c0_45 = arith.constant 0 : index
    %50 = vector.load %arg8[%c1_43, %c1_44, %c0_45] : memref<18x18x16xbf16, #tpu.memory_space<vmem>>, vector<16x16x16xbf16>
    %51 = vector.shape_cast %50 : vector<16x16x16xbf16> to vector<256x16xbf16>
    %c4 = arith.constant 4 : index
    %c0_46 = arith.constant 0 : index
    %c0_47 = arith.constant 0 : index
    %52 = vector.load %arg4[%c4, %c0_46, %c0_47] : memref<9x16x128xbf16, #tpu.memory_space<vmem>>, vector<1x16x128xbf16>
    %53 = vector.shape_cast %52 : vector<1x16x128xbf16> to vector<16x128xbf16>
    %cst_48 = arith.constant dense<0.000000e+00> : vector<256x128xf32>
    %54 = tpu.matmul %51, %53, %cst_48 {dimension_numbers = #tpu.dot_dimension_numbers<[1], [0], [0], [1], [0, 0, 1, 1], [], []>} : vector<256x16xbf16>, vector<16x128xbf16>, vector<256x128xf32> -> vector<256x128xf32>
    %55 = arith.addf %49, %54 : vector<256x128xf32>
    %c1_49 = arith.constant 1 : index
    %c2_50 = arith.constant 2 : index
    %c0_51 = arith.constant 0 : index
    %56 = vector.load %arg8[%c1_49, %c2_50, %c0_51] : memref<18x18x16xbf16, #tpu.memory_space<vmem>>, vector<16x16x16xbf16>
    %57 = vector.shape_cast %56 : vector<16x16x16xbf16> to vector<256x16xbf16>
    %c5 = arith.constant 5 : index
    %c0_52 = arith.constant 0 : index
    %c0_53 = arith.constant 0 : index
    %58 = vector.load %arg4[%c5, %c0_52, %c0_53] : memref<9x16x128xbf16, #tpu.memory_space<vmem>>, vector<1x16x128xbf16>
    %59 = vector.shape_cast %58 : vector<1x16x128xbf16> to vector<16x128xbf16>
    %cst_54 = arith.constant dense<0.000000e+00> : vector<256x128xf32>
    %60 = tpu.matmul %57, %59, %cst_54 {dimension_numbers = #tpu.dot_dimension_numbers<[1], [0], [0], [1], [0, 0, 1, 1], [], []>} : vector<256x16xbf16>, vector<16x128xbf16>, vector<256x128xf32> -> vector<256x128xf32>
    %61 = arith.addf %55, %60 : vector<256x128xf32>
    %c2_55 = arith.constant 2 : index
    %c0_56 = arith.constant 0 : index
    %c0_57 = arith.constant 0 : index
    %62 = vector.load %arg8[%c2_55, %c0_56, %c0_57] : memref<18x18x16xbf16, #tpu.memory_space<vmem>>, vector<16x16x16xbf16>
    %63 = vector.shape_cast %62 : vector<16x16x16xbf16> to vector<256x16xbf16>
    %c6 = arith.constant 6 : index
    %c0_58 = arith.constant 0 : index
    %c0_59 = arith.constant 0 : index
    %64 = vector.load %arg4[%c6, %c0_58, %c0_59] : memref<9x16x128xbf16, #tpu.memory_space<vmem>>, vector<1x16x128xbf16>
    %65 = vector.shape_cast %64 : vector<1x16x128xbf16> to vector<16x128xbf16>
    %cst_60 = arith.constant dense<0.000000e+00> : vector<256x128xf32>
    %66 = tpu.matmul %63, %65, %cst_60 {dimension_numbers = #tpu.dot_dimension_numbers<[1], [0], [0], [1], [0, 0, 1, 1], [], []>} : vector<256x16xbf16>, vector<16x128xbf16>, vector<256x128xf32> -> vector<256x128xf32>
    %67 = arith.addf %61, %66 : vector<256x128xf32>
    %c2_61 = arith.constant 2 : index
    %c1_62 = arith.constant 1 : index
    %c0_63 = arith.constant 0 : index
    %68 = vector.load %arg8[%c2_61, %c1_62, %c0_63] : memref<18x18x16xbf16, #tpu.memory_space<vmem>>, vector<16x16x16xbf16>
    %69 = vector.shape_cast %68 : vector<16x16x16xbf16> to vector<256x16xbf16>
    %c7 = arith.constant 7 : index
    %c0_64 = arith.constant 0 : index
    %c0_65 = arith.constant 0 : index
    %70 = vector.load %arg4[%c7, %c0_64, %c0_65] : memref<9x16x128xbf16, #tpu.memory_space<vmem>>, vector<1x16x128xbf16>
    %71 = vector.shape_cast %70 : vector<1x16x128xbf16> to vector<16x128xbf16>
    %cst_66 = arith.constant dense<0.000000e+00> : vector<256x128xf32>
    %72 = tpu.matmul %69, %71, %cst_66 {dimension_numbers = #tpu.dot_dimension_numbers<[1], [0], [0], [1], [0, 0, 1, 1], [], []>} : vector<256x16xbf16>, vector<16x128xbf16>, vector<256x128xf32> -> vector<256x128xf32>
    %73 = arith.addf %67, %72 : vector<256x128xf32>
    %c2_67 = arith.constant 2 : index
    %c2_68 = arith.constant 2 : index
    %c0_69 = arith.constant 0 : index
    %74 = vector.load %arg8[%c2_67, %c2_68, %c0_69] : memref<18x18x16xbf16, #tpu.memory_space<vmem>>, vector<16x16x16xbf16>
    %75 = vector.shape_cast %74 : vector<16x16x16xbf16> to vector<256x16xbf16>
    %c8 = arith.constant 8 : index
    %c0_70 = arith.constant 0 : index
    %c0_71 = arith.constant 0 : index
    %76 = vector.load %arg4[%c8, %c0_70, %c0_71] : memref<9x16x128xbf16, #tpu.memory_space<vmem>>, vector<1x16x128xbf16>
    %77 = vector.shape_cast %76 : vector<1x16x128xbf16> to vector<16x128xbf16>
    %cst_72 = arith.constant dense<0.000000e+00> : vector<256x128xf32>
    %78 = tpu.matmul %75, %77, %cst_72 {dimension_numbers = #tpu.dot_dimension_numbers<[1], [0], [0], [1], [0, 0, 1, 1], [], []>} : vector<256x16xbf16>, vector<16x128xbf16>, vector<256x128xf32> -> vector<256x128xf32>
    %79 = arith.addf %73, %78 : vector<256x128xf32>
    %80 = vector.shape_cast %79 : vector<256x128xf32> to vector<16x16x128xf32>
    %81 = arith.truncf %80 : vector<16x16x128xf32> to vector<16x16x128xbf16>
    %c0_73 = arith.constant 0 : index
    %c0_74 = arith.constant 0 : index
    %c0_75 = arith.constant 0 : index
    %c0_76 = arith.constant 0 : index
    %82 = vector.load %arg5[%c0_73, %c0_74, %c0_75, %c0_76] : memref<1x16x16x128xbf16, #tpu.memory_space<vmem>>, vector<1x16x16x128xbf16>
    %83 = vector.shape_cast %82 : vector<1x16x16x128xbf16> to vector<16x16x128xbf16>
    %84 = vector.shape_cast %81 : vector<16x16x128xbf16> to vector<1x16x16x128xbf16>
    tpu.vector_store %arg5[%c0_73, %c0_74, %c0_75, %c0_76], %84 {strides = array<i32>} : memref<1x16x16x128xbf16, #tpu.memory_space<vmem>>, vector<1x16x16x128xbf16>,
    %cst_77 = arith.constant dense<0.000000e+00> : vector<128xf32>
    %85 = vector.multi_reduction <add>, %79, %cst_77 [0] : vector<256x128xf32> to vector<128xf32>
    %86 = vector.shape_cast %85 : vector<128xf32> to vector<1x128xf32>
    %cst_78 = arith.constant 3.906250e-03 : f32
    %87 = vector.broadcast %cst_78 : f32 to vector<1x128xf32>
    %88 = arith.mulf %86, %87 : vector<1x128xf32>
    %89 = vector.broadcast %88 : vector<1x128xf32> to vector<256x128xf32>
    %90 = arith.subf %79, %89 : vector<256x128xf32>
    %91 = arith.mulf %90, %90 : vector<256x128xf32>
    %cst_79 = arith.constant dense<0.000000e+00> : vector<128xf32>
    %92 = vector.multi_reduction <add>, %91, %cst_79 [0] : vector<256x128xf32> to vector<128xf32>
    %93 = vector.shape_cast %92 : vector<128xf32> to vector<1x128xf32>
    %94 = vector.shape_cast %86 : vector<1x128xf32> to vector<1x1x128xf32>
    %c0_80 = arith.constant 0 : index
    %c0_81 = arith.constant 0 : index
    %c0_82 = arith.constant 0 : index
    %95 = vector.load %arg6[%c0_80, %c0_81, %c0_82] : memref<1x1x128xf32, #tpu.memory_space<vmem>>, vector<1x1x128xf32>
    tpu.vector_store %arg6[%c0_80, %c0_81, %c0_82], %94 {strides = array<i32>} : memref<1x1x128xf32, #tpu.memory_space<vmem>>, vector<1x1x128xf32>,
    %96 = vector.shape_cast %93 : vector<1x128xf32> to vector<1x1x128xf32>
    %c0_83 = arith.constant 0 : index
    %c0_84 = arith.constant 0 : index
    %c0_85 = arith.constant 0 : index
    %97 = vector.load %arg7[%c0_83, %c0_84, %c0_85] : memref<1x1x128xf32, #tpu.memory_space<vmem>>, vector<1x1x128xf32>
    tpu.vector_store %arg7[%c0_83, %c0_84, %c0_85], %96 {strides = array<i32>} : memref<1x1x128xf32, #tpu.memory_space<vmem>>, vector<1x1x128xf32>,
    return
  }
  func.func @transform_0(%arg0: i32) -> (i32, i32, i32, i32) {
    %c0_i32 = arith.constant 0 : i32
    %c0_i32_0 = arith.constant 0 : i32
    %c0_i32_1 = arith.constant 0 : i32
    %c0_i32_2 = arith.constant 0 : i32
    return %arg0, %c0_i32, %c0_i32_0, %c0_i32_1 : i32, i32, i32, i32
  }
  func.func @transform_1(%arg0: i32) -> (i32, i32) {
    %c0_i32 = arith.constant 0 : i32
    %c0_i32_0 = arith.constant 0 : i32
    %c0_i32_1 = arith.constant 0 : i32
    return %c0_i32, %c0_i32_0 : i32, i32
  }
  func.func @transform_2(%arg0: i32) -> (i32, i32) {
    %c0_i32 = arith.constant 0 : i32
    %c0_i32_0 = arith.constant 0 : i32
    %c0_i32_1 = arith.constant 0 : i32
    return %c0_i32, %c0_i32_0 : i32, i32
  }
  func.func @transform_3(%arg0: i32) -> (i32, i32, i32) {
    %c0_i32 = arith.constant 0 : i32
    %c0_i32_0 = arith.constant 0 : i32
    %c0_i32_1 = arith.constant 0 : i32
    %c0_i32_2 = arith.constant 0 : i32
    return %c0_i32, %c0_i32_0, %c0_i32_1 : i32, i32, i32
  }
  func.func @transform_4(%arg0: i32) -> (i32, i32, i32, i32) {
    %c0_i32 = arith.constant 0 : i32
    %c0_i32_0 = arith.constant 0 : i32
    %c0_i32_1 = arith.constant 0 : i32
    %c0_i32_2 = arith.constant 0 : i32
    return %arg0, %c0_i32, %c0_i32_0, %c0_i32_1 : i32, i32, i32, i32
  }
  func.func @transform_5(%arg0: i32) -> (i32, i32, i32) {
    %c0_i32 = arith.constant 0 : i32
    %c0_i32_0 = arith.constant 0 : i32
    %c0_i32_1 = arith.constant 0 : i32
    return %arg0, %c0_i32, %c0_i32_0 : i32, i32, i32
  }
  func.func @transform_6(%arg0: i32) -> (i32, i32, i32) {
    %c0_i32 = arith.constant 0 : i32
    %c0_i32_0 = arith.constant 0 : i32
    %c0_i32_1 = arith.constant 0 : i32
    return %arg0, %c0_i32, %c0_i32_0 : i32, i32, i32
  }
}

module attributes {stable_mosaic.version = 11 : i64} {
  func.func @_bn_relu_kernel(%arg0: i32, %arg1: i32, %arg2: memref<1x16x16x128xbf16, #tpu.memory_space<vmem>>, %arg3: memref<1x8xf32, #tpu.memory_space<vmem>>, %arg4: memref<1x8xf32, #tpu.memory_space<vmem>>, %arg5: memref<1x16x16x8xf32, #tpu.memory_space<vmem>>) attributes {dimension_semantics = [#tpu.dimension_semantics<parallel>, #tpu.dimension_semantics<parallel>], iteration_bounds = array<i64: 2, 1>, scalar_prefetch = 0 : i64, scratch_operands = 0 : i64, tpu.core_type = #tpu.core_type<tc>, window_params = [{transform_indices = @transform_0, window_bounds = array<i64: 1, 16, 16, 128>}, {pipeline_mode = #tpu.pipeline_mode<synchronous>, transform_indices = @transform_1, window_bounds = array<i64: 1, 8>}, {pipeline_mode = #tpu.pipeline_mode<synchronous>, transform_indices = @transform_2, window_bounds = array<i64: 1, 8>}, {transform_indices = @transform_3, window_bounds = array<i64: 1, 16, 16, 8>}]} {
    %c0 = arith.constant 0 : index
    %c0_0 = arith.constant 0 : index
    %c0_1 = arith.constant 0 : index
    %c0_2 = arith.constant 0 : index
    %0 = vector.load %arg2[%c0, %c0_0, %c0_1, %c0_2] : memref<1x16x16x128xbf16, #tpu.memory_space<vmem>>, vector<1x16x16x128xbf16>
    %1 = vector.shape_cast %0 : vector<1x16x16x128xbf16> to vector<16x16x128xbf16>
    %2 = vector.extract_strided_slice %1 {offsets = [0, 0, 0], sizes = [16, 16, 8], strides = [1, 1, 1]} : vector<16x16x128xbf16> to vector<16x16x8xbf16>
    %c0_3 = arith.constant 0 : index
    %c0_4 = arith.constant 0 : index
    %3 = vector.load %arg3[%c0_3, %c0_4] : memref<1x8xf32, #tpu.memory_space<vmem>>, vector<1x8xf32>
    %4 = vector.shape_cast %3 : vector<1x8xf32> to vector<1x1x8xf32>
    %c0_5 = arith.constant 0 : index
    %c0_6 = arith.constant 0 : index
    %5 = vector.load %arg4[%c0_5, %c0_6] : memref<1x8xf32, #tpu.memory_space<vmem>>, vector<1x8xf32>
    %6 = vector.shape_cast %5 : vector<1x8xf32> to vector<1x1x8xf32>
    %7 = arith.extf %2 : vector<16x16x8xbf16> to vector<16x16x8xf32>
    %8 = vector.broadcast %4 : vector<1x1x8xf32> to vector<16x16x8xf32>
    %9 = arith.mulf %7, %8 : vector<16x16x8xf32>
    %10 = vector.broadcast %6 : vector<1x1x8xf32> to vector<16x16x8xf32>
    %11 = arith.addf %9, %10 : vector<16x16x8xf32>
    %cst = arith.constant 0.000000e+00 : f32
    %12 = vector.broadcast %cst : f32 to vector<16x16x8xf32>
    %13 = arith.maximumf %11, %12 : vector<16x16x8xf32>
    %c0_7 = arith.constant 0 : index
    %c0_8 = arith.constant 0 : index
    %c0_9 = arith.constant 0 : index
    %c0_10 = arith.constant 0 : index
    %14 = vector.load %arg5[%c0_7, %c0_8, %c0_9, %c0_10] : memref<1x16x16x8xf32, #tpu.memory_space<vmem>>, vector<1x16x16x8xf32>
    %15 = vector.shape_cast %14 : vector<1x16x16x8xf32> to vector<16x16x8xf32>
    %16 = vector.shape_cast %13 : vector<16x16x8xf32> to vector<1x16x16x8xf32>
    tpu.vector_store %arg5[%c0_7, %c0_8, %c0_9, %c0_10], %16 {strides = array<i32>} : memref<1x16x16x8xf32, #tpu.memory_space<vmem>>, vector<1x16x16x8xf32>,
    return
  }
  func.func @transform_0(%arg0: i32, %arg1: i32) -> (i32, i32, i32, i32) {
    %c0_i32 = arith.constant 0 : i32
    %c0_i32_0 = arith.constant 0 : i32
    %c0_i32_1 = arith.constant 0 : i32
    return %arg0, %arg1, %c0_i32, %c0_i32_0 : i32, i32, i32, i32
  }
  func.func @transform_1(%arg0: i32, %arg1: i32) -> (i32, i32) {
    %c0_i32 = arith.constant 0 : i32
    %c0_i32_0 = arith.constant 0 : i32
    %c0_i32_1 = arith.constant 0 : i32
    return %c0_i32, %c0_i32_0 : i32, i32
  }
  func.func @transform_2(%arg0: i32, %arg1: i32) -> (i32, i32) {
    %c0_i32 = arith.constant 0 : i32
    %c0_i32_0 = arith.constant 0 : i32
    %c0_i32_1 = arith.constant 0 : i32
    return %c0_i32, %c0_i32_0 : i32, i32
  }
  func.func @transform_3(%arg0: i32, %arg1: i32) -> (i32, i32, i32, i32) {
    %c0_i32 = arith.constant 0 : i32
    %c0_i32_0 = arith.constant 0 : i32
    %c0_i32_1 = arith.constant 0 : i32
    return %arg0, %arg1, %c0_i32, %c0_i32_0 : i32, i32, i32, i32
  }
}

</mosaic_0001>

<bundles_post_ra>
// kernel: double_conv_forward.5
= control target key start
LH: loop header
LB: loop body
LE: loop exit
PB: predicated region body
PF: predicated region fallthrough
CT: control target
= control target key end

     0   :  { %s680_s12 = smov 0   ;;  %s682_s13 = smov 0   ;;  %s875_s0 = inlined_call_operand.vmem [shape: bf16[2,16,16,128], index: 0, kind: input, shape index: {}]   ;;  %s876_s1 = inlined_call_operand.vmem [shape: f32[1,8], index: 1, kind: input, shape index: {}]   ;;  %s877_s2 = inlined_call_operand.vmem [shape: f32[1,8], index: 2, kind: input, shape index: {}]   ;;  %s878_s3 = inlined_call_operand.vmem [shape: f32[2,16,16,8], index: 3, kind: output, shape index: {}]  }
   0x1   :  { %s684_s14 = smov 0  }
   0x2 LB: > { %s25_s15 = sadd.s32 1, %s654_s13  ;;  %p522_p0 = scmp.ge.s32.totalorder %s658_s14, 1  ;;  %s658_s14 = sphi %s684_s14, %s13_s14   ;;  %s654_s13 = sphi %s682_s13, %s880_s13   ;;  %s650_s12 = sphi %s680_s12, %s879_s12  }
   0x3   : > { %p27_p1 = scmp.ge.s32.totalorder %s25_s15, 2  ;;  %p159_p2 = scmp.lt.s32.totalorder %s658_s14, 3 }
   0x5   : > { %s882_s15 = smov (%p27_p1, %s25_s15), 0  ;;  %p160_p3 = pnand %p522_p0, %p159_p2 }
   0x6   : > { %p194_p4 = scmp.lt.s32.totalorder (!%p160_p3), %s650_s12, 1  ;;  %v709_v0 = vld [vmem:[%s876_s1] ss:$0 sm:$0xff] (!%p160_p3)  ;;  %vm389_vm0 = vcmask (!%p160_p3), 64512  }
   0x7   : > { %163 = sbr.rel (%p160_p3) target bundleno = 54 (0x36), region = 32  ;;  %v718_v9 = vld [vmem:[%s877_s2] ss:$0 sm:$0xff] (!%p160_p3) }
   0xe   : > { %s884_s12 = smov (!%p194_p4, %s650_s12), 1 }
   0xf   : > { %s531_s16 = sshll.u32 %s884_s12, 7  ;;  %s532_s24 = sshll.u32 %s884_s12, 8 }
  0x10   : > { %s704_s19 = scalar_lea.vmem %s875_s0, %s531_s16  ;;  %s736_s27 = scalar_lea.vmem %s878_s3, %s532_s24 }
  0x11   : > { %v534_v1 = vld [vmem:[%s704_s19] sm:$0xff]   ;;  %v597_v2 = vld [vmem:[%s704_s19 + $0x8] sm:$0xff]   ;;  %v598_v3 = vld [vmem:[%s704_s19 + $0x10] sm:$0xff]  }
  0x12   : > { %v535_v4 = vunpack.c.l.bf16 %v534_v1  ;;  %v536_v5 = vunpack.c.h.bf16 %v534_v1  ;;  %v539_v6 = vunpack.c.l.bf16 %v597_v2  ;;  %v540_v7 = vunpack.c.h.bf16 %v597_v2  ;;  %v599_v8 = vld [vmem:[%s704_s19 + $0x18] sm:$0xff]   ;;  %v600_v30 = vld [vmem:[%s704_s19 + $0x20] sm:$0xff]   ;;  %v601_v31 = vld [vmem:[%s704_s19 + $0x28] sm:$0xff]  }
  0x13   : > { %v543_v10 = vunpack.c.l.bf16 %v598_v3  ;;  %v544_v11 = vunpack.c.h.bf16 %v598_v3  ;;  %v547_v12 = vunpack.c.l.bf16 %v599_v8  ;;  %v548_v13 = vunpack.c.h.bf16 %v599_v8  ;;  %v602_v36 = vld [vmem:[%s704_s19 + $0x30] sm:$0xff]   ;;  %v603_v37 = vld [vmem:[%s704_s19 + $0x38] sm:$0xff]   ;;  %v604_v3 = vld [vmem:[%s704_s19 + $0x40] sm:$0xff]  }
  0x14   : > { %v287_v14 = vmul.f32 %v535_v4, %v709_v0  ;;  %v288_v15 = vmul.f32 %v536_v5, %v709_v0  ;;  %v289_v16 = vmul.f32 %v539_v6, %v709_v0  ;;  %v290_v17 = vmul.f32 %v540_v7, %v709_v0  ;;  %v605_v4 = vld [vmem:[%s704_s19 + $0x48] sm:$0xff]  }
  0x15   : > { %v291_v18 = vmul.f32 %v543_v10, %v709_v0  ;;  %v292_v19 = vmul.f32 %v544_v11, %v709_v0  ;;  %v293_v20 = vmul.f32 %v547_v12, %v709_v0  ;;  %v294_v21 = vmul.f32 %v548_v13, %v709_v0  ;;  %v606_v10 = vld [vmem:[%s704_s19 + $0x50] sm:$0xff]   ;;  %v607_v11 = vld [vmem:[%s704_s19 + $0x58] sm:$0xff]  }
  0x16   : > { %v325_v22 = vadd.f32 %v718_v9, %v287_v14  ;;  %v326_v23 = vadd.f32 %v718_v9, %v288_v15  ;;  %v327_v24 = vadd.f32 %v718_v9, %v289_v16  ;;  %v328_v25 = vadd.f32 %v718_v9, %v290_v17 }
  0x17   : > { %v329_v26 = vadd.f32 %v718_v9, %v291_v18  ;;  %v330_v27 = vadd.f32 %v718_v9, %v292_v19  ;;  %v331_v28 = vadd.f32 %v718_v9, %v293_v20  ;;  %v332_v29 = vadd.f32 %v718_v9, %v294_v21 }
  0x18   : > { %v357_v32 = vmax.f32 %v325_v22, 0.0  ;;  %v358_v33 = vmax.f32 %v326_v23, 0.0  ;;  %v359_v34 = vmax.f32 %v327_v24, 0.0  ;;  %v360_v35 = vmax.f32 %v328_v25, 0.0 }
  0x19   : > { %v361_v38 = vmax.f32 %v329_v26, 0.0  ;;  %v362_v39 = vmax.f32 %v330_v27, 0.0  ;;  %v363_v40 = vmax.f32 %v331_v28, 0.0  ;;  %v364_v41 = vmax.f32 %v332_v29, 0.0 }
  0x1a   : > { %390 = vst.msk [vmem:[%s736_s27] sm:$0xff] %vm389_vm0, %v357_v32  ;;  %391 = vst.msk [vmem:[%s736_s27 + $0x8] sm:$0xff] %vm389_vm0, %v358_v33  ;;  %v551_v42 = vunpack.c.l.bf16 %v600_v30  ;;  %v552_v43 = vunpack.c.h.bf16 %v600_v30  ;;  %v555_v44 = vunpack.c.l.bf16 %v601_v31  ;;  %v556_v45 = vunpack.c.h.bf16 %v601_v31 }
  0x1b   : > { %392 = vst.msk [vmem:[%s736_s27 + $0x10] sm:$0xff] %vm389_vm0, %v359_v34  ;;  %393 = vst.msk [vmem:[%s736_s27 + $0x18] sm:$0xff] %vm389_vm0, %v360_v35  ;;  %v559_v46 = vunpack.c.l.bf16 %v602_v36  ;;  %v560_v47 = vunpack.c.h.bf16 %v602_v36  ;;  %v563_v48 = vunpack.c.l.bf16 %v603_v37  ;;  %v564_v49 = vunpack.c.h.bf16 %v603_v37 }
  0x1c   : > { %394 = vst.msk [vmem:[%s736_s27 + $0x20] sm:$0xff] %vm389_vm0, %v361_v38  ;;  %395 = vst.msk [vmem:[%s736_s27 + $0x28] sm:$0xff] %vm389_vm0, %v362_v39  ;;  %v295_v50 = vmul.f32 %v551_v42, %v709_v0  ;;  %v296_v51 = vmul.f32 %v552_v43, %v709_v0  ;;  %v297_v52 = vmul.f32 %v555_v44, %v709_v0  ;;  %v567_v16 = vunpack.c.l.bf16 %v604_v3 }
  0x1d   : > { %396 = vst.msk [vmem:[%s736_s27 + $0x30] sm:$0xff] %vm389_vm0, %v363_v40  ;;  %397 = vst.msk [vmem:[%s736_s27 + $0x38] sm:$0xff] %vm389_vm0, %v364_v41  ;;  %v298_v53 = vmul.f32 %v556_v45, %v709_v0  ;;  %v299_v54 = vmul.f32 %v559_v46, %v709_v0  ;;  %v300_v55 = vmul.f32 %v560_v47, %v709_v0  ;;  %v568_v17 = vunpack.c.h.bf16 %v604_v3  ;;  %v608_v40 = vld [vmem:[%s704_s19 + $0x60] sm:$0xff]   ;;  %v609_v41 = vld [vmem:[%s704_s19 + $0x68] sm:$0xff]  }
  0x1e   : > { %v301_v56 = vmul.f32 %v563_v48, %v709_v0  ;;  %v302_v57 = vmul.f32 %v564_v49, %v709_v0  ;;  %v333_v58 = vadd.f32 %v718_v9, %v295_v50  ;;  %v334_v59 = vadd.f32 %v718_v9, %v296_v51  ;;  %v610_v46 = vld [vmem:[%s704_s19 + $0x70] sm:$0xff]   ;;  %v611_v47 = vld [vmem:[%s704_s19 + $0x78] sm:$0xff]  }
  0x1f   : > { %v335_v60 = vadd.f32 %v718_v9, %v297_v52  ;;  %v336_v61 = vadd.f32 %v718_v9, %v298_v53  ;;  %v337_v62 = vadd.f32 %v718_v9, %v299_v54  ;;  %v338_v63 = vadd.f32 %v718_v9, %v300_v55 }
  0x20   : > { %v339_v1 = vadd.f32 %v718_v9, %v301_v56  ;;  %v340_v2 = vadd.f32 %v718_v9, %v302_v57  ;;  %v365_v5 = vmax.f32 %v333_v58, 0.0  ;;  %v366_v6 = vmax.f32 %v334_v59, 0.0 }
  0x21   : > { %v367_v7 = vmax.f32 %v335_v60, 0.0  ;;  %v368_v8 = vmax.f32 %v336_v61, 0.0  ;;  %v369_v12 = vmax.f32 %v337_v62, 0.0  ;;  %v370_v13 = vmax.f32 %v338_v63, 0.0 }
  0x22   : > { %v371_v14 = vmax.f32 %v339_v1, 0.0  ;;  %v372_v15 = vmax.f32 %v340_v2, 0.0  ;;  %398 = vst.msk [vmem:[%s736_s27 + $0x40] sm:$0xff] %vm389_vm0, %v365_v5  ;;  %399 = vst.msk [vmem:[%s736_s27 + $0x48] sm:$0xff] %vm389_vm0, %v366_v6  ;;  %v571_v18 = vunpack.c.l.bf16 %v605_v4  ;;  %v572_v19 = vunpack.c.h.bf16 %v605_v4 }
  0x23   : > { %400 = vst.msk [vmem:[%s736_s27 + $0x50] sm:$0xff] %vm389_vm0, %v367_v7  ;;  %401 = vst.msk [vmem:[%s736_s27 + $0x58] sm:$0xff] %vm389_vm0, %v368_v8  ;;  %v575_v20 = vunpack.c.l.bf16 %v606_v10  ;;  %v576_v21 = vunpack.c.h.bf16 %v606_v10  ;;  %v579_v22 = vunpack.c.l.bf16 %v607_v11  ;;  %v580_v23 = vunpack.c.h.bf16 %v607_v11 }
  0x24   : > { %402 = vst.msk [vmem:[%s736_s27 + $0x60] sm:$0xff] %vm389_vm0, %v369_v12  ;;  %403 = vst.msk [vmem:[%s736_s27 + $0x68] sm:$0xff] %vm389_vm0, %v370_v13  ;;  %v303_v24 = vmul.f32 %v567_v16, %v709_v0  ;;  %v304_v25 = vmul.f32 %v568_v17, %v709_v0  ;;  %v305_v26 = vmul.f32 %v571_v18, %v709_v0  ;;  %v583_v52 = vunpack.c.l.bf16 %v608_v40 }
  0x25   : > { %404 = vst.msk [vmem:[%s736_s27 + $0x70] sm:$0xff] %vm389_vm0, %v371_v14  ;;  %405 = vst.msk [vmem:[%s736_s27 + $0x78] sm:$0xff] %vm389_vm0, %v372_v15  ;;  %v306_v27 = vmul.f32 %v572_v19, %v709_v0  ;;  %v307_v28 = vmul.f32 %v575_v20, %v709_v0  ;;  %v308_v29 = vmul.f32 %v576_v21, %v709_v0  ;;  %v584_v53 = vunpack.c.h.bf16 %v608_v40 }
  0x26   : > { %v309_v30 = vmul.f32 %v579_v22, %v709_v0  ;;  %v310_v31 = vmul.f32 %v580_v23, %v709_v0  ;;  %v341_v32 = vadd.f32 %v718_v9, %v303_v24  ;;  %v342_v33 = vadd.f32 %v718_v9, %v304_v25 }
  0x27   : > { %v343_v34 = vadd.f32 %v718_v9, %v305_v26  ;;  %v344_v35 = vadd.f32 %v718_v9, %v306_v27  ;;  %v345_v36 = vadd.f32 %v718_v9, %v307_v28  ;;  %v346_v37 = vadd.f32 %v718_v9, %v308_v29 }
  0x28   : > { %v347_v38 = vadd.f32 %v718_v9, %v309_v30  ;;  %v348_v39 = vadd.f32 %v718_v9, %v310_v31  ;;  %v373_v42 = vmax.f32 %v341_v32, 0.0  ;;  %v374_v43 = vmax.f32 %v342_v33, 0.0 }
  0x29   : > { %v375_v44 = vmax.f32 %v343_v34, 0.0  ;;  %v376_v45 = vmax.f32 %v344_v35, 0.0  ;;  %v377_v48 = vmax.f32 %v345_v36, 0.0  ;;  %v378_v49 = vmax.f32 %v346_v37, 0.0 }
  0x2a   : > { %v379_v50 = vmax.f32 %v347_v38, 0.0  ;;  %v380_v51 = vmax.f32 %v348_v39, 0.0  ;;  %406 = vst.msk [vmem:[%s736_s27 + $0x80] sm:$0xff] %vm389_vm0, %v373_v42  ;;  %407 = vst.msk [vmem:[%s736_s27 + $0x88] sm:$0xff] %vm389_vm0, %v374_v43  ;;  %v587_v54 = vunpack.c.l.bf16 %v609_v41  ;;  %v588_v55 = vunpack.c.h.bf16 %v609_v41 }
  0x2b   : > { %408 = vst.msk [vmem:[%s736_s27 + $0x90] sm:$0xff] %vm389_vm0, %v375_v44  ;;  %409 = vst.msk [vmem:[%s736_s27 + $0x98] sm:$0xff] %vm389_vm0, %v376_v45  ;;  %v591_v56 = vunpack.c.l.bf16 %v610_v46  ;;  %v592_v57 = vunpack.c.h.bf16 %v610_v46  ;;  %v595_v58 = vunpack.c.l.bf16 %v611_v47  ;;  %v596_v59 = vunpack.c.h.bf16 %v611_v47 }
  0x2c   : > { %410 = vst.msk [vmem:[%s736_s27 + $0xa0] sm:$0xff] %vm389_vm0, %v377_v48  ;;  %411 = vst.msk [vmem:[%s736_s27 + $0xa8] sm:$0xff] %vm389_vm0, %v378_v49  ;;  %v311_v60 = vmul.f32 %v583_v52, %v709_v0  ;;  %v312_v61 = vmul.f32 %v584_v53, %v709_v0  ;;  %v313_v62 = vmul.f32 %v587_v54, %v709_v0 }
  0x2d   : > { %412 = vst.msk [vmem:[%s736_s27 + $0xb0] sm:$0xff] %vm389_vm0, %v379_v50  ;;  %413 = vst.msk [vmem:[%s736_s27 + $0xb8] sm:$0xff] %vm389_vm0, %v380_v51  ;;  %v314_v63 = vmul.f32 %v588_v55, %v709_v0  ;;  %v315_v1 = vmul.f32 %v591_v56, %v709_v0  ;;  %v316_v2 = vmul.f32 %v592_v57, %v709_v0 }
  0x2e   : > { %v317_v3 = vmul.f32 %v595_v58, %v709_v0  ;;  %v318_v4 = vmul.f32 %v596_v59, %v709_v0  ;;  %v349_v5 = vadd.f32 %v718_v9, %v311_v60  ;;  %v350_v6 = vadd.f32 %v718_v9, %v312_v61 }
  0x2f   : > { %v351_v7 = vadd.f32 %v718_v9, %v313_v62  ;;  %v352_v8 = vadd.f32 %v718_v9, %v314_v63  ;;  %v353_v10 = vadd.f32 %v718_v9, %v315_v1  ;;  %v354_v11 = vadd.f32 %v718_v9, %v316_v2 }
  0x30   : > { %v355_v0 = vadd.f32 %v718_v9, %v317_v3  ;;  %v356_v12 = vadd.f32 %v718_v9, %v318_v4  ;;  %v381_v13 = vmax.f32 %v349_v5, 0.0  ;;  %v382_v14 = vmax.f32 %v350_v6, 0.0 }
  0x31   : > { %v383_v15 = vmax.f32 %v351_v7, 0.0  ;;  %v384_v16 = vmax.f32 %v352_v8, 0.0  ;;  %v385_v17 = vmax.f32 %v353_v10, 0.0  ;;  %v386_v18 = vmax.f32 %v354_v11, 0.0 }
  0x32   : > { %v387_v19 = vmax.f32 %v355_v0, 0.0  ;;  %v388_v20 = vmax.f32 %v356_v12, 0.0  ;;  %414 = vst.msk [vmem:[%s736_s27 + $0xc0] sm:$0xff] %vm389_vm0, %v381_v13  ;;  %415 = vst.msk [vmem:[%s736_s27 + $0xc8] sm:$0xff] %vm389_vm0, %v382_v14 }
  0x33   : > { %416 = vst.msk [vmem:[%s736_s27 + $0xd0] sm:$0xff] %vm389_vm0, %v383_v15  ;;  %417 = vst.msk [vmem:[%s736_s27 + $0xd8] sm:$0xff] %vm389_vm0, %v384_v16 }
  0x34   : > { %418 = vst.msk [vmem:[%s736_s27 + $0xe0] sm:$0xff] %vm389_vm0, %v385_v17  ;;  %419 = vst.msk [vmem:[%s736_s27 + $0xe8] sm:$0xff] %vm389_vm0, %v386_v18 }
  0x35   : > { %420 = vst.msk [vmem:[%s736_s27 + $0xf0] sm:$0xff] %vm389_vm0, %v387_v19  ;;  %421 = vst.msk [vmem:[%s736_s27 + $0xf8] sm:$0xff] %vm389_vm0, %v388_v20 }
  0x36 PF: > { %s13_s14 = sadd.s32 1, %s658_s14   ;;  %s879_s12 = smov %s654_s13 }
  0x37   : > { %p10_p5 = scmp.ge.s32.totalorder %s13_s14, 4   ;;  %s880_s13 = smov %s882_s15 }
  0x39   :  { %12 = sbr.rel (!%p10_p5) target bundleno = 2 (0x2), region = 62 }

// kernel: double_conv_forward.3
= control target key start
LH: loop header
LB: loop body
LE: loop exit
PB: predicated region body
PF: predicated region fallthrough
CT: control target
= control target key end

     0   :  { %s7205_s15 = smov 0   ;;  %s9052_s0 = inlined_call_operand.vmem [shape: bf16[2,16,16,16], index: 0, kind: input, shape index: {}]   ;;  %s9053_s1 = inlined_call_operand.vmem [shape: bf16[9,16,128], index: 1, kind: input, shape index: {}]   ;;  %s9054_s2 = inlined_call_operand.vmem [shape: bf16[2,16,16,128], index: 2, kind: output, shape index: {0}]   ;;  %s9055_s3 = inlined_call_operand.vmem [shape: f32[2,1,128], index: 3, kind: output, shape index: {1}]   ;;  %s9056_s4 = inlined_call_operand.vmem [shape: f32[2,1,128], index: 4, kind: output, shape index: {2}]  }
   0x1 LB: > { %s5740_s16 = sadd.s32 4294967295, %s7177_s15   ;;  %p5744_p0 = scmp.ge.s32.totalorder %s7177_s15, 1  ;;  %s7177_s15 = sphi %s7205_s15, %s15_s15  }
   0x2   : > { %p167_p1 = scmp.lt.s32.totalorder %s7177_s15, 3 }
   0x4   : > { %p168_p2 = pnand %p5744_p0, %p167_p1 }
   0x6   : > { %171 = sbr.rel (%p168_p2) target bundleno = 729 (0x2d9), region = 28 }
   0xd   : > { %v7063_v0 = vld [vmem:[%s9053_s1 + $0x8] sm:$0xff]   ;;  %vm248_vm0 = vcmask 125952   ;;  %v7064_v1 = vld [vmem:[%s9053_s1 + $0x20] sm:$0xff]   ;;  %v7179_v2 = vmov 0   ;;  %vm251_vm1 = vcmask 122880   ;;  %p199_p3 = scmp.lt.s32.totalorder %s5740_s16, 1 }
   0xe   : > { %6490 = vmatprep.subr.bf16.mxu1 %v7063_v0  ;;  %249 = vst.msk [vmem:[#allocation2] sm:$0xf] %vm248_vm0, %v7179_v2  ;;  %250 = vst.msk [vmem:[#allocation2 + $0x4] sm:$0xf] %vm248_vm0, %v7179_v2  ;;  %6626 = vmatprep.subr.bf16.mxu0 %v7064_v1  ;;  %vm791_vm2 = vsmask.f32 3328 }
   0xf   : > { %254 = vst.msk [vmem:[#allocation2 + $0xcc] sm:$0xf] %vm248_vm0, %v7179_v2  ;;  %255 = vst.msk [vmem:[#allocation2 + $0xd0] sm:$0xf] %vm248_vm0, %v7179_v2  ;;  %6491 = vmatpush3.bf16.msra.mxu1 %v7063_v0  ;;  %6627 = vmatpush3.bf16.msra.mxu0 %v7064_v1  ;;  %vm792_vm3 = vsmask.f32 7440 }
  0x10   : > { %252 = vst.msk [vmem:[#allocation2 + $0x8] sm:$0x1] %vm251_vm1, %v7179_v2  ;;  %256 = vst.msk [vmem:[#allocation2 + $0xd4] sm:$0x1] %vm251_vm1, %v7179_v2  ;;  %v7228_v3 = vld [vmem:[%s9053_s1] sm:$0xff]   ;;  %s9133_s16 = smov (!%p199_p3, %s5740_s16), 1 }
  0x11   : > { %v7235_v4 = vld [vmem:[%s9053_s1 + $0x28] sm:$0xff]   ;;  %vm482_vm4 = vsmask.f32 256  ;;  %6524 = vmatprep.subr.bf16.mxu1 %v7228_v3  ;;  %s6208_s25 = sshll.u32 %s9133_s16, 7  ;;  %vm1235_vm5 = vcmask 130048   ;;  %vm481_vm6 = vcmask 1040384   ;;  %vm7252_vm7 = vmor %vm791_vm2, %vm792_vm3  ;;  %s211_s24 = scalar_lea.vmem %s9055_s3, %s9133_s16 }
  0x12   : > { %6660 = vmatprep.subr.bf16.mxu0 %v7235_v4  ;;  %s7245_s28 = scalar_lea.vmem %s9052_s0, %s6208_s25  ;;  %vm7258_vm8 = vmand %vm481_vm6, %vm482_vm4  ;;  %vm1788_vm9 = vcmask 1042432   ;;  %vm1789_vm10 = vcmask 1046532   ;;  %s8865_s21 = scalar_lea.vmem %s9054_s2, %s6208_s25 }
  0x13   : > { %v7065_v13 = vld [vmem:[%s7245_s28] sm:$0xff]   ;;  %v7068_v14 = vld [vmem:[%s7245_s28 + $0x8] sm:$0xff]   ;;  %v7069_v26 = vld [vmem:[%s7245_s28 + $0x10] sm:$0xff]   ;;  %s214_s27 = scalar_lea.vmem %s9056_s4, %s9133_s16 }
  0x14   : > { %v338_v20 = vshrl.u32 %v7065_v13, 16  ;;  %v341_v21 = vshll.u32 %v7065_v13, 16  ;;  %v345_v22 = vshrl.u32 %v7068_v14, 16  ;;  %v348_v25 = vshll.u32 %v7068_v14, 16  ;;  %v7070_v35 = vld [vmem:[%s7245_s28 + $0x18] sm:$0xff]   ;;  %v7071_v36 = vld [vmem:[%s7245_s28 + $0x20] sm:$0xff]   ;;  %vm7430_vm11 = vmor %vm1788_vm9, %vm1789_vm10 }
  0x15   : > { %v741_v5 = vld [vmem:[#allocation2] sm:$0xf]  ;;  %v742_v6 = vld [vmem:[#allocation2 + $0x4] sm:$0xf]  ;;  %v352_v33 = vshrl.u32 %v7069_v26, 16  ;;  %v355_v34 = vshll.u32 %v7069_v26, 16 }
  0x16   : > { %v795_v8 = vshrl.u32 %v741_v5, 16  ;;  %v798_v9 = vshll.u32 %v741_v5, 16  ;;  %v804_v10 = vshll.u32 %v742_v6, 16  ;;  %v808_v11 = vshrl.u32 %v742_v6, 16  ;;  %v7072_v45 = vld [vmem:[%s7245_s28 + $0x28] sm:$0xff]   ;;  %v7073_v50 = vld [vmem:[%s7245_s28 + $0x30] sm:$0xff]  }
  0x17   : > { %v775_v7 = vld [vmem:[#allocation2 + $0x8] sm:$0x1]  ;;  %v340_v28 = vrot.slane %v338_v20, 7  ;;  %v347_v29 = vrot.slane %v345_v22, 7  ;;  %v354_v49 = vrot.slane %v352_v33, 7  ;;  %v359_v57 = vshrl.u32 %v7070_v35, 16 }
  0x18   : > { %v814_v12 = vshll.u32 %v775_v7, 16  ;;  %v797_v15 = vrot.slane %v795_v8, 4  ;;  %v800_v16 = vrot.slane %v798_v9, 5  ;;  %v806_v17 = vrot.slane %v804_v10, 5 }
  0x19   : > { %v810_v18 = vrot.slane %v808_v11, 4  ;;  %v343_v37 = vor.u32 %v341_v21, %v340_v28  ;;  %v500_v38 = vsel %vm7258_vm8, %v340_v28, 0  ;;  %v350_v39 = vor.u32 %v348_v25, %v347_v29 }
  0x1a   : > { %v816_v19 = vrot.slane %v814_v12, 5  ;;  %v801_v23 = vor.u32 %v800_v16, %v797_v15  ;;  %v501_v40 = vsel %vm7258_vm8, %v347_v29, 0  ;;  %v5767_v43 = vcombine.low %v500_v38, %v500_v38 }
  0x1b   : > { %v811_v24 = vor.u32 %v810_v18, %v806_v17  ;;  %v5770_v44 = vcombine.low %v501_v40, %v501_v40  ;;  %v484_v47 = vsel %vm7258_vm8, 0, %v343_v37  ;;  %v485_v48 = vsel %vm7258_vm8, 0, %v350_v39 }
  0x1c   : > { %v802_v30 = vrot.slane %v801_v23, 4  ;;  %v5765_v51 = vcombine.low %v484_v47, %v484_v47  ;;  %v5766_v52 = vcombine.high %v484_v47, %v484_v47  ;;  %695 = vst.msk [vmem:[#allocation2 + $0x14] sm:$0x1] %vm251_vm1, %v5767_v43  ;;  %v5768_v53 = vcombine.low %v485_v48, %v485_v48 }
  0x1d   : > { %v812_v31 = vrot.slane %v811_v24, 4  ;;  %v5769_v54 = vcombine.high %v485_v48, %v485_v48  ;;  %698 = vst.msk [vmem:[#allocation2 + $0x20] sm:$0x1] %vm251_vm1, %v5770_v44  ;;  %v357_v55 = vor.u32 %v355_v34, %v354_v49  ;;  %v502_v56 = vsel %vm7258_vm8, %v354_v49, 0 }
  0x1e   : > { %v807_v41 = vsel %vm7252_vm7, %v802_v30, %v806_v17  ;;  %693 = vst.msk [vmem:[#allocation2 + $0xc] sm:$0xf] %vm248_vm0, %v5765_v51  ;;  %694 = vst.msk [vmem:[#allocation2 + $0x10] sm:$0xf] %vm248_vm0, %v5766_v52  ;;  %v5773_v58 = vcombine.low %v502_v56, %v502_v56  ;;  %v362_v59 = vshll.u32 %v7070_v35, 16  ;;  %v366_v60 = vshrl.u32 %v7071_v36, 16 }
  0x1f   : > { %v817_v42 = vsel %vm7252_vm7, %v812_v31, %v816_v19  ;;  %696 = vst.msk [vmem:[#allocation2 + $0x18] sm:$0xf] %vm248_vm0, %v5768_v53  ;;  %697 = vst.msk [vmem:[#allocation2 + $0x1c] sm:$0xf] %vm248_vm0, %v5769_v54  ;;  %v373_v61 = vshrl.u32 %v7072_v45, 16  ;;  %v486_v62 = vsel %vm7258_vm8, 0, %v357_v55 }
  0x20   : > { %v5815_v46 = vcombine.low %v807_v41, %v817_v42  ;;  %v361_v63 = vrot.slane %v359_v57, 7  ;;  %v369_v0 = vshll.u32 %v7071_v36, 16  ;;  %v380_v1 = vshrl.u32 %v7073_v50, 16  ;;  %701 = vst.msk [vmem:[#allocation2 + $0x2c] sm:$0x1] %vm251_vm1, %v5773_v58 }
  0x21   : > { %v5771_v2 = vcombine.low %v486_v62, %v486_v62  ;;  %v5772_v5 = vcombine.high %v486_v62, %v486_v62  ;;  %v368_v6 = vrot.slane %v366_v60, 7  ;;  %v376_v7 = vshll.u32 %v7072_v45, 16 }
  0x22   : > { %6492 = vmatprep.mubr.msk.bf16.mxu1 %vm1235_vm5, %v5815_v46  ;;  %v503_v8 = vsel %vm7258_vm8, %v361_v63, 0  ;;  %v7292_v9 = vrot.slane %v373_v61, 7  ;;  %v7294_v10 = vrot.slane %v380_v1, 7  ;;  %v383_v11 = vshll.u32 %v7073_v50, 16 }
  0x23   : > { %699 = vst.msk [vmem:[#allocation2 + $0x24] sm:$0xf] %vm248_vm0, %v5771_v2  ;;  %700 = vst.msk [vmem:[#allocation2 + $0x28] sm:$0xf] %vm248_vm0, %v5772_v5  ;;  %v5776_v12 = vcombine.low %v503_v8, %v503_v8  ;;  %v504_v13 = vsel %vm7258_vm8, %v368_v6, 0  ;;  %v7308_v22 = vor.u32 %v362_v59, %v361_v63  ;;  %v7310_v23 = vor.u32 %v369_v0, %v368_v6 }
  0x24   : > { %v776_v14 = vld [vmem:[#allocation2 + $0x14] sm:$0x1]  ;;  %v5779_v16 = vcombine.low %v504_v13, %v504_v13  ;;  %v7314_v24 = vor.u32 %v376_v7, %v7292_v9  ;;  %v7317_v25 = vor.u32 %v383_v11, %v7294_v10  ;;  %v7332_v61 = vld [vmem:[#allocation2 + $0x20] sm:$0x1] }
  0x25   : > { %v7300_v15 = vld [vmem:[#allocation2 + $0x14] sm:$0x1]  ;;  %v838_v17 = vshll.u32 %v776_v14, 16  ;;  %704 = vst.msk [vmem:[#allocation2 + $0x38] sm:$0x1] %vm251_vm1, %v5776_v12  ;;  %v2655_v14 = vshll.u32 %v7332_v61, 16 }
  0x26   : > { %v2631_v18 = vshll.u32 %v7300_v15, 16  ;;  %v7304_v19 = vld [vmem:[#allocation2 + $0xc] sm:$0xf]  ;;  %v7306_v20 = vld [vmem:[#allocation2 + $0x10] sm:$0xf]  ;;  %v3362_v36 = vrot.slane %v7300_v15, 5 }
  0x27   : > { %v2563_v21 = vld [vmem:[#allocation2 + $0xc] sm:$0xf]  ;;  %707 = vst.msk [vmem:[#allocation2 + $0x44] sm:$0x1] %vm251_vm1, %v5779_v16  ;;  %v819_v26 = vshrl.u32 %v7304_v19, 16  ;;  %v822_v28 = vshll.u32 %v7304_v19, 16 }
  0x28   : > { %v828_v29 = vshll.u32 %v7306_v20, 16  ;;  %v832_v30 = vshrl.u32 %v7306_v20, 16  ;;  %v7323_v31 = vld [vmem:[#allocation2 + $0x10] sm:$0xf]  ;;  %v840_v33 = vrot.slane %v838_v17, 5  ;;  %v2612_v34 = vshrl.u32 %v2563_v21, 16 }
  0x29   : > { %v2615_v35 = vshll.u32 %v2563_v21, 16  ;;  %v821_v37 = vrot.slane %v819_v26, 4  ;;  %v824_v38 = vrot.slane %v822_v28, 5  ;;  %v2566_v41 = vld [vmem:[#allocation2 + $0x18] sm:$0xf]  ;;  %v2621_v44 = vshll.u32 %v7323_v31, 16 }
  0x2a   : > { %v830_v39 = vrot.slane %v828_v29, 5  ;;  %v834_v40 = vrot.slane %v832_v30, 4  ;;  %v2614_v42 = vrot.slane %v2612_v34, 4  ;;  %v2625_v45 = vshrl.u32 %v7323_v31, 16  ;;  %v7328_v46 = vld [vmem:[#allocation2 + $0x1c] sm:$0xf] }
  0x2b   : > { %v2617_v43 = vrot.slane %v2615_v35, 5  ;;  %v825_v47 = vor.u32 %v824_v38, %v821_v37  ;;  %v2633_v49 = vrot.slane %v2631_v18, 5  ;;  %v3359_v50 = vrot.slane %v7323_v31, 5  ;;  %v745_v6 = vld [vmem:[#allocation2 + $0x18] sm:$0xf] }
  0x2c   : > { %v835_v48 = vor.u32 %v834_v40, %v830_v39  ;;  %v2623_v52 = vrot.slane %v2621_v44, 5  ;;  %v2627_v53 = vrot.slane %v2625_v45, 4  ;;  %v2636_v54 = vshrl.u32 %v2566_v41, 16  ;;  %v746_v18 = vld [vmem:[#allocation2 + $0x1c] sm:$0xf] }
  0x2d   : > { %v2618_v51 = vor.u32 %v2617_v43, %v2614_v42  ;;  %v826_v55 = vrot.slane %v825_v47, 4  ;;  %v2639_v57 = vshll.u32 %v2566_v41, 16  ;;  %v2645_v58 = vshll.u32 %v7328_v46, 16  ;;  %v777_v28 = vld [vmem:[#allocation2 + $0x20] sm:$0x1] }
  0x2e   : > { %v836_v56 = vrot.slane %v835_v48, 4  ;;  %v2628_v60 = vor.u32 %v2627_v53, %v2623_v52  ;;  %v2638_v62 = vrot.slane %v2636_v54, 4  ;;  %v2649_v63 = vshrl.u32 %v7328_v46, 16  ;;  %v778_v44 = vld [vmem:[#allocation2 + $0x2c] sm:$0x1] }
  0x2f   : > { %v2619_v59 = vrot.slane %v2618_v51, 4  ;;  %v831_v0 = vsel %vm7252_vm7, %v826_v55, %v830_v39  ;;  %v2641_v2 = vrot.slane %v2639_v57, 5  ;;  %v2647_v5 = vrot.slane %v2645_v58, 5  ;;  %v748_v39 = vld [vmem:[#allocation2 + $0x28] sm:$0xf] }
  0x30   : > { %v841_v1 = vsel %vm7252_vm7, %v836_v56, %v840_v33  ;;  %v2629_v11 = vrot.slane %v2628_v60, 4  ;;  %v2651_v12 = vrot.slane %v2649_v63, 4  ;;  %v3366_v16 = vrot.slane %v7328_v46, 5  ;;  %v747_v33 = vld [vmem:[#allocation2 + $0x24] sm:$0xf]  ;;  %v7362_v60 = vld [vmem:[%s9053_s1 + $0x30] sm:$0xff]  }
  0x31   : > { %v5816_v7 = vcombine.low %v831_v0, %v841_v1  ;;  %v2624_v8 = vsel %vm7252_vm7, %v2619_v59, %v2623_v52  ;;  %v2642_v13 = vor.u32 %v2641_v2, %v2638_v62  ;;  %v3369_v17 = vrot.slane %v7332_v61, 5  ;;  %v2569_v45 = vld [vmem:[#allocation2 + $0x24] sm:$0xf]  ;;  %v7357_v59 = vld [vmem:[#allocation2 + $0x28] sm:$0xf] }
  0x32   : > { %v2634_v21 = vsel %vm7252_vm7, %v2629_v11, %v2633_v49  ;;  %v2652_v26 = vor.u32 %v2651_v12, %v2647_v5  ;;  %v843_v29 = vshrl.u32 %v745_v6, 16  ;;  %v846_v30 = vshll.u32 %v745_v6, 16  ;;  %v7364_v2 = vld [vmem:[#allocation2 + $0x2c] sm:$0x1] }
  0x33   : > { %6493 = vmatmul.mubr.msk.bf16.vlgmr.msra.gmra.mrb[0].mxu1 %vm1235_vm5, %v5816_v7  ;;  %v5969_v34 = vcombine.low %v2624_v8, %v2634_v21  ;;  %v2643_v35 = vrot.slane %v2642_v13, 4  ;;  %v2657_v37 = vrot.slane %v2655_v14, 5  ;;  %v7350_v38 = vrot.slane %v3366_v16, 4 }
  0x34   : > { %6525 = vmatpush3.bf16.msra.mxu1 %v7228_v3  ;;  %v2653_v40 = vrot.slane %v2652_v26, 4  ;;  %v845_v41 = vrot.slane %v843_v29, 4  ;;  %v848_v42 = vrot.slane %v846_v30, 5  ;;  %v852_v43 = vshll.u32 %v746_v18, 16  ;;  %v7370_v29 = vld [vmem:[#allocation2 + $0x38] sm:$0x1] }
  0x35   : > { %6628 = vmatprep.mubr.msk.bf16.mxu0 %vm1235_vm5, %v5969_v34  ;;  %v2648_v47 = vsel %vm7252_vm7, %v2643_v35, %v2647_v5  ;;  %v856_v48 = vshrl.u32 %v746_v18, 16  ;;  %v862_v3 = vshll.u32 %v777_v28, 16  ;;  %v867_v49 = vshrl.u32 %v747_v33, 16  ;;  %v779_v30 = vld [vmem:[#allocation2 + $0x38] sm:$0x1] }
  0x36   : > { %v2658_v51 = vsel %vm7252_vm7, %v2653_v40, %v2657_v37  ;;  %v849_v52 = vor.u32 %v848_v42, %v845_v41  ;;  %v854_v53 = vrot.slane %v852_v43, 5  ;;  %v870_v54 = vshll.u32 %v747_v33, 16  ;;  %v7083_v42 = vld [vmem:[%s9053_s1 + $0x10] sm:$0xff]  }
  0x37   : > { %v5970_v55 = vcombine.low %v2648_v47, %v2658_v51  ;;  %v858_v56 = vrot.slane %v856_v48, 4  ;;  %v864_v57 = vrot.slane %v862_v3, 5  ;;  %v869_v58 = vrot.slane %v867_v49, 4  ;;  %v780_v48 = vld [vmem:[#allocation2 + $0x44] sm:$0x1]  ;;  %6558 = vmatprep.subr.bf16.mxu1 %v7083_v42 }
  0x38   : > { %v850_v62 = vrot.slane %v849_v52, 4  ;;  %v872_v63 = vrot.slane %v870_v54, 5  ;;  %v876_v0 = vshll.u32 %v748_v39, 16  ;;  %v880_v1 = vshrl.u32 %v748_v39, 16  ;;  %v7386_v3 = vld [vmem:[#allocation2 + $0x44] sm:$0x1] }
  0x39   : > { %6629 = vmatmul.mubr.msk.bf16.vlgmr.msra.gmra.mrb[0].mxu0 %vm1235_vm5, %v5970_v55  ;;  %v859_v5 = vor.u32 %v858_v56, %v854_v53  ;;  %v886_v6 = vshll.u32 %v778_v44, 16  ;;  %v2660_v7 = vshrl.u32 %v2569_v45, 16  ;;  %v2663_v8 = vshll.u32 %v2569_v45, 16 }
  0x3a   : > { %6661 = vmatpush3.bf16.msra.mxu0 %v7235_v4  ;;  %v855_v11 = vsel %vm7252_vm7, %v850_v62, %v854_v53  ;;  %v873_v12 = vor.u32 %v872_v63, %v869_v58  ;;  %v878_v13 = vrot.slane %v876_v0, 5  ;;  %v882_v14 = vrot.slane %v880_v1, 4  ;;  %v7399_v0 = vld [vmem:[%s7245_s28 + $0x38] sm:$0xff]   ;;  %v7402_v1 = vld [vmem:[%s7245_s28 + $0x40] sm:$0xff]  }
  0x3b   : > { %v860_v18 = vrot.slane %v859_v5, 4  ;;  %v888_v21 = vrot.slane %v886_v6, 5  ;;  %v2662_v26 = vrot.slane %v2660_v7, 4  ;;  %v2665_v28 = vrot.slane %v2663_v8, 5  ;;  %6694 = vmatprep.subr.bf16.mxu0 %v7362_v60 }
  0x3c   : > { %v874_v33 = vrot.slane %v873_v12, 4  ;;  %v883_v34 = vor.u32 %v882_v14, %v878_v13  ;;  %v2669_v4 = vshll.u32 %v7357_v59, 16  ;;  %v2673_v35 = vshrl.u32 %v7357_v59, 16 }
  0x3d   : > { %v865_v37 = vsel %vm7252_vm7, %v860_v18, %v864_v57  ;;  %v2666_v39 = vor.u32 %v2665_v28, %v2662_v26  ;;  %v2679_v40 = vshll.u32 %v7364_v2, 16  ;;  %v487_v41 = vsel %vm7258_vm8, 0, %v7308_v22 }
  0x3e   : > { %v5817_v43 = vcombine.low %v855_v11, %v865_v37  ;;  %v879_v44 = vsel %vm7252_vm7, %v874_v33, %v878_v13  ;;  %v884_v45 = vrot.slane %v883_v34, 4  ;;  %v2671_v47 = vrot.slane %v2669_v4, 5 }
  0x3f   : > { %v2667_v49 = vrot.slane %v2666_v39, 4  ;;  %v2675_v51 = vrot.slane %v2673_v35, 4  ;;  %v2681_v52 = vrot.slane %v2679_v40, 5  ;;  %v5774_v53 = vcombine.low %v487_v41, %v487_v41 }
  0x40   : > { %6496 = vmatprep.mubr.msk.bf16.mxu1 %vm1235_vm5, %v5817_v43  ;;  %v889_v22 = vsel %vm7252_vm7, %v884_v45, %v888_v21  ;;  %v5775_v54 = vcombine.high %v487_v41, %v487_v41  ;;  %v2703_v55 = vshll.u32 %v7370_v29, 16  ;;  %v910_v56 = vshll.u32 %v779_v30, 16 }
  0x41   : > { %v5818_v57 = vcombine.low %v879_v44, %v889_v22  ;;  %v2672_v58 = vsel %vm7252_vm7, %v2667_v49, %v2671_v47  ;;  %v2676_v62 = vor.u32 %v2675_v51, %v2671_v47  ;;  %702 = vst.msk [vmem:[#allocation2 + $0x30] sm:$0xf] %vm248_vm0, %v5774_v53  ;;  %v488_v63 = vsel %vm7258_vm8, 0, %v7310_v23 }
  0x42   : > { %703 = vst.msk [vmem:[#allocation2 + $0x34] sm:$0xf] %vm248_vm0, %v5775_v54  ;;  %v7405_v5 = vrot.slane %v2703_v55, 5  ;;  %v7407_v6 = vrot.slane %v910_v56, 5  ;;  %v5777_v7 = vcombine.low %v488_v63, %v488_v63  ;;  %v5778_v8 = vcombine.high %v488_v63, %v488_v63 }
  0x43   : > { %6497 = vmatmul.mubr.msk.bf16.gmra.mrb[4].mxu1 %vm1235_vm5, %v5818_v57  ;;  %v2677_v11 = vrot.slane %v2676_v62, 4  ;;  %v934_v12 = vshll.u32 %v780_v48, 16  ;;  %v2727_v13 = vshll.u32 %v7386_v3, 16  ;;  %v489_v23 = vsel %vm7258_vm8, 0, %v7314_v24 }
  0x44   : > { %705 = vst.msk [vmem:[#allocation2 + $0x3c] sm:$0xf] %vm248_vm0, %v5777_v7  ;;  %706 = vst.msk [vmem:[#allocation2 + $0x40] sm:$0xf] %vm248_vm0, %v5778_v8  ;;  %v505_v14 = vsel %vm7258_vm8, %v7292_v9, 0  ;;  %v5780_v18 = vcombine.low %v489_v23, %v489_v23  ;;  %v5781_v21 = vcombine.high %v489_v23, %v489_v23  ;;  %v490_v26 = vsel %vm7258_vm8, 0, %v7317_v25 }
  0x45   : > { %v2682_v28 = vsel %vm7252_vm7, %v2677_v11, %v2681_v52  ;;  %v7424_v30 = vrot.slane %v934_v12, 5  ;;  %v7426_v24 = vrot.slane %v2727_v13, 5  ;;  %v5782_v33 = vcombine.low %v505_v14, %v505_v14  ;;  %v7434_v9 = vld [vmem:[#allocation2 + $0xc] sm:$0xe] }
  0x46   : > { %v5971_v4 = vcombine.low %v2672_v58, %v2682_v28  ;;  %708 = vst.msk [vmem:[#allocation2 + $0x48] sm:$0xf] %vm248_vm0, %v5780_v18  ;;  %709 = vst.msk [vmem:[#allocation2 + $0x4c] sm:$0xf] %vm248_vm0, %v5781_v21  ;;  %v506_v25 = vsel %vm7258_vm8, %v7294_v10, 0  ;;  %v5783_v35 = vcombine.low %v490_v26, %v490_v26  ;;  %v5784_v37 = vcombine.high %v490_v26, %v490_v26 }
  0x47   : > { %710 = vst.msk [vmem:[#allocation2 + $0x50] sm:$0x1] %vm251_vm1, %v5782_v33  ;;  %v5785_v39 = vcombine.low %v506_v25, %v506_v25  ;;  %v387_v40 = vshrl.u32 %v7399_v0, 16  ;;  %v390_v41 = vshll.u32 %v7399_v0, 16  ;;  %v394_v42 = vshrl.u32 %v7402_v1, 16  ;;  %v7078_v0 = vld [vmem:[%s7245_s28 + $0x50] sm:$0xff]  }
  0x48   : > { %6632 = vmatprep.mubr.msk.bf16.mxu0 %vm1235_vm5, %v5971_v4  ;;  %v2572_v43 = vld [vmem:[#allocation2 + $0x30] sm:$0xf]  ;;  %711 = vst.msk [vmem:[#allocation2 + $0x54] sm:$0xf] %vm248_vm0, %v5783_v35  ;;  %712 = vst.msk [vmem:[#allocation2 + $0x58] sm:$0xf] %vm248_vm0, %v5784_v37  ;;  %v7455_v47 = vsel %vm7430_vm11, %v7350_v38, %v3369_v17  ;;  %v5849_v53 = vcombine.low %v7304_v19, %v7306_v20 }
  0x49   : > { %v749_v44 = vld [vmem:[#allocation2 + $0x30] sm:$0xf]  ;;  %v397_v10 = vshll.u32 %v7402_v1, 16  ;;  %v6002_v45 = vrot.slane %v7434_v9, 9  ;;  %v7457_v48 = vld [vmem:[#allocation2 + $0x34] sm:$0xf] }
  0x4a   : > { %v2684_v49 = vshrl.u32 %v2572_v43, 16  ;;  %v2687_v51 = vshll.u32 %v2572_v43, 16  ;;  %v750_v52 = vld [vmem:[#allocation2 + $0x34] sm:$0xf]  ;;  %713 = vst.msk [vmem:[#allocation2 + $0x5c] sm:$0x1] %vm251_vm1, %v5785_v39 }
  0x4b   : > { %v2693_v22 = vshll.u32 %v7457_v48, 16  ;;  %v2697_v54 = vshrl.u32 %v7457_v48, 16  ;;  %v891_v61 = vshrl.u32 %v749_v44, 16  ;;  %v894_v55 = vshll.u32 %v749_v44, 16  ;;  %v751_v58 = vld [vmem:[#allocation2 + $0x3c] sm:$0xf] }
  0x4c   : > { %v2686_v56 = vrot.slane %v2684_v49, 4  ;;  %v2689_v57 = vrot.slane %v2687_v51, 5  ;;  %v900_v17 = vshll.u32 %v750_v52, 16  ;;  %v904_v38 = vshrl.u32 %v750_v52, 16  ;;  %v752_v11 = vld [vmem:[#allocation2 + $0x40] sm:$0xf] }
  0x4d   : > { %v2695_v62 = vrot.slane %v2693_v22, 5  ;;  %v2699_v63 = vrot.slane %v2697_v54, 4  ;;  %v893_v7 = vrot.slane %v891_v61, 4  ;;  %v896_v8 = vrot.slane %v894_v55, 5  ;;  %v2575_v33 = vld [vmem:[#allocation2 + $0x3c] sm:$0xf] }
  0x4e   : > { %v2690_v12 = vor.u32 %v2689_v57, %v2686_v56  ;;  %v902_v13 = vrot.slane %v900_v17, 5  ;;  %v906_v23 = vrot.slane %v904_v38, 4  ;;  %v915_v14 = vshrl.u32 %v751_v58, 16  ;;  %v7466_v54 = vld [vmem:[#allocation2 + $0x40] sm:$0xf] }
  0x4f   : > { %v2700_v18 = vor.u32 %v2699_v63, %v2695_v62  ;;  %v897_v21 = vor.u32 %v896_v8, %v893_v7  ;;  %v918_v26 = vshll.u32 %v751_v58, 16  ;;  %v924_v28 = vshll.u32 %v752_v11, 16  ;;  %v2578_v38 = vld [vmem:[#allocation2 + $0x48] sm:$0xf]  ;;  %v7476_v8 = vld [vmem:[#allocation2 + $0x4c] sm:$0xf] }
  0x50   : > { %v2691_v4 = vrot.slane %v2690_v12, 4  ;;  %v907_v25 = vor.u32 %v906_v23, %v902_v13  ;;  %v917_v35 = vrot.slane %v915_v14, 4  ;;  %v928_v37 = vshrl.u32 %v752_v11, 16  ;;  %v7883_v19 = vld [vmem:[#allocation2 + $0x28] sm:$0xf] }
  0x51   : > { %v2701_v39 = vrot.slane %v2700_v18, 4  ;;  %v898_v43 = vrot.slane %v897_v21, 4  ;;  %v920_v44 = vrot.slane %v918_v26, 5  ;;  %v926_v49 = vrot.slane %v924_v28, 5 }
  0x52   : > { %v2696_v51 = vsel %vm7252_vm7, %v2691_v4, %v2695_v62  ;;  %v908_v52 = vrot.slane %v907_v25, 4  ;;  %v930_v22 = vrot.slane %v928_v37, 4  ;;  %v2708_v61 = vshrl.u32 %v2575_v33, 16  ;;  %v753_v25 = vld [vmem:[#allocation2 + $0x48] sm:$0xf] }
  0x53   : > { %v2706_v55 = vsel %vm7252_vm7, %v2701_v39, %v7405_v5  ;;  %v903_v56 = vsel %vm7252_vm7, %v898_v43, %v902_v13  ;;  %v921_v57 = vor.u32 %v920_v44, %v917_v35  ;;  %v2711_v17 = vshll.u32 %v2575_v33, 16  ;;  %v7484_v33 = vld [vmem:[#allocation2 + $0x50] sm:$0x1]  ;;  %v754_v44 = vld [vmem:[#allocation2 + $0x4c] sm:$0xf] }
  0x54   : > { %v5972_v58 = vcombine.low %v2696_v51, %v2706_v55  ;;  %v913_v62 = vsel %vm7252_vm7, %v908_v52, %v7407_v6  ;;  %v931_v63 = vor.u32 %v930_v22, %v926_v49  ;;  %v2710_v7 = vrot.slane %v2708_v61, 4  ;;  %v781_v61 = vld [vmem:[#allocation2 + $0x50] sm:$0x1] }
  0x55   : > { %v5819_v11 = vcombine.low %v903_v56, %v913_v62  ;;  %v922_v12 = vrot.slane %v921_v57, 4  ;;  %v2713_v23 = vrot.slane %v2711_v17, 5  ;;  %v2717_v5 = vshll.u32 %v7466_v54, 16 }
  0x56   : > { %6633 = vmatmul.mubr.msk.bf16.gmra.mrb[4].mxu0 %vm1235_vm5, %v5972_v58  ;;  %v932_v13 = vrot.slane %v931_v63, 4  ;;  %v2721_v14 = vshrl.u32 %v7466_v54, 16  ;;  %v2732_v18 = vshrl.u32 %v2578_v38, 16  ;;  %v2735_v21 = vshll.u32 %v2578_v38, 16  ;;  %v755_v38 = vld [vmem:[#allocation2 + $0x54] sm:$0xf] }
  0x57   : > { %6500 = vmatprep.mubr.msk.bf16.mxu1 %vm1235_vm5, %v5819_v11  ;;  %v927_v6 = vsel %vm7252_vm7, %v922_v12, %v926_v49  ;;  %v2714_v26 = vor.u32 %v2713_v23, %v2710_v7  ;;  %v2719_v28 = vrot.slane %v2717_v5, 5  ;;  %v2741_v4 = vshll.u32 %v7476_v8, 16  ;;  %v756_v5 = vld [vmem:[#allocation2 + $0x58] sm:$0xf] }
  0x58   : > { %v937_v35 = vsel %vm7252_vm7, %v932_v13, %v7424_v30  ;;  %v2723_v37 = vrot.slane %v2721_v14, 4  ;;  %v2734_v39 = vrot.slane %v2732_v18, 4  ;;  %v2737_v43 = vrot.slane %v2735_v21, 5 }
  0x59   : > { %v5820_v51 = vcombine.low %v927_v6, %v937_v35  ;;  %v2715_v52 = vrot.slane %v2714_v26, 4  ;;  %v2743_v22 = vrot.slane %v2741_v4, 5  ;;  %v2745_v49 = vshrl.u32 %v7476_v8, 16  ;;  %v782_v6 = vld [vmem:[#allocation2 + $0x5c] sm:$0x1] }
  0x5a   : > { %v2724_v55 = vor.u32 %v2723_v37, %v2719_v28  ;;  %v2738_v56 = vor.u32 %v2737_v43, %v2734_v39  ;;  %v2751_v57 = vshll.u32 %v7484_v33, 16  ;;  %v939_v17 = vshrl.u32 %v753_v25, 16  ;;  %v2581_v35 = vld [vmem:[#allocation2 + $0x54] sm:$0xf] }
  0x5b   : > { %6501 = vmatmul.mubr.msk.bf16.gmra.mrb[8].mxu1 %vm1235_vm5, %v5820_v51  ;;  %v2720_v30 = vsel %vm7252_vm7, %v2715_v52, %v2719_v28  ;;  %v2747_v58 = vrot.slane %v2745_v49, 4  ;;  %v942_v62 = vshll.u32 %v753_v25, 16  ;;  %v948_v63 = vshll.u32 %v754_v44, 16  ;;  %v7500_v52 = vld [vmem:[#allocation2 + $0x58] sm:$0xf] }
  0x5c   : > { %v2725_v7 = vrot.slane %v2724_v55, 4  ;;  %v2739_v11 = vrot.slane %v2738_v56, 4  ;;  %v2753_v12 = vrot.slane %v2751_v57, 5  ;;  %v941_v23 = vrot.slane %v939_v17, 4 }
  0x5d   : > { %v2748_v13 = vor.u32 %v2747_v58, %v2743_v22  ;;  %v944_v14 = vrot.slane %v942_v62, 5  ;;  %v950_v18 = vrot.slane %v948_v63, 5  ;;  %v952_v21 = vshrl.u32 %v754_v44, 16  ;;  %v7505_v63 = vld [vmem:[#allocation2 + $0x5c] sm:$0x1] }
  0x5e   : > { %v2730_v26 = vsel %vm7252_vm7, %v2725_v7, %v7426_v24  ;;  %v2744_v28 = vsel %vm7252_vm7, %v2739_v11, %v2743_v22  ;;  %v958_v4 = vshll.u32 %v781_v61, 16  ;;  %v963_v25 = vshrl.u32 %v755_v38, 16 }
  0x5f   : > { %v5973_v37 = vcombine.low %v2720_v30, %v2730_v26  ;;  %v2749_v39 = vrot.slane %v2748_v13, 4  ;;  %v945_v43 = vor.u32 %v944_v14, %v941_v23  ;;  %v954_v51 = vrot.slane %v952_v21, 4 }
  0x60   : > { %v960_v49 = vrot.slane %v958_v4, 5  ;;  %v965_v55 = vrot.slane %v963_v25, 4  ;;  %v966_v44 = vshll.u32 %v755_v38, 16  ;;  %v972_v56 = vshll.u32 %v756_v5, 16 }
  0x61   : > { %6636 = vmatprep.mubr.msk.bf16.mxu0 %vm1235_vm5, %v5973_v37  ;;  %v2754_v24 = vsel %vm7252_vm7, %v2749_v39, %v2753_v12  ;;  %v946_v57 = vrot.slane %v945_v43, 4  ;;  %v955_v22 = vor.u32 %v954_v51, %v950_v18  ;;  %v976_v61 = vshrl.u32 %v756_v5, 16 }
  0x62   : > { %v5974_v17 = vcombine.low %v2744_v28, %v2754_v24  ;;  %v968_v58 = vrot.slane %v966_v44, 5  ;;  %v974_v30 = vrot.slane %v972_v56, 5  ;;  %v982_v62 = vshll.u32 %v782_v6, 16 }
  0x63   : > { %v951_v7 = vsel %vm7252_vm7, %v946_v57, %v950_v18  ;;  %v956_v11 = vrot.slane %v955_v22, 4  ;;  %v978_v38 = vrot.slane %v976_v61, 4  ;;  %v2756_v23 = vshrl.u32 %v2581_v35, 16 }
  0x64   : > { %6637 = vmatmul.mubr.msk.bf16.gmra.mrb[8].mxu0 %vm1235_vm5, %v5974_v17  ;;  %v969_v13 = vor.u32 %v968_v58, %v965_v55  ;;  %v984_v14 = vrot.slane %v982_v62, 5  ;;  %v2759_v12 = vshll.u32 %v2581_v35, 16  ;;  %v2765_v21 = vshll.u32 %v7500_v52, 16  ;;  %v7077_v58 = vld [vmem:[%s7245_s28 + $0x48] sm:$0xff]  }
  0x65   : > { %v961_v5 = vsel %vm7252_vm7, %v956_v11, %v960_v49  ;;  %v979_v26 = vor.u32 %v978_v38, %v974_v30  ;;  %v2758_v6 = vrot.slane %v2756_v23, 4  ;;  %v2769_v28 = vshrl.u32 %v7500_v52, 16  ;;  %v3294_v11 = vld [vmem:[#allocation2 + $0x18] sm:$0xe] }
  0x66   : > { %v5821_v4 = vcombine.low %v951_v7, %v961_v5  ;;  %v970_v25 = vrot.slane %v969_v13, 4  ;;  %v2761_v18 = vrot.slane %v2759_v12, 5  ;;  %v2767_v37 = vrot.slane %v2765_v21, 5 }
  0x67   : > { %v980_v39 = vrot.slane %v979_v26, 4  ;;  %v2771_v43 = vrot.slane %v2769_v28, 4  ;;  %v2775_v51 = vshll.u32 %v7505_v63, 16  ;;  %v389_v35 = vrot.slane %v387_v40, 7 }
  0x68   : > { %6504 = vmatprep.mubr.msk.bf16.mxu1 %vm1235_vm5, %v5821_v4  ;;  %v975_v49 = vsel %vm7252_vm7, %v970_v25, %v974_v30  ;;  %v2762_v55 = vor.u32 %v2761_v18, %v2758_v6  ;;  %v396_v44 = vrot.slane %v394_v42, 7  ;;  %v7528_v56 = vsel %vm7430_vm11, %v6002_v45, %v3359_v50 }
  0x69   : > { %v985_v40 = vsel %vm7252_vm7, %v980_v39, %v984_v14  ;;  %v2772_v24 = vor.u32 %v2771_v43, %v2767_v37  ;;  %v2777_v57 = vrot.slane %v2775_v51, 5  ;;  %v392_v22 = vor.u32 %v390_v41, %v389_v35  ;;  %v7573_v51 = vld [vmem:[#allocation2 + $0x30] sm:$0xe] }
  0x6a   : > { %v5822_v61 = vcombine.low %v975_v49, %v985_v40  ;;  %v2763_v17 = vrot.slane %v2762_v55, 4  ;;  %v507_v42 = vsel %vm7258_vm8, %v389_v35, 0  ;;  %v399_v9 = vor.u32 %v397_v10, %v396_v44  ;;  %v3295_v10 = vld [vmem:[#allocation2 + $0x24] sm:$0xe] }
  0x6b   : > { %v2773_v30 = vrot.slane %v2772_v24, 4  ;;  %v491_v45 = vsel %vm7258_vm8, 0, %v392_v22  ;;  %v5788_v62 = vcombine.low %v507_v42, %v507_v42  ;;  %v508_v7 = vsel %vm7258_vm8, %v396_v44, 0 }
  0x6c   : > { %6505 = vmatmul.mubr.msk.bf16.gmra.mrb[12].mxu1 %vm1235_vm5, %v5822_v61  ;;  %v2768_v41 = vsel %vm7252_vm7, %v2763_v17, %v2767_v37  ;;  %v5786_v38 = vcombine.low %v491_v45, %v491_v45  ;;  %v5787_v23 = vcombine.high %v491_v45, %v491_v45  ;;  %v492_v1 = vsel %vm7258_vm8, 0, %v399_v9 }
  0x6d   : > { %v2778_v13 = vsel %vm7252_vm7, %v2773_v30, %v2777_v57  ;;  %716 = vst.msk [vmem:[#allocation2 + $0x68] sm:$0x1] %vm251_vm1, %v5788_v62  ;;  %v5789_v14 = vcombine.low %v492_v1, %v492_v1  ;;  %v5790_v12 = vcombine.high %v492_v1, %v492_v1  ;;  %v5791_v21 = vcombine.low %v508_v7, %v508_v7 }
  0x6e   : > { %v5975_v5 = vcombine.low %v2768_v41, %v2778_v13  ;;  %714 = vst.msk [vmem:[#allocation2 + $0x60] sm:$0xf] %vm248_vm0, %v5786_v38  ;;  %715 = vst.msk [vmem:[#allocation2 + $0x64] sm:$0xf] %vm248_vm0, %v5787_v23  ;;  %v3361_v26 = vrot.slane %v3359_v50, 4  ;;  %v6003_v6 = vrot.slane %v3294_v11, 9 }
  0x6f   : > { %v401_v28 = vshrl.u32 %v7077_v58, 16  ;;  %717 = vst.msk [vmem:[#allocation2 + $0x6c] sm:$0xf] %vm248_vm0, %v5789_v14  ;;  %718 = vst.msk [vmem:[#allocation2 + $0x70] sm:$0xf] %vm248_vm0, %v5790_v12  ;;  %v404_v4 = vshll.u32 %v7077_v58, 16 }
  0x70   : > { %719 = vst.msk [vmem:[#allocation2 + $0x74] sm:$0x1] %vm251_vm1, %v5791_v21  ;;  %v408_v25 = vshrl.u32 %v7078_v0, 16  ;;  %v411_v18 = vshll.u32 %v7078_v0, 16  ;;  %v6004_v37 = vrot.slane %v3295_v10, 9  ;;  %6640 = vmatprep.mubr.msk.bf16.mxu0 %vm1235_vm5, %v5975_v5  ;;  %v7564_v31 = vsel %vm7430_vm11, %v3361_v26, %v3362_v36 }
  0x71   : > { %v7570_v50 = vsel %vm7430_vm11, %v6003_v6, %v3366_v16  ;;  %v403_v39 = vrot.slane %v401_v28, 7  ;;  %v3373_v43 = vrot.slane %v7357_v59, 5  ;;  %v6020_v35 = vcombine.low %v7528_v56, %v7564_v31 }
  0x72   : > { %v6021_v15 = vcombine.low %v7570_v50, %v7455_v47  ;;  %v410_v49 = vrot.slane %v408_v25, 7  ;;  %v3376_v36 = vrot.slane %v7364_v2, 5  ;;  %v6005_v57 = vrot.slane %v7573_v51, 9 }
  0x73   : > { %v406_v55 = vor.u32 %v404_v4, %v403_v39  ;;  %v509_v46 = vsel %vm7258_vm8, %v403_v39, 0  ;;  %v7584_v16 = vsel %vm7430_vm11, %v6004_v37, %v3373_v43  ;;  %v3375_v59 = vrot.slane %v3373_v43, 4 }
  0x74   : > { %v5794_v44 = vcombine.low %v509_v46, %v509_v46  ;;  %v7586_v40 = vor.u32 %v411_v18, %v410_v49  ;;  %v510_v24 = vsel %vm7258_vm8, %v410_v49, 0  ;;  %v7591_v22 = vld [vmem:[#allocation2 + $0x68] sm:$0x1]  ;;  %v3380_v9 = vrot.slane %v7457_v48, 5 }
  0x75   : > { %v783_v2 = vld [vmem:[#allocation2 + $0x68] sm:$0x1]  ;;  %v493_v61 = vsel %vm7258_vm8, 0, %v406_v55  ;;  %v5797_v17 = vcombine.low %v510_v24, %v510_v24  ;;  %v7597_v42 = vsel %vm7430_vm11, %v3375_v59, %v3376_v36  ;;  %v2584_v58 = vld [vmem:[#allocation2 + $0x60] sm:$0xf]  ;;  %v2799_v45 = vshll.u32 %v7591_v22, 16 }
  0x76   : > { %v7600_v30 = vld [vmem:[#allocation2 + $0x64] sm:$0xf]  ;;  %v1006_v62 = vshll.u32 %v783_v2, 16  ;;  %v5792_v7 = vcombine.low %v493_v61, %v493_v61  ;;  %v5793_v11 = vcombine.high %v493_v61, %v493_v61  ;;  %722 = vst.msk [vmem:[#allocation2 + $0x80] sm:$0x1] %vm251_vm1, %v5794_v44  ;;  %v2780_v0 = vshrl.u32 %v2584_v58, 16 }
  0x77   : > { %v2783_v41 = vshll.u32 %v2584_v58, 16  ;;  %v2789_v38 = vshll.u32 %v7600_v30, 16  ;;  %v2793_v23 = vshrl.u32 %v7600_v30, 16  ;;  %v7606_v1 = vld [vmem:[#allocation2 + $0x60] sm:$0xf]  ;;  %v2801_v10 = vrot.slane %v2799_v45, 5 }
  0x78   : > { %725 = vst.msk [vmem:[#allocation2 + $0x8c] sm:$0x1] %vm251_vm1, %v5797_v17  ;;  %v7609_v13 = vld [vmem:[#allocation2 + $0x64] sm:$0xf]  ;;  %v987_v14 = vshrl.u32 %v7606_v1, 16  ;;  %v990_v12 = vshll.u32 %v7606_v1, 16  ;;  %v6022_v56 = vcombine.low %v7584_v16, %v7597_v42  ;;  %v3381_v16 = vsel %vm7430_vm11, %v6005_v57, %v3380_v9 }
  0x79   : > { %v1008_v21 = vrot.slane %v1006_v62, 5  ;;  %720 = vst.msk [vmem:[#allocation2 + $0x78] sm:$0xf] %vm248_vm0, %v5792_v7  ;;  %721 = vst.msk [vmem:[#allocation2 + $0x7c] sm:$0xf] %vm248_vm0, %v5793_v11  ;;  %v2782_v5 = vrot.slane %v2780_v0, 4 }
  0x7a   : > { %v2785_v26 = vrot.slane %v2783_v41, 5  ;;  %v2791_v6 = vrot.slane %v2789_v38, 5  ;;  %v2795_v28 = vrot.slane %v2793_v23, 4  ;;  %v7615_v4 = vld [vmem:[#allocation2 + $0x6c] sm:$0xf]  ;;  %v989_v25 = vrot.slane %v987_v14, 4 }
  0x7b   : > { %v992_v18 = vrot.slane %v990_v12, 5  ;;  %v996_v37 = vshll.u32 %v7609_v13, 16  ;;  %v1000_v39 = vshrl.u32 %v7609_v13, 16  ;;  %v7619_v43 = vld [vmem:[#allocation2 + $0x70] sm:$0xf]  ;;  %v1011_v55 = vshrl.u32 %v7615_v4, 16 }
  0x7c   : > { %v2786_v49 = vor.u32 %v2785_v26, %v2782_v5  ;;  %v2796_v36 = vor.u32 %v2795_v28, %v2791_v6  ;;  %v1014_v46 = vshll.u32 %v7615_v4, 16  ;;  %v784_v2 = vld [vmem:[#allocation2 + $0x74] sm:$0x1]  ;;  %v1020_v61 = vshll.u32 %v7619_v43, 16 }
  0x7d   : > { %v993_v59 = vor.u32 %v992_v18, %v989_v25  ;;  %v998_v44 = vrot.slane %v996_v37, 5  ;;  %v1002_v24 = vrot.slane %v1000_v39, 4  ;;  %v1013_v45 = vrot.slane %v1011_v55, 4 }
  0x7e   : > { %v2787_v17 = vrot.slane %v2786_v49, 4  ;;  %v2797_v58 = vrot.slane %v2796_v36, 4  ;;  %v1016_v62 = vrot.slane %v1014_v46, 5  ;;  %v1022_v0 = vrot.slane %v1020_v61, 5 }
  0x7f   : > { %v994_v7 = vrot.slane %v993_v59, 4  ;;  %v1003_v11 = vor.u32 %v1002_v24, %v998_v44  ;;  %v1024_v41 = vshrl.u32 %v7619_v43, 16  ;;  %v1030_v12 = vshll.u32 %v784_v2, 16  ;;  %v786_v24 = vld [vmem:[#allocation2 + $0x8c] sm:$0x1] }
  0x80   : > { %v2792_v38 = vsel %vm7252_vm7, %v2787_v17, %v2791_v6  ;;  %v2802_v23 = vsel %vm7252_vm7, %v2797_v58, %v2801_v10  ;;  %v1017_v14 = vor.u32 %v1016_v62, %v1013_v45  ;;  %v7629_v5 = vld [vmem:[#allocation2 + $0x78] sm:$0xf]  ;;  %v7631_v26 = vld [vmem:[#allocation2 + $0x7c] sm:$0xf]  ;;  %v785_v6 = vld [vmem:[#allocation2 + $0x80] sm:$0x1] }
  0x81   : > { %v5976_v28 = vcombine.low %v2792_v38, %v2802_v23  ;;  %v999_v25 = vsel %vm7252_vm7, %v994_v7, %v998_v44  ;;  %v1004_v18 = vrot.slane %v1003_v11, 4  ;;  %v1026_v37 = vrot.slane %v1024_v41, 4  ;;  %v7079_v45 = vld [vmem:[%s7245_s28 + $0x58] sm:$0xff]   ;;  %v7080_v62 = vld [vmem:[%s7245_s28 + $0x60] sm:$0xff]  }
  0x82   : > { %v1018_v39 = vrot.slane %v1017_v14, 4  ;;  %v1032_v49 = vrot.slane %v1030_v12, 5  ;;  %v1035_v36 = vshrl.u32 %v7629_v5, 16  ;;  %v1038_v10 = vshll.u32 %v7629_v5, 16 }
  0x83   : > { %6641 = vmatmul.mubr.msk.bf16.gmra.mrb[12].mxu0 %vm1235_vm5, %v5976_v28  ;;  %v1009_v55 = vsel %vm7252_vm7, %v1004_v18, %v1008_v21  ;;  %v1027_v46 = vor.u32 %v1026_v37, %v1022_v0  ;;  %v1044_v59 = vshll.u32 %v7631_v26, 16  ;;  %v1048_v44 = vshrl.u32 %v7631_v26, 16  ;;  %v3297_v28 = vld [vmem:[#allocation2 + $0x3c] sm:$0xe] }
  0x84   : > { %v5823_v2 = vcombine.low %v999_v25, %v1009_v55  ;;  %v1023_v61 = vsel %vm7252_vm7, %v1018_v39, %v1022_v0  ;;  %6662 = vmatprep.mubr.msk.bf16.mxu0 %vm1235_vm5, %v6020_v35  ;;  %v1037_v17 = vrot.slane %v1035_v36, 4  ;;  %v1040_v58 = vrot.slane %v1038_v10, 5  ;;  %v3298_v55 = vld [vmem:[#allocation2 + $0x48] sm:$0xe] }
  0x85   : > { %v1028_v21 = vrot.slane %v1027_v46, 4  ;;  %v1046_v7 = vrot.slane %v1044_v59, 5  ;;  %v1050_v11 = vrot.slane %v1048_v44, 4  ;;  %v1054_v41 = vshll.u32 %v785_v6, 16 }
  0x86   : > { %6508 = vmatprep.mubr.msk.bf16.mxu1 %vm1235_vm5, %v5823_v2  ;;  %v1041_v38 = vor.u32 %v1040_v58, %v1037_v17  ;;  %v494_v0 = vsel %vm7258_vm8, 0, %v7586_v40  ;;  %v1078_v23 = vshll.u32 %v786_v24, 16  ;;  %v3382_v40 = vrot.slane %v3380_v9, 4 }
  0x87   : > { %v1033_v31 = vsel %vm7252_vm7, %v1028_v21, %v1032_v49  ;;  %v1051_v35 = vor.u32 %v1050_v11, %v1046_v7  ;;  %v1056_v14 = vrot.slane %v1054_v41, 5  ;;  %v5795_v12 = vcombine.low %v494_v0, %v494_v0  ;;  %v7673_v49 = vld [vmem:[%s9053_s1 + $0x38] sm:$0xff]  }
  0x88   : > { %v5824_v25 = vcombine.low %v1023_v61, %v1033_v31  ;;  %v1042_v18 = vrot.slane %v1041_v38, 4  ;;  %v5796_v37 = vcombine.high %v494_v0, %v494_v0  ;;  %v7658_v39 = vrot.slane %v1078_v23, 5  ;;  %v7081_v0 = vld [vmem:[%s7245_s28 + $0x68] sm:$0xff]  }
  0x89   : > { %v1052_v6 = vrot.slane %v1051_v35, 4  ;;  %723 = vst.msk [vmem:[#allocation2 + $0x84] sm:$0xf] %vm248_vm0, %v5795_v12  ;;  %v3383_v42 = vrot.slane %v7370_v29, 5  ;;  %v415_v51 = vshrl.u32 %v7079_v45, 16  ;;  %v418_v10 = vshll.u32 %v7079_v45, 16 }
  0x8a   : > { %6509 = vmatmul.mubr.msk.bf16.gmra.mrb[16].mxu1 %vm1235_vm5, %v5824_v25  ;;  %v1047_v36 = vsel %vm7252_vm7, %v1042_v18, %v1046_v7  ;;  %724 = vst.msk [vmem:[#allocation2 + $0x88] sm:$0xf] %vm248_vm0, %v5796_v37  ;;  %v422_v57 = vshrl.u32 %v7080_v62, 16  ;;  %v425_v9 = vshll.u32 %v7080_v62, 16  ;;  %v6006_v46 = vrot.slane %v3297_v28, 9  ;;  %v7082_v12 = vld [vmem:[%s7245_s28 + $0x70] sm:$0xff]  }
  0x8b   : > { %6663 = vmatmul.mubr.msk.bf16.vlgmr.msra.gmra.mrb[0].mxu0 %vm1235_vm5, %v6021_v15  ;;  %v1057_v29 = vsel %vm7252_vm7, %v1052_v6, %v1056_v14  ;;  %v3384_v48 = vsel %vm7430_vm11, %v3382_v40, %v3383_v42  ;;  %v417_v24 = vrot.slane %v415_v51, 7  ;;  %v3387_v47 = vrot.slane %v7466_v54, 5 }
  0x8c   : > { %6695 = vmatpush3.bf16.msra.mxu0 %v7362_v60  ;;  %v5825_v59 = vcombine.low %v1047_v36, %v1057_v29  ;;  %6666 = vmatprep.mubr.msk.bf16.mxu0 %vm1235_vm5, %v6022_v56  ;;  %v6023_v44 = vcombine.low %v3381_v16, %v3384_v48  ;;  %v424_v2 = vrot.slane %v422_v57, 7  ;;  %v3390_v50 = vrot.slane %v7386_v3, 5 }
  0x8d   : > { %v6007_v15 = vrot.slane %v3298_v55, 9  ;;  %v3394_v61 = vrot.slane %v7476_v8, 5  ;;  %6728 = vmatprep.subr.bf16.mxu0 %v7673_v49  ;;  %v420_v17 = vor.u32 %v418_v10, %v417_v24  ;;  %v511_v60 = vsel %vm7258_vm8, %v417_v24, 0  ;;  %v7728_v55 = vld [vmem:[#allocation2 + $0x54] sm:$0xe] }
  0x8e   : > { %6512 = vmatprep.mubr.msk.bf16.mxu1 %vm1235_vm5, %v5825_v59  ;;  %v427_v58 = vor.u32 %v425_v9, %v424_v2  ;;  %v512_v45 = vsel %vm7258_vm8, %v424_v2, 0  ;;  %v5800_v62 = vcombine.low %v511_v60, %v511_v60  ;;  %v3388_v3 = vsel %vm7430_vm11, %v6006_v46, %v3387_v47 }
  0x8f   : > { %v5803_v54 = vcombine.low %v512_v45, %v512_v45  ;;  %v3389_v8 = vrot.slane %v3387_v47, 4  ;;  %v495_v7 = vsel %vm7258_vm8, 0, %v420_v17  ;;  %v7708_v41 = vsel %vm7430_vm11, %v6007_v15, %v3394_v61 }
  0x90   : > { %v7700_v21 = vld [vmem:[#allocation2 + $0x84] sm:$0xf]  ;;  %v496_v11 = vsel %vm7258_vm8, 0, %v427_v58  ;;  %v3396_v38 = vrot.slane %v3394_v61, 4  ;;  %v5798_v35 = vcombine.low %v495_v7, %v495_v7  ;;  %v5799_v14 = vcombine.high %v495_v7, %v495_v7  ;;  %728 = vst.msk [vmem:[#allocation2 + $0x98] sm:$0x1] %vm251_vm1, %v5800_v62 }
  0x91   : > { %v7711_v23 = vld [vmem:[#allocation2 + $0x88] sm:$0xf]  ;;  %v1059_v56 = vshrl.u32 %v7700_v21, 16  ;;  %v1062_v31 = vshll.u32 %v7700_v21, 16  ;;  %731 = vst.msk [vmem:[#allocation2 + $0xa4] sm:$0x1] %vm251_vm1, %v5803_v54  ;;  %v5801_v18 = vcombine.low %v496_v11, %v496_v11  ;;  %v5802_v37 = vcombine.high %v496_v11, %v496_v11 }
  0x92   : > { %v1068_v28 = vshll.u32 %v7711_v23, 16  ;;  %v1072_v25 = vshrl.u32 %v7711_v23, 16  ;;  %726 = vst.msk [vmem:[#allocation2 + $0x90] sm:$0xf] %vm248_vm0, %v5798_v35  ;;  %727 = vst.msk [vmem:[#allocation2 + $0x94] sm:$0xf] %vm248_vm0, %v5799_v14  ;;  %v3391_v40 = vsel %vm7430_vm11, %v3389_v8, %v3390_v50 }
  0x93   : > { %v1061_v6 = vrot.slane %v1059_v56, 4  ;;  %v1064_v16 = vrot.slane %v1062_v31, 5  ;;  %6667 = vmatmul.mubr.msk.bf16.gmra.mrb[4].mxu0 %vm1235_vm5, %v6023_v44  ;;  %v3397_v42 = vrot.slane %v7484_v33, 5  ;;  %729 = vst.msk [vmem:[#allocation2 + $0x9c] sm:$0xf] %vm248_vm0, %v5801_v18  ;;  %v6024_v10 = vcombine.low %v3388_v3, %v3391_v40 }
  0x94   : > { %v1070_v36 = vrot.slane %v1068_v28, 5  ;;  %v1074_v51 = vrot.slane %v1072_v25, 4  ;;  %730 = vst.msk [vmem:[#allocation2 + $0xa0] sm:$0xf] %vm248_vm0, %v5802_v37  ;;  %v429_v57 = vshrl.u32 %v7081_v0, 16  ;;  %v432_v9 = vshll.u32 %v7081_v0, 16 }
  0x95   : > { %v1065_v29 = vor.u32 %v1064_v16, %v1061_v6  ;;  %v3398_v48 = vsel %vm7430_vm11, %v3396_v38, %v3397_v42  ;;  %v436_v46 = vshrl.u32 %v7082_v12, 16  ;;  %6670 = vmatprep.mubr.msk.bf16.mxu0 %vm1235_vm5, %v6024_v10  ;;  %v439_v24 = vshll.u32 %v7082_v12, 16 }
  0x96   : > { %v1075_v59 = vor.u32 %v1074_v51, %v1070_v36  ;;  %v6025_v33 = vcombine.low %v7708_v41, %v3398_v48  ;;  %v431_v44 = vrot.slane %v429_v57, 7  ;;  %v6008_v50 = vrot.slane %v7728_v55, 9 }
  0x97   : > { %v1066_v2 = vrot.slane %v1065_v29, 4  ;;  %v438_v47 = vrot.slane %v436_v46, 7  ;;  %v3401_v15 = vrot.slane %v7500_v52, 5  ;;  %v7736_v17 = vld [vmem:[#allocation2 + $0x98] sm:$0x1] }
  0x98   : > { %v1076_v61 = vrot.slane %v1075_v59, 4  ;;  %v788_v60 = vld [vmem:[#allocation2 + $0xa4] sm:$0x1]  ;;  %v434_v58 = vor.u32 %v432_v9, %v431_v44  ;;  %v513_v45 = vsel %vm7258_vm8, %v431_v44, 0  ;;  %v1102_v54 = vshll.u32 %v7736_v17, 16 }
  0x99   : > { %v1071_v62 = vsel %vm7252_vm7, %v1066_v2, %v1070_v36  ;;  %v1126_v3 = vshll.u32 %v788_v60, 16  ;;  %v5806_v8 = vcombine.low %v513_v45, %v513_v45  ;;  %v7746_v52 = vld [vmem:[#allocation2 + $0x90] sm:$0xf]  ;;  %v7748_v11 = vld [vmem:[#allocation2 + $0x94] sm:$0xf]  ;;  %v441_v38 = vor.u32 %v439_v24, %v438_v47 }
  0x9a   : > { %v1081_v7 = vsel %vm7252_vm7, %v1076_v61, %v7658_v39  ;;  %v497_v41 = vsel %vm7258_vm8, 0, %v434_v58  ;;  %v514_v0 = vsel %vm7258_vm8, %v438_v47, 0  ;;  %v1083_v31 = vshrl.u32 %v7746_v52, 16  ;;  %v7757_v12 = vld [vmem:[#allocation2 + $0x9c] sm:$0xf] }
  0x9b   : > { %v5826_v56 = vcombine.low %v1071_v62, %v1081_v7  ;;  %v1086_v35 = vshll.u32 %v7746_v52, 16  ;;  %v1092_v14 = vshll.u32 %v7748_v11, 16  ;;  %6671 = vmatmul.mubr.msk.bf16.gmra.mrb[8].mxu0 %vm1235_vm5, %v6025_v33  ;;  %734 = vst.msk [vmem:[#allocation2 + $0xb0] sm:$0x1] %vm251_vm1, %v5806_v8  ;;  %v1096_v39 = vshrl.u32 %v7748_v11, 16 }
  0x9c   : > { %v1104_v28 = vrot.slane %v1102_v54, 5  ;;  %v7762_v25 = vld [vmem:[#allocation2 + $0xa0] sm:$0xf]  ;;  %v1107_v18 = vshrl.u32 %v7757_v12, 16  ;;  %v1110_v37 = vshll.u32 %v7757_v12, 16  ;;  %v1085_v6 = vrot.slane %v1083_v31, 4 }
  0x9d   : > { %6513 = vmatmul.mubr.msk.bf16.gmra.mrb[20].mxu1 %vm1235_vm5, %v5826_v56  ;;  %v1088_v16 = vrot.slane %v1086_v35, 5  ;;  %v1094_v40 = vrot.slane %v1092_v14, 5  ;;  %v1116_v42 = vshll.u32 %v7762_v25, 16  ;;  %v1098_v36 = vrot.slane %v1096_v39, 4  ;;  %v3300_v54 = vld [vmem:[#allocation2 + $0x60] sm:$0xe] }
  0x9e   : > { %v1109_v51 = vrot.slane %v1107_v18, 4  ;;  %v1112_v10 = vrot.slane %v1110_v37, 5  ;;  %v1120_v57 = vshrl.u32 %v7762_v25, 16  ;;  %v1128_v48 = vrot.slane %v1126_v3, 5 }
  0x9f   : > { %v1089_v55 = vor.u32 %v1088_v16, %v1085_v6  ;;  %v1118_v29 = vrot.slane %v1116_v42, 5  ;;  %v5804_v9 = vcombine.low %v497_v41, %v497_v41  ;;  %v1099_v46 = vor.u32 %v1098_v36, %v1094_v40 }
  0xa0   : > { %v1113_v59 = vor.u32 %v1112_v10, %v1109_v51  ;;  %v1122_v33 = vrot.slane %v1120_v57, 4  ;;  %v5805_v44 = vcombine.high %v497_v41, %v497_v41  ;;  %v498_v2 = vsel %vm7258_vm8, 0, %v441_v38  ;;  %v3301_v38 = vld [vmem:[#allocation2 + $0x6c] sm:$0xe]  ;;  %v2589_v51 = vld [vmem:[#allocation2 + $0x74] sm:$0x1] }
  0xa1   : > { %v1090_v24 = vrot.slane %v1089_v55, 4  ;;  %732 = vst.msk [vmem:[#allocation2 + $0xa8] sm:$0xf] %vm248_vm0, %v5804_v9  ;;  %v5809_v47 = vcombine.low %v514_v0, %v514_v0  ;;  %v1100_v61 = vrot.slane %v1099_v46, 4  ;;  %v5807_v62 = vcombine.low %v498_v2, %v498_v2 }
  0xa2   : > { %v1114_v60 = vrot.slane %v1113_v59, 4  ;;  %v1123_v58 = vor.u32 %v1122_v33, %v1118_v29  ;;  %733 = vst.msk [vmem:[#allocation2 + $0xac] sm:$0xf] %vm248_vm0, %v5805_v44  ;;  %v7773_v45 = vld [vmem:[#allocation2 + $0xb0] sm:$0x1]  ;;  %v5808_v8 = vcombine.high %v498_v2, %v498_v2  ;;  %v3402_v7 = vsel %vm7430_vm11, %v6008_v50, %v3401_v15 }
  0xa3   : > { %v1095_v3 = vsel %vm7252_vm7, %v1090_v24, %v1094_v40  ;;  %737 = vst.msk [vmem:[#allocation2 + $0xbc] sm:$0x1] %vm251_vm1, %v5809_v47  ;;  %v3403_v41 = vrot.slane %v3401_v15, 4  ;;  %v1105_v0 = vsel %vm7252_vm7, %v1100_v61, %v1104_v28  ;;  %v3404_v35 = vrot.slane %v7505_v63, 5  ;;  %v2588_v15 = vld [vmem:[#allocation2 + $0x70] sm:$0xf] }
  0xa4   : > { %v1119_v56 = vsel %vm7252_vm7, %v1114_v60, %v1118_v29  ;;  %v1124_v31 = vrot.slane %v1123_v58, 4  ;;  %735 = vst.msk [vmem:[#allocation2 + $0xb4] sm:$0xf] %vm248_vm0, %v5807_v62  ;;  %v5827_v14 = vcombine.low %v1095_v3, %v1105_v0  ;;  %v1150_v39 = vshll.u32 %v7773_v45, 16  ;;  %736 = vst.msk [vmem:[#allocation2 + $0xb8] sm:$0xf] %vm248_vm0, %v5808_v8 }
  0xa5   : > { %v6009_v18 = vrot.slane %v3300_v54, 9  ;;  %v3408_v50 = vrot.slane %v7600_v30, 5  ;;  %v3405_v37 = vsel %vm7430_vm11, %v3403_v41, %v3404_v35  ;;  %v3411_v6 = vrot.slane %v7591_v22, 5 }
  0xa6   : > { %v1129_v28 = vsel %vm7252_vm7, %v1124_v31, %v1128_v48  ;;  %v6010_v16 = vrot.slane %v3301_v38, 9  ;;  %6516 = vmatprep.mubr.msk.bf16.mxu1 %vm1235_vm5, %v5827_v14  ;;  %v6026_v40 = vcombine.low %v3402_v7, %v3405_v37  ;;  %v3415_v10 = vrot.slane %v2588_v15, 5 }
  0xa7   : > { %v5828_v63 = vcombine.low %v1119_v56, %v1129_v28  ;;  %v3409_v42 = vsel %vm7430_vm11, %v6009_v18, %v3408_v50  ;;  %v3410_v36 = vrot.slane %v3408_v50, 4  ;;  %v1152_v29 = vrot.slane %v1150_v39, 5  ;;  %v7825_v39 = vld [vmem:[#allocation2 + $0x7c] sm:$0xf]  ;;  %v3302_v18 = vld [vmem:[#allocation2 + $0x78] sm:$0xe] }
  0xa8   : > { %v7797_v30 = vld [vmem:[#allocation2 + $0xa8] sm:$0xf]  ;;  %6674 = vmatprep.mubr.msk.bf16.mxu0 %vm1235_vm5, %v6026_v40  ;;  %v3418_v44 = vrot.slane %v2589_v51, 5  ;;  %v3416_v61 = vsel %vm7430_vm11, %v6010_v16, %v3415_v10  ;;  %v3417_v60 = vrot.slane %v3415_v10, 4 }
  0xa9   : > { %6517 = vmatmul.mubr.msk.bf16.gmra.mrb[24].mxu1 %vm1235_vm5, %v5828_v63  ;;  %v7800_v57 = vld [vmem:[#allocation2 + $0xac] sm:$0xf]  ;;  %v1131_v55 = vshrl.u32 %v7797_v30, 16  ;;  %v1134_v22 = vshll.u32 %v7797_v30, 16  ;;  %v3412_v48 = vsel %vm7430_vm11, %v3410_v36, %v3411_v6  ;;  %v7827_v6 = vld [vmem:[#allocation2 + $0x80] sm:$0x1] }
  0xaa   : > { %v1140_v9 = vshll.u32 %v7800_v57, 16  ;;  %v1144_v46 = vshrl.u32 %v7800_v57, 16  ;;  %v7809_v59 = vld [vmem:[#allocation2 + $0xbc] sm:$0x1]  ;;  %v6027_v33 = vcombine.low %v3409_v42, %v3412_v48  ;;  %v3419_v14 = vsel %vm7430_vm11, %v3417_v60, %v3418_v44  ;;  %v2594_v40 = vld [vmem:[#allocation2 + $0x88] sm:$0xf] }
  0xab   : > { %9078 = vst [vmem:[#allocation3_spill] sm:$0xff] %v7809_v59  ;;  %v1133_v24 = vrot.slane %v1131_v55, 4  ;;  %v1136_v2 = vrot.slane %v1134_v22, 5  ;;  %v7811_v47 = vld [vmem:[#allocation2 + $0xb4] sm:$0xf]  ;;  %v1174_v0 = vshll.u32 %v7809_v59, 16  ;;  %v6028_v37 = vcombine.low %v3416_v61, %v3419_v14 }
  0xac   : > { %v1142_v58 = vrot.slane %v1140_v9, 5  ;;  %v1146_v62 = vrot.slane %v1144_v46, 4  ;;  %v7815_v54 = vld [vmem:[#allocation2 + $0xb8] sm:$0xf]  ;;  %v1155_v3 = vshrl.u32 %v7811_v47, 16  ;;  %v1158_v8 = vshll.u32 %v7811_v47, 16  ;;  %6675 = vmatmul.mubr.msk.bf16.gmra.mrb[12].mxu0 %vm1235_vm5, %v6027_v33 }
  0xad   : > { %v1137_v7 = vor.u32 %v1136_v2, %v1133_v24  ;;  %v1164_v41 = vshll.u32 %v7815_v54, 16  ;;  %v1168_v38 = vshrl.u32 %v7815_v54, 16  ;;  %v2595_v42 = vld [vmem:[#allocation2 + $0x8c] sm:$0x1]  ;;  %v3303_v36 = vld [vmem:[#allocation2 + $0x84] sm:$0xe]  ;;  %6678 = vmatprep.mubr.msk.bf16.mxu0 %vm1235_vm5, %v6028_v37 }
  0xae   : > { %v1147_v56 = vor.u32 %v1146_v62, %v1142_v58  ;;  %v1157_v31 = vrot.slane %v1155_v3, 4  ;;  %v1160_v35 = vrot.slane %v1158_v8, 5  ;;  %v1176_v55 = vrot.slane %v1174_v0, 5  ;;  %v2597_v33 = vld [vmem:[#allocation2 + $0x94] sm:$0xf] }
  0xaf   : > { %v1138_v50 = vrot.slane %v1137_v7, 4  ;;  %v1166_v15 = vrot.slane %v1164_v41, 5  ;;  %v1170_v28 = vrot.slane %v1168_v38, 4  ;;  %v6011_v22 = vrot.slane %v3302_v18, 9  ;;  %v3304_v60 = vld [vmem:[#allocation2 + $0x90] sm:$0xe] }
  0xb0   : > { %v1148_v16 = vrot.slane %v1147_v56, 4  ;;  %v1161_v63 = vor.u32 %v1160_v35, %v1157_v31  ;;  %v3422_v46 = vrot.slane %v7825_v39, 5  ;;  %v3425_v2 = vrot.slane %v7827_v6, 5  ;;  %v2598_v8 = vld [vmem:[#allocation2 + $0x98] sm:$0x1] }
  0xb1   : > { %v1143_v51 = vsel %vm7252_vm7, %v1138_v50, %v1142_v58  ;;  %v1171_v10 = vor.u32 %v1170_v28, %v1166_v15  ;;  %v6012_v61 = vrot.slane %v3303_v36, 9  ;;  %v7120_v7 = vld [vmem:[#allocation2] sm:$0xf]  ;;  %v7843_v41 = vld [vmem:[#allocation2 + $0x4] sm:$0xf]  ;;  %v3429_v0 = vrot.slane %v2594_v40, 5 }
  0xb2   : > { %v1153_v48 = vsel %vm7252_vm7, %v1148_v16, %v1152_v29  ;;  %v1162_v9 = vrot.slane %v1161_v63, 4  ;;  %v3423_v62 = vsel %vm7430_vm11, %v6011_v22, %v3422_v46  ;;  %v3424_v3 = vrot.slane %v3422_v46, 4  ;;  %v3305_v31 = vld [vmem:[#allocation2 + $0x9c] sm:$0xe]  ;;  %v2601_v28 = vld [vmem:[#allocation2 + $0xa4] sm:$0x1] }
  0xb3   : > { %v5829_v44 = vcombine.low %v1143_v51, %v1153_v48  ;;  %v1172_v24 = vrot.slane %v1171_v10, 4  ;;  %v5848_v38 = vcombine.low %v7120_v7, %v7843_v41  ;;  %v3432_v56 = vrot.slane %v2595_v42, 5  ;;  %v2603_v51 = vld [vmem:[#allocation2 + $0xac] sm:$0xf]  ;;  %v7084_v48 = vld [vmem:[%s7245_s28 + $0x78] sm:$0xff]  }
  0xb4   : > { %v1167_v58 = vsel %vm7252_vm7, %v1162_v9, %v1166_v15  ;;  %v3426_v14 = vsel %vm7430_vm11, %v3424_v3, %v3425_v2  ;;  %v6013_v18 = vrot.slane %v3304_v60, 9  ;;  %v3436_v50 = vrot.slane %v2597_v33, 5  ;;  %v2600_v15 = vld [vmem:[#allocation2 + $0xa0] sm:$0xf]  ;;  %v2606_v46 = vld [vmem:[#allocation2 + $0xb8] sm:$0xf] }
  0xb5   : > { %6520 = vmatprep.mubr.msk.bf16.mxu1 %vm1235_vm5, %v5829_v44  ;;  %v1177_v29 = vsel %vm7252_vm7, %v1172_v24, %v1176_v55  ;;  %v6029_v37 = vcombine.low %v3423_v62, %v3426_v14  ;;  %v3430_v16 = vsel %vm7430_vm11, %v6012_v61, %v3429_v0  ;;  %v3431_v63 = vrot.slane %v3429_v0, 4  ;;  %v2604_v2 = vld [vmem:[#allocation2 + $0xb0] sm:$0x1]  ;;  %v3306_v61 = vld [vmem:[#allocation2 + $0xa8] sm:$0xe] }
  0xb6   : > { %v5830_v35 = vcombine.low %v1167_v58, %v1177_v29  ;;  %v3439_v36 = vrot.slane %v2598_v8, 5  ;;  %v3438_v40 = vrot.slane %v3436_v50, 4  ;;  %v6014_v42 = vrot.slane %v3305_v31, 9  ;;  %v3307_v62 = vld [vmem:[#allocation2 + $0xb4] sm:$0xe] }
  0xb7   : > { %6679 = vmatmul.mubr.msk.bf16.gmra.mrb[16].mxu0 %vm1235_vm5, %v6029_v37  ;;  %v3433_v10 = vsel %vm7430_vm11, %v3431_v63, %v3432_v56  ;;  %v3443_v55 = vrot.slane %v2600_v15, 5  ;;  %v3446_v22 = vrot.slane %v2601_v28, 5  ;;  %v3437_v33 = vsel %vm7430_vm11, %v6013_v18, %v3436_v50  ;;  %v7122_v3 = vld [vmem:[#allocation2 + $0x18] sm:$0xf]  ;;  %v7863_v8 = vld [vmem:[#allocation2 + $0x1c] sm:$0xf] }
  0xb8   : > { %6521 = vmatmul.mubr.msk.bf16.gmra.mrb[28].mxu1 %vm1235_vm5, %v5830_v35  ;;  %v6030_v9 = vcombine.low %v3430_v16, %v3433_v10  ;;  %v3440_v44 = vsel %vm7430_vm11, %v3438_v40, %v3439_v36  ;;  %v3450_v60 = vrot.slane %v2603_v51, 5  ;;  %v5850_v29 = vcombine.low %v7122_v3, %v7863_v8  ;;  %v7871_v16 = vld [vmem:[%s9053_s1 + $0x18] sm:$0xff]   ;;  %v7124_v63 = vld [vmem:[#allocation2 + $0x10] sm:$0xf]  ;;  %v1741_v51 = vld [vmem:[#allocation2 + $0xc] sm:$0xe] }
  0xb9   : > { %6526 = vmatprep.mubr.msk.bf16.mxu1 %vm1235_vm5, %v5848_v38  ;;  %v3445_v24 = vrot.slane %v3443_v55, 4  ;;  %v3444_v58 = vsel %vm7430_vm11, %v6014_v42, %v3443_v55  ;;  %v2607_v38 = vld [vmem:[#allocation2 + $0xbc] sm:$0x1]  ;;  %v3457_v0 = vrot.slane %v2606_v46, 5  ;;  %v443_v56 = vshrl.u32 %v7084_v48, 16  ;;  %v7125_v10 = vld [vmem:[%s9053_s1 + $0x10] sm:$0xff]  }
  0xba   : > { %6682 = vmatprep.mubr.msk.bf16.mxu0 %vm1235_vm5, %v6030_v9  ;;  %v6031_v31 = vcombine.low %v3437_v33, %v3440_v44  ;;  %v6015_v35 = vrot.slane %v3306_v61, 9  ;;  %v3453_v14 = vrot.slane %v2604_v2, 5  ;;  %v446_v18 = vshll.u32 %v7084_v48, 16  ;;  %v7126_v48 = vld [vmem:[#allocation2 + $0x14] sm:$0x1] }
  0xbb   : > { %v3447_v7 = vsel %vm7430_vm11, %v3445_v24, %v3446_v22  ;;  %v3452_v15 = vrot.slane %v3450_v60, 4  ;;  %v6016_v28 = vrot.slane %v3307_v62, 9  ;;  %v445_v37 = vrot.slane %v443_v56, 7  ;;  %v7127_v46 = vld [vmem:[#allocation2 + $0x24] sm:$0xf] }
  0xbc   : > { %v6032_v50 = vcombine.low %v3444_v58, %v3447_v7  ;;  %v1800_v36 = vrot.slane %v7124_v63, 5  ;;  %v3459_v40 = vrot.slane %v3457_v0, 4  ;;  %v3460_v42 = vrot.slane %v2607_v38, 5  ;;  %v7900_v7 = vld [vmem:[#allocation2 + $0x34] sm:$0xf] }
  0xbd   : > { %v448_v55 = vor.u32 %v446_v18, %v445_v37  ;;  %v515_v22 = vsel %vm7258_vm8, %v445_v37, 0  ;;  %v1803_v9 = vrot.slane %v7126_v48, 5  ;;  %v5851_v20 = vcombine.low %v7127_v46, %v7883_v19  ;;  %v7131_v18 = vld [vmem:[#allocation2 + $0x3c] sm:$0xf]  ;;  %v7922_v37 = vld [vmem:[#allocation2 + $0x4c] sm:$0xf] }
  0xbe   : > { %v5812_v33 = vcombine.low %v515_v22, %v515_v22  ;;  %v3454_v44 = vsel %vm7430_vm11, %v3452_v15, %v3453_v14  ;;  %v3458_v24 = vsel %vm7430_vm11, %v6016_v28, %v3457_v0  ;;  %v5882_v61 = vrot.slane %v1741_v51, 9  ;;  %v7133_v28 = vld [vmem:[#allocation2 + $0x48] sm:$0xf] }
  0xbf   : > { %6683 = vmatmul.mubr.msk.bf16.gmra.mrb[20].mxu0 %vm1235_vm5, %v6031_v31  ;;  %v499_v2 = vsel %vm7258_vm8, 0, %v448_v55  ;;  %v3461_v58 = vsel %vm7430_vm11, %v3459_v40, %v3460_v42  ;;  %v1802_v3 = vrot.slane %v1800_v36, 4  ;;  %v5854_v63 = vcombine.low %v7133_v28, %v7922_v37  ;;  %v7088_v28 = vld [vmem:[#allocation2 + $0x30] sm:$0xff]  }
  0xc0   : > { %6527 = vmatmul.mubr.msk.bf16.vlgmr.msra.gmra.mrb[0].mxu1 %vm1235_vm5, %v5849_v53  ;;  %v3451_v53 = vsel %vm7430_vm11, %v6015_v35, %v3450_v60  ;;  %6686 = vmatprep.mubr.msk.bf16.mxu0 %vm1235_vm5, %v6032_v50  ;;  %v5810_v62 = vcombine.low %v499_v2, %v499_v2  ;;  %v5811_v60 = vcombine.high %v499_v2, %v499_v2  ;;  %v7919_v50 = vld [vmem:[#allocation2 + $0x40] sm:$0xf]  ;;  %v2837_v46 = vshll.u32 %v7825_v39, 16 }
  0xc1   : > { %6559 = vmatpush3.bf16.msra.mxu1 %v7125_v10  ;;  %6530 = vmatprep.mubr.msk.bf16.mxu1 %vm1235_vm5, %v5850_v29  ;;  %740 = vst.msk [vmem:[#allocation2 + $0xc8] sm:$0x1] %vm251_vm1, %v5812_v33  ;;  %v7129_v29 = vld [vmem:[#allocation2 + $0x30] sm:$0xf]  ;;  %v7905_v32 = vsel %vm7430_vm11, %v5882_v61, %v1800_v36  ;;  %v6033_v0 = vcombine.low %v3451_v53, %v3454_v44  ;;  %v7135_v33 = vld [vmem:[#allocation2 + $0x54] sm:$0xf] }
  0xc2   : > { %6592 = vmatprep.subr.bf16.mxu1 %v7871_v16  ;;  %v5852_v38 = vcombine.low %v7129_v29, %v7900_v7  ;;  %738 = vst.msk [vmem:[#allocation2 + $0xc0] sm:$0xf] %vm248_vm0, %v5810_v62  ;;  %739 = vst.msk [vmem:[#allocation2 + $0xc4] sm:$0xf] %vm248_vm0, %v5811_v60  ;;  %v7911_v56 = vsel %vm7430_vm11, %v1802_v3, %v1803_v9  ;;  %v6034_v31 = vcombine.low %v3458_v24, %v3461_v58  ;;  %v7085_v9 = vld [vmem:[#allocation2 + $0x18] sm:$0xff]  }
  0xc3   : > { %v5853_v15 = vcombine.low %v7131_v18, %v7919_v50  ;;  %v7933_v44 = vld [vmem:[#allocation2 + $0x58] sm:$0xf]  ;;  %v1740_v2 = vld [vmem:[#allocation2] sm:$0xe]  ;;  %v1743_v58 = vld [vmem:[#allocation2 + $0x24] sm:$0xe]  ;;  %v5856_v62 = vcombine.low %v7606_v1, %v7609_v13 }
  0xc4   : > { %v5855_v24 = vcombine.low %v7135_v33, %v7933_v44  ;;  %v1742_v61 = vld [vmem:[#allocation2 + $0x18] sm:$0xe]  ;;  %v1793_v60 = vrot.slane %v7843_v41, 5  ;;  %v1814_v3 = vrot.slane %v7883_v19, 5  ;;  %v7943_v29 = vrot.slane %v2837_v46, 5  ;;  %v7087_v1 = vld [vmem:[#allocation2 + $0x24] sm:$0xff]  }
  0xc5   : > { %v5881_v13 = vrot.slane %v1740_v2, 9  ;;  %v5883_v18 = vrot.slane %v1742_v61, 9  ;;  %v1828_v33 = vrot.slane %v7919_v50, 5  ;;  %v5859_v2 = vcombine.low %v7700_v21, %v7711_v23  ;;  %v7140_v61 = vld [vmem:[#allocation2 + $0x38] sm:$0x1] }
  0xc6   : > { %9079 = vst [vmem:[#allocation4_spill] sm:$0xff] %v7943_v29  ;;  %v1795_v41 = vrot.slane %v1793_v60, 4  ;;  %v1746_v21 = vld [vmem:[#allocation2 + $0x48] sm:$0xe] }
  0xc7   : > { %6687 = vmatmul.mubr.msk.bf16.gmra.mrb[24].mxu0 %vm1235_vm5, %v6033_v0  ;;  %v7137_v0 = vld [vmem:[#allocation2 + $0x8] sm:$0x1]  ;;  %v7964_v46 = vsel %vm7430_vm11, %v5881_v13, %v1793_v60  ;;  %v4133_v13 = vld [vmem:[#allocation2 + $0x24] sm:$0xf] }
  0xc8   : > { %6531 = vmatmul.mubr.msk.bf16.gmra.mrb[4].mxu1 %vm1235_vm5, %v5851_v20  ;;  %6690 = vmatprep.mubr.msk.bf16.mxu0 %vm1235_vm5, %v6034_v31  ;;  %v2610_v14 = vld [vmem:[#allocation2 + $0xc8] sm:$0x1]  ;;  %v2841_v20 = vshrl.u32 %v7825_v39, 16  ;;  %v1807_v39 = vrot.slane %v7863_v8, 5  ;;  %v1796_v31 = vrot.slane %v7137_v0, 5 }
  0xc9   : > { %6534 = vmatprep.mubr.msk.bf16.mxu1 %vm1235_vm5, %v5852_v38  ;;  %v2609_v36 = vld [vmem:[#allocation2 + $0xc4] sm:$0xf]  ;;  %v3308_v40 = vld [vmem:[#allocation2 + $0xc0] sm:$0xe]  ;;  %v3467_v42 = vrot.slane %v2610_v14, 5  ;;  %v2847_v14 = vshll.u32 %v7827_v6, 16 }
  0xca   : > { %v6017_v51 = vrot.slane %v3308_v40, 9  ;;  %v3464_v10 = vrot.slane %v2609_v36, 5  ;;  %v2843_v38 = vrot.slane %v2841_v20, 4  ;;  %v1809_v8 = vrot.slane %v1807_v39, 4  ;;  %v7139_v40 = vld [vmem:[#allocation2 + $0x2c] sm:$0x1] }
  0xcb   : > { %v1816_v36 = vrot.slane %v1814_v3, 4  ;;  %v1821_v6 = vrot.slane %v7900_v7, 5  ;;  %v7968_v7 = vsel %vm7430_vm11, %v1795_v41, %v1796_v31  ;;  %v7972_v20 = vsel %vm7430_vm11, %v5883_v18, %v1807_v39  ;;  %v7090_v41 = vld [vmem:[#allocation2 + $0x48] sm:$0xff]  }
  0xcc   : > { %v3465_v55 = vsel %vm7430_vm11, %v6017_v51, %v3464_v10  ;;  %v3466_v22 = vrot.slane %v3464_v10, 4  ;;  %v2844_v51 = vor.u32 %v2843_v38, %v7943_v29  ;;  %v1744_v10 = vld [vmem:[#allocation2 + $0x30] sm:$0xe]  ;;  %v7089_v38 = vld [vmem:[#allocation2 + $0x3c] sm:$0xff]   ;;  %v4135_v0 = vld [vmem:[#allocation2 + $0x2c] sm:$0x1] }
  0xcd   : > { %v4222_v60 = vshll.u32 %v4135_v0, 16 }
  0xce   : > { %v3468_v48 = vsel %vm7430_vm11, %v3466_v22, %v3467_v42  ;;  %v1817_v42 = vrot.slane %v7139_v40, 5  ;;  %v7955_v22 = vrot.slane %v2847_v14, 5  ;;  %v5887_v40 = vrot.slane %v1746_v21, 9 }
  0xcf   : > { %v6035_v53 = vcombine.low %v3465_v55, %v3468_v48  ;;  %v7953_v55 = vld [vmem:[%s9053_s1 + $0x40] sm:$0xff]   ;;  %v5857_v48 = vcombine.low %v7615_v4, %v7619_v43 }
  0xd0   : > { %6535 = vmatmul.mubr.msk.bf16.gmra.mrb[8].mxu1 %vm1235_vm5, %v5853_v15  ;;  %v5884_v15 = vrot.slane %v1743_v58, 9  ;;  %9080 = vst [vmem:[#allocation5_spill] sm:$0xff] %v7953_v55  ;;  %9081 = vst [vmem:[#allocation6_spill] sm:$0xff] %v7955_v22  ;;  %v1824_v58 = vrot.slane %v7140_v61, 5  ;;  %v4206_v61 = vshll.u32 %v4133_v13, 16 }
  0xd1   : > { %6538 = vmatprep.mubr.msk.bf16.mxu1 %vm1235_vm5, %v5854_v63  ;;  %6691 = vmatmul.mubr.msk.bf16.gmra.mrb[28].mxu0 %vm1235_vm5, %v6035_v53  ;;  %v7138_v63 = vld [vmem:[#allocation2 + $0x20] sm:$0x1]  ;;  %v1745_v53 = vld [vmem:[#allocation2 + $0x3c] sm:$0xe] }
  0xd2   : > { %6696 = vmatprep.mubr.msk.bf16.mxu0 %vm1235_vm5, %v7085_v9  ;;  %v1810_v19 = vrot.slane %v7138_v63, 5  ;;  %v5858_v9 = vcombine.low %v7629_v5, %v7631_v26  ;;  %v7976_v4 = vsel %vm7430_vm11, %v5884_v15, %v1814_v3  ;;  %v7986_v5 = vsel %vm7430_vm11, %v1816_v36, %v1817_v42  ;;  %v4130_v3 = vld [vmem:[#allocation2 + $0x18] sm:$0xf] }
  0xd3   : > { %v5885_v26 = vrot.slane %v1744_v10, 9  ;;  %v5886_v14 = vrot.slane %v1745_v53, 9  ;;  %v1830_v15 = vrot.slane %v1828_v33, 4  ;;  %v1835_v63 = vrot.slane %v7922_v37, 5  ;;  %v1747_v10 = vld [vmem:[#allocation2 + $0x54] sm:$0xe] }
  0xd4   : > { %v7982_v43 = vsel %vm7430_vm11, %v1809_v8, %v1810_v19  ;;  %v4134_v19 = vld [vmem:[#allocation2 + $0x28] sm:$0xf]  ;;  %v4179_v42 = vshrl.u32 %v4130_v3, 16  ;;  %v4203_v53 = vshrl.u32 %v4133_v13, 16  ;;  %v7142_v37 = vld [vmem:[#allocation2 + $0x50] sm:$0x1] }
  0xd5   : > { %v8012_v18 = vsel %vm7430_vm11, %v5885_v26, %v1821_v6  ;;  %v1838_v26 = vrot.slane %v7142_v37, 5  ;;  %v4216_v31 = vshrl.u32 %v4134_v19, 16  ;;  %v1837_v21 = vrot.slane %v1835_v63, 4 }
  0xd6   : > { %v4181_v13 = vrot.slane %v4179_v42, 4 }
  0xd7   : > { %v8044_v42 = vsel %vm7430_vm11, %v1837_v21, %v1838_v26  ;;  %v1750_v26 = vld [vmem:[#allocation2 + $0x78] sm:$0xe]  ;;  %v7147_v21 = vld [vmem:[#allocation2 + $0x7c] sm:$0xf] }
  0xd8   : > { %6539 = vmatmul.mubr.msk.bf16.gmra.mrb[12].mxu1 %vm1235_vm5, %v5855_v24  ;;  %v7989_v24 = vrot.slane %v2844_v51, 4  ;;  %v4182_v51 = vshll.u32 %v4130_v3, 16  ;;  %v1842_v3 = vrot.slane %v7933_v44, 5  ;;  %v1863_v29 = vrot.slane %v7147_v21, 5  ;;  %v8063_v21 = vld [vmem:[#allocation2 + $0x34] sm:$0xf] }
  0xd9   : > { %6542 = vmatprep.mubr.msk.bf16.mxu1 %vm1235_vm5, %v5856_v62  ;;  %6697 = vmatmul.mubr.msk.bf16.vlgmr.msra.gmra.mrb[0].mxu0 %vm1235_vm5, %v7087_v1  ;;  %v5860_v62 = vcombine.low %v7746_v52, %v7748_v11  ;;  %v4131_v1 = vld [vmem:[#allocation2 + $0x1c] sm:$0xf]  ;;  %v7143_v52 = vld [vmem:[#allocation2 + $0x64] sm:$0xf]  ;;  %9083 = vst [vmem:[#allocation8_spill] sm:$0xff] %v8063_v21 }
  0xda   : > { %6729 = vmatpush3.bf16.msra.mxu0 %v7673_v49  ;;  %6700 = vmatprep.mubr.msk.bf16.mxu0 %vm1235_vm5, %v7088_v28  ;;  %9082 = vst [vmem:[#allocation7_spill] sm:$0xff] %v7989_v24  ;;  %v1823_v49 = vrot.slane %v1821_v6, 4  ;;  %v7141_v28 = vld [vmem:[#allocation2 + $0x44] sm:$0x1]  ;;  %v8022_v6 = vsel %vm7430_vm11, %v5886_v14, %v1828_v33  ;;  %v8034_v33 = vsel %vm7430_vm11, %v5887_v40, %v1835_v63  ;;  %v5888_v14 = vrot.slane %v1747_v10, 9 }
  0xdb   : > { %6762 = vmatprep.subr.bf16.mxu0 %v7953_v55  ;;  %v1831_v8 = vrot.slane %v7141_v28, 5  ;;  %v4212_v28 = vshll.u32 %v4134_v19, 16  ;;  %v4184_v19 = vrot.slane %v4182_v51, 5  ;;  %v1849_v35 = vrot.slane %v7143_v52, 5  ;;  %v7092_v40 = vld [vmem:[#allocation2 + $0x60] sm:$0xff]  }
  0xdc   : > { %v8017_v36 = vsel %vm7430_vm11, %v1823_v49, %v1824_v58  ;;  %v4218_v63 = vrot.slane %v4216_v31, 4  ;;  %v7144_v51 = vld [vmem:[#allocation2 + $0x5c] sm:$0x1]  ;;  %v7146_v52 = vld [vmem:[#allocation2 + $0x68] sm:$0x1]  ;;  %v1865_v24 = vrot.slane %v1863_v29, 4 }
  0xdd   : > { %v8029_v58 = vsel %vm7430_vm11, %v1830_v15, %v1831_v8  ;;  %v4205_v15 = vrot.slane %v4203_v53, 4  ;;  %v4208_v8 = vrot.slane %v4206_v61, 5  ;;  %v8040_v39 = vrot.slane %v4212_v28, 5 }
  0xde   : > { %v1845_v10 = vrot.slane %v7144_v51, 5  ;;  %v1852_v61 = vrot.slane %v7146_v52, 5  ;;  %v4185_v28 = vor.u32 %v4184_v19, %v4181_v13  ;;  %v1751_v52 = vld [vmem:[#allocation2 + $0x84] sm:$0xe]  ;;  %v7148_v13 = vld [vmem:[#allocation2 + $0x74] sm:$0x1] }
  0xdf   : > { %v4209_v50 = vor.u32 %v4208_v8, %v4205_v15  ;;  %v1859_v19 = vrot.slane %v7148_v13, 5  ;;  %v5892_v13 = vrot.slane %v1751_v52, 9 }
  0xe0   : > { %6543 = vmatmul.mubr.msk.bf16.gmra.mrb[16].mxu1 %vm1235_vm5, %v5857_v48  ;;  %v4188_v48 = vshll.u32 %v4131_v1, 16  ;;  %v4186_v15 = vrot.slane %v4185_v28, 4  ;;  %v7093_v28 = vld [vmem:[#allocation2 + $0x6c] sm:$0xff]  }
  0xe1   : > { %6546 = vmatprep.mubr.msk.bf16.mxu1 %vm1235_vm5, %v5858_v9  ;;  %v4192_v9 = vshrl.u32 %v4131_v1, 16  ;;  %6701 = vmatmul.mubr.msk.bf16.gmra.mrb[4].mxu0 %vm1235_vm5, %v7089_v38  ;;  %v1748_v38 = vld [vmem:[#allocation2 + $0x60] sm:$0xe]  ;;  %v7091_v1 = vld [vmem:[#allocation2 + $0x54] sm:$0xff]  }
  0xe2   : > { %6704 = vmatprep.mubr.msk.bf16.mxu0 %vm1235_vm5, %v7090_v41  ;;  %v4132_v41 = vld [vmem:[#allocation2 + $0x20] sm:$0x1]  ;;  %v8037_v37 = vrot.slane %v4188_v48, 5  ;;  %v5889_v44 = vrot.slane %v1748_v38, 9  ;;  %v1749_v48 = vld [vmem:[#allocation2 + $0x6c] sm:$0xe] }
  0xe3   : > { %v4194_v49 = vrot.slane %v4192_v9, 4  ;;  %v7145_v9 = vld [vmem:[#allocation2 + $0x70] sm:$0xf]  ;;  %v4198_v38 = vshll.u32 %v4132_v41, 16 }
  0xe4   : > { %v1856_v53 = vrot.slane %v7145_v9, 5  ;;  %v8054_v51 = vsel %vm7430_vm11, %v5889_v44, %v1849_v35  ;;  %v1851_v9 = vrot.slane %v1849_v35, 4  ;;  %v4136_v41 = vld [vmem:[#allocation2 + $0x30] sm:$0xf]  ;;  %v5891_v44 = vrot.slane %v1750_v26, 9 }
  0xe5   : > { %v4195_v31 = vor.u32 %v4194_v49, %v8037_v37  ;;  %v4200_v8 = vrot.slane %v4198_v38, 5  ;;  %v7149_v35 = vld [vmem:[#allocation2 + $0x80] sm:$0x1]  ;;  %v7095_v38 = vld [vmem:[#allocation2 + $0x78] sm:$0xff]   ;;  %v4227_v55 = vshrl.u32 %v4136_v41, 16  ;;  %v4191_v52 = vsel %vm7252_vm7, %v4186_v15, %v8037_v37 }
  0xe6   : > { %v1858_v0 = vrot.slane %v1856_v53, 4 }
  0xe8   : > { %6547 = vmatmul.mubr.msk.bf16.gmra.mrb[20].mxu1 %vm1235_vm5, %v5859_v2  ;;  %v1844_v2 = vrot.slane %v1842_v3, 4 }
  0xe9   : > { %6550 = vmatprep.mubr.msk.bf16.mxu1 %vm1235_vm5, %v5860_v62  ;;  %v8048_v62 = vsel %vm7430_vm11, %v5888_v14, %v1842_v3  ;;  %6705 = vmatmul.mubr.msk.bf16.gmra.mrb[8].mxu0 %vm1235_vm5, %v7091_v1  ;;  %v5890_v3 = vrot.slane %v1749_v48, 9  ;;  %v4219_v14 = vor.u32 %v4218_v63, %v8040_v39  ;;  %v1870_v1 = vrot.slane %v7711_v23, 5 }
  0xea   : > { %6708 = vmatprep.mubr.msk.bf16.mxu0 %vm1235_vm5, %v7092_v40  ;;  %v8060_v49 = vsel %vm7430_vm11, %v1844_v2, %v1845_v10  ;;  %v1866_v48 = vrot.slane %v7149_v35, 5  ;;  %v9084_v63 = vcombine.low %v7757_v12, %v7762_v25  ;;  %v4196_v40 = vrot.slane %v4195_v31, 4  ;;  %v7150_v35 = vld [vmem:[#allocation2 + $0x8c] sm:$0x1]  ;;  %v8073_v12 = vld [vmem:[#allocation2 + $0x38] sm:$0x1] }
  0xeb   : > { %v4210_v2 = vrot.slane %v4209_v50, 4  ;;  %v4224_v10 = vrot.slane %v4222_v60, 5  ;;  %v9085_v23 = vcombine.low %v7797_v30, %v7800_v57  ;;  %v4220_v26 = vrot.slane %v4219_v14, 4  ;;  %9086 = vst [vmem:[#allocation9_spill] sm:$0xff] %v8073_v12 }
  0xec   : > { %v1873_v22 = vrot.slane %v7150_v35, 5  ;;  %v1872_v59 = vrot.slane %v1870_v1, 4  ;;  %v4236_v50 = vshll.u32 %v8063_v21, 16  ;;  %v4240_v60 = vshrl.u32 %v8063_v21, 16  ;;  %v7097_v35 = vld [vmem:[#allocation2 + $0x90] sm:$0xff]  }
  0xed   : > { %v8079_v30 = vsel %vm7430_vm11, %v1851_v9, %v1852_v61  ;;  %v8083_v31 = vsel %vm7430_vm11, %v5890_v3, %v1856_v53  ;;  %v8087_v14 = vsel %vm7430_vm11, %v1858_v0, %v1859_v19  ;;  %v4215_v61 = vsel %vm7252_vm7, %v4210_v2, %v8040_v39  ;;  %v4139_v19 = vld [vmem:[#allocation2 + $0x3c] sm:$0xf] }
  0xee   : > { %v8099_v9 = vsel %vm7430_vm11, %v5891_v44, %v1863_v29  ;;  %v8103_v53 = vsel %vm7430_vm11, %v1865_v24, %v1866_v48  ;;  %v4225_v37 = vsel %vm7252_vm7, %v4220_v26, %v4224_v10  ;;  %v8110_v3 = vsel %vm7430_vm11, %v5892_v13, %v1870_v1  ;;  %v7096_v13 = vld [vmem:[#allocation2 + $0x84] sm:$0xff]  }
  0xef   : > { %v4229_v0 = vrot.slane %v4227_v55, 4  ;;  %v4246_v39 = vshll.u32 %v8073_v12, 16  ;;  %v8116_v29 = vsel %vm7430_vm11, %v1872_v59, %v1873_v22  ;;  %v8118_v15 = vrot.slane %v4236_v50, 5 }
  0xf0   : > { %6551 = vmatmul.mubr.msk.bf16.gmra.mrb[24].mxu1 %vm1235_vm5, %v9084_v63  ;;  %v4230_v63 = vshll.u32 %v4136_v41, 16  ;;  %v4201_v41 = vsel %vm7252_vm7, %v4196_v40, %v4200_v8  ;;  %9087 = vst [vmem:[#allocation10_spill] sm:$0xff] %v8116_v29  ;;  %v4242_v8 = vrot.slane %v4240_v60, 4  ;;  %v8128_v40 = vld [vmem:[#allocation2 + $0x40] sm:$0xf]  ;;  %v9089_v59 = vcombine.low %v7811_v47, %v7815_v54 }
  0xf1   : > { %6554 = vmatprep.mubr.msk.bf16.mxu1 %vm1235_vm5, %v9085_v23  ;;  %6709 = vmatmul.mubr.msk.bf16.gmra.mrb[12].mxu0 %vm1235_vm5, %v7093_v28  ;;  %9088 = vst [vmem:[#allocation11_spill] sm:$0xff] %v8128_v40  ;;  %v8136_v2 = vcombine.low %v4191_v52, %v4201_v41  ;;  %v4251_v10 = vshrl.u32 %v4139_v19, 16  ;;  %v4254_v23 = vshll.u32 %v4139_v19, 16  ;;  %v4142_v28 = vld [vmem:[#allocation2 + $0x48] sm:$0xf]  ;;  %v9091_v26 = vcombine.low %v7964_v46, %v7968_v7 }
  0xf2   : > { %6712 = vmatprep.mubr.msk.bf16.mxu0 %vm1235_vm5, %v7095_v38  ;;  %v4232_v24 = vrot.slane %v4230_v63, 5  ;;  %v8138_v38 = vld [vmem:[#allocation2 + $0x4c] sm:$0xf]  ;;  %v8144_v47 = vcombine.low %v4215_v61, %v4225_v37  ;;  %v8150_v60 = vrot.slane %v4246_v39, 5  ;;  %v4145_v52 = vld [vmem:[#allocation2 + $0x54] sm:$0xf]  ;;  %v4243_v19 = vor.u32 %v4242_v8, %v8118_v15 }
  0xf3   : > { %9090 = vst [vmem:[#allocation12_spill] sm:$0xff] %v8138_v38  ;;  %v4260_v46 = vshll.u32 %v8128_v40, 16  ;;  %v4264_v7 = vshrl.u32 %v8128_v40, 16  ;;  %v8157_v61 = vld [vmem:[#allocation2 + $0x58] sm:$0xf]  ;;  %v4275_v37 = vshrl.u32 %v4142_v28, 16 }
  0xf4   : > { %v4233_v41 = vor.u32 %v4232_v24, %v4229_v0  ;;  %9093 = vst [vmem:[#allocation14_spill] sm:$0xff] %v8157_v61  ;;  %v4284_v63 = vshll.u32 %v8138_v38, 16  ;;  %v4288_v50 = vshrl.u32 %v8138_v38, 16  ;;  %v4253_v39 = vrot.slane %v4251_v10, 4  ;;  %v1752_v8 = vld [vmem:[#allocation2 + $0x90] sm:$0xe] }
  0xf5   : > { %v4256_v22 = vrot.slane %v4254_v23, 5  ;;  %v4299_v48 = vshrl.u32 %v4145_v52, 16  ;;  %v4302_v0 = vshll.u32 %v4145_v52, 16  ;;  %v1877_v55 = vrot.slane %v7748_v11, 5  ;;  %v7098_v11 = vld [vmem:[#allocation2 + $0x9c] sm:$0xff]  }
  0xf6   : > { %v4308_v1 = vshll.u32 %v8157_v61, 16  ;;  %v4312_v44 = vshrl.u32 %v8157_v61, 16  ;;  %v4244_v40 = vrot.slane %v4243_v19, 4  ;;  %v8167_v12 = vrot.slane %v4260_v46, 5  ;;  %v8175_v29 = vld [vmem:[#allocation2 + $0x50] sm:$0x1] }
  0xf7   : > { %v4266_v10 = vrot.slane %v4264_v7, 4  ;;  %v4277_v23 = vrot.slane %v4275_v37, 4  ;;  %v8169_v21 = vrot.slane %v4284_v63, 5  ;;  %v4257_v38 = vor.u32 %v4256_v22, %v4253_v39  ;;  %v7099_v22 = vld [vmem:[#allocation2 + $0xa8] sm:$0xff]   ;;  %v8193_v46 = vld [vmem:[#allocation2 + $0x5c] sm:$0x1] }
  0xf8   : > { %6555 = vmatmul.mubr.msk.bf16.gmra.mrb[28].mxu1 %vm1235_vm5, %v9089_v59  ;;  %v8153_v59 = vld [vmem:[#allocation2 + $0x44] sm:$0x1]  ;;  %v5893_v61 = vrot.slane %v1752_v8, 9  ;;  %v9095_v19 = vcombine.low %v7972_v20, %v7982_v43  ;;  %v1879_v63 = vrot.slane %v1877_v55, 4  ;;  %v1884_v43 = vrot.slane %v7762_v25, 5 }
  0xf9   : > { %6560 = vmatprep.mubr.msk.bf16.mxu1 %vm1235_vm5, %v9091_v26  ;;  %9092 = vst [vmem:[#allocation13_spill] sm:$0xff] %v8153_v59  ;;  %v4278_v26 = vshll.u32 %v4142_v28, 16  ;;  %6713 = vmatmul.mubr.msk.bf16.gmra.mrb[16].mxu0 %vm1235_vm5, %v7096_v13  ;;  %v4270_v24 = vshll.u32 %v8153_v59, 16  ;;  %v4234_v28 = vrot.slane %v4233_v41, 4  ;;  %v4290_v13 = vrot.slane %v4288_v50, 4 }
  0xfa   : > { %6716 = vmatprep.mubr.msk.bf16.mxu0 %vm1235_vm5, %v7097_v35  ;;  %v9094_v59 = vcombine.low %v7905_v32, %v7911_v56  ;;  %v4301_v35 = vrot.slane %v4299_v48, 4  ;;  %v4304_v41 = vrot.slane %v4302_v0, 5  ;;  %v1880_v50 = vrot.slane %v7736_v17, 5  ;;  %v1753_v32 = vld [vmem:[#allocation2 + $0x9c] sm:$0xe]  ;;  %v8198_v17 = vld [vmem:[%s9053_s1 + $0x20] sm:$0xff]  }
  0xfb   : > { %v4280_v52 = vrot.slane %v4278_v26, 5  ;;  %v8183_v56 = vrot.slane %v4308_v1, 5  ;;  %v4239_v48 = vsel %vm7252_vm7, %v4234_v28, %v8118_v15  ;;  %v4267_v20 = vor.u32 %v4266_v10, %v8167_v12  ;;  %9096 = vst [vmem:[#allocation15_spill] sm:$0xff] %v8198_v17  ;;  %v1754_v37 = vld [vmem:[#allocation2 + $0xa8] sm:$0xe] }
  0xfc   : > { %v4291_v1 = vor.u32 %v4290_v13, %v8169_v21  ;;  %v5894_v25 = vrot.slane %v1753_v32, 9  ;;  %v4305_v7 = vor.u32 %v4304_v41, %v4301_v35  ;;  %v1891_v26 = vrot.slane %v7800_v57, 5  ;;  %v7152_v10 = vld [vmem:[#allocation2 + $0xa4] sm:$0x1]  ;;  %v4148_v57 = vld [vmem:[#allocation2 + $0x60] sm:$0xf] }
  0xfd   : > { %v4281_v15 = vor.u32 %v4280_v52, %v4277_v23  ;;  %v4258_v0 = vrot.slane %v4257_v38, 4  ;;  %v4318_v8 = vshll.u32 %v8193_v46, 16  ;;  %v4268_v28 = vrot.slane %v4267_v20, 4 }
  0xfe   : > { %v1887_v23 = vrot.slane %v7152_v10, 5  ;;  %v4292_v13 = vrot.slane %v4291_v1, 4  ;;  %v5895_v35 = vrot.slane %v1754_v37, 9  ;;  %v9097_v38 = vcombine.low %v7976_v4, %v7986_v5  ;;  %v7101_v4 = vld [vmem:[#allocation2 + $0xc0] sm:$0xff]  }
  0xff   : > { %v4282_v52 = vrot.slane %v4281_v15, 4  ;;  %v4306_v41 = vrot.slane %v4305_v7, 4  ;;  %v1894_v32 = vrot.slane %v7773_v45, 5  ;;  %v4323_v20 = vshrl.u32 %v4148_v57, 16 }
 0x100   : > { %6561 = vmatmul.mubr.msk.bf16.vlgmr.msra.gmra.mrb[0].mxu1 %vm1235_vm5, %v9094_v59  ;;  %v4314_v59 = vrot.slane %v4312_v44, 4  ;;  %v8201_v44 = vrot.slane %v4270_v24, 5  ;;  %v4326_v15 = vshll.u32 %v4148_v57, 16  ;;  %v4263_v5 = vsel %vm7252_vm7, %v4258_v0, %v8167_v12  ;;  %v9100_v0 = vld [vmem:[#allocation3_spill] sm:$0xff] }
 0x101   : > { %6593 = vmatpush3.bf16.msra.mxu1 %v7871_v16  ;;  %6564 = vmatprep.mubr.msk.bf16.mxu1 %vm1235_vm5, %v9095_v19  ;;  %v4249_v16 = vsel %vm7252_vm7, %v4244_v40, %v8150_v60  ;;  %v4294_v40 = vshll.u32 %v8175_v29, 16  ;;  %v8207_v60 = vsel %vm7430_vm11, %v5893_v61, %v1877_v55  ;;  %v8218_v55 = vsel %vm7430_vm11, %v1879_v63, %v1880_v50 }
 0x102   : > { %6796 = vmatprep.subr.bf16.mxu1 %v8198_v17  ;;  %6717 = vmatmul.mubr.msk.bf16.gmra.mrb[20].mxu0 %vm1235_vm5, %v7098_v11  ;;  %v8211_v39 = vcombine.low %v4239_v48, %v4249_v16  ;;  %v4315_v24 = vor.u32 %v4314_v59, %v8183_v56  ;;  %v1886_v61 = vrot.slane %v1884_v43, 4  ;;  %v1893_v19 = vrot.slane %v1891_v26, 4  ;;  %v1755_v59 = vld [vmem:[#allocation2 + $0xb4] sm:$0xe] }
 0x103   : > { %6720 = vmatprep.mubr.msk.bf16.mxu0 %vm1235_vm5, %v7099_v22  ;;  %v4296_v11 = vrot.slane %v4294_v40, 5  ;;  %v1898_v63 = vrot.slane %v7815_v54, 5  ;;  %v9098_v50 = vcombine.low %v8012_v18, %v8017_v36  ;;  %v7100_v22 = vld [vmem:[#allocation2 + $0xb4] sm:$0xff]   ;;  %v4320_v16 = vrot.slane %v4318_v8, 5  ;;  %v8244_v36 = vld [vmem:[#allocation2 + $0x64] sm:$0xf] }
 0x104   : > { %v4316_v48 = vrot.slane %v4315_v24, 4  ;;  %v4273_v45 = vsel %vm7252_vm7, %v4268_v28, %v8201_v44  ;;  %v8238_v54 = vsel %vm7430_vm11, %v5894_v25, %v1884_v43  ;;  %v8242_v18 = vsel %vm7430_vm11, %v1886_v61, %v1887_v23  ;;  %v8255_v43 = vld [vmem:[#allocation2 + $0x68] sm:$0x1]  ;;  %v4151_v25 = vld [vmem:[#allocation2 + $0x6c] sm:$0xf] }
 0x105   : > { %v4287_v1 = vsel %vm7252_vm7, %v4282_v52, %v8169_v21  ;;  %v4297_v12 = vsel %vm7252_vm7, %v4292_v13, %v4296_v11  ;;  %v8253_v44 = vsel %vm7430_vm11, %v5895_v35, %v1891_v26  ;;  %v5896_v40 = vrot.slane %v1755_v59, 9  ;;  %v8265_v8 = vld [vmem:[#allocation2 + $0x70] sm:$0xf] }
 0x106   : > { %v4311_v7 = vsel %vm7252_vm7, %v4306_v41, %v8183_v56  ;;  %v8262_v37 = vsel %vm7430_vm11, %v1893_v19, %v1894_v32  ;;  %v1900_v21 = vrot.slane %v1898_v63, 4  ;;  %v1901_v24 = vrot.slane %v9100_v0, 5  ;;  %v4163_v19 = vld [vmem:[#allocation2 + $0x9c] sm:$0xf] }
 0x107   : > { %9099 = vst [vmem:[#allocation16_spill] sm:$0xff] %v8262_v37  ;;  %v4321_v26 = vsel %vm7252_vm7, %v4316_v48, %v4320_v16  ;;  %v8270_v28 = vrot.slane %v4323_v20, 4  ;;  %v8272_v61 = vrot.slane %v4326_v15, 5  ;;  %v4332_v56 = vshll.u32 %v8244_v36, 16  ;;  %v8298_v48 = vld [vmem:[#allocation2 + $0x7c] sm:$0xf] }
 0x108   : > { %6565 = vmatmul.mubr.msk.bf16.gmra.mrb[4].mxu1 %vm1235_vm5, %v9097_v38  ;;  %v4336_v10 = vshrl.u32 %v8244_v36, 16  ;;  %v4342_v23 = vshll.u32 %v8255_v43, 16  ;;  %v4347_v57 = vshrl.u32 %v4151_v25, 16  ;;  %v4350_v52 = vshll.u32 %v4151_v25, 16  ;;  %9102 = vst [vmem:[#allocation3_spill] sm:$0xff] %v8298_v48 }
 0x109   : > { %6568 = vmatprep.mubr.msk.bf16.mxu1 %vm1235_vm5, %v9098_v50  ;;  %v8278_v13 = vcombine.low %v4263_v5, %v4273_v45  ;;  %v4356_v35 = vshll.u32 %v8265_v8, 16  ;;  %v4360_v38 = vshrl.u32 %v8265_v8, 16  ;;  %v9101_v41 = vcombine.low %v8022_v6, %v8029_v58  ;;  %v7102_v58 = vld [vmem:[#allocation2 + $0xcc] sm:$0xff]   ;;  %v4157_v5 = vld [vmem:[#allocation2 + $0x84] sm:$0xf] }
 0x10a   : > { %6721 = vmatmul.mubr.msk.bf16.gmra.mrb[24].mxu0 %vm1235_vm5, %v7100_v22  ;;  %v8290_v32 = vcombine.low %v4287_v1, %v4297_v12  ;;  %v8296_v50 = vsel %vm7430_vm11, %v5896_v40, %v1898_v63  ;;  %v4154_v22 = vld [vmem:[#allocation2 + $0x78] sm:$0xf]  ;;  %v9103_v6 = vcombine.low %v8034_v33, %v8044_v42  ;;  %v8304_v16 = vcombine.low %v4311_v7, %v4321_v26  ;;  %v8316_v45 = vld [vmem:[#allocation2 + $0x88] sm:$0xf]  ;;  %v4160_v40 = vld [vmem:[#allocation2 + $0x90] sm:$0xf] }
 0x10b   : > { %6724 = vmatprep.mubr.msk.bf16.mxu0 %vm1235_vm5, %v7101_v4  ;;  %v8308_v20 = vsel %vm7430_vm11, %v1900_v21, %v1901_v24  ;;  %v4329_v15 = vor.u32 %v8272_v61, %v8270_v28  ;;  %v8312_v63 = vrot.slane %v4332_v56, 5  ;;  %v8314_v4 = vld [vmem:[#allocation2 + $0x74] sm:$0x1]  ;;  %9104 = vst [vmem:[#allocation17_spill] sm:$0xff] %v8316_v45  ;;  %v4338_v33 = vrot.slane %v4336_v10, 4 }
 0x10c   : > { %v8318_v42 = vrot.slane %v4342_v23, 5  ;;  %v4349_v1 = vrot.slane %v4347_v57, 4  ;;  %v4352_v12 = vrot.slane %v4350_v52, 5  ;;  %v8320_v25 = vrot.slane %v4356_v35, 5  ;;  %v8322_v24 = vld [vmem:[#allocation2 + $0x94] sm:$0xf] }
 0x10d   : > { %v4362_v7 = vrot.slane %v4360_v38, 4  ;;  %v4371_v21 = vshrl.u32 %v4154_v22, 16  ;;  %v4374_v0 = vshll.u32 %v4154_v22, 16  ;;  %9105 = vst [vmem:[#allocation18_spill] sm:$0xff] %v8322_v24  ;;  %v4380_v26 = vshll.u32 %v8298_v48, 16 }
 0x10e   : > { %v4384_v28 = vshrl.u32 %v8298_v48, 16  ;;  %v4395_v61 = vshrl.u32 %v4157_v5, 16  ;;  %v4398_v56 = vshll.u32 %v4157_v5, 16  ;;  %v4404_v10 = vshll.u32 %v8316_v45, 16 }
 0x10f   : > { %v4408_v23 = vshrl.u32 %v8316_v45, 16  ;;  %v4419_v57 = vshrl.u32 %v4160_v40, 16  ;;  %v4422_v52 = vshll.u32 %v4160_v40, 16  ;;  %v4339_v35 = vor.u32 %v4338_v33, %v8312_v63 }
 0x110   : > { %6569 = vmatmul.mubr.msk.bf16.gmra.mrb[8].mxu1 %vm1235_vm5, %v9101_v41  ;;  %v4366_v38 = vshll.u32 %v8314_v4, 16  ;;  %v4428_v41 = vshll.u32 %v8322_v24, 16  ;;  %v4432_v22 = vshrl.u32 %v8322_v24, 16  ;;  %v4373_v5 = vrot.slane %v4371_v21, 4 }
 0x111   : > { %6572 = vmatprep.mubr.msk.bf16.mxu1 %vm1235_vm5, %v9103_v6  ;;  %v4353_v6 = vor.u32 %v4352_v12, %v4349_v1  ;;  %v4376_v59 = vrot.slane %v4374_v0, 5  ;;  %v9106_v40 = vcombine.low %v8048_v62, %v8060_v49  ;;  %v8342_v33 = vrot.slane %v4380_v26, 5  ;;  %v8348_v12 = vld [vmem:[#allocation2 + $0x8c] sm:$0x1]  ;;  %v8352_v0 = vld [vmem:[#allocation2 + $0x98] sm:$0x1] }
 0x112   : > { %6725 = vmatmul.mubr.msk.bf16.gmra.mrb[28].mxu0 %vm1235_vm5, %v7102_v58  ;;  %v4363_v58 = vor.u32 %v4362_v7, %v8320_v25  ;;  %v4386_v11 = vrot.slane %v4384_v28, 4  ;;  %v4397_v17 = vrot.slane %v4395_v61, 4  ;;  %v4400_v45 = vrot.slane %v4398_v56, 5 }
 0x113   : > { %6730 = vmatprep.mubr.msk.bf16.mxu0 %vm1235_vm5, %v8136_v2  ;;  %v8340_v2 = vld [vmem:[#allocation2 + $0x80] sm:$0x1]  ;;  %v9107_v1 = vcombine.low %v8054_v51, %v8079_v30  ;;  %v8350_v7 = vrot.slane %v4404_v10, 5  ;;  %v4410_v21 = vrot.slane %v4408_v23, 4  ;;  %v4421_v62 = vrot.slane %v4419_v57, 4 }
 0x114   : > { %v4424_v49 = vrot.slane %v4422_v52, 5  ;;  %v4434_v26 = vrot.slane %v4432_v22, 4  ;;  %v4443_v28 = vshrl.u32 %v4163_v19, 16  ;;  %v4446_v61 = vshll.u32 %v4163_v19, 16  ;;  %v8358_v23 = vld [vmem:[#allocation2 + $0xa0] sm:$0xf] }
 0x115   : > { %v4330_v56 = vrot.slane %v4329_v15, 4  ;;  %v4340_v24 = vrot.slane %v4339_v35, 4  ;;  %v4368_v48 = vrot.slane %v4366_v38, 5  ;;  %v4390_v51 = vshll.u32 %v8340_v2, 16  ;;  %v9108_v35 = vld [vmem:[#allocation5_spill] sm:$0xff] }
 0x116   : > { %v4354_v30 = vrot.slane %v4353_v6, 4  ;;  %v4377_v37 = vor.u32 %v4376_v59, %v4373_v5  ;;  %v4387_v10 = vor.u32 %v4386_v11, %v8342_v33  ;;  %v4401_v57 = vor.u32 %v4400_v45, %v4397_v17 }
 0x117   : > { %v4411_v52 = vor.u32 %v4410_v21, %v8350_v7  ;;  %v4414_v19 = vshll.u32 %v8348_v12, 16  ;;  %v4438_v15 = vshll.u32 %v8352_v0, 16  ;;  %v4425_v59 = vor.u32 %v4424_v49, %v4421_v62  ;;  %v4166_v21 = vld [vmem:[#allocation2 + $0xa8] sm:$0xf]  ;;  %v8390_v49 = vld [vmem:[#allocation2 + $0xa4] sm:$0x1] }
 0x118   : > { %6573 = vmatmul.mubr.msk.bf16.gmra.mrb[12].mxu1 %vm1235_vm5, %v9106_v40  ;;  %v8354_v40 = vrot.slane %v4428_v41, 5  ;;  %v4445_v38 = vrot.slane %v4443_v28, 4  ;;  %v4448_v41 = vrot.slane %v4446_v61, 5  ;;  %v4345_v17 = vsel %vm7252_vm7, %v4340_v24, %v8318_v42 }
 0x119   : > { %6576 = vmatprep.mubr.msk.bf16.mxu1 %vm1235_vm5, %v9107_v1  ;;  %v4364_v1 = vrot.slane %v4363_v58, 4  ;;  %v4452_v45 = vshll.u32 %v8358_v23, 16  ;;  %v4456_v22 = vshrl.u32 %v8358_v23, 16  ;;  %v4359_v6 = vsel %vm7252_vm7, %v4354_v30, %v8320_v25 }
 0x11a   : > { %6731 = vmatmul.mubr.msk.bf16.vlgmr.msra.gmra.mrb[0].mxu0 %vm1235_vm5, %v8144_v47  ;;  %v4435_v11 = vor.u32 %v4434_v26, %v8354_v40  ;;  %v4335_v47 = vsel %vm7252_vm7, %v4330_v56, %v8312_v63  ;;  %v4378_v58 = vrot.slane %v4377_v37, 4  ;;  %v4392_v5 = vrot.slane %v4390_v51, 5  ;;  %v8392_v56 = vld [vmem:[#allocation2 + $0xac] sm:$0xf] }
 0x11b   : > { %6763 = vmatpush3.bf16.msra.mxu0 %v9108_v35  ;;  %6734 = vmatprep.mubr.msk.bf16.mxu0 %vm1235_vm5, %v8211_v39  ;;  %v9109_v39 = vcombine.low %v8083_v31, %v8087_v14  ;;  %v4369_v63 = vsel %vm7252_vm7, %v4364_v1, %v4368_v48  ;;  %v9110_v42 = vcombine.low %v8099_v9, %v8103_v53  ;;  %v4388_v24 = vrot.slane %v4387_v10, 4  ;;  %v4169_v35 = vld [vmem:[#allocation2 + $0xb4] sm:$0xf] }
 0x11c   : > { %v4402_v62 = vrot.slane %v4401_v57, 4  ;;  %v4412_v31 = vrot.slane %v4411_v52, 4  ;;  %v4416_v14 = vrot.slane %v4414_v19, 5  ;;  %v4426_v26 = vrot.slane %v4425_v59, 4 }
 0x11d   : > { %v4436_v28 = vrot.slane %v4435_v11, 4  ;;  %v4440_v25 = vrot.slane %v4438_v15, 5  ;;  %v4449_v61 = vor.u32 %v4448_v41, %v4445_v38  ;;  %v8394_v37 = vrot.slane %v4452_v45, 5  ;;  %v9111_v45 = vld [vmem:[#allocation10_spill] sm:$0xff] }
 0x11e   : > { %v4458_v48 = vrot.slane %v4456_v22, 4  ;;  %v4467_v51 = vshrl.u32 %v4166_v21, 16  ;;  %v4470_v30 = vshll.u32 %v4166_v21, 16  ;;  %v5914_v9 = vcombine.low %v8296_v50, %v8308_v20 }
 0x11f   : > { %v6096_v53 = vcombine.low %v4335_v47, %v4345_v17  ;;  %v4383_v1 = vsel %vm7252_vm7, %v4378_v58, %v8342_v33  ;;  %v4462_v10 = vshll.u32 %v8390_v49, 16  ;;  %v4393_v57 = vsel %vm7252_vm7, %v4388_v24, %v4392_v5 }
 0x120   : > { %6577 = vmatmul.mubr.msk.bf16.gmra.mrb[16].mxu1 %vm1235_vm5, %v9109_v39  ;;  %v4407_v52 = vsel %vm7252_vm7, %v4402_v62, %v8350_v7  ;;  %v4417_v19 = vsel %vm7252_vm7, %v4412_v31, %v4416_v14  ;;  %v4476_v15 = vshll.u32 %v8392_v56, 16  ;;  %v8414_v33 = vcombine.low %v4359_v6, %v4369_v63  ;;  %v8423_v7 = vld [vmem:[#allocation2 + $0xb0] sm:$0x1]  ;;  %v8437_v63 = vld [vmem:[#allocation2 + $0xb8] sm:$0xf] }
 0x121   : > { %6580 = vmatprep.mubr.msk.bf16.mxu1 %vm1235_vm5, %v9110_v42  ;;  %v4441_v59 = vsel %vm7252_vm7, %v4436_v28, %v4440_v25  ;;  %v8421_v11 = vrot.slane %v4449_v61, 4  ;;  %v4459_v38 = vor.u32 %v4458_v48, %v8394_v37  ;;  %v4469_v41 = vrot.slane %v4467_v51, 4  ;;  %v4865_v62 = vld [vmem:[#allocation2 + $0x54] sm:$0xe] }
 0x122   : > { %6735 = vmatmul.mubr.msk.bf16.gmra.mrb[4].mxu0 %vm1235_vm5, %v8278_v13  ;;  %v4431_v13 = vsel %vm7252_vm7, %v4426_v26, %v8354_v40  ;;  %v4472_v47 = vrot.slane %v4470_v30, 5  ;;  %v4480_v17 = vshrl.u32 %v8392_v56, 16  ;;  %v9112_v22 = vcombine.low %v8110_v3, %v9111_v45  ;;  %v9114_v26 = vld [vmem:[#allocation12_spill] sm:$0xff] }
 0x123   : > { %6738 = vmatprep.mubr.msk.bf16.mxu0 %vm1235_vm5, %v8290_v32  ;;  %v4864_v32 = vld [vmem:[#allocation2 + $0x48] sm:$0xe]  ;;  %v8431_v40 = vcombine.low %v4383_v1, %v4393_v57  ;;  %v8433_v39 = vcombine.low %v4407_v52, %v4417_v19  ;;  %v8435_v6 = vrot.slane %v4462_v10, 5  ;;  %v4491_v58 = vshrl.u32 %v4169_v35, 16  ;;  %v4867_v52 = vld [vmem:[#allocation2 + $0x6c] sm:$0xe] }
 0x124   : > { %v9113_v5 = vcombine.low %v8207_v60, %v8218_v55  ;;  %v8443_v21 = vcombine.low %v4431_v13, %v4441_v59  ;;  %v8445_v42 = vrot.slane %v4476_v15, 5  ;;  %v4486_v3 = vshll.u32 %v8423_v7, 16  ;;  %v4866_v55 = vld [vmem:[#allocation2 + $0x60] sm:$0xe]  ;;  %v9115_v19 = vld [vmem:[#allocation14_spill] sm:$0xff] }
 0x125   : > { %v4494_v24 = vshll.u32 %v4169_v35, 16  ;;  %v4455_v31 = vsel %vm7252_vm7, %v8421_v11, %v8394_v37  ;;  %v6127_v14 = vrot.slane %v4864_v32, 9  ;;  %v4954_v28 = vrot.slane %v9114_v26, 5 }
 0x126   : > { %v4957_v60 = vrot.slane %v8175_v29, 5  ;;  %v8454_v25 = vrot.slane %v4459_v38, 4  ;;  %v4473_v61 = vor.u32 %v4472_v47, %v4469_v41  ;;  %v8456_v48 = vrot.slane %v4480_v17, 4 }
 0x127   : > { %v4500_v51 = vshll.u32 %v8437_v63, 16  ;;  %v8459_v30 = vrot.slane %v4491_v58, 4  ;;  %v8463_v1 = vsel %vm7430_vm11, %v6127_v14, %v4954_v28  ;;  %v4956_v10 = vrot.slane %v4954_v28, 4  ;;  %v9117_v58 = vld [vmem:[#allocation16_spill] sm:$0xff] }
 0x128   : > { %6581 = vmatmul.mubr.msk.bf16.gmra.mrb[20].mxu1 %vm1235_vm5, %v9112_v22  ;;  %v6128_v57 = vrot.slane %v4865_v62, 9  ;;  %v8467_v29 = vrot.slane %v4494_v24, 5  ;;  %v4961_v15 = vrot.slane %v9115_v19, 5  ;;  %v4964_v35 = vrot.slane %v8193_v46, 5  ;;  %v8507_v62 = vld [vmem:[#allocation2 + $0xbc] sm:$0x1] }
 0x129   : > { %6584 = vmatprep.mubr.msk.bf16.mxu1 %vm1235_vm5, %v9113_v5  ;;  %v6129_v13 = vrot.slane %v4866_v55, 9  ;;  %v4504_v59 = vshrl.u32 %v8437_v63, 16  ;;  %v8475_v38 = vsel %vm7430_vm11, %v4956_v10, %v4957_v60  ;;  %v4968_v41 = vrot.slane %v8244_v36, 5  ;;  %v4172_v14 = vld [vmem:[#allocation2 + $0xc0] sm:$0xf] }
 0x12a   : > { %6739 = vmatmul.mubr.msk.bf16.gmra.mrb[8].mxu0 %vm1235_vm5, %v8304_v16  ;;  %v4971_v47 = vrot.slane %v8255_v43, 5  ;;  %v6145_v16 = vcombine.low %v8463_v1, %v8475_v38  ;;  %v8483_v17 = vsel %vm7430_vm11, %v6128_v57, %v4961_v15  ;;  %v4963_v46 = vrot.slane %v4961_v15, 4  ;;  %v8529_v10 = vld [vmem:[#allocation2 + $0xc4] sm:$0xf]  ;;  %v7117_v1 = vld [vmem:[#allocation2 + $0xa8] sm:$0xff]   ;;  %v7118_v38 = vld [vmem:[#allocation2 + $0xb4] sm:$0xff]  }
 0x12b   : > { %6742 = vmatprep.mubr.msk.bf16.mxu0 %vm1235_vm5, %v6096_v53  ;;  %v6130_v32 = vrot.slane %v4867_v52, 9  ;;  %v9116_v53 = vcombine.low %v8238_v54, %v8242_v18  ;;  %v8491_v45 = vsel %vm7430_vm11, %v6129_v13, %v4968_v41  ;;  %v4970_v36 = vrot.slane %v4968_v41, 4  ;;  %v4868_v52 = vld [vmem:[#allocation2 + $0x78] sm:$0xe] }
 0x12c   : > { %v4975_v43 = vrot.slane %v8265_v8, 5  ;;  %v4978_v22 = vrot.slane %v8314_v4, 5  ;;  %v9118_v5 = vcombine.low %v8253_v44, %v9117_v58  ;;  %v4465_v54 = vsel %vm7252_vm7, %v8454_v25, %v8435_v6  ;;  %v2590_v4 = vld [vmem:[#allocation2 + $0x78] sm:$0xf]  ;;  %v9125_v6 = vld [vmem:[#allocation18_spill] sm:$0xff] }
 0x12d   : > { %v8503_v18 = vrot.slane %v4473_v61, 4  ;;  %v8505_v24 = vrot.slane %v4486_v3, 5  ;;  %v8511_v8 = vsel %vm7430_vm11, %v4963_v46, %v4964_v35  ;;  %v8517_v26 = vsel %vm7430_vm11, %v4970_v36, %v4971_v47  ;;  %v9119_v46 = vld [vmem:[#allocation6_spill] sm:$0xff] }
 0x12e   : > { %v6146_v44 = vcombine.low %v8483_v17, %v8511_v8  ;;  %v8521_v28 = vsel %vm7430_vm11, %v6130_v32, %v4975_v43  ;;  %v4977_v3 = vrot.slane %v4975_v43, 4  ;;  %v4483_v60 = vor.u32 %v8456_v48, %v8445_v42  ;;  %v7104_v48 = vld [vmem:[#allocation2 + $0xc] sm:$0xff]   ;;  %v9120_v32 = vld [vmem:[#allocation7_spill] sm:$0xff] }
 0x12f   : > { %v4497_v55 = vor.u32 %v8467_v29, %v8459_v30  ;;  %v8527_v61 = vrot.slane %v4500_v51, 5  ;;  %v4506_v19 = vrot.slane %v4504_v59, 4  ;;  %v4510_v15 = vshll.u32 %v8507_v62, 16  ;;  %v7160_v17 = vld [vmem:[#allocation2 + $0x8c] sm:$0x1] }
 0x130   : > { %6585 = vmatmul.mubr.msk.bf16.gmra.mrb[24].mxu1 %vm1235_vm5, %v9116_v53  ;;  %v8536_v35 = vsel %vm7430_vm11, %v4977_v3, %v4978_v22  ;;  %v2828_v13 = vshrl.u32 %v2590_v4, 16  ;;  %v4515_v51 = vshrl.u32 %v4172_v14, 16  ;;  %v2831_v47 = vshll.u32 %v2590_v4, 16  ;;  %v4869_v53 = vld [vmem:[#allocation2 + $0x84] sm:$0xe]  ;;  %v9121_v3 = vld [vmem:[#allocation3_spill] sm:$0xff] }
 0x131   : > { %6588 = vmatprep.mubr.msk.bf16.mxu1 %vm1235_vm5, %v9118_v5  ;;  %v2850_v59 = vsel %vm7252_vm7, %v9120_v32, %v9119_v46  ;;  %v4518_v36 = vshll.u32 %v4172_v14, 16  ;;  %v4524_v43 = vshll.u32 %v8529_v10, 16  ;;  %v4528_v58 = vshrl.u32 %v8529_v10, 16 }
 0x132   : > { %6743 = vmatmul.mubr.msk.bf16.gmra.mrb[12].mxu0 %vm1235_vm5, %v8414_v33  ;;  %v2830_v22 = vrot.slane %v2828_v13, 4  ;;  %v6131_v33 = vrot.slane %v4868_v52, 9  ;;  %v2833_v5 = vrot.slane %v2831_v47, 5  ;;  %v4982_v41 = vrot.slane %v9121_v3, 5  ;;  %v8563_v13 = vld [vmem:[#allocation2 + $0xc8] sm:$0x1] }
 0x133   : > { %6746 = vmatprep.mubr.msk.bf16.mxu0 %vm1235_vm5, %v8431_v40  ;;  %v4985_v4 = vrot.slane %v8340_v2, 5  ;;  %v4484_v46 = vrot.slane %v4483_v60, 4  ;;  %v6132_v32 = vrot.slane %v4869_v53, 9  ;;  %v9122_v40 = vld [vmem:[#allocation17_spill] sm:$0xff]  ;;  %v4992_v57 = vrot.slane %v8348_v12, 5 }
 0x134   : > { %v4989_v14 = vrot.slane %v9122_v40, 5  ;;  %v4479_v52 = vsel %vm7252_vm7, %v8503_v18, %v8445_v42  ;;  %v2834_v2 = vor.u32 %v2833_v5, %v2830_v22  ;;  %v8567_v50 = vsel %vm7430_vm11, %v6131_v33, %v4982_v41  ;;  %v4175_v47 = vld [vmem:[#allocation2 + $0xcc] sm:$0xf]  ;;  %v8575_v42 = vld [vmem:[#allocation2 + $0xd0] sm:$0xf]  ;;  %v7105_v33 = vld [vmem:[#allocation2 + $0x18] sm:$0xff]  }
 0x135   : > { %v4984_v20 = vrot.slane %v4982_v41, 4  ;;  %v4520_v60 = vrot.slane %v4518_v36, 5  ;;  %v8573_v53 = vrot.slane %v4524_v43, 5  ;;  %v4530_v3 = vrot.slane %v4528_v58, 4  ;;  %v7106_v58 = vld [vmem:[#allocation2 + $0x24] sm:$0xff]  }
 0x136   : > { %v8571_v12 = vsel %vm7430_vm11, %v6132_v32, %v4989_v14  ;;  %v2835_v18 = vrot.slane %v2834_v2, 4  ;;  %v4507_v41 = vor.u32 %v4506_v19, %v8527_v61  ;;  %v4534_v5 = vshll.u32 %v8563_v13, 16  ;;  %v9123_v32 = vld [vmem:[#allocation4_spill] sm:$0xff] }
 0x137   : > { %v8579_v22 = vsel %vm7430_vm11, %v4984_v20, %v4985_v4  ;;  %v4539_v4 = vshrl.u32 %v4175_v47, 16  ;;  %v4552_v40 = vshrl.u32 %v8575_v42, 16  ;;  %v4531_v2 = vor.u32 %v4530_v3, %v8573_v53  ;;  %v4870_v20 = vld [vmem:[#allocation2 + $0x90] sm:$0xe] }
 0x138   : > { %6589 = vmatmul.mubr.msk.bf16.gmra.mrb[28].mxu1 %vm1235_vm5, %v5914_v9  ;;  %v4517_v9 = vrot.slane %v4515_v51, 4  ;;  %v4489_v51 = vsel %vm7252_vm7, %v4484_v46, %v8505_v24  ;;  %v6149_v36 = vcombine.low %v8567_v50, %v8579_v22  ;;  %v2840_v24 = vsel %vm7252_vm7, %v2835_v18, %v9123_v32 }
 0x139   : > { %6594 = vmatprep.mubr.msk.bf16.mxu1 %vm1235_vm5, %v7104_v48  ;;  %v4991_v48 = vrot.slane %v4989_v14, 4  ;;  %v4542_v46 = vshll.u32 %v4175_v47, 16  ;;  %v4508_v18 = vrot.slane %v4507_v41, 4  ;;  %v4512_v32 = vrot.slane %v4510_v15, 5  ;;  %v8622_v15 = vld [vmem:[#allocation2 + $0xd4] sm:$0x1] }
 0x13a   : > { %6747 = vmatmul.mubr.msk.bf16.gmra.mrb[16].mxu0 %vm1235_vm5, %v8433_v39  ;;  %v8603_v39 = vcombine.low %v2840_v24, %v2850_v59  ;;  %v4521_v14 = vor.u32 %v4520_v60, %v4517_v9  ;;  %v6101_v59 = vcombine.low %v4455_v31, %v4465_v54  ;;  %v6102_v9 = vcombine.low %v4479_v52, %v4489_v51  ;;  %v7108_v52 = vld [vmem:[#allocation2 + $0x3c] sm:$0xff]  }
 0x13b   : > { %v8589_v43 = vsel %vm7430_vm11, %v4991_v48, %v4992_v57  ;;  %6750 = vmatprep.mubr.msk.bf16.mxu0 %vm1235_vm5, %v8443_v21  ;;  %v4548_v57 = vshll.u32 %v8575_v42, 16  ;;  %v4498_v48 = vrot.slane %v4497_v55, 4  ;;  %v9124_v21 = vld [vmem:[#allocation15_spill] sm:$0xff]  ;;  %v4536_v30 = vrot.slane %v4534_v5, 5 }
 0x13c   : > { %v6150_v19 = vcombine.low %v8571_v12, %v8589_v43  ;;  %v4541_v29 = vrot.slane %v4539_v4, 4  ;;  %v4871_v55 = vld [vmem:[#allocation2 + $0x9c] sm:$0xe]  ;;  %v4544_v60 = vrot.slane %v4542_v46, 5  ;;  %v4554_v3 = vrot.slane %v4552_v40, 4 }
 0x13d   : > { %v8624_v47 = vrot.slane %v4548_v57, 5  ;;  %v4522_v41 = vrot.slane %v4521_v14, 4  ;;  %v4996_v25 = vrot.slane %v9125_v6, 5  ;;  %v4999_v24 = vrot.slane %v8352_v0, 5  ;;  %v7109_v6 = vld [vmem:[#allocation2 + $0x48] sm:$0xff]  }
 0x13e   : > { %v4503_v37 = vsel %vm7252_vm7, %v4498_v48, %v8527_v61  ;;  %v4513_v11 = vsel %vm7252_vm7, %v4508_v18, %v4512_v32  ;;  %v6134_v31 = vrot.slane %v4871_v55, 9  ;;  %v5003_v54 = vrot.slane %v8358_v23, 5  ;;  %v4860_v48 = vld [vmem:[#allocation2 + $0x18] sm:$0xe]  ;;  %v7167_v43 = vld [vmem:[#allocation2 + $0xb0] sm:$0x1] }
 0x13f   : > { %v4558_v51 = vshll.u32 %v8622_v15, 16  ;;  %v4998_v0 = vrot.slane %v4996_v25, 4  ;;  %v5006_v4 = vrot.slane %v8390_v49, 5  ;;  %v4545_v61 = vor.u32 %v4544_v60, %v4541_v29 }
 0x140   : > { %6595 = vmatmul.mubr.msk.bf16.vlgmr.msra.gmra.mrb[0].mxu1 %vm1235_vm5, %v7105_v33  ;;  %v6133_v33 = vrot.slane %v4870_v20, 9  ;;  %v4555_v46 = vor.u32 %v4554_v3, %v8624_v47  ;;  %v8645_v23 = vsel %vm7430_vm11, %v6134_v31, %v5003_v54  ;;  %v5005_v57 = vrot.slane %v5003_v54, 4 }
 0x141   : > { %6797 = vmatpush3.bf16.msra.mxu1 %v9124_v21  ;;  %6598 = vmatprep.mubr.msk.bf16.mxu1 %vm1235_vm5, %v7106_v58  ;;  %v4532_v58 = vrot.slane %v4531_v2, 4  ;;  %v7107_v21 = vld [vmem:[#allocation2 + $0x30] sm:$0xff]   ;;  %v4527_v40 = vsel %vm7252_vm7, %v4522_v41, %v8573_v53  ;;  %v7153_v2 = vld [vmem:[#allocation2 + $0x1c] sm:$0xf]  ;;  %v8654_v49 = vsel %vm7430_vm11, %v4998_v0, %v4999_v24  ;;  %v6103_v53 = vcombine.low %v4503_v37, %v4513_v11  ;;  %v4861_v24 = vld [vmem:[#allocation2 + $0x24] sm:$0xe] }
 0x142   : > { %6751 = vmatmul.mubr.msk.bf16.gmra.mrb[20].mxu0 %vm1235_vm5, %v6101_v59  ;;  %v8638_v5 = vsel %vm7430_vm11, %v6133_v33, %v4996_v25  ;;  %v4926_v20 = vrot.slane %v7153_v2, 5  ;;  %v8661_v32 = vsel %vm7430_vm11, %v5005_v57, %v5006_v4  ;;  %v4556_v29 = vrot.slane %v4555_v46, 4  ;;  %v7154_v33 = vld [vmem:[#allocation2 + $0x20] sm:$0x1]  ;;  %v7110_v25 = vld [vmem:[#allocation2 + $0x54] sm:$0xff]  }
 0x143   : > { %6754 = vmatprep.mubr.msk.bf16.mxu0 %vm1235_vm5, %v6102_v9  ;;  %v4537_v14 = vsel %vm7252_vm7, %v4532_v58, %v4536_v30  ;;  %v6151_v18 = vcombine.low %v8638_v5, %v8654_v49  ;;  %v6152_v59 = vcombine.low %v8645_v23, %v8661_v32  ;;  %v4546_v30 = vrot.slane %v4545_v61, 4  ;;  %v4872_v58 = vld [vmem:[#allocation2 + $0xa8] sm:$0xe]  ;;  %v9126_v61 = vld [vmem:[#allocation8_spill] sm:$0xff] }
 0x144   : > { %v6104_v9 = vcombine.low %v4527_v40, %v4537_v14  ;;  %v4560_v55 = vrot.slane %v4558_v51, 5  ;;  %v6123_v60 = vrot.slane %v4860_v48, 9  ;;  %v4928_v3 = vrot.slane %v4926_v20, 4  ;;  %v4873_v51 = vld [vmem:[#allocation2 + $0xb4] sm:$0xe] }
 0x145   : > { %v4929_v41 = vrot.slane %v7154_v33, 5  ;;  %v4551_v37 = vsel %vm7252_vm7, %v4546_v30, %v8624_v47  ;;  %v6135_v54 = vrot.slane %v4872_v58, 9  ;;  %v4940_v46 = vrot.slane %v9126_v61, 5  ;;  %v4862_v40 = vld [vmem:[#allocation2 + $0x30] sm:$0xe]  ;;  %v9127_v33 = vld [vmem:[#allocation9_spill] sm:$0xff] }
 0x146   : > { %v4561_v11 = vsel %vm7252_vm7, %v4556_v29, %v4560_v55  ;;  %v4927_v0 = vsel %vm7430_vm11, %v6123_v60, %v4926_v20  ;;  %v5013_v57 = vrot.slane %v8423_v7, 5  ;;  %v6124_v47 = vrot.slane %v4861_v24, 9  ;;  %v7156_v20 = vld [vmem:[#allocation2 + $0x2c] sm:$0x1]  ;;  %v4874_v61 = vld [vmem:[#allocation2 + $0xc0] sm:$0xe] }
 0x147   : > { %v4930_v4 = vsel %vm7430_vm11, %v4928_v3, %v4929_v41  ;;  %v6105_v2 = vcombine.low %v4551_v37, %v4561_v11  ;;  %v4936_v48 = vrot.slane %v7156_v20, 5  ;;  %v5020_v55 = vrot.slane %v8507_v62, 5  ;;  %v7112_v24 = vld [vmem:[#allocation2 + $0x6c] sm:$0xff]  }
 0x148   : > { %6599 = vmatmul.mubr.msk.bf16.gmra.mrb[4].mxu1 %vm1235_vm5, %v7107_v21  ;;  %v7155_v21 = vld [vmem:[#allocation2 + $0x28] sm:$0xf]  ;;  %v6141_v30 = vcombine.low %v4927_v0, %v4930_v4  ;;  %v6125_v60 = vrot.slane %v4862_v40, 9  ;;  %v4942_v3 = vrot.slane %v4940_v46, 4  ;;  %v4943_v41 = vrot.slane %v9127_v33, 5 }
 0x149   : > { %6602 = vmatprep.mubr.msk.bf16.mxu1 %vm1235_vm5, %v7108_v52  ;;  %v4933_v31 = vrot.slane %v7155_v21, 5  ;;  %v5010_v52 = vrot.slane %v8392_v56, 5  ;;  %v9128_v21 = vld [vmem:[#allocation11_spill] sm:$0xff]  ;;  %v9129_v40 = vld [vmem:[#allocation13_spill] sm:$0xff]  ;;  %v2871_v8 = vshll.u32 %v7160_v17, 16 }
 0x14a   : > { %6755 = vmatmul.mubr.msk.bf16.gmra.mrb[24].mxu0 %vm1235_vm5, %v6103_v53  ;;  %v6136_v53 = vrot.slane %v4873_v51, 9  ;;  %v4947_v37 = vrot.slane %v9128_v21, 5  ;;  %v4941_v51 = vsel %vm7430_vm11, %v6125_v60, %v4940_v46  ;;  %v4944_v0 = vsel %vm7430_vm11, %v4942_v3, %v4943_v41  ;;  %v7114_v3 = vld [vmem:[#allocation2 + $0x84] sm:$0xff]   ;;  %v2605_v17 = vld [vmem:[#allocation2 + $0xb4] sm:$0xf] }
 0x14b   : > { %6758 = vmatprep.mubr.msk.bf16.mxu0 %vm1235_vm5, %v6104_v9  ;;  %v8683_v14 = vsel %vm7430_vm11, %v6135_v54, %v5010_v52  ;;  %v5012_v56 = vrot.slane %v5010_v52, 4  ;;  %v5017_v9 = vrot.slane %v8437_v63, 5  ;;  %v4935_v29 = vrot.slane %v4933_v31, 4  ;;  %v4863_v54 = vld [vmem:[#allocation2 + $0x3c] sm:$0xe] }
 0x14c   : > { %v4934_v62 = vsel %vm7430_vm11, %v6124_v47, %v4933_v31  ;;  %v4949_v47 = vrot.slane %v4947_v37, 4  ;;  %v6143_v20 = vcombine.low %v4941_v51, %v4944_v0  ;;  %v6137_v46 = vrot.slane %v4874_v61, 9 }
 0x14d   : > { %v8689_v7 = vsel %vm7430_vm11, %v5012_v56, %v5013_v57  ;;  %v5019_v63 = vrot.slane %v5017_v9, 4  ;;  %v4937_v11 = vsel %vm7430_vm11, %v4935_v29, %v4936_v48  ;;  %v6126_v57 = vrot.slane %v4863_v54, 9  ;;  %v2587_v48 = vld [vmem:[#allocation2 + $0x6c] sm:$0xf] }
 0x14e   : > { %v6153_v58 = vcombine.low %v8683_v14, %v8689_v7  ;;  %v6142_v31 = vcombine.low %v4934_v62, %v4937_v11  ;;  %v4950_v56 = vrot.slane %v9129_v40, 5  ;;  %v5034_v62 = vrot.slane %v8622_v15, 5  ;;  %v7115_v40 = vld [vmem:[#allocation2 + $0x90] sm:$0xff]  }
 0x14f   : > { %v8708_v52 = vsel %vm7430_vm11, %v5019_v63, %v5020_v55  ;;  %v4948_v33 = vsel %vm7430_vm11, %v6126_v57, %v4947_v37  ;;  %v7157_v63 = vld [vmem:[#allocation2 + $0x70] sm:$0xf] }
 0x150   : > { %6603 = vmatmul.mubr.msk.bf16.gmra.mrb[8].mxu1 %vm1235_vm5, %v7109_v6  ;;  %v7111_v6 = vld [vmem:[#allocation2 + $0x60] sm:$0xff]   ;;  %v4951_v41 = vsel %vm7430_vm11, %v4949_v47, %v4950_v56  ;;  %v2817_v11 = vshrl.u32 %v7157_v63, 16 }
 0x151   : > { %6606 = vmatprep.mubr.msk.bf16.mxu1 %vm1235_vm5, %v7110_v25  ;;  %v8697_v25 = vsel %vm7430_vm11, %v6136_v53, %v5017_v9  ;;  %v5024_v53 = vrot.slane %v8529_v10, 5  ;;  %v5027_v9 = vrot.slane %v8563_v13, 5  ;;  %v5031_v10 = vrot.slane %v8575_v42, 5  ;;  %v7116_v56 = vld [vmem:[#allocation2 + $0x9c] sm:$0xff]  }
 0x152   : > { %6759 = vmatmul.mubr.msk.bf16.gmra.mrb[28].mxu0 %vm1235_vm5, %v6105_v2  ;;  %v6154_v4 = vcombine.low %v8697_v25, %v8708_v52  ;;  %v4875_v2 = vld [vmem:[#allocation2 + $0xcc] sm:$0xe]  ;;  %v2807_v13 = vshll.u32 %v2587_v48, 16  ;;  %v6144_v51 = vcombine.low %v4948_v33, %v4951_v41  ;;  %v2819_v47 = vrot.slane %v2817_v11, 4  ;;  %v2596_v33 = vld [vmem:[#allocation2 + $0x90] sm:$0xf] }
 0x153   : > { %6764 = vmatprep.mubr.msk.bf16.mxu0 %vm1235_vm5, %v6141_v30  ;;  %v7113_v30 = vld [vmem:[#allocation2 + $0x78] sm:$0xff]   ;;  %v8723_v29 = vsel %vm7430_vm11, %v6137_v46, %v5024_v53  ;;  %v5026_v55 = vrot.slane %v5024_v53, 4  ;;  %v6138_v60 = vrot.slane %v4875_v2, 9  ;;  %v5033_v42 = vrot.slane %v5031_v10, 4  ;;  %v2593_v2 = vld [vmem:[#allocation2 + $0x84] sm:$0xf] }
 0x154   : > { %v2809_v15 = vrot.slane %v2807_v13, 5  ;;  %v2852_v53 = vshrl.u32 %v2593_v2, 16  ;;  %v2599_v11 = vld [vmem:[#allocation2 + $0x9c] sm:$0xf] }
 0x155   : > { %v8734_v21 = vsel %vm7430_vm11, %v5026_v55, %v5027_v9  ;;  %v8741_v54 = vsel %vm7430_vm11, %v6138_v60, %v5031_v10  ;;  %v8747_v0 = vsel %vm7430_vm11, %v5033_v42, %v5034_v62  ;;  %v2855_v9 = vshll.u32 %v2593_v2, 16  ;;  %v7162_v2 = vld [vmem:[#allocation2 + $0xa0] sm:$0xf] }
 0x156   : > { %v6155_v37 = vcombine.low %v8723_v29, %v8734_v21  ;;  %v2879_v62 = vshll.u32 %v2596_v33, 16  ;;  %v9130_v42 = vcombine.low %v8491_v45, %v8517_v26  ;;  %v2913_v45 = vshrl.u32 %v7162_v2, 16 }
 0x157   : > { %v2857_v10 = vrot.slane %v2855_v9, 5  ;;  %v2873_v9 = vrot.slane %v2871_v8, 5  ;;  %v7165_v8 = vld [vmem:[#allocation2 + $0xac] sm:$0xf] }
 0x158   : > { %6607 = vmatmul.mubr.msk.bf16.gmra.mrb[12].mxu1 %vm1235_vm5, %v7111_v6  ;;  %v2804_v6 = vshrl.u32 %v2587_v48, 16  ;;  %v7158_v48 = vld [vmem:[#allocation2 + $0x74] sm:$0x1] }
 0x159   : > { %6610 = vmatprep.mubr.msk.bf16.mxu1 %vm1235_vm5, %v7112_v24  ;;  %v2813_v24 = vshll.u32 %v7157_v63, 16  ;;  %v2823_v46 = vshll.u32 %v7158_v48, 16  ;;  %v2881_v48 = vrot.slane %v2879_v62, 5 }
 0x15a   : > { %6765 = vmatmul.mubr.msk.bf16.vlgmr.msra.gmra.mrb[0].mxu0 %vm1235_vm5, %v6142_v31  ;;  %v2806_v61 = vrot.slane %v2804_v6, 4  ;;  %v6156_v31 = vcombine.low %v8741_v54, %v8747_v0 }
 0x15b   : > { %6768 = vmatprep.mubr.msk.bf16.mxu0 %vm1235_vm5, %v6143_v20  ;;  %v2815_v57 = vrot.slane %v2813_v24, 5  ;;  %v2825_v6 = vrot.slane %v2823_v46, 5  ;;  %v2876_v24 = vshrl.u32 %v2596_v33, 16  ;;  %v7119_v46 = vld [vmem:[#allocation2 + $0xc0] sm:$0xff]  }
 0x15c   : > { %v2810_v34 = vor.u32 %v2809_v15, %v2806_v61 }
 0x15d   : > { %v2820_v20 = vor.u32 %v2819_v47, %v2815_v57 }
 0x15f   : > { %v2821_v41 = vrot.slane %v2820_v20, 4  ;;  %v2878_v20 = vrot.slane %v2876_v24, 4 }
 0x160   : > { %6611 = vmatmul.mubr.msk.bf16.gmra.mrb[16].mxu1 %vm1235_vm5, %v7113_v30  ;;  %v7159_v30 = vld [vmem:[#allocation2 + $0x88] sm:$0xf] }
 0x161   : > { %6614 = vmatprep.mubr.msk.bf16.mxu1 %vm1235_vm5, %v7114_v3  ;;  %v2861_v55 = vshll.u32 %v7159_v30, 16  ;;  %v2865_v60 = vshrl.u32 %v7159_v30, 16  ;;  %v2811_v3 = vrot.slane %v2810_v34, 4  ;;  %v2826_v61 = vsel %vm7252_vm7, %v2821_v41, %v2825_v6  ;;  %v2602_v6 = vld [vmem:[#allocation2 + $0xa8] sm:$0xf] }
 0x162   : > { %6769 = vmatmul.mubr.msk.bf16.gmra.mrb[4].mxu0 %vm1235_vm5, %v6144_v51  ;;  %v2909_v34 = vshll.u32 %v7162_v2, 16  ;;  %v2915_v41 = vrot.slane %v2913_v45, 4  ;;  %v7166_v2 = vld [vmem:[#allocation2 + $0xb8] sm:$0xf] }
 0x163   : > { %6772 = vmatprep.mubr.msk.bf16.mxu0 %vm1235_vm5, %v6145_v16  ;;  %v2854_v16 = vrot.slane %v2852_v53, 4  ;;  %v8762_v13 = vrot.slane %v2861_v55, 5  ;;  %v2867_v63 = vrot.slane %v2865_v60, 4  ;;  %v2816_v51 = vsel %vm7252_vm7, %v2811_v3, %v2815_v57 }
 0x164   : > { %v5977_v53 = vcombine.low %v2816_v51, %v2826_v61  ;;  %v8777_v33 = vrot.slane %v2909_v34, 5  ;;  %v2924_v51 = vshrl.u32 %v2602_v6, 16  ;;  %v2927_v61 = vshll.u32 %v2602_v6, 16 }
 0x165   : > { %v2858_v26 = vor.u32 %v2857_v10, %v2854_v16  ;;  %v2868_v57 = vor.u32 %v2867_v63, %v8762_v13  ;;  %v2882_v10 = vor.u32 %v2881_v48, %v2878_v20  ;;  %v7163_v63 = vld [vmem:[#allocation2 + $0x98] sm:$0x1]  ;;  %v2957_v34 = vshll.u32 %v7166_v2, 16 }
 0x166   : > { %v2895_v24 = vshll.u32 %v7163_v63, 16  ;;  %v2961_v45 = vshrl.u32 %v7166_v2, 16  ;;  %v2926_v20 = vrot.slane %v2924_v51, 4  ;;  %v2929_v48 = vrot.slane %v2927_v61, 5  ;;  %v7168_v63 = vld [vmem:[#allocation2 + $0xc4] sm:$0xf] }
 0x167   : > { %v2869_v16 = vrot.slane %v2868_v57, 4  ;;  %v7169_v51 = vld [vmem:[#allocation2 + $0xbc] sm:$0x1] }
 0x168   : > { %6615 = vmatmul.mubr.msk.bf16.gmra.mrb[20].mxu1 %vm1235_vm5, %v7115_v40  ;;  %v2900_v40 = vshrl.u32 %v2599_v11, 16  ;;  %v2963_v6 = vrot.slane %v2961_v45, 4 }
 0x169   : > { %6618 = vmatprep.mubr.msk.bf16.mxu1 %vm1235_vm5, %v7116_v56  ;;  %v2903_v56 = vshll.u32 %v2599_v11, 16  ;;  %v7164_v11 = vld [vmem:[#allocation2 + $0xa4] sm:$0x1]  ;;  %v2874_v22 = vsel %vm7252_vm7, %v2869_v16, %v2873_v9 }
 0x16a   : > { %6773 = vmatmul.mubr.msk.bf16.gmra.mrb[8].mxu0 %vm1235_vm5, %v6146_v44  ;;  %v7161_v44 = vld [vmem:[#allocation2 + $0x94] sm:$0xf]  ;;  %v2902_v60 = vrot.slane %v2900_v40, 4  ;;  %v2948_v40 = vshrl.u32 %v2605_v17, 16 }
 0x16b   : > { %6776 = vmatprep.mubr.msk.bf16.mxu0 %vm1235_vm5, %v9130_v42  ;;  %v2885_v15 = vshll.u32 %v7161_v44, 16  ;;  %v2889_v47 = vshrl.u32 %v7161_v44, 16  ;;  %v2905_v3 = vrot.slane %v2903_v56, 5  ;;  %v2919_v42 = vshll.u32 %v7164_v11, 16 }
 0x16c   : > { %v2933_v44 = vshll.u32 %v7165_v8, 16  ;;  %v2951_v56 = vshll.u32 %v2605_v17, 16  ;;  %v2950_v9 = vrot.slane %v2948_v40, 4 }
 0x16d   : > { %v8775_v30 = vrot.slane %v2885_v15, 5  ;;  %v2891_v55 = vrot.slane %v2889_v47, 4  ;;  %v2937_v15 = vshrl.u32 %v7165_v8, 16  ;;  %v2897_v47 = vrot.slane %v2895_v24, 5 }
 0x16e   : > { %v2921_v57 = vrot.slane %v2919_v42, 5  ;;  %v2981_v24 = vshll.u32 %v7168_v63, 16 }
 0x16f   : > { %v2892_v62 = vor.u32 %v2891_v55, %v8775_v30  ;;  %v2935_v55 = vrot.slane %v2933_v44, 5 }
 0x170   : > { %6619 = vmatmul.mubr.msk.bf16.gmra.mrb[24].mxu1 %vm1235_vm5, %v7117_v1  ;;  %v9131_v1 = vcombine.low %v8521_v28, %v8536_v35  ;;  %v2906_v28 = vor.u32 %v2905_v3, %v2902_v60  ;;  %v2916_v35 = vor.u32 %v2915_v41, %v8777_v33  ;;  %v2939_v60 = vrot.slane %v2937_v15, 4 }
 0x171   : > { %6622 = vmatprep.mubr.msk.bf16.mxu1 %vm1235_vm5, %v7118_v38  ;;  %v2859_v38 = vrot.slane %v2858_v26, 4  ;;  %v2893_v26 = vrot.slane %v2892_v62, 4  ;;  %v2953_v3 = vrot.slane %v2951_v56, 5  ;;  %v2959_v41 = vrot.slane %v2957_v34, 5  ;;  %v7170_v56 = vld [vmem:[#allocation2 + $0xc8] sm:$0x1] }
 0x172   : > { %6777 = vmatmul.mubr.msk.bf16.gmra.mrb[12].mxu0 %vm1235_vm5, %v9131_v1  ;;  %v2608_v1 = vld [vmem:[#allocation2 + $0xc0] sm:$0xf]  ;;  %v2940_v16 = vor.u32 %v2939_v60, %v2935_v55  ;;  %v2985_v62 = vshrl.u32 %v7168_v63, 16  ;;  %v2983_v15 = vrot.slane %v2981_v24, 5  ;;  %v2991_v2 = vshll.u32 %v7170_v56, 16 }
 0x173   : > { %6780 = vmatprep.mubr.msk.bf16.mxu0 %vm1235_vm5, %v6149_v36  ;;  %v2864_v50 = vsel %vm7252_vm7, %v2859_v38, %v8762_v13  ;;  %v2883_v36 = vrot.slane %v2882_v10, 4  ;;  %v2898_v12 = vsel %vm7252_vm7, %v2893_v26, %v2897_v47  ;;  %v2975_v10 = vshll.u32 %v2608_v1, 16 }
 0x174   : > { %v5979_v13 = vcombine.low %v2864_v50, %v2874_v22  ;;  %v2954_v11 = vor.u32 %v2953_v3, %v2950_v9  ;;  %v2964_v42 = vor.u32 %v2963_v6, %v2959_v41  ;;  %v2987_v50 = vrot.slane %v2985_v62, 4 }
 0x175   : > { %v2888_v38 = vsel %vm7252_vm7, %v2883_v36, %v8775_v30  ;;  %v2972_v30 = vshrl.u32 %v2608_v1, 16  ;;  %v2977_v44 = vrot.slane %v2975_v10, 5 }
 0x176   : > { %v5980_v61 = vcombine.low %v2888_v38, %v2898_v12  ;;  %v2955_v22 = vrot.slane %v2954_v11, 4  ;;  %v2965_v36 = vrot.slane %v2964_v42, 4 }
 0x177   : > { %v2974_v8 = vrot.slane %v2972_v30, 4 }
 0x178   : > { %6623 = vmatmul.mubr.msk.bf16.gmra.mrb[28].mxu1 %vm1235_vm5, %v7119_v46  ;;  %v2907_v46 = vrot.slane %v2906_v28, 4  ;;  %v2960_v14 = vsel %vm7252_vm7, %v2955_v22, %v2959_v41 }
 0x179   : > { %6644 = vmatprep.mubr.msk.bf16.mxu1 %vm1235_vm5, %v5977_v53  ;;  %v2917_v53 = vrot.slane %v2916_v35, 4  ;;  %v2978_v32 = vor.u32 %v2977_v44, %v2974_v8 }
 0x17a   : > { %6781 = vmatmul.mubr.msk.bf16.gmra.mrb[16].mxu0 %vm1235_vm5, %v6150_v19  ;;  %v2943_v19 = vshll.u32 %v7167_v43, 16  ;;  %v2912_v5 = vsel %vm7252_vm7, %v2907_v46, %v8777_v33  ;;  %v2941_v33 = vrot.slane %v2940_v16, 4 }
 0x17b   : > { %6784 = vmatprep.mubr.msk.bf16.mxu0 %vm1235_vm5, %v6151_v18  ;;  %v2922_v49 = vsel %vm7252_vm7, %v2917_v53, %v2921_v57  ;;  %v2930_v18 = vor.u32 %v2929_v48, %v2926_v20  ;;  %v2979_v45 = vrot.slane %v2978_v32, 4  ;;  %v2993_v57 = vrot.slane %v2991_v2, 5 }
 0x17c   : > { %v5981_v17 = vcombine.low %v2912_v5, %v2922_v49  ;;  %v2945_v35 = vrot.slane %v2943_v19, 5 }
 0x17d   : > { %v2931_v28 = vrot.slane %v2930_v18, 4  ;;  %v2984_v20 = vsel %vm7252_vm7, %v2979_v45, %v2983_v15 }
 0x17e   : > { %v2946_v23 = vsel %vm7252_vm7, %v2941_v33, %v2945_v35 }
 0x17f   : > { %v2936_v40 = vsel %vm7252_vm7, %v2931_v28, %v2935_v55 }
 0x180   : > { %6645 = vmatmul.mubr.msk.bf16.vlgmr.msra.gmra.mrb[16].mxu1 %vm1235_vm5, %v8603_v39  ;;  %v2967_v39 = vshll.u32 %v7169_v51, 16 }
 0x181   : > { %6648 = vmatprep.mubr.msk.bf16.mxu1 %vm1235_vm5, %v5979_v13 }
 0x182   : > { %6785 = vmatmul.mubr.msk.bf16.gmra.mrb[20].mxu0 %vm1235_vm5, %v6152_v59  ;;  %v2969_v47 = vrot.slane %v2967_v39, 5  ;;  %v2988_v59 = vor.u32 %v2987_v50, %v2983_v15 }
 0x183   : > { %6788 = vmatprep.mubr.msk.bf16.mxu0 %vm1235_vm5, %v6153_v58  ;;  %v5982_v58 = vcombine.low %v2936_v40, %v2946_v23 }
 0x184   : > { %v2970_v7 = vsel %vm7252_vm7, %v2965_v36, %v2969_v47  ;;  %v2989_v26 = vrot.slane %v2988_v59, 4 }
 0x185   : > { %v5983_v34 = vcombine.low %v2960_v14, %v2970_v7 }
 0x186   : > { %v2994_v25 = vsel %vm7252_vm7, %v2989_v26, %v2993_v57 }
 0x187   : > { %v5984_v52 = vcombine.low %v2984_v20, %v2994_v25 }
 0x188   : > { %6649 = vmatmul.mubr.msk.bf16.gmra.mrb[20].mxu1 %vm1235_vm5, %v5980_v61 }
 0x189   : > { %6652 = vmatprep.mubr.msk.bf16.mxu1 %vm1235_vm5, %v5981_v17 }
 0x18a   : > { %6789 = vmatmul.mubr.msk.bf16.gmra.mrb[24].mxu0 %vm1235_vm5, %v6154_v4 }
 0x18b   : > { %6792 = vmatprep.mubr.msk.bf16.mxu0 %vm1235_vm5, %v6155_v37 }
 0x190   : > { %6653 = vmatmul.mubr.msk.bf16.gmra.mrb[24].mxu1 %vm1235_vm5, %v5982_v58 }
 0x191   : > { %6656 = vmatprep.mubr.msk.bf16.mxu1 %vm1235_vm5, %v5983_v34 }
 0x192   : > { %6793 = vmatmul.mubr.msk.bf16.gmra.mrb[28].mxu0 %vm1235_vm5, %v6156_v31 }
 0x198   : > { %6657 = vmatmul.mubr.msk.bf16.gmra.mrb[28].mxu1 %vm1235_vm5, %v5984_v52 }
 0x213   : > { %v6596_v4 = vpop.f32.mrb[0].mxu1 }
 0x214   : > { %v2404_v29 = vpop.f32.mrb[1].mxu1 }
 0x215   : > { %v6597_v21 = vpop.f32.mrb[2].mxu1 }
 0x216   : > { %v2407_v37 = vpop.f32.mrb[3].mxu1 }
 0x21b   : > { %v6600_v48 = vpop.f32.mrb[4].mxu1 }
 0x21c   : > { %v2420_v46 = vpop.f32.mrb[5].mxu1 }
 0x21d   : > { %v6601_v53 = vpop.f32.mrb[6].mxu1 }
 0x21e   : > { %v2423_v55 = vpop.f32.mrb[7].mxu1 }
 0x223   : > { %v6604_v60 = vpop.f32.mrb[8].mxu1 }
 0x224   : > { %v2436_v27 = vpop.f32.mrb[9].mxu1 }
 0x225   : > { %v6605_v13 = vpop.f32.mrb[10].mxu1 }
 0x226   : > { %v2439_v9 = vpop.f32.mrb[11].mxu1 }
 0x22b   : > { %v6608_v3 = vpop.f32.mrb[12].mxu1 }
 0x22c   : > { %v2452_v41 = vpop.f32.mrb[13].mxu1 }
 0x22d   : > { %v6609_v54 = vpop.f32.mrb[14].mxu1  ;;  %v6766_v31 = vpop.f32.mrb[0].mxu0 }
 0x22e   : > { %v2455_v0 = vpop.f32.mrb[15].mxu1  ;;  %v8854_v6 = vadd.f32 %v6766_v31, %v6596_v4  ;;  %v5175_v1 = vpop.f32.mrb[1].mxu0 }
 0x22f   : > { %v8856_v38 = vadd.f32 %v5175_v1, %v2404_v29  ;;  %v6767_v12 = vpop.f32.mrb[2].mxu0 }
 0x230   : > { %v8858_v43 = vadd.f32 %v6767_v12, %v6597_v21  ;;  %v5178_v19 = vpop.f32.mrb[3].mxu0 }
 0x231   : > { %v8867_v5 = vadd.f32 %v5178_v19, %v2407_v37 }
 0x232   : > { %v6250_v49 = vpack.c.bf16 %v8858_v43, %v8854_v6 }
 0x233   : > { %v6245_v18 = vpack.c.bf16 %v8867_v5, %v8856_v38  ;;  %v5494_v16 = vadd.f32 %v8867_v5, %v8856_v38 }
 0x234   : > { %6322 = vst [vmem:[%s8865_s21 + $0x8] sm:$0xff] %v6250_v49  }
 0x235   : > { %6246 = vst [vmem:[%s8865_s21] sm:$0xff] %v6245_v18   ;;  %v5495_v30 = vadd.f32 %v8854_v6, %v5494_v16  ;;  %v6770_v10 = vpop.f32.mrb[4].mxu0 }
 0x236   : > { %v8878_v63 = vadd.f32 %v6770_v10, %v6600_v48  ;;  %v5191_v24 = vpop.f32.mrb[5].mxu0 }
 0x237   : > { %v8880_v62 = vadd.f32 %v5191_v24, %v2420_v46  ;;  %v5496_v11 = vadd.f32 %v8858_v43, %v5495_v30  ;;  %v6771_v42 = vpop.f32.mrb[6].mxu0 }
 0x238   : > { %v8883_v51 = vadd.f32 %v6771_v42, %v6601_v53  ;;  %v5194_v39 = vpop.f32.mrb[7].mxu0 }
 0x239   : > { %v5497_v61 = vadd.f32 %v8880_v62, %v5496_v11  ;;  %v8886_v17 = vadd.f32 %v5194_v39, %v2423_v55 }
 0x23a   : > { %v6260_v28 = vpack.c.bf16 %v8883_v51, %v8878_v63 }
 0x23b   : > { %v6255_v33 = vpack.c.bf16 %v8886_v17, %v8880_v62  ;;  %v5498_v35 = vadd.f32 %v8886_v17, %v5497_v61 }
 0x23c   : > { %6324 = vst [vmem:[%s8865_s21 + $0x18] sm:$0xff] %v6260_v28  }
 0x23d   : > { %6323 = vst [vmem:[%s8865_s21 + $0x10] sm:$0xff] %v6255_v33   ;;  %v5499_v8 = vadd.f32 %v8878_v63, %v5498_v35  ;;  %v6774_v44 = vpop.f32.mrb[8].mxu0 }
 0x23e   : > { %v8896_v15 = vadd.f32 %v6774_v44, %v6604_v60  ;;  %v5207_v50 = vpop.f32.mrb[9].mxu0 }
 0x23f   : > { %v8898_v22 = vadd.f32 %v5207_v50, %v2436_v27  ;;  %v5500_v36 = vadd.f32 %v8883_v51, %v5499_v8  ;;  %v6775_v47 = vpop.f32.mrb[10].mxu0 }
 0x240   : > { %v8901_v40 = vadd.f32 %v6775_v47, %v6605_v13  ;;  %v5210_v23 = vpop.f32.mrb[11].mxu0 }
 0x241   : > { %v5501_v32 = vadd.f32 %v8898_v22, %v5500_v36  ;;  %v8904_v59 = vadd.f32 %v5210_v23, %v2439_v9 }
 0x242   : > { %v6270_v56 = vpack.c.bf16 %v8901_v40, %v8896_v15 }
 0x243   : > { %v6265_v2 = vpack.c.bf16 %v8904_v59, %v8898_v22  ;;  %v5502_v14 = vadd.f32 %v8904_v59, %v5501_v32 }
 0x244   : > { %6326 = vst [vmem:[%s8865_s21 + $0x28] sm:$0xff] %v6270_v56  }
 0x245   : > { %6325 = vst [vmem:[%s8865_s21 + $0x20] sm:$0xff] %v6265_v2   ;;  %v5503_v7 = vadd.f32 %v8896_v15, %v5502_v14  ;;  %v6778_v58 = vpop.f32.mrb[12].mxu0 }
 0x246   : > { %v8914_v34 = vadd.f32 %v6778_v58, %v6608_v3  ;;  %v5223_v45 = vpop.f32.mrb[13].mxu0 }
 0x247   : > { %v8916_v26 = vadd.f32 %v5223_v45, %v2452_v41  ;;  %v5504_v57 = vadd.f32 %v8901_v40, %v5503_v7  ;;  %v6779_v20 = vpop.f32.mrb[14].mxu0 }
 0x248   : > { %v8919_v25 = vadd.f32 %v6779_v20, %v6609_v54  ;;  %v5226_v52 = vpop.f32.mrb[15].mxu0 }
 0x249   : > { %v5505_v4 = vadd.f32 %v8916_v26, %v5504_v57  ;;  %v8922_v29 = vadd.f32 %v5226_v52, %v2455_v0 }
 0x24a   : > { %v6280_v21 = vpack.c.bf16 %v8919_v25, %v8914_v34 }
 0x24b   : > { %v6275_v37 = vpack.c.bf16 %v8922_v29, %v8916_v26  ;;  %v5506_v48 = vadd.f32 %v8922_v29, %v5505_v4 }
 0x24c   : > { %6328 = vst [vmem:[%s8865_s21 + $0x38] sm:$0xff] %v6280_v21  }
 0x24d   : > { %6327 = vst [vmem:[%s8865_s21 + $0x30] sm:$0xff] %v6275_v37   ;;  %v5507_v46 = vadd.f32 %v8914_v34, %v5506_v48  ;;  %v6782_v53 = vpop.f32.mrb[16].mxu0 }
 0x24e   : > { %v5239_v55 = vpop.f32.mrb[17].mxu0 }
 0x24f   : > { %v5508_v60 = vadd.f32 %v8919_v25, %v5507_v46  ;;  %v6783_v27 = vpop.f32.mrb[18].mxu0 }
 0x250   : > { %v5242_v9 = vpop.f32.mrb[19].mxu0 }
 0x253   : > { %v6646_v13 = vpop.f32.mrb[16].mxu1 }
 0x254   : > { %v3198_v3 = vpop.f32.mrb[17].mxu1  ;;  %v8933_v41 = vadd.f32 %v6782_v53, %v6646_v13 }
 0x255   : > { %v6647_v54 = vpop.f32.mrb[18].mxu1  ;;  %v8935_v0 = vadd.f32 %v5239_v55, %v3198_v3  ;;  %v6786_v18 = vpop.f32.mrb[20].mxu0 }
 0x256   : > { %v3201_v31 = vpop.f32.mrb[19].mxu1  ;;  %v8937_v1 = vadd.f32 %v6783_v27, %v6647_v54  ;;  %v5255_v10 = vpop.f32.mrb[21].mxu0 }
 0x257   : > { %v5509_v12 = vadd.f32 %v8935_v0, %v5508_v60  ;;  %v8940_v19 = vadd.f32 %v5242_v9, %v3201_v31  ;;  %v6787_v24 = vpop.f32.mrb[22].mxu0 }
 0x258   : > { %v6290_v49 = vpack.c.bf16 %v8937_v1, %v8933_v41  ;;  %v5258_v39 = vpop.f32.mrb[23].mxu0 }
 0x259   : > { %v6285_v16 = vpack.c.bf16 %v8940_v19, %v8935_v0  ;;  %v5510_v30 = vadd.f32 %v8940_v19, %v5509_v12 }
 0x25a   : > { %6330 = vst [vmem:[%s8865_s21 + $0x48] sm:$0xff] %v6290_v49  }
 0x25b   : > { %6329 = vst [vmem:[%s8865_s21 + $0x40] sm:$0xff] %v6285_v16   ;;  %v5511_v11 = vadd.f32 %v8933_v41, %v5510_v30  ;;  %v6650_v42 = vpop.f32.mrb[20].mxu1 }
 0x25c   : > { %v3214_v61 = vpop.f32.mrb[21].mxu1  ;;  %v8950_v28 = vadd.f32 %v6786_v18, %v6650_v42 }
 0x25d   : > { %v6651_v33 = vpop.f32.mrb[22].mxu1  ;;  %v8952_v35 = vadd.f32 %v5255_v10, %v3214_v61  ;;  %v5512_v8 = vadd.f32 %v8937_v1, %v5511_v11  ;;  %v6790_v32 = vpop.f32.mrb[24].mxu0 }
 0x25e   : > { %v3217_v44 = vpop.f32.mrb[23].mxu1  ;;  %v8955_v50 = vadd.f32 %v6787_v24, %v6651_v33  ;;  %v5271_v14 = vpop.f32.mrb[25].mxu0 }
 0x25f   : > { %v5513_v36 = vadd.f32 %v8952_v35, %v5512_v8  ;;  %v8958_v47 = vadd.f32 %v5258_v39, %v3217_v44  ;;  %v6791_v7 = vpop.f32.mrb[26].mxu0 }
 0x260   : > { %v6300_v23 = vpack.c.bf16 %v8955_v50, %v8950_v28  ;;  %v5274_v57 = vpop.f32.mrb[27].mxu0 }
 0x261   : > { %v6295_v56 = vpack.c.bf16 %v8958_v47, %v8952_v35  ;;  %v5514_v2 = vadd.f32 %v8958_v47, %v5513_v36 }
 0x262   : > { %6332 = vst [vmem:[%s8865_s21 + $0x58] sm:$0xff] %v6300_v23  }
 0x263   : > { %6331 = vst [vmem:[%s8865_s21 + $0x50] sm:$0xff] %v6295_v56   ;;  %v5515_v58 = vadd.f32 %v8950_v28, %v5514_v2  ;;  %v6654_v45 = vpop.f32.mrb[24].mxu1 }
 0x264   : > { %v3230_v20 = vpop.f32.mrb[25].mxu1  ;;  %v6822_v52 = vadd.f32 %v6790_v32, %v6654_v45 }
 0x265   : > { %v6655_v4 = vpop.f32.mrb[26].mxu1  ;;  %v6823_v21 = vadd.f32 %v5271_v14, %v3230_v20  ;;  %v5516_v37 = vadd.f32 %v8955_v50, %v5515_v58  ;;  %v6794_v27 = vpop.f32.mrb[28].mxu0 }
 0x266   : > { %v3233_v48 = vpop.f32.mrb[27].mxu1  ;;  %v6824_v46 = vadd.f32 %v6791_v7, %v6655_v4  ;;  %v5287_v3 = vpop.f32.mrb[29].mxu0 }
 0x267   : > { %v5517_v53 = vadd.f32 %v6823_v21, %v5516_v37  ;;  %v6825_v55 = vadd.f32 %v5274_v57, %v3233_v48  ;;  %v6795_v54 = vpop.f32.mrb[30].mxu0 }
 0x268   : > { %v6310_v60 = vpack.c.bf16 %v6824_v46, %v6822_v52  ;;  %v5290_v49 = vpop.f32.mrb[31].mxu0 }
 0x269   : > { %v6305_v13 = vpack.c.bf16 %v6825_v55, %v6823_v21  ;;  %v5518_v9 = vadd.f32 %v6825_v55, %v5517_v53 }
 0x26a   : > { %6334 = vst [vmem:[%s8865_s21 + $0x68] sm:$0xff] %v6310_v60  }
 0x26b   : > { %6333 = vst [vmem:[%s8865_s21 + $0x60] sm:$0xff] %v6305_v13   ;;  %v5519_v31 = vadd.f32 %v6822_v52, %v5518_v9  ;;  %v6658_v12 = vpop.f32.mrb[28].mxu1 }
 0x26c   : > { %v3246_v18 = vpop.f32.mrb[29].mxu1  ;;  %v6826_v16 = vadd.f32 %v6794_v27, %v6658_v12 }
 0x26d   : > { %v6659_v30 = vpop.f32.mrb[30].mxu1  ;;  %v6827_v10 = vadd.f32 %v5287_v3, %v3246_v18  ;;  %v5520_v24 = vadd.f32 %v6824_v46, %v5519_v31 }
 0x26e   : > { %v3249_v11 = vpop.f32.mrb[31].mxu1  ;;  %v6828_v42 = vadd.f32 %v6795_v54, %v6659_v30 }
 0x26f   : > { %v5521_v39 = vadd.f32 %v6827_v10, %v5520_v24  ;;  %v6829_v61 = vadd.f32 %v5290_v49, %v3249_v11 }
 0x270   : > { %v6320_v33 = vpack.c.bf16 %v6828_v42, %v6826_v16 }
 0x271   : > { %v6315_v8 = vpack.c.bf16 %v6829_v61, %v6827_v10  ;;  %v5522_v44 = vadd.f32 %v6829_v61, %v5521_v39 }
 0x272   : > { %6336 = vst [vmem:[%s8865_s21 + $0x78] sm:$0xff] %v6320_v33  }
 0x273   : > { %6335 = vst [vmem:[%s8865_s21 + $0x70] sm:$0xff] %v6315_v8   ;;  %v5523_v36 = vadd.f32 %v6826_v16, %v5522_v44 }
 0x275   : > { %v5524_v23 = vadd.f32 %v6828_v42, %v5523_v36 }
 0x277   : > { %v5525_v32 = vrot.slane %v5524_v23, 4 }
 0x279   : > { %v5526_v56 = vadd.f32 %v5525_v32, %v5524_v23 }
 0x27b   : > { %v5527_v2 = vrot.slane %v5526_v56, 2 }
 0x27d   : > { %v5528_v14 = vadd.f32 %v5527_v2, %v5526_v56 }
 0x27f   : > { %v5529_v7 = vrot.slane %v5528_v14, 1 }
 0x281   : > { %v5530_v58 = vadd.f32 %v5529_v7, %v5528_v14 }
 0x283   : > { %5633 = vst [vmem:[%s211_s24] sm:$0x1] %v5530_v58  ;;  %v5531_v45 = vmul.f32 0.00390625, %v5530_v58 }
 0x285   : > { %v5544_v57 = vsub.f32 %v8916_v26, %v5531_v45  ;;  %v5545_v20 = vsub.f32 %v8922_v29, %v5531_v45  ;;  %v5546_v4 = vsub.f32 %v8914_v34, %v5531_v45  ;;  %v5547_v37 = vsub.f32 %v8919_v25, %v5531_v45 }
 0x286   : > { %v5548_v48 = vsub.f32 %v8935_v0, %v5531_v45  ;;  %v5549_v53 = vsub.f32 %v8940_v19, %v5531_v45  ;;  %v5550_v60 = vsub.f32 %v8933_v41, %v5531_v45  ;;  %v5551_v27 = vsub.f32 %v8937_v1, %v5531_v45 }
 0x287   : > { %v5552_v13 = vsub.f32 %v8952_v35, %v5531_v45  ;;  %v8987_v9 = vsub.f32 %v8958_v47, %v5531_v45  ;;  %v8990_v26 = vsub.f32 %v8950_v28, %v5531_v45  ;;  %v8993_v34 = vsub.f32 %v8955_v50, %v5531_v45 }
 0x288   : > { %v8995_v25 = vsub.f32 %v6823_v21, %v5531_v45  ;;  %v8997_v29 = vsub.f32 %v6825_v55, %v5531_v45  ;;  %v8999_v0 = vsub.f32 %v6822_v52, %v5531_v45  ;;  %v9001_v41 = vsub.f32 %v6824_v46, %v5531_v45 }
 0x289   : > { %v9003_v1 = vsub.f32 %v6827_v10, %v5531_v45  ;;  %v9005_v19 = vsub.f32 %v6829_v61, %v5531_v45  ;;  %v9007_v35 = vsub.f32 %v6826_v16, %v5531_v45  ;;  %v9009_v47 = vsub.f32 %v6828_v42, %v5531_v45 }
 0x28a   : > { %v5532_v28 = vsub.f32 %v8856_v38, %v5531_v45  ;;  %v5533_v50 = vsub.f32 %v8867_v5, %v5531_v45  ;;  %v5534_v21 = vsub.f32 %v8854_v6, %v5531_v45  ;;  %v5535_v52 = vsub.f32 %v8858_v43, %v5531_v45 }
 0x28b   : > { %v5536_v46 = vsub.f32 %v8880_v62, %v5531_v45  ;;  %v5537_v12 = vsub.f32 %v8886_v17, %v5531_v45  ;;  %v5538_v16 = vsub.f32 %v8878_v63, %v5531_v45  ;;  %v5539_v5 = vsub.f32 %v8883_v51, %v5531_v45 }
 0x28c   : > { %v5564_v55 = vmul.f32 %v5532_v28, %v5532_v28  ;;  %v5565_v3 = vmul.f32 %v5533_v50, %v5533_v50  ;;  %v5566_v54 = vmul.f32 %v5534_v21, %v5534_v21  ;;  %v5567_v49 = vmul.f32 %v5535_v52, %v5535_v52 }
 0x28d   : > { %v5568_v30 = vmul.f32 %v5536_v46, %v5536_v46  ;;  %v5569_v10 = vmul.f32 %v5537_v12, %v5537_v12  ;;  %v5540_v24 = vsub.f32 %v8898_v22, %v5531_v45  ;;  %v5570_v11 = vmul.f32 %v5538_v16, %v5538_v16 }
 0x28e   : > { %v5596_v31 = vadd.f32 %v5565_v3, %v5564_v55  ;;  %v5541_v62 = vsub.f32 %v8904_v59, %v5531_v45  ;;  %v5571_v42 = vmul.f32 %v5539_v5, %v5539_v5  ;;  %v5542_v17 = vsub.f32 %v8896_v15, %v5531_v45 }
 0x28f   : > { %v5572_v61 = vmul.f32 %v5540_v24, %v5540_v24  ;;  %v5543_v63 = vsub.f32 %v8901_v40, %v5531_v45  ;;  %v5576_v56 = vmul.f32 %v5544_v57, %v5544_v57  ;;  %v5577_v2 = vmul.f32 %v5545_v20, %v5545_v20 }
 0x290   : > { %v5597_v18 = vadd.f32 %v5596_v31, %v5566_v54  ;;  %v5573_v8 = vmul.f32 %v5541_v62, %v5541_v62  ;;  %v5574_v36 = vmul.f32 %v5542_v17, %v5542_v17  ;;  %v5578_v7 = vmul.f32 %v5546_v4, %v5546_v4 }
 0x291   : > { %v5575_v23 = vmul.f32 %v5543_v63, %v5543_v63  ;;  %v5579_v58 = vmul.f32 %v5547_v37, %v5547_v37  ;;  %v5580_v50 = vmul.f32 %v5548_v48, %v5548_v48  ;;  %v5581_v21 = vmul.f32 %v5549_v53, %v5549_v53 }
 0x292   : > { %v5598_v38 = vadd.f32 %v5597_v18, %v5567_v49  ;;  %v5582_v3 = vmul.f32 %v5550_v60, %v5550_v60  ;;  %v5583_v45 = vmul.f32 %v5551_v27, %v5551_v27  ;;  %v5584_v46 = vmul.f32 %v5552_v13, %v5552_v13 }
 0x293   : > { %v5585_v57 = vmul.f32 %v8987_v9, %v8987_v9  ;;  %v5586_v20 = vmul.f32 %v8990_v26, %v8990_v26  ;;  %v5587_v37 = vmul.f32 %v8993_v34, %v8993_v34  ;;  %v5588_v53 = vmul.f32 %v8995_v25, %v8995_v25 }
 0x294   : > { %v5599_v6 = vadd.f32 %v5598_v38, %v5568_v30  ;;  %v5589_v27 = vmul.f32 %v8997_v29, %v8997_v29  ;;  %v5590_v9 = vmul.f32 %v8999_v0, %v8999_v0  ;;  %v5591_v26 = vmul.f32 %v9001_v41, %v9001_v41 }
 0x295   : > { %v5592_v34 = vmul.f32 %v9003_v1, %v9003_v1  ;;  %v5593_v25 = vmul.f32 %v9005_v19, %v9005_v19  ;;  %v5594_v29 = vmul.f32 %v9007_v35, %v9007_v35  ;;  %v5595_v0 = vmul.f32 %v9009_v47, %v9009_v47 }
 0x296   : > { %v5600_v43 = vadd.f32 %v5599_v6, %v5569_v10 }
 0x298   : > { %v5601_v39 = vadd.f32 %v5600_v43, %v5570_v11 }
 0x29a   : > { %v5602_v33 = vadd.f32 %v5601_v39, %v5571_v42 }
 0x29c   : > { %v5603_v44 = vadd.f32 %v5602_v33, %v5572_v61 }
 0x29e   : > { %v5604_v51 = vadd.f32 %v5603_v44, %v5573_v8 }
 0x2a0   : > { %v5605_v32 = vadd.f32 %v5604_v51, %v5574_v36 }
 0x2a2   : > { %v5606_v22 = vadd.f32 %v5605_v32, %v5575_v23 }
 0x2a4   : > { %v5607_v14 = vadd.f32 %v5606_v22, %v5576_v56 }
 0x2a6   : > { %v5608_v59 = vadd.f32 %v5607_v14, %v5577_v2 }
 0x2a8   : > { %v5609_v28 = vadd.f32 %v5608_v59, %v5578_v7 }
 0x2aa   : > { %v5610_v15 = vadd.f32 %v5609_v28, %v5579_v58 }
 0x2ac   : > { %v5611_v55 = vadd.f32 %v5610_v15, %v5580_v50 }
 0x2ae   : > { %v5612_v40 = vadd.f32 %v5611_v55, %v5581_v21 }
 0x2b0   : > { %v5613_v52 = vadd.f32 %v5612_v40, %v5582_v3 }
 0x2b2   : > { %v5614_v54 = vadd.f32 %v5613_v52, %v5583_v45 }
 0x2b4   : > { %v5615_v31 = vadd.f32 %v5614_v54, %v5584_v46 }
 0x2b6   : > { %v5616_v4 = vadd.f32 %v5615_v31, %v5585_v57 }
 0x2b8   : > { %v5617_v48 = vadd.f32 %v5616_v4, %v5586_v20 }
 0x2ba   : > { %v5618_v60 = vadd.f32 %v5617_v48, %v5587_v37 }
 0x2bc   : > { %v5619_v13 = vadd.f32 %v5618_v60, %v5588_v53 }
 0x2be   : > { %v5620_v12 = vadd.f32 %v5619_v13, %v5589_v27 }
 0x2c0   : > { %v5621_v49 = vadd.f32 %v5620_v12, %v5590_v9 }
 0x2c2   : > { %v5622_v18 = vadd.f32 %v5621_v49, %v5591_v26 }
 0x2c4   : > { %v5623_v16 = vadd.f32 %v5622_v18, %v5592_v34 }
 0x2c6   : > { %v5624_v30 = vadd.f32 %v5623_v16, %v5593_v25 }
 0x2c8   : > { %v5625_v38 = vadd.f32 %v5624_v30, %v5594_v29 }
 0x2ca   : > { %v5626_v5 = vadd.f32 %v5625_v38, %v5595_v0 }
 0x2cc   : > { %v5627_v41 = vrot.slane %v5626_v5, 4 }
 0x2ce   : > { %v5628_v10 = vadd.f32 %v5627_v41, %v5626_v5 }
 0x2d0   : > { %v5629_v6 = vrot.slane %v5628_v10, 2 }
 0x2d2   : > { %v5630_v24 = vadd.f32 %v5629_v6, %v5628_v10 }
 0x2d4   : > { %v5631_v11 = vrot.slane %v5630_v24, 1 }
 0x2d6   : > { %v5632_v1 = vadd.f32 %v5631_v11, %v5630_v24 }
 0x2d8   : > { %5634 = vst [vmem:[%s214_s27] sm:$0x1] %v5632_v1 }
 0x2d9 PF: > { %s15_s15 = sadd.s32 1, %s7177_s15  }
 0x2da   : > { %p12_p4 = scmp.ge.s32.totalorder %s15_s15, 4  }
 0x2dc   :  { %14 = sbr.rel (!%p12_p4) target bundleno = 1 (0x1), region = 93 }

// kernel: double_conv_forward.4
= control target key start
LH: loop header
LB: loop body
LE: loop exit
PB: predicated region body
PF: predicated region fallthrough
CT: control target
= control target key end

     0   :  { %s7402_s21 = smov 0   ;;  %s9380_s0 = inlined_call_operand.vmem [shape: bf16[2,16,16,128], index: 0, kind: input, shape index: {}]   ;;  %s9381_s1 = inlined_call_operand.vmem [shape: f32[1,16], index: 1, kind: input, shape index: {}]   ;;  %s9382_s2 = inlined_call_operand.vmem [shape: f32[1,16], index: 2, kind: input, shape index: {}]   ;;  %s9383_s3 = inlined_call_operand.vmem [shape: bf16[9,16,128], index: 3, kind: input, shape index: {}]   ;;  %s9384_s4 = inlined_call_operand.vmem [shape: bf16[2,16,16,128], index: 4, kind: output, shape index: {0}]   ;;  %s9385_s5 = inlined_call_operand.vmem [shape: f32[2,1,128], index: 5, kind: output, shape index: {1}]   ;;  %s9386_s6 = inlined_call_operand.vmem [shape: f32[2,1,128], index: 6, kind: output, shape index: {2}]  }
   0x1 LB: > { %s5872_s22 = sadd.s32 4294967295, %s7364_s21   ;;  %p5876_p0 = scmp.ge.s32.totalorder %s7364_s21, 1  ;;  %s7364_s21 = sphi %s7402_s21, %s17_s21  }
   0x2   : > { %p217_p1 = scmp.lt.s32.totalorder %s7364_s21, 3 }
   0x4   : > { %p218_p2 = pnand %p5876_p0, %p217_p1 }
   0x6   : > { %221 = sbr.rel (%p218_p2) target bundleno = 768 (0x300), region = 36 }
   0xd   : > { %v7260_v0 = vld [vmem:[%s9383_s3 + $0x8] sm:$0xff]   ;;  %vm460_vm0 = vcmask 125952   ;;  %v7261_v1 = vld [vmem:[%s9383_s3 + $0x20] sm:$0xff]   ;;  %v7366_v2 = vmov 0   ;;  %vm463_vm1 = vcmask 122880   ;;  %p253_p3 = scmp.lt.s32.totalorder %s5872_s22, 1 }
   0xe   : > { %6687 = vmatprep.subr.bf16.mxu1 %v7260_v0  ;;  %461 = vst.msk [vmem:[#allocation2] sm:$0xf] %vm460_vm0, %v7366_v2  ;;  %462 = vst.msk [vmem:[#allocation2 + $0x4] sm:$0xf] %vm460_vm0, %v7366_v2  ;;  %6823 = vmatprep.subr.bf16.mxu0 %v7261_v1  ;;  %vm923_vm2 = vsmask.f32 3328 }
   0xf   : > { %466 = vst.msk [vmem:[#allocation2 + $0xcc] sm:$0xf] %vm460_vm0, %v7366_v2  ;;  %467 = vst.msk [vmem:[#allocation2 + $0xd0] sm:$0xf] %vm460_vm0, %v7366_v2  ;;  %6688 = vmatpush3.bf16.msra.mxu1 %v7260_v0  ;;  %6824 = vmatpush3.bf16.msra.mxu0 %v7261_v1  ;;  %vm924_vm3 = vsmask.f32 7440 }
  0x10   : > { %464 = vst.msk [vmem:[#allocation2 + $0x8] sm:$0x1] %vm463_vm1, %v7366_v2  ;;  %468 = vst.msk [vmem:[#allocation2 + $0xd4] sm:$0x1] %vm463_vm1, %v7366_v2  ;;  %s9485_s22 = smov (!%p253_p3, %s5872_s22), 1  ;;  %v7427_v3 = vld [vmem:[%s9383_s3] sm:$0xff]  }
  0x11   : > { %v7432_v4 = vld [vmem:[%s9383_s3 + $0x28] sm:$0xff]   ;;  %s6326_s7 = sshll.u32 %s9485_s22, 7  ;;  %6721 = vmatprep.subr.bf16.mxu1 %v7427_v3  ;;  %v7446_v5 = vld [vmem:[%s9381_s1] ss:$0 sm:$0xff]  ;;  %vm1367_vm4 = vcmask 130048   ;;  %vm613_vm5 = vcmask 1040384   ;;  %vm7461_vm7 = vmor %vm923_vm2, %vm924_vm3  ;;  %s265_s16 = scalar_lea.vmem %s9385_s5, %s9485_s22 }
  0x12   : > { %s7441_s10 = scalar_lea.vmem %s9380_s0, %s6326_s7  ;;  %6857 = vmatprep.subr.bf16.mxu0 %v7432_v4  ;;  %v7455_v23 = vld [vmem:[%s9382_s2] ss:$0 sm:$0xff]  ;;  %vm614_vm6 = vsmask.f32 256  ;;  %vm1920_vm9 = vcmask 1042432   ;;  %vm1921_vm10 = vcmask 1046532   ;;  %s9204_s14 = scalar_lea.vmem %s9384_s4, %s6326_s7 }
  0x13   : > { %v6361_v8 = vld [vmem:[%s7441_s10] sm:$0xff]   ;;  %v6504_v17 = vld [vmem:[%s7441_s10 + $0x8] sm:$0xff]   ;;  %v6505_v18 = vld [vmem:[%s7441_s10 + $0x10] sm:$0xff]   ;;  %s268_s19 = scalar_lea.vmem %s9386_s6, %s9485_s22 }
  0x14   : > { %v6362_v15 = vunpack.c.l.bf16 %v6361_v8  ;;  %v6363_v16 = vunpack.c.h.bf16 %v6361_v8  ;;  %v6366_v27 = vunpack.c.l.bf16 %v6504_v17  ;;  %v6367_v30 = vunpack.c.h.bf16 %v6504_v17  ;;  %v6506_v41 = vld [vmem:[%s7441_s10 + $0x18] sm:$0xff]   ;;  %v6507_v50 = vld [vmem:[%s7441_s10 + $0x20] sm:$0xff]   ;;  %v7482_v59 = vld [vmem:[%s7441_s10 + $0x28] sm:$0xff]  }
  0x15   : > { %v873_v6 = vld [vmem:[#allocation2] sm:$0xf]  ;;  %v874_v7 = vld [vmem:[#allocation2 + $0x4] sm:$0xf]  ;;  %v6370_v31 = vunpack.c.l.bf16 %v6505_v18  ;;  %v6371_v36 = vunpack.c.h.bf16 %v6505_v18  ;;  %v6374_v57 = vunpack.c.l.bf16 %v6506_v41  ;;  %v6375_v58 = vunpack.c.h.bf16 %v6506_v41  ;;  %vm7491_vm8 = vmand %vm613_vm5, %vm614_vm6 }
  0x16   : > { %v927_v10 = vshrl.u32 %v873_v6, 16  ;;  %v930_v11 = vshll.u32 %v873_v6, 16  ;;  %v936_v12 = vshll.u32 %v874_v7, 16  ;;  %v940_v13 = vshrl.u32 %v874_v7, 16  ;;  %vm7783_vm11 = vmor %vm1920_vm9, %vm1921_vm10 }
  0x17   : > { %v907_v9 = vld [vmem:[#allocation2 + $0x8] sm:$0x1]  ;;  %v342_v25 = vmul.f32 %v6362_v15, %v7446_v5  ;;  %v343_v26 = vmul.f32 %v6363_v16, %v7446_v5  ;;  %v344_v35 = vmul.f32 %v6366_v27, %v7446_v5  ;;  %v345_v39 = vmul.f32 %v6367_v30, %v7446_v5 }
  0x18   : > { %v946_v14 = vshll.u32 %v907_v9, 16  ;;  %v929_v19 = vrot.slane %v927_v10, 4  ;;  %v932_v20 = vrot.slane %v930_v11, 5  ;;  %v938_v21 = vrot.slane %v936_v12, 5 }
  0x19   : > { %v942_v22 = vrot.slane %v940_v13, 4  ;;  %v380_v33 = vadd.f32 %v7455_v23, %v342_v25  ;;  %v381_v34 = vadd.f32 %v7455_v23, %v343_v26  ;;  %v346_v40 = vmul.f32 %v6370_v31, %v7446_v5 }
  0x1a   : > { %v948_v24 = vrot.slane %v946_v14, 5  ;;  %v933_v28 = vor.u32 %v932_v20, %v929_v19  ;;  %v382_v44 = vadd.f32 %v7455_v23, %v344_v35  ;;  %v347_v45 = vmul.f32 %v6371_v36, %v7446_v5 }
  0x1b   : > { %v943_v29 = vor.u32 %v942_v22, %v938_v21  ;;  %v412_v42 = vmax.f32 %v380_v33, 0.0  ;;  %v413_v43 = vmax.f32 %v381_v34, 0.0  ;;  %v383_v48 = vadd.f32 %v7455_v23, %v345_v39 }
  0x1c   : > { %v934_v37 = vrot.slane %v933_v28, 4  ;;  %v384_v49 = vadd.f32 %v7455_v23, %v346_v40  ;;  %v414_v53 = vmax.f32 %v382_v44, 0.0  ;;  %v385_v54 = vadd.f32 %v7455_v23, %v347_v45 }
  0x1d   : > { %v944_v38 = vrot.slane %v943_v29, 4  ;;  %v444_v52 = vpack.c.bf16 %v413_v43, %v412_v42  ;;  %v415_v55 = vmax.f32 %v383_v48, 0.0  ;;  %v6378_v63 = vunpack.c.l.bf16 %v6507_v50  ;;  %v6509_v42 = vld [vmem:[%s7441_s10 + $0x30] sm:$0xff]  }
  0x1e   : > { %v939_v46 = vsel %vm7461_vm7, %v934_v37, %v938_v21  ;;  %v416_v56 = vmax.f32 %v384_v49, 0.0  ;;  %v417_v62 = vmax.f32 %v385_v54, 0.0  ;;  %v348_v1 = vmul.f32 %v6374_v57, %v7446_v5 }
  0x1f   : > { %v949_v47 = vsel %vm7461_vm7, %v944_v38, %v948_v24  ;;  %v470_v60 = vshrl.u32 %v444_v52, 16  ;;  %v473_v61 = vshll.u32 %v444_v52, 16  ;;  %v445_v0 = vpack.c.bf16 %v415_v55, %v414_v53 }
  0x20   : > { %v5933_v51 = vcombine.low %v939_v46, %v949_v47  ;;  %v349_v2 = vmul.f32 %v6375_v58, %v7446_v5  ;;  %v6379_v6 = vunpack.c.h.bf16 %v6507_v50  ;;  %v446_v8 = vpack.c.bf16 %v417_v62, %v416_v56 }
  0x21   : > { %v472_v7 = vrot.slane %v470_v60, 7  ;;  %v350_v9 = vmul.f32 %v6378_v63, %v7446_v5  ;;  %v6382_v10 = vunpack.c.l.bf16 %v7482_v59  ;;  %v477_v12 = vshrl.u32 %v445_v0, 16 }
  0x22   : > { %6689 = vmatprep.mubr.msk.bf16.mxu1 %vm1367_vm4, %v5933_v51  ;;  %v480_v13 = vshll.u32 %v445_v0, 16  ;;  %v386_v14 = vadd.f32 %v7455_v23, %v348_v1  ;;  %v387_v15 = vadd.f32 %v7455_v23, %v349_v2  ;;  %v484_v18 = vshrl.u32 %v446_v8, 16  ;;  %v7519_v51 = vld [vmem:[%s7441_s10 + $0x38] sm:$0xff]  }
  0x23   : > { %v475_v16 = vor.u32 %v473_v61, %v472_v7  ;;  %v632_v17 = vsel %vm7491_vm8, %v472_v7, 0  ;;  %v487_v19 = vshll.u32 %v446_v8, 16  ;;  %v479_v21 = vrot.slane %v477_v12, 7 }
  0x24   : > { %v5885_v20 = vcombine.low %v632_v17, %v632_v17  ;;  %v418_v22 = vmax.f32 %v386_v14, 0.0  ;;  %v419_v24 = vmax.f32 %v387_v15, 0.0  ;;  %v486_v26 = vrot.slane %v484_v18, 7 }
  0x25   : > { %v616_v25 = vsel %vm7491_vm8, 0, %v475_v16  ;;  %v351_v27 = vmul.f32 %v6379_v6, %v7446_v5  ;;  %v388_v28 = vadd.f32 %v7455_v23, %v350_v9  ;;  %v482_v31 = vor.u32 %v480_v13, %v479_v21 }
  0x26   : > { %v5883_v29 = vcombine.low %v616_v25, %v616_v25  ;;  %v5884_v30 = vcombine.high %v616_v25, %v616_v25  ;;  %827 = vst.msk [vmem:[#allocation2 + $0x14] sm:$0x1] %vm463_vm1, %v5885_v20  ;;  %v633_v33 = vsel %vm7491_vm8, %v479_v21, 0  ;;  %v489_v35 = vor.u32 %v487_v19, %v486_v26 }
  0x27   : > { %v5888_v34 = vcombine.low %v633_v33, %v633_v33  ;;  %v634_v36 = vsel %vm7491_vm8, %v486_v26, 0  ;;  %v447_v37 = vpack.c.bf16 %v419_v24, %v418_v22  ;;  %v617_v38 = vsel %vm7491_vm8, 0, %v482_v31 }
  0x28   : > { %825 = vst.msk [vmem:[#allocation2 + $0xc] sm:$0xf] %vm460_vm0, %v5883_v29  ;;  %826 = vst.msk [vmem:[#allocation2 + $0x10] sm:$0xf] %vm460_vm0, %v5884_v30  ;;  %v5891_v39 = vcombine.low %v634_v36, %v634_v36  ;;  %v389_v40 = vadd.f32 %v7455_v23, %v351_v27  ;;  %v420_v41 = vmax.f32 %v388_v28, 0.0  ;;  %v5886_v43 = vcombine.low %v617_v38, %v617_v38 }
  0x29   : > { %v5887_v44 = vcombine.high %v617_v38, %v617_v38  ;;  %830 = vst.msk [vmem:[#allocation2 + $0x20] sm:$0x1] %vm463_vm1, %v5888_v34  ;;  %v618_v45 = vsel %vm7491_vm8, 0, %v489_v35  ;;  %v491_v46 = vshrl.u32 %v447_v37, 16  ;;  %v494_v49 = vshll.u32 %v447_v37, 16 }
  0x2a   : > { %v5889_v47 = vcombine.low %v618_v45, %v618_v45  ;;  %v5890_v48 = vcombine.high %v618_v45, %v618_v45  ;;  %833 = vst.msk [vmem:[#allocation2 + $0x2c] sm:$0x1] %vm463_vm1, %v5891_v39  ;;  %v421_v50 = vmax.f32 %v389_v40, 0.0  ;;  %v6383_v53 = vunpack.c.h.bf16 %v7482_v59 }
  0x2b   : > { %828 = vst.msk [vmem:[#allocation2 + $0x18] sm:$0xf] %vm460_vm0, %v5886_v43  ;;  %829 = vst.msk [vmem:[#allocation2 + $0x1c] sm:$0xf] %vm460_vm0, %v5887_v44  ;;  %v493_v52 = vrot.slane %v491_v46, 7  ;;  %v352_v54 = vmul.f32 %v6382_v10, %v7446_v5  ;;  %v6386_v55 = vunpack.c.l.bf16 %v6509_v42  ;;  %v6387_v57 = vunpack.c.h.bf16 %v6509_v42 }
  0x2c   : > { %831 = vst.msk [vmem:[#allocation2 + $0x24] sm:$0xf] %vm460_vm0, %v5889_v47  ;;  %832 = vst.msk [vmem:[#allocation2 + $0x28] sm:$0xf] %vm460_vm0, %v5890_v48  ;;  %v7527_v56 = vpack.c.bf16 %v421_v50, %v420_v41  ;;  %v353_v62 = vmul.f32 %v6383_v53, %v7446_v5  ;;  %v6390_v59 = vunpack.c.l.bf16 %v7519_v51  ;;  %v6391_v63 = vunpack.c.h.bf16 %v7519_v51 }
  0x2d   : > { %v908_v58 = vld [vmem:[#allocation2 + $0x14] sm:$0x1]  ;;  %v635_v61 = vsel %vm7491_vm8, %v493_v52, 0  ;;  %v7538_v6 = vor.u32 %v494_v49, %v493_v52  ;;  %v7541_v12 = vadd.f32 %v7455_v23, %v352_v54  ;;  %v7547_v14 = vmul.f32 %v6386_v55, %v7446_v5 }
  0x2e   : > { %v7529_v60 = vld [vmem:[#allocation2 + $0x14] sm:$0x1]  ;;  %v970_v0 = vshll.u32 %v908_v58, 16  ;;  %v5894_v10 = vcombine.low %v635_v61, %v635_v61  ;;  %v7544_v13 = vadd.f32 %v7455_v23, %v353_v62  ;;  %v7553_v24 = vmul.f32 %v6387_v57, %v7446_v5 }
  0x2f   : > { %v2763_v1 = vshll.u32 %v7529_v60, 16  ;;  %v3494_v2 = vrot.slane %v7529_v60, 5  ;;  %v875_v7 = vld [vmem:[#allocation2 + $0xc] sm:$0xf]  ;;  %v876_v8 = vld [vmem:[#allocation2 + $0x10] sm:$0xf] }
  0x30   : > { %v2695_v9 = vld [vmem:[#allocation2 + $0xc] sm:$0xf]  ;;  %v951_v15 = vshrl.u32 %v875_v7, 16  ;;  %v954_v16 = vshll.u32 %v875_v7, 16  ;;  %v960_v17 = vshll.u32 %v876_v8, 16  ;;  %v964_v18 = vshrl.u32 %v876_v8, 16 }
  0x31   : > { %v7549_v19 = vld [vmem:[#allocation2 + $0x10] sm:$0xf]  ;;  %v972_v20 = vrot.slane %v970_v0, 5  ;;  %v2744_v21 = vshrl.u32 %v2695_v9, 16  ;;  %v2747_v22 = vshll.u32 %v2695_v9, 16  ;;  %v2765_v38 = vrot.slane %v2763_v1, 5 }
  0x32   : > { %836 = vst.msk [vmem:[#allocation2 + $0x38] sm:$0x1] %vm463_vm1, %v5894_v10  ;;  %v953_v25 = vrot.slane %v951_v15, 4  ;;  %v956_v26 = vrot.slane %v954_v16, 5  ;;  %v962_v27 = vrot.slane %v960_v17, 5  ;;  %v966_v28 = vrot.slane %v964_v18, 4 }
  0x33   : > { %v2698_v29 = vld [vmem:[#allocation2 + $0x18] sm:$0xf]  ;;  %v2746_v30 = vrot.slane %v2744_v21, 4  ;;  %v2749_v31 = vrot.slane %v2747_v22, 5  ;;  %v2753_v33 = vshll.u32 %v7549_v19, 16  ;;  %v2757_v34 = vshrl.u32 %v7549_v19, 16 }
  0x34   : > { %v7557_v35 = vld [vmem:[#allocation2 + $0x1c] sm:$0xf]  ;;  %v957_v36 = vor.u32 %v956_v26, %v953_v25  ;;  %v967_v37 = vor.u32 %v966_v28, %v962_v27  ;;  %v3491_v39 = vrot.slane %v7549_v19, 5  ;;  %v2768_v43 = vshrl.u32 %v2698_v29, 16  ;;  %v7561_v50 = vld [vmem:[#allocation2 + $0x20] sm:$0x1] }
  0x35   : > { %v2750_v40 = vor.u32 %v2749_v31, %v2746_v30  ;;  %v2755_v41 = vrot.slane %v2753_v33, 5  ;;  %v2759_v42 = vrot.slane %v2757_v34, 4  ;;  %v2771_v46 = vshll.u32 %v2698_v29, 16  ;;  %v877_v61 = vld [vmem:[#allocation2 + $0x18] sm:$0xf] }
  0x36   : > { %v958_v44 = vrot.slane %v957_v36, 4  ;;  %v968_v45 = vrot.slane %v967_v37, 4  ;;  %v2777_v47 = vshll.u32 %v7557_v35, 16  ;;  %v2770_v52 = vrot.slane %v2768_v43, 4  ;;  %v878_v16 = vld [vmem:[#allocation2 + $0x1c] sm:$0xf] }
  0x37   : > { %v2751_v48 = vrot.slane %v2750_v40, 4  ;;  %v2760_v49 = vor.u32 %v2759_v42, %v2755_v41  ;;  %v2781_v53 = vshrl.u32 %v7557_v35, 16  ;;  %v2773_v57 = vrot.slane %v2771_v46, 5  ;;  %v879_v25 = vld [vmem:[#allocation2 + $0x24] sm:$0xf] }
  0x38   : > { %v963_v54 = vsel %vm7461_vm7, %v958_v44, %v962_v27  ;;  %v973_v55 = vsel %vm7461_vm7, %v968_v45, %v972_v20  ;;  %v2779_v58 = vrot.slane %v2777_v47, 5  ;;  %v2787_v9 = vshll.u32 %v7561_v50, 16  ;;  %v909_v20 = vld [vmem:[#allocation2 + $0x20] sm:$0x1]  ;;  %v880_v30 = vld [vmem:[#allocation2 + $0x28] sm:$0xf] }
  0x39   : > { %v5934_v62 = vcombine.low %v963_v54, %v973_v55  ;;  %v2756_v0 = vsel %vm7461_vm7, %v2751_v48, %v2755_v41  ;;  %v2761_v1 = vrot.slane %v2760_v49, 4  ;;  %v2783_v7 = vrot.slane %v2781_v53, 4  ;;  %v910_v37 = vld [vmem:[#allocation2 + $0x2c] sm:$0x1]  ;;  %v7586_v53 = vld [vmem:[#allocation2 + $0x28] sm:$0xf] }
  0x3a   : > { %v2774_v8 = vor.u32 %v2773_v57, %v2770_v52  ;;  %v3498_v10 = vrot.slane %v7557_v35, 5  ;;  %v3501_v15 = vrot.slane %v7561_v50, 5  ;;  %v975_v21 = vshrl.u32 %v877_v61, 16  ;;  %v7591_v54 = vld [vmem:[%s9383_s3 + $0x30] sm:$0xff]   ;;  %v7844_v35 = vld [vmem:[%s9382_s2] ss:$0 sm:$0xff] }
  0x3b   : > { %6690 = vmatmul.mubr.msk.bf16.vlgmr.msra.gmra.mrb[0].mxu1 %vm1367_vm4, %v5934_v62  ;;  %v2766_v17 = vsel %vm7461_vm7, %v2761_v1, %v2765_v38  ;;  %v2784_v18 = vor.u32 %v2783_v7, %v2779_v58  ;;  %v978_v22 = vshll.u32 %v877_v61, 16  ;;  %v2789_v28 = vrot.slane %v2787_v9, 5  ;;  %v2701_v38 = vld [vmem:[#allocation2 + $0x24] sm:$0xf]  ;;  %v7593_v62 = vld [vmem:[#allocation2 + $0x2c] sm:$0x1] }
  0x3c   : > { %v6087_v26 = vcombine.low %v2756_v0, %v2766_v17  ;;  %6722 = vmatpush3.bf16.msra.mxu1 %v7427_v3  ;;  %v2775_v27 = vrot.slane %v2774_v8, 4  ;;  %v7579_v29 = vrot.slane %v3498_v10, 4  ;;  %v977_v33 = vrot.slane %v975_v21, 4 }
  0x3d   : > { %v2785_v31 = vrot.slane %v2784_v18, 4  ;;  %v980_v34 = vrot.slane %v978_v22, 5  ;;  %v984_v36 = vshll.u32 %v878_v16, 16  ;;  %v988_v41 = vshrl.u32 %v878_v16, 16 }
  0x3e   : > { %6825 = vmatprep.mubr.msk.bf16.mxu0 %vm1367_vm4, %v6087_v26  ;;  %v2780_v40 = vsel %vm7461_vm7, %v2775_v27, %v2779_v58  ;;  %v994_v3 = vshll.u32 %v909_v20, 16  ;;  %v999_v42 = vshrl.u32 %v879_v25, 16  ;;  %v1002_v46 = vshll.u32 %v879_v25, 16 }
  0x3f   : > { %v2790_v43 = vsel %vm7461_vm7, %v2785_v31, %v2789_v28  ;;  %v981_v44 = vor.u32 %v980_v34, %v977_v33  ;;  %v986_v45 = vrot.slane %v984_v36, 5  ;;  %v990_v48 = vrot.slane %v988_v41, 4  ;;  %v7608_v36 = vld [vmem:[#allocation2 + $0x38] sm:$0x1] }
  0x40   : > { %v6088_v47 = vcombine.low %v2780_v40, %v2790_v43  ;;  %v996_v49 = vrot.slane %v994_v3, 5  ;;  %v1001_v52 = vrot.slane %v999_v42, 4  ;;  %v1004_v57 = vrot.slane %v1002_v46, 5 }
  0x41   : > { %v982_v55 = vrot.slane %v981_v44, 4  ;;  %v1008_v58 = vshll.u32 %v880_v30, 16  ;;  %v1012_v61 = vshrl.u32 %v880_v30, 16  ;;  %v991_v0 = vor.u32 %v990_v48, %v986_v45 }
  0x42   : > { %6826 = vmatmul.mubr.msk.bf16.vlgmr.msra.gmra.mrb[0].mxu0 %vm1367_vm4, %v6088_v47  ;;  %v1018_v1 = vshll.u32 %v910_v37, 16  ;;  %v2792_v7 = vshrl.u32 %v2701_v38, 16  ;;  %v2795_v8 = vshll.u32 %v2701_v38, 16  ;;  %v1005_v16 = vor.u32 %v1004_v57, %v1001_v52  ;;  %v911_v37 = vld [vmem:[#allocation2 + $0x38] sm:$0x1] }
  0x43   : > { %6858 = vmatpush3.bf16.msra.mxu0 %v7432_v4  ;;  %v987_v9 = vsel %vm7461_vm7, %v982_v55, %v986_v45  ;;  %v1010_v17 = vrot.slane %v1008_v58, 5  ;;  %v1014_v18 = vrot.slane %v1012_v61, 4  ;;  %v992_v20 = vrot.slane %v991_v0, 4  ;;  %v7621_v58 = vld [vmem:[%s7441_s10 + $0x40] sm:$0xff]  }
  0x44   : > { %v1020_v21 = vrot.slane %v1018_v1, 5  ;;  %v2794_v22 = vrot.slane %v2792_v7, 4  ;;  %v2797_v25 = vrot.slane %v2795_v8, 5  ;;  %6891 = vmatprep.subr.bf16.mxu0 %v7591_v54  ;;  %v1006_v26 = vrot.slane %v1005_v16, 4 }
  0x45   : > { %v1015_v27 = vor.u32 %v1014_v18, %v1010_v17  ;;  %v2801_v28 = vshll.u32 %v7586_v53, 16  ;;  %v2805_v30 = vshrl.u32 %v7586_v53, 16  ;;  %v997_v4 = vsel %vm7461_vm7, %v992_v20, %v996_v49 }
  0x46   : > { %v2798_v31 = vor.u32 %v2797_v25, %v2794_v22  ;;  %v2811_v33 = vshll.u32 %v7593_v62, 16  ;;  %v619_v34 = vsel %vm7491_vm8, 0, %v7538_v6  ;;  %v5935_v38 = vcombine.low %v987_v9, %v997_v4 }
  0x47   : > { %v1011_v40 = vsel %vm7461_vm7, %v1006_v26, %v1010_v17  ;;  %v1016_v41 = vrot.slane %v1015_v27, 4  ;;  %v2803_v3 = vrot.slane %v2801_v28, 5  ;;  %v2807_v43 = vrot.slane %v2805_v30, 4 }
  0x48   : > { %v2799_v42 = vrot.slane %v2798_v31, 4  ;;  %v2813_v44 = vrot.slane %v2811_v33, 5  ;;  %v5892_v45 = vcombine.low %v619_v34, %v619_v34  ;;  %6693 = vmatprep.mubr.msk.bf16.mxu1 %vm1367_vm4, %v5935_v38  ;;  %v5893_v6 = vcombine.high %v619_v34, %v619_v34 }
  0x49   : > { %v1021_v46 = vsel %vm7461_vm7, %v1016_v41, %v1020_v21  ;;  %v2835_v47 = vshll.u32 %v7608_v36, 16  ;;  %v1042_v48 = vshll.u32 %v911_v37, 16  ;;  %v2808_v55 = vor.u32 %v2807_v43, %v2803_v3 }
  0x4a   : > { %v5936_v49 = vcombine.low %v1011_v40, %v1021_v46  ;;  %v2804_v52 = vsel %vm7461_vm7, %v2799_v42, %v2803_v3  ;;  %834 = vst.msk [vmem:[#allocation2 + $0x30] sm:$0xf] %vm460_vm0, %v5892_v45  ;;  %v498_v57 = vshrl.u32 %v7527_v56, 16  ;;  %835 = vst.msk [vmem:[#allocation2 + $0x34] sm:$0xf] %vm460_vm0, %v5893_v6  ;;  %v501_v1 = vshll.u32 %v7527_v56, 16 }
  0x4b   : > { %v7624_v61 = vrot.slane %v2835_v47, 5  ;;  %v7626_v0 = vrot.slane %v1042_v48, 5  ;;  %v422_v7 = vmax.f32 %v7541_v12, 0.0  ;;  %v2809_v8 = vrot.slane %v2808_v55, 4 }
  0x4c   : > { %6694 = vmatmul.mubr.msk.bf16.gmra.mrb[4].mxu1 %vm1367_vm4, %v5936_v49  ;;  %v500_v9 = vrot.slane %v498_v57, 7  ;;  %v423_v16 = vmax.f32 %v7544_v13, 0.0  ;;  %v392_v17 = vadd.f32 %v7455_v23, %v7547_v14  ;;  %v393_v18 = vadd.f32 %v7455_v23, %v7553_v24 }
  0x4d   : > { %v356_v20 = vmul.f32 %v6390_v59, %v7446_v5  ;;  %v357_v56 = vmul.f32 %v6391_v63, %v7446_v5  ;;  %v6394_v12 = vunpack.c.l.bf16 %v7621_v58  ;;  %v2814_v21 = vsel %vm7461_vm7, %v2809_v8, %v2813_v44 }
  0x4e   : > { %v503_v13 = vor.u32 %v501_v1, %v500_v9  ;;  %v636_v14 = vsel %vm7491_vm8, %v500_v9, 0  ;;  %v449_v22 = vpack.c.bf16 %v423_v16, %v422_v7  ;;  %v6089_v25 = vcombine.low %v2804_v52, %v2814_v21 }
  0x4f   : > { %v5897_v24 = vcombine.low %v636_v14, %v636_v14  ;;  %v424_v26 = vmax.f32 %v392_v17, 0.0  ;;  %v425_v27 = vmax.f32 %v393_v18, 0.0  ;;  %v7650_v63 = vadd.f32 %v7455_v23, %v356_v20 }
  0x50   : > { %v620_v59 = vsel %vm7491_vm8, 0, %v503_v13  ;;  %v505_v28 = vshrl.u32 %v449_v22, 16  ;;  %v508_v51 = vshll.u32 %v449_v22, 16  ;;  %6829 = vmatprep.mubr.msk.bf16.mxu0 %vm1367_vm4, %v6089_v25  ;;  %v7657_v37 = vadd.f32 %v7455_v23, %v357_v56 }
  0x51   : > { %v2704_v30 = vld [vmem:[#allocation2 + $0x30] sm:$0xf]  ;;  %v5895_v31 = vcombine.low %v620_v59, %v620_v59  ;;  %v5896_v33 = vcombine.high %v620_v59, %v620_v59  ;;  %839 = vst.msk [vmem:[#allocation2 + $0x44] sm:$0x1] %vm463_vm1, %v5897_v24  ;;  %v7654_v34 = vpack.c.bf16 %v425_v27, %v424_v26  ;;  %v7659_v38 = vld [vmem:[#allocation2 + $0x34] sm:$0xf]  ;;  %v6395_v42 = vunpack.c.h.bf16 %v7621_v58 }
  0x52   : > { %v881_v4 = vld [vmem:[#allocation2 + $0x30] sm:$0xf]  ;;  %v2816_v40 = vshrl.u32 %v2704_v30, 16  ;;  %v2819_v41 = vshll.u32 %v2704_v30, 16  ;;  %v882_v3 = vld [vmem:[#allocation2 + $0x34] sm:$0xf]  ;;  %v7663_v43 = vmul.f32 %v6394_v12, %v7446_v5 }
  0x53   : > { %v2825_v44 = vshll.u32 %v7659_v38, 16  ;;  %v2829_v45 = vshrl.u32 %v7659_v38, 16  ;;  %v1023_v46 = vshrl.u32 %v881_v4, 16  ;;  %v1026_v6 = vshll.u32 %v881_v4, 16  ;;  %837 = vst.msk [vmem:[#allocation2 + $0x3c] sm:$0xf] %vm460_vm0, %v5895_v31 }
  0x54   : > { %838 = vst.msk [vmem:[#allocation2 + $0x40] sm:$0xf] %vm460_vm0, %v5896_v33  ;;  %v2818_v47 = vrot.slane %v2816_v40, 4  ;;  %v2821_v48 = vrot.slane %v2819_v41, 5  ;;  %v1032_v49 = vshll.u32 %v882_v3, 16  ;;  %v1036_v52 = vshrl.u32 %v882_v3, 16 }
  0x55   : > { %v2827_v55 = vrot.slane %v2825_v44, 5  ;;  %v2831_v57 = vrot.slane %v2829_v45, 4  ;;  %v1025_v1 = vrot.slane %v1023_v46, 4  ;;  %v1028_v7 = vrot.slane %v1026_v6, 5 }
  0x56   : > { %v2822_v8 = vor.u32 %v2821_v48, %v2818_v47  ;;  %v1034_v9 = vrot.slane %v1032_v49, 5  ;;  %v1038_v16 = vrot.slane %v1036_v52, 4  ;;  %v507_v17 = vrot.slane %v505_v28, 7 }
  0x57   : > { %v2832_v18 = vor.u32 %v2831_v57, %v2827_v55  ;;  %v1029_v20 = vor.u32 %v1028_v7, %v1025_v1  ;;  %v512_v56 = vshrl.u32 %v7654_v34, 16  ;;  %v515_v12 = vshll.u32 %v7654_v34, 16 }
  0x58   : > { %v2823_v21 = vrot.slane %v2822_v8, 4  ;;  %v1039_v13 = vor.u32 %v1038_v16, %v1034_v9  ;;  %v912_v14 = vld [vmem:[#allocation2 + $0x44] sm:$0x1]  ;;  %v510_v25 = vor.u32 %v508_v51, %v507_v17  ;;  %v637_v24 = vsel %vm7491_vm8, %v507_v17, 0 }
  0x59   : > { %v7671_v22 = vld [vmem:[#allocation2 + $0x44] sm:$0x1]  ;;  %v2833_v26 = vrot.slane %v2832_v18, 4  ;;  %v1030_v27 = vrot.slane %v1029_v20, 4  ;;  %v1066_v59 = vshll.u32 %v912_v14, 16  ;;  %v5900_v41 = vcombine.low %v637_v24, %v637_v24 }
  0x5a   : > { %v2859_v28 = vshll.u32 %v7671_v22, 16  ;;  %v2828_v30 = vsel %vm7461_vm7, %v2823_v21, %v2827_v55  ;;  %v1040_v4 = vrot.slane %v1039_v13, 4  ;;  %v883_v31 = vld [vmem:[#allocation2 + $0x3c] sm:$0xf]  ;;  %v621_v40 = vsel %vm7491_vm8, 0, %v510_v25 }
  0x5b   : > { %v884_v33 = vld [vmem:[#allocation2 + $0x40] sm:$0xf]  ;;  %v2838_v51 = vsel %vm7461_vm7, %v2833_v26, %v7624_v61  ;;  %v1035_v3 = vsel %vm7461_vm7, %v1030_v27, %v1034_v9  ;;  %v1047_v44 = vshrl.u32 %v883_v31, 16  ;;  %v1050_v45 = vshll.u32 %v883_v31, 16  ;;  %v2707_v46 = vld [vmem:[#allocation2 + $0x3c] sm:$0xf] }
  0x5c   : > { %v6090_v6 = vcombine.low %v2828_v30, %v2838_v51  ;;  %v1045_v47 = vsel %vm7461_vm7, %v1040_v4, %v7626_v0  ;;  %v1056_v48 = vshll.u32 %v884_v33, 16  ;;  %v1060_v49 = vshrl.u32 %v884_v33, 16  ;;  %v7688_v52 = vld [vmem:[#allocation2 + $0x40] sm:$0xf]  ;;  %842 = vst.msk [vmem:[#allocation2 + $0x50] sm:$0x1] %vm463_vm1, %v5900_v41 }
  0x5d   : > { %v5937_v55 = vcombine.low %v1035_v3, %v1045_v47  ;;  %v1049_v57 = vrot.slane %v1047_v44, 4  ;;  %v1052_v61 = vrot.slane %v1050_v45, 5  ;;  %v1068_v1 = vrot.slane %v1066_v59, 5 }
  0x5e   : > { %6830 = vmatmul.mubr.msk.bf16.gmra.mrb[4].mxu0 %vm1367_vm4, %v6090_v6  ;;  %v1058_v7 = vrot.slane %v1056_v48, 5  ;;  %v1062_v8 = vrot.slane %v1060_v49, 4  ;;  %v2840_v9 = vshrl.u32 %v2707_v46, 16  ;;  %v2843_v16 = vshll.u32 %v2707_v46, 16 }
  0x5f   : > { %6697 = vmatprep.mubr.msk.bf16.mxu1 %vm1367_vm4, %v5937_v55  ;;  %v1053_v17 = vor.u32 %v1052_v61, %v1049_v57  ;;  %v2849_v0 = vshll.u32 %v7688_v52, 16  ;;  %v2853_v18 = vshrl.u32 %v7688_v52, 16  ;;  %v2861_v20 = vrot.slane %v2859_v28, 5  ;;  %v7723_v57 = vld [vmem:[%s7441_s10 + $0x48] sm:$0xff]  }
  0x60   : > { %v1063_v21 = vor.u32 %v1062_v8, %v1058_v7  ;;  %v2842_v13 = vrot.slane %v2840_v9, 4  ;;  %v2845_v14 = vrot.slane %v2843_v16, 5  ;;  %v5898_v25 = vcombine.low %v621_v40, %v621_v40 }
  0x61   : > { %v1054_v24 = vrot.slane %v1053_v17, 4  ;;  %v2851_v26 = vrot.slane %v2849_v0, 5  ;;  %v2855_v27 = vrot.slane %v2853_v18, 4  ;;  %v5899_v59 = vcombine.high %v621_v40, %v621_v40 }
  0x62   : > { %v1064_v30 = vrot.slane %v1063_v21, 4  ;;  %v2846_v4 = vor.u32 %v2845_v14, %v2842_v13  ;;  %840 = vst.msk [vmem:[#allocation2 + $0x48] sm:$0xf] %vm460_vm0, %v5898_v25  ;;  %v514_v31 = vrot.slane %v512_v56, 7  ;;  %v426_v33 = vmax.f32 %v7650_v63, 0.0  ;;  %v7265_v63 = vld [vmem:[%s9383_s3 + $0x10] sm:$0xff]  }
  0x63   : > { %v1059_v41 = vsel %vm7461_vm7, %v1054_v24, %v1058_v7  ;;  %v2856_v51 = vor.u32 %v2855_v27, %v2851_v26  ;;  %841 = vst.msk [vmem:[#allocation2 + $0x4c] sm:$0xf] %vm460_vm0, %v5899_v59  ;;  %v7700_v28 = vld [vmem:[#allocation2 + $0x50] sm:$0x1]  ;;  %v427_v44 = vmax.f32 %v7657_v37, 0.0  ;;  %v359_v40 = vmul.f32 %v6395_v42, %v7446_v5  ;;  %6755 = vmatprep.subr.bf16.mxu1 %v7265_v63 }
  0x64   : > { %v913_v3 = vld [vmem:[#allocation2 + $0x50] sm:$0x1]  ;;  %v1069_v56 = vsel %vm7461_vm7, %v1064_v30, %v1068_v1  ;;  %v2847_v45 = vrot.slane %v2846_v4, 4  ;;  %v2883_v46 = vshll.u32 %v7700_v28, 16  ;;  %v517_v37 = vor.u32 %v515_v12, %v514_v31 }
  0x65   : > { %v1090_v6 = vshll.u32 %v913_v3, 16  ;;  %v5938_v47 = vcombine.low %v1059_v41, %v1069_v56  ;;  %v2857_v48 = vrot.slane %v2856_v51, 4  ;;  %v638_v5 = vsel %vm7491_vm8, %v514_v31, 0  ;;  %v7733_v7 = vld [vmem:[%s7441_s10 + $0x50] sm:$0xff]  }
  0x66   : > { %v2852_v58 = vsel %vm7461_vm7, %v2847_v45, %v2851_v26  ;;  %v7718_v42 = vrot.slane %v2883_v46, 5  ;;  %v5903_v55 = vcombine.low %v638_v5, %v638_v5  ;;  %v622_v12 = vsel %vm7491_vm8, 0, %v517_v37 }
  0x67   : > { %v7720_v49 = vrot.slane %v1090_v6, 5  ;;  %6698 = vmatmul.mubr.msk.bf16.gmra.mrb[8].mxu1 %vm1367_vm4, %v5938_v47  ;;  %v2862_v34 = vsel %vm7461_vm7, %v2857_v48, %v2861_v20  ;;  %v451_v61 = vpack.c.bf16 %v427_v44, %v426_v33  ;;  %v396_v1 = vadd.f32 %v7455_v23, %v7663_v43 }
  0x68   : > { %v6091_v8 = vcombine.low %v2852_v58, %v2862_v34  ;;  %v5901_v9 = vcombine.low %v622_v12, %v622_v12  ;;  %v5902_v16 = vcombine.high %v622_v12, %v622_v12  ;;  %845 = vst.msk [vmem:[#allocation2 + $0x5c] sm:$0x1] %vm463_vm1, %v5903_v55  ;;  %v397_v17 = vadd.f32 %v7455_v23, %v359_v40 }
  0x69   : > { %v2710_v0 = vld [vmem:[#allocation2 + $0x48] sm:$0xf]  ;;  %v519_v21 = vshrl.u32 %v451_v61, 16  ;;  %v522_v20 = vshll.u32 %v451_v61, 16  ;;  %v6398_v13 = vunpack.c.l.bf16 %v7723_v57  ;;  %v6399_v14 = vunpack.c.h.bf16 %v7723_v57 }
  0x6a   : > { %v885_v18 = vld [vmem:[#allocation2 + $0x48] sm:$0xf]  ;;  %6833 = vmatprep.mubr.msk.bf16.mxu0 %vm1367_vm4, %v6091_v8  ;;  %v7740_v43 = vld [vmem:[#allocation2 + $0x4c] sm:$0xf]  ;;  %v2864_v25 = vshrl.u32 %v2710_v0, 16  ;;  %v2867_v24 = vshll.u32 %v2710_v0, 16  ;;  %v6402_v23 = vunpack.c.l.bf16 %v7733_v7  ;;  %v6403_v27 = vunpack.c.h.bf16 %v7733_v7 }
  0x6b   : > { %v886_v26 = vld [vmem:[#allocation2 + $0x4c] sm:$0xf]  ;;  %843 = vst.msk [vmem:[#allocation2 + $0x54] sm:$0xf] %vm460_vm0, %v5901_v9  ;;  %844 = vst.msk [vmem:[#allocation2 + $0x58] sm:$0xf] %vm460_vm0, %v5902_v16 }
  0x6c   : > { %v2873_v59 = vshll.u32 %v7740_v43, 16  ;;  %v2877_v30 = vshrl.u32 %v7740_v43, 16  ;;  %v1071_v4 = vshrl.u32 %v885_v18, 16  ;;  %v1074_v31 = vshll.u32 %v885_v18, 16 }
  0x6d   : > { %v2866_v33 = vrot.slane %v2864_v25, 4  ;;  %v2869_v41 = vrot.slane %v2867_v24, 5  ;;  %v1080_v51 = vshll.u32 %v886_v26, 16  ;;  %v1084_v3 = vshrl.u32 %v886_v26, 16 }
  0x6e   : > { %v2875_v44 = vrot.slane %v2873_v59, 5  ;;  %v2879_v40 = vrot.slane %v2877_v30, 4  ;;  %v1073_v63 = vrot.slane %v1071_v4, 4  ;;  %v1076_v56 = vrot.slane %v1074_v31, 5 }
  0x6f   : > { %v2870_v45 = vor.u32 %v2869_v41, %v2866_v33  ;;  %v1082_v46 = vrot.slane %v1080_v51, 5  ;;  %v1086_v6 = vrot.slane %v1084_v3, 4  ;;  %v521_v47 = vrot.slane %v519_v21, 7  ;;  %v914_v5 = vld [vmem:[#allocation2 + $0x5c] sm:$0x1] }
  0x70   : > { %v2880_v48 = vor.u32 %v2879_v40, %v2875_v44  ;;  %v1077_v37 = vor.u32 %v1076_v56, %v1073_v63  ;;  %v7748_v58 = vld [vmem:[#allocation2 + $0x5c] sm:$0x1]  ;;  %v428_v55 = vmax.f32 %v396_v1, 0.0  ;;  %v429_v34 = vmax.f32 %v397_v17, 0.0 }
  0x71   : > { %v2871_v12 = vrot.slane %v2870_v45, 4  ;;  %v1087_v61 = vor.u32 %v1086_v6, %v1082_v46  ;;  %v1114_v8 = vshll.u32 %v914_v5, 16  ;;  %v2907_v9 = vshll.u32 %v7748_v58, 16 }
  0x72   : > { %v2881_v16 = vrot.slane %v2880_v48, 4  ;;  %v1078_v0 = vrot.slane %v1077_v37, 4  ;;  %v887_v18 = vld [vmem:[#allocation2 + $0x54] sm:$0xf]  ;;  %v888_v25 = vld [vmem:[#allocation2 + $0x58] sm:$0xf]  ;;  %v524_v24 = vor.u32 %v522_v20, %v521_v47  ;;  %v7751_v26 = vpack.c.bf16 %v429_v34, %v428_v55 }
  0x73   : > { %v2876_v21 = vsel %vm7461_vm7, %v2871_v12, %v2875_v44  ;;  %v1088_v59 = vrot.slane %v1087_v61, 4  ;;  %v1095_v30 = vshrl.u32 %v887_v18, 16  ;;  %v1098_v4 = vshll.u32 %v887_v18, 16  ;;  %v2713_v41 = vld [vmem:[#allocation2 + $0x54] sm:$0xf] }
  0x74   : > { %v2886_v1 = vsel %vm7461_vm7, %v2881_v16, %v7718_v42  ;;  %v1083_v17 = vsel %vm7461_vm7, %v1078_v0, %v1082_v46  ;;  %v1104_v31 = vshll.u32 %v888_v25, 16  ;;  %v1108_v33 = vshrl.u32 %v888_v25, 16  ;;  %v7760_v20 = vld [vmem:[#allocation2 + $0x58] sm:$0xf] }
  0x75   : > { %v6092_v51 = vcombine.low %v2876_v21, %v2886_v1  ;;  %v1093_v3 = vsel %vm7461_vm7, %v1088_v59, %v7720_v49  ;;  %v1097_v44 = vrot.slane %v1095_v30, 4  ;;  %v1100_v40 = vrot.slane %v1098_v4, 5  ;;  %v3425_v59 = vld [vmem:[#allocation2 + $0xc] sm:$0xe] }
  0x76   : > { %v5939_v63 = vcombine.low %v1083_v17, %v1093_v3  ;;  %v1106_v56 = vrot.slane %v1104_v31, 5  ;;  %v1110_v45 = vrot.slane %v1108_v33, 4  ;;  %v1116_v6 = vrot.slane %v1114_v8, 5  ;;  %v3426_v17 = vld [vmem:[#allocation2 + $0x18] sm:$0xe] }
  0x77   : > { %6834 = vmatmul.mubr.msk.bf16.gmra.mrb[8].mxu0 %vm1367_vm4, %v6092_v51  ;;  %v1101_v42 = vor.u32 %v1100_v40, %v1097_v44  ;;  %v2888_v46 = vshrl.u32 %v2713_v41, 16  ;;  %v2891_v48 = vshll.u32 %v2713_v41, 16  ;;  %v2897_v37 = vshll.u32 %v7760_v20, 16 }
  0x78   : > { %6701 = vmatprep.mubr.msk.bf16.mxu1 %vm1367_vm4, %v5939_v63  ;;  %v1111_v5 = vor.u32 %v1110_v45, %v1106_v56  ;;  %v2901_v55 = vshrl.u32 %v7760_v20, 16  ;;  %v2909_v34 = vrot.slane %v2907_v9, 5  ;;  %v623_v49 = vsel %vm7491_vm8, 0, %v524_v24 }
  0x79   : > { %v1102_v12 = vrot.slane %v1101_v42, 4  ;;  %v2890_v61 = vrot.slane %v2888_v46, 4  ;;  %v2893_v16 = vrot.slane %v2891_v48, 5  ;;  %v2899_v8 = vrot.slane %v2897_v37, 5  ;;  %v7808_v46 = vld [vmem:[%s9381_s1] ss:$0 sm:$0xff] }
  0x7a   : > { %v1112_v0 = vrot.slane %v1111_v5, 4  ;;  %v2903_v18 = vrot.slane %v2901_v55, 4  ;;  %v639_v25 = vsel %vm7491_vm8, %v521_v47, 0  ;;  %v5904_v21 = vcombine.low %v623_v49, %v623_v49  ;;  %v7832_v55 = vld [vmem:[%s7441_s10 + $0x58] sm:$0xff]  }
  0x7b   : > { %v1107_v30 = vsel %vm7461_vm7, %v1102_v12, %v1106_v56  ;;  %v2894_v4 = vor.u32 %v2893_v16, %v2890_v61  ;;  %v5905_v1 = vcombine.high %v623_v49, %v623_v49  ;;  %v5906_v9 = vcombine.low %v639_v25, %v639_v25 }
  0x7c   : > { %v1117_v24 = vsel %vm7461_vm7, %v1112_v0, %v1116_v6  ;;  %v2904_v31 = vor.u32 %v2903_v18, %v2899_v8  ;;  %846 = vst.msk [vmem:[#allocation2 + $0x60] sm:$0xf] %vm460_vm0, %v5904_v21  ;;  %v526_v33 = vshrl.u32 %v7751_v26, 16  ;;  %v529_v41 = vshll.u32 %v7751_v26, 16 }
  0x7d   : > { %v5940_v47 = vcombine.low %v1107_v30, %v1117_v24  ;;  %v2895_v51 = vrot.slane %v2894_v4, 4  ;;  %847 = vst.msk [vmem:[#allocation2 + $0x64] sm:$0xf] %vm460_vm0, %v5905_v1  ;;  %v6120_v3 = vrot.slane %v3425_v59, 9  ;;  %v3493_v56 = vrot.slane %v3491_v39, 4 }
  0x7e   : > { %848 = vst.msk [vmem:[#allocation2 + $0x68] sm:$0x1] %vm463_vm1, %v5906_v9  ;;  %v2905_v44 = vrot.slane %v2904_v31, 4  ;;  %v528_v40 = vrot.slane %v526_v33, 7  ;;  %v6121_v26 = vrot.slane %v3426_v17, 9  ;;  %v7803_v42 = vsel %vm7783_vm11, %v7579_v29, %v3501_v15 }
  0x7f   : > { %6702 = vmatmul.mubr.msk.bf16.gmra.mrb[12].mxu1 %vm1367_vm4, %v5940_v47  ;;  %v2900_v45 = vsel %vm7461_vm7, %v2895_v51, %v2899_v8  ;;  %v7796_v6 = vsel %vm7783_vm11, %v6120_v3, %v3491_v39  ;;  %v360_v19 = vmul.f32 %v7808_v46, %v6398_v13  ;;  %v7821_v15 = vsel %vm7783_vm11, %v3493_v56, %v3494_v2 }
  0x80   : > { %v2910_v39 = vsel %vm7461_vm7, %v2905_v44, %v2909_v34  ;;  %v531_v48 = vor.u32 %v529_v41, %v528_v40  ;;  %v640_v50 = vsel %vm7491_vm8, %v528_v40, 0  ;;  %v6138_v5 = vcombine.low %v7796_v6, %v7821_v15 }
  0x81   : > { %v6093_v29 = vcombine.low %v2900_v45, %v2910_v39  ;;  %v5909_v37 = vcombine.low %v640_v50, %v640_v50  ;;  %v7829_v13 = vsel %vm7783_vm11, %v6121_v26, %v3498_v10  ;;  %v361_v34 = vmul.f32 %v7808_v46, %v6399_v14 }
  0x82   : > { %v624_v60 = vsel %vm7491_vm8, 0, %v531_v48  ;;  %v6139_v2 = vcombine.low %v7829_v13, %v7803_v42  ;;  %v398_v10 = vadd.f32 %v7844_v35, %v360_v19  ;;  %v362_v57 = vmul.f32 %v7808_v46, %v6402_v23 }
  0x83   : > { %6837 = vmatprep.mubr.msk.bf16.mxu0 %vm1367_vm4, %v6093_v29  ;;  %v2716_v49 = vld [vmem:[#allocation2 + $0x60] sm:$0xf]  ;;  %v5907_v61 = vcombine.low %v624_v60, %v624_v60  ;;  %v5908_v16 = vcombine.high %v624_v60, %v624_v60  ;;  %851 = vst.msk [vmem:[#allocation2 + $0x74] sm:$0x1] %vm463_vm1, %v5909_v37  ;;  %v363_v14 = vmul.f32 %v7808_v46, %v6403_v27  ;;  %v6406_v59 = vunpack.c.l.bf16 %v7832_v55 }
  0x84   : > { %v889_v12 = vld [vmem:[#allocation2 + $0x60] sm:$0xf]  ;;  %v7855_v8 = vld [vmem:[#allocation2 + $0x64] sm:$0xf]  ;;  %v2912_v18 = vshrl.u32 %v2716_v49, 16  ;;  %v2915_v25 = vshll.u32 %v2716_v49, 16  ;;  %v399_v21 = vadd.f32 %v7844_v35, %v361_v34  ;;  %v400_v60 = vadd.f32 %v7844_v35, %v362_v57 }
  0x85   : > { %v7857_v0 = vld [vmem:[#allocation2 + $0x68] sm:$0x1]  ;;  %v2921_v30 = vshll.u32 %v7855_v8, 16  ;;  %v2925_v4 = vshrl.u32 %v7855_v8, 16  ;;  %v890_v1 = vld [vmem:[#allocation2 + $0x64] sm:$0xf] }
  0x86   : > { %v2931_v23 = vshll.u32 %v7857_v0, 16  ;;  %v1119_v7 = vshrl.u32 %v889_v12, 16  ;;  %849 = vst.msk [vmem:[#allocation2 + $0x6c] sm:$0xf] %vm460_vm0, %v5907_v61  ;;  %850 = vst.msk [vmem:[#allocation2 + $0x70] sm:$0xf] %vm460_vm0, %v5908_v16 }
  0x87   : > { %v2914_v27 = vrot.slane %v2912_v18, 4  ;;  %v2917_v9 = vrot.slane %v2915_v25, 5  ;;  %v915_v17 = vld [vmem:[#allocation2 + $0x68] sm:$0x1]  ;;  %v1122_v24 = vshll.u32 %v889_v12, 16  ;;  %v1128_v31 = vshll.u32 %v890_v1, 16 }
  0x88   : > { %v2923_v33 = vrot.slane %v2921_v30, 5  ;;  %v2927_v41 = vrot.slane %v2925_v4, 4  ;;  %v2933_v47 = vrot.slane %v2931_v23, 5  ;;  %v1121_v51 = vrot.slane %v1119_v7, 4  ;;  %v3427_v7 = vld [vmem:[#allocation2 + $0x24] sm:$0xe] }
  0x89   : > { %v2918_v3 = vor.u32 %v2917_v9, %v2914_v27  ;;  %v1124_v44 = vrot.slane %v1122_v24, 5  ;;  %v1130_v40 = vrot.slane %v1128_v31, 5  ;;  %v1132_v56 = vshrl.u32 %v890_v1, 16  ;;  %v3428_v31 = vld [vmem:[#allocation2 + $0x30] sm:$0xe] }
  0x8a   : > { %v2928_v26 = vor.u32 %v2927_v41, %v2923_v33  ;;  %v1138_v45 = vshll.u32 %v915_v17, 16  ;;  %v430_v19 = vmax.f32 %v398_v10, 0.0  ;;  %v431_v39 = vmax.f32 %v399_v21, 0.0  ;;  %v916_v37 = vld [vmem:[#allocation2 + $0x74] sm:$0x1] }
  0x8b   : > { %v2919_v48 = vrot.slane %v2918_v3, 4  ;;  %v1125_v50 = vor.u32 %v1124_v44, %v1121_v51  ;;  %v1134_v29 = vrot.slane %v1132_v56, 4  ;;  %v1162_v12 = vshll.u32 %v916_v37, 16 }
  0x8c   : > { %v2929_v34 = vrot.slane %v2928_v26, 4  ;;  %v1140_v49 = vrot.slane %v1138_v45, 5  ;;  %v453_v61 = vpack.c.bf16 %v431_v39, %v430_v19  ;;  %v401_v10 = vadd.f32 %v7844_v35, %v363_v14 }
  0x8d   : > { %v2924_v16 = vsel %vm7461_vm7, %v2919_v48, %v2923_v33  ;;  %v1126_v18 = vrot.slane %v1125_v50, 4  ;;  %v1135_v25 = vor.u32 %v1134_v29, %v1130_v40  ;;  %v7869_v30 = vld [vmem:[#allocation2 + $0x6c] sm:$0xf]  ;;  %v7871_v4 = vld [vmem:[#allocation2 + $0x70] sm:$0xf]  ;;  %v1164_v51 = vrot.slane %v1162_v12, 5 }
  0x8e   : > { %v2934_v21 = vsel %vm7461_vm7, %v2929_v34, %v2933_v47  ;;  %v1143_v57 = vshrl.u32 %v7869_v30, 16  ;;  %v1146_v23 = vshll.u32 %v7869_v30, 16  ;;  %v1152_v1 = vshll.u32 %v7871_v4, 16 }
  0x8f   : > { %v6094_v27 = vcombine.low %v2924_v16, %v2934_v21  ;;  %v1131_v9 = vsel %vm7461_vm7, %v1126_v18, %v1130_v40  ;;  %v1136_v17 = vrot.slane %v1135_v25, 4  ;;  %v1156_v24 = vshrl.u32 %v7871_v4, 16 }
  0x90   : > { %v1145_v33 = vrot.slane %v1143_v57, 4  ;;  %v1148_v14 = vrot.slane %v1146_v23, 5  ;;  %v1154_v41 = vrot.slane %v1152_v1, 5  ;;  %v533_v44 = vshrl.u32 %v453_v61, 16  ;;  %v7906_v57 = vld [vmem:[%s9383_s3 + $0x38] sm:$0xff]  }
  0x91   : > { %6838 = vmatmul.mubr.msk.bf16.gmra.mrb[12].mxu0 %vm1367_vm4, %v6094_v27  ;;  %v1141_v47 = vsel %vm7461_vm7, %v1136_v17, %v1140_v49  ;;  %v1158_v3 = vrot.slane %v1156_v24, 4  ;;  %v536_v56 = vshll.u32 %v453_v61, 16  ;;  %v432_v40 = vmax.f32 %v400_v60, 0.0 }
  0x92   : > { %v5941_v26 = vcombine.low %v1131_v9, %v1141_v47  ;;  %v1149_v45 = vor.u32 %v1148_v14, %v1145_v33  ;;  %6859 = vmatprep.mubr.msk.bf16.mxu0 %vm1367_vm4, %v6138_v5  ;;  %v433_v19 = vmax.f32 %v401_v10, 0.0  ;;  %v535_v48 = vrot.slane %v533_v44, 7  ;;  %v6515_v9 = vld [vmem:[%s7441_s10 + $0x60] sm:$0xff]  }
  0x93   : > { %v1159_v39 = vor.u32 %v1158_v3, %v1154_v41  ;;  %v6122_v50 = vrot.slane %v3427_v7, 9  ;;  %v3505_v29 = vrot.slane %v7586_v53, 5  ;;  %v3508_v49 = vrot.slane %v7593_v62, 5 }
  0x94   : > { %6705 = vmatprep.mubr.msk.bf16.mxu1 %vm1367_vm4, %v5941_v26  ;;  %v1150_v37 = vrot.slane %v1149_v45, 4  ;;  %v454_v34 = vpack.c.bf16 %v433_v19, %v432_v40  ;;  %v6123_v12 = vrot.slane %v3428_v31, 9  ;;  %v538_v16 = vor.u32 %v536_v56, %v535_v48  ;;  %v7936_v26 = vld [vmem:[#allocation2 + $0x48] sm:$0xe] }
  0x95   : > { %v1160_v61 = vrot.slane %v1159_v39, 4  ;;  %v641_v6 = vsel %vm7491_vm8, %v535_v48, 0  ;;  %v3506_v15 = vsel %vm7783_vm11, %v6122_v50, %v3505_v29  ;;  %v3507_v10 = vrot.slane %v3505_v29, 4  ;;  %v7945_v29 = vld [vmem:[%s7441_s10 + $0x68] sm:$0xff]  }
  0x96   : > { %v1155_v5 = vsel %vm7461_vm7, %v1150_v37, %v1154_v41  ;;  %v5912_v53 = vcombine.low %v641_v6, %v641_v6  ;;  %v540_v60 = vshrl.u32 %v454_v34, 16  ;;  %v543_v18 = vshll.u32 %v454_v34, 16 }
  0x97   : > { %v1165_v25 = vsel %vm7461_vm7, %v1160_v61, %v1164_v51  ;;  %v625_v62 = vsel %vm7491_vm8, 0, %v538_v16  ;;  %v3512_v21 = vrot.slane %v7659_v38, 5  ;;  %v3509_v38 = vsel %vm7783_vm11, %v3507_v10, %v3508_v49  ;;  %v3429_v51 = vld [vmem:[#allocation2 + $0x3c] sm:$0xe] }
  0x98   : > { %v5942_v23 = vcombine.low %v1155_v5, %v1165_v25  ;;  %v5910_v1 = vcombine.low %v625_v62, %v625_v62  ;;  %v5911_v7 = vcombine.high %v625_v62, %v625_v62  ;;  %854 = vst.msk [vmem:[#allocation2 + $0x80] sm:$0x1] %vm463_vm1, %v5912_v53  ;;  %v542_v27 = vrot.slane %v540_v60, 7 }
  0x99   : > { %6860 = vmatmul.mubr.msk.bf16.vlgmr.msra.gmra.mrb[0].mxu0 %vm1367_vm4, %v6139_v2  ;;  %v3513_v17 = vsel %vm7783_vm11, %v6123_v12, %v3512_v21  ;;  %v3514_v24 = vrot.slane %v3512_v21, 4  ;;  %v3515_v31 = vrot.slane %v7608_v36, 5  ;;  %v6140_v2 = vcombine.low %v3506_v15, %v3509_v38 }
  0x9a   : > { %6706 = vmatmul.mubr.msk.bf16.gmra.mrb[16].mxu1 %vm1367_vm4, %v5942_v23  ;;  %6892 = vmatpush3.bf16.msra.mxu0 %v7591_v54  ;;  %852 = vst.msk [vmem:[#allocation2 + $0x78] sm:$0xf] %vm460_vm0, %v5910_v1  ;;  %853 = vst.msk [vmem:[#allocation2 + $0x7c] sm:$0xf] %vm460_vm0, %v5911_v7  ;;  %v545_v42 = vor.u32 %v543_v18, %v542_v27  ;;  %v642_v13 = vsel %vm7491_vm8, %v542_v27, 0  ;;  %v6407_v33 = vunpack.c.h.bf16 %v7832_v55  ;;  %v6410_v54 = vunpack.c.l.bf16 %v6515_v9 }
  0x9b   : > { %v5915_v14 = vcombine.low %v642_v13, %v642_v13  ;;  %v3516_v41 = vsel %vm7783_vm11, %v3514_v24, %v3515_v31  ;;  %v364_v36 = vmul.f32 %v7808_v46, %v6406_v59  ;;  %6925 = vmatprep.subr.bf16.mxu0 %v7906_v57  ;;  %6863 = vmatprep.mubr.msk.bf16.mxu0 %vm1367_vm4, %v6140_v2  ;;  %v6411_v56 = vunpack.c.h.bf16 %v6515_v9 }
  0x9c   : > { %v626_v47 = vsel %vm7491_vm8, 0, %v545_v42  ;;  %v6141_v3 = vcombine.low %v3513_v17, %v3516_v41  ;;  %v365_v44 = vmul.f32 %v7808_v46, %v6407_v33  ;;  %v366_v40 = vmul.f32 %v7808_v46, %v6410_v54 }
  0x9d   : > { %v5913_v45 = vcombine.low %v626_v47, %v626_v47  ;;  %v5914_v55 = vcombine.high %v626_v47, %v626_v47  ;;  %857 = vst.msk [vmem:[#allocation2 + $0x8c] sm:$0x1] %vm463_vm1, %v5915_v14  ;;  %v402_v59 = vadd.f32 %v7844_v35, %v364_v36  ;;  %v367_v39 = vmul.f32 %v7808_v46, %v6411_v56 }
  0x9e   : > { %v403_v19 = vadd.f32 %v7844_v35, %v365_v44  ;;  %v6124_v48 = vrot.slane %v3429_v51, 9  ;;  %v3519_v50 = vrot.slane %v7688_v52, 5  ;;  %v404_v49 = vadd.f32 %v7844_v35, %v366_v40 }
  0x9f   : > { %v917_v37 = vld [vmem:[#allocation2 + $0x80] sm:$0x1]  ;;  %855 = vst.msk [vmem:[#allocation2 + $0x84] sm:$0xf] %vm460_vm0, %v5913_v45  ;;  %856 = vst.msk [vmem:[#allocation2 + $0x88] sm:$0xf] %vm460_vm0, %v5914_v55  ;;  %v405_v15 = vadd.f32 %v7844_v35, %v367_v39  ;;  %v6414_v25 = vunpack.c.l.bf16 %v7945_v29 }
  0xa0   : > { %v434_v34 = vmax.f32 %v402_v59, 0.0  ;;  %v3522_v12 = vrot.slane %v7671_v22, 5  ;;  %v6125_v61 = vrot.slane %v7936_v26, 9  ;;  %v1186_v16 = vshll.u32 %v917_v37, 16 }
  0xa1   : > { %v435_v6 = vmax.f32 %v403_v19, 0.0  ;;  %v3520_v52 = vsel %vm7783_vm11, %v6124_v48, %v3519_v50  ;;  %v7955_v5 = vld [vmem:[#allocation2 + $0x78] sm:$0xf]  ;;  %v7957_v53 = vld [vmem:[#allocation2 + $0x7c] sm:$0xf]  ;;  %6864 = vmatmul.mubr.msk.bf16.gmra.mrb[4].mxu0 %vm1367_vm4, %v6141_v3  ;;  %v436_v60 = vmax.f32 %v404_v49, 0.0  ;;  %v6415_v22 = vunpack.c.h.bf16 %v7945_v29 }
  0xa2   : > { %v3521_v18 = vrot.slane %v3519_v50, 4  ;;  %v1167_v62 = vshrl.u32 %v7955_v5, 16  ;;  %v1170_v10 = vshll.u32 %v7955_v5, 16  ;;  %v1176_v21 = vshll.u32 %v7957_v53, 16 }
  0xa3   : > { %v1180_v23 = vshrl.u32 %v7957_v53, 16  ;;  %v1188_v1 = vrot.slane %v1186_v16, 5  ;;  %v455_v7 = vpack.c.bf16 %v435_v6, %v434_v34  ;;  %v437_v27 = vmax.f32 %v405_v15, 0.0 }
  0xa4   : > { %v3523_v9 = vsel %vm7783_vm11, %v3521_v18, %v3522_v12  ;;  %v1169_v38 = vrot.slane %v1167_v62, 4  ;;  %v1172_v17 = vrot.slane %v1170_v10, 5  ;;  %v1178_v24 = vrot.slane %v1176_v21, 5  ;;  %v918_v42 = vld [vmem:[#allocation2 + $0x8c] sm:$0x1]  ;;  %v6517_v21 = vld [vmem:[%s7441_s10 + $0x70] sm:$0xff]  }
  0xa5   : > { %v1182_v31 = vrot.slane %v1180_v23, 4  ;;  %v1210_v13 = vshll.u32 %v918_v42, 16  ;;  %v547_v2 = vshrl.u32 %v455_v7, 16  ;;  %v550_v33 = vshll.u32 %v455_v7, 16 }
  0xa6   : > { %v456_v14 = vpack.c.bf16 %v437_v27, %v436_v60  ;;  %v1173_v41 = vor.u32 %v1172_v17, %v1169_v38  ;;  %v7968_v54 = vld [vmem:[#allocation2 + $0x84] sm:$0xf]  ;;  %v7970_v51 = vld [vmem:[#allocation2 + $0x88] sm:$0xf]  ;;  %v6142_v47 = vcombine.low %v3520_v52, %v3523_v9  ;;  %v3526_v3 = vrot.slane %v7740_v43, 5 }
  0xa7   : > { %v1183_v36 = vor.u32 %v1182_v31, %v1178_v24  ;;  %v1191_v44 = vshrl.u32 %v7968_v54, 16  ;;  %v1194_v56 = vshll.u32 %v7968_v54, 16  ;;  %v1200_v26 = vshll.u32 %v7970_v51, 16 }
  0xa8   : > { %v1204_v45 = vshrl.u32 %v7970_v51, 16  ;;  %v1174_v55 = vrot.slane %v1173_v41, 4  ;;  %v1212_v40 = vrot.slane %v1210_v13, 5  ;;  %v549_v19 = vrot.slane %v547_v2, 7  ;;  %6867 = vmatprep.mubr.msk.bf16.mxu0 %vm1367_vm4, %v6142_v47  ;;  %v3431_v2 = vld [vmem:[#allocation2 + $0x54] sm:$0xe] }
  0xa9   : > { %v1184_v59 = vrot.slane %v1183_v36, 4  ;;  %v1193_v39 = vrot.slane %v1191_v44, 4  ;;  %v1196_v48 = vrot.slane %v1194_v56, 5  ;;  %v1202_v50 = vrot.slane %v1200_v26, 5  ;;  %v3432_v26 = vld [vmem:[#allocation2 + $0x60] sm:$0xe] }
  0xaa   : > { %v1206_v37 = vrot.slane %v1204_v45, 4  ;;  %v1179_v43 = vsel %vm7461_vm7, %v1174_v55, %v1178_v24  ;;  %v552_v49 = vor.u32 %v550_v33, %v549_v19  ;;  %v643_v12 = vsel %vm7491_vm8, %v549_v19, 0 }
  0xab   : > { %v1189_v34 = vsel %vm7461_vm7, %v1184_v59, %v1188_v1  ;;  %v1197_v6 = vor.u32 %v1196_v48, %v1193_v39  ;;  %v5918_v52 = vcombine.low %v643_v12, %v643_v12  ;;  %v554_v18 = vshrl.u32 %v456_v14, 16 }
  0xac   : > { %v5943_v16 = vcombine.low %v1179_v43, %v1189_v34  ;;  %v1207_v15 = vor.u32 %v1206_v37, %v1202_v50  ;;  %v627_v60 = vsel %vm7491_vm8, 0, %v552_v49  ;;  %v557_v62 = vshll.u32 %v456_v14, 16 }
  0xad   : > { %v3527_v10 = vsel %vm7783_vm11, %v6125_v61, %v3526_v3  ;;  %v1198_v23 = vrot.slane %v1197_v6, 4  ;;  %v5916_v7 = vcombine.low %v627_v60, %v627_v60  ;;  %v5917_v27 = vcombine.high %v627_v60, %v627_v60  ;;  %860 = vst.msk [vmem:[#allocation2 + $0x98] sm:$0x1] %vm463_vm1, %v5918_v52 }
  0xae   : > { %6709 = vmatprep.mubr.msk.bf16.mxu1 %vm1367_vm4, %v5943_v16  ;;  %v1208_v1 = vrot.slane %v1207_v15, 4  ;;  %v556_v9 = vrot.slane %v554_v18, 7  ;;  %v3528_v38 = vrot.slane %v3526_v3, 4  ;;  %v3529_v17 = vrot.slane %v7700_v28, 5 }
  0xaf   : > { %v368_v24 = vmul.f32 %v7808_v46, %v6414_v25  ;;  %v1203_v31 = vsel %vm7461_vm7, %v1198_v23, %v1202_v50  ;;  %858 = vst.msk [vmem:[#allocation2 + $0x90] sm:$0xf] %vm460_vm0, %v5916_v7  ;;  %859 = vst.msk [vmem:[#allocation2 + $0x94] sm:$0xf] %vm460_vm0, %v5917_v27  ;;  %v369_v42 = vmul.f32 %v7808_v46, %v6415_v22  ;;  %v6418_v13 = vunpack.c.l.bf16 %v6517_v21 }
  0xb0   : > { %v1213_v61 = vsel %vm7461_vm7, %v1208_v1, %v1212_v40  ;;  %v559_v28 = vor.u32 %v557_v62, %v556_v9  ;;  %v644_v25 = vsel %vm7491_vm8, %v556_v9, 0  ;;  %v3530_v14 = vsel %vm7783_vm11, %v3528_v38, %v3529_v17 }
  0xb1   : > { %v5944_v33 = vcombine.low %v1203_v31, %v1213_v61  ;;  %v5921_v41 = vcombine.low %v644_v25, %v644_v25  ;;  %v6143_v36 = vcombine.low %v3527_v10, %v3530_v14  ;;  %v406_v47 = vadd.f32 %v7844_v35, %v368_v24 }
  0xb2   : > { %v407_v3 = vadd.f32 %v7844_v35, %v369_v42  ;;  %v628_v29 = vsel %vm7491_vm8, 0, %v559_v28  ;;  %v6419_v22 = vunpack.c.h.bf16 %v6517_v21  ;;  %v370_v44 = vmul.f32 %v7808_v46, %v6418_v13 }
  0xb3   : > { %6710 = vmatmul.mubr.msk.bf16.gmra.mrb[20].mxu1 %vm1367_vm4, %v5944_v33  ;;  %v6126_v56 = vrot.slane %v3431_v2, 9  ;;  %v5919_v45 = vcombine.low %v628_v29, %v628_v29  ;;  %v5920_v55 = vcombine.high %v628_v29, %v628_v29  ;;  %863 = vst.msk [vmem:[#allocation2 + $0xa4] sm:$0x1] %vm463_vm1, %v5921_v41  ;;  %6868 = vmatmul.mubr.msk.bf16.gmra.mrb[8].mxu0 %vm1367_vm4, %v6143_v36  ;;  %v438_v59 = vmax.f32 %v406_v47, 0.0 }
  0xb4   : > { %v439_v40 = vmax.f32 %v407_v3, 0.0  ;;  %v919_v19 = vld [vmem:[#allocation2 + $0x98] sm:$0x1]  ;;  %v371_v39 = vmul.f32 %v7808_v46, %v6419_v22  ;;  %v408_v48 = vadd.f32 %v7844_v35, %v370_v44  ;;  %v3533_v50 = vrot.slane %v7760_v20, 5 }
  0xb5   : > { %v3536_v37 = vrot.slane %v7748_v58, 5  ;;  %v1234_v43 = vshll.u32 %v919_v19, 16  ;;  %861 = vst.msk [vmem:[#allocation2 + $0x9c] sm:$0xf] %vm460_vm0, %v5919_v45  ;;  %862 = vst.msk [vmem:[#allocation2 + $0xa0] sm:$0xf] %vm460_vm0, %v5920_v55 }
  0xb6   : > { %v457_v34 = vpack.c.bf16 %v439_v40, %v438_v59  ;;  %v6127_v49 = vrot.slane %v3432_v26, 9  ;;  %v3540_v12 = vrot.slane %v7855_v8, 5  ;;  %v8021_v16 = vld [vmem:[#allocation2 + $0x90] sm:$0xf]  ;;  %v8023_v6 = vld [vmem:[#allocation2 + $0x94] sm:$0xf]  ;;  %v409_v15 = vadd.f32 %v7844_v35, %v371_v39 }
  0xb7   : > { %v440_v52 = vmax.f32 %v408_v48, 0.0  ;;  %v3535_v60 = vrot.slane %v3533_v50, 4  ;;  %v1215_v20 = vshrl.u32 %v8021_v16, 16  ;;  %v1218_v58 = vshll.u32 %v8021_v16, 16 }
  0xb8   : > { %v1224_v18 = vshll.u32 %v8023_v6, 16  ;;  %v1228_v62 = vshrl.u32 %v8023_v6, 16  ;;  %v561_v10 = vshrl.u32 %v457_v34, 16  ;;  %v564_v21 = vshll.u32 %v457_v34, 16  ;;  %v3433_v34 = vld [vmem:[#allocation2 + $0x6c] sm:$0xe] }
  0xb9   : > { %v441_v23 = vmax.f32 %v409_v15, 0.0  ;;  %v3534_v8 = vsel %vm7783_vm11, %v6126_v56, %v3533_v50  ;;  %v1217_v1 = vrot.slane %v1215_v20, 4  ;;  %v1220_v7 = vrot.slane %v1218_v58, 5 }
  0xba   : > { %v1226_v27 = vrot.slane %v1224_v18, 5  ;;  %v1230_v9 = vrot.slane %v1228_v62, 4  ;;  %v1236_v38 = vrot.slane %v1234_v43, 5  ;;  %v8032_v17 = vld [vmem:[#allocation2 + $0xa4] sm:$0x1]  ;;  %v563_v24 = vrot.slane %v561_v10, 7 }
  0xbb   : > { %v458_v31 = vpack.c.bf16 %v441_v23, %v440_v52  ;;  %v3537_v61 = vsel %vm7783_vm11, %v3535_v60, %v3536_v37  ;;  %v1221_v42 = vor.u32 %v1220_v7, %v1217_v1  ;;  %v1258_v2 = vshll.u32 %v8032_v17, 16  ;;  %v2720_v10 = vld [vmem:[#allocation2 + $0x70] sm:$0xf] }
  0xbc   : > { %v1231_v13 = vor.u32 %v1230_v9, %v1226_v27  ;;  %v6144_v33 = vcombine.low %v3534_v8, %v3537_v61  ;;  %v8037_v28 = vld [vmem:[#allocation2 + $0x9c] sm:$0xf]  ;;  %v8039_v25 = vld [vmem:[#allocation2 + $0xa0] sm:$0xf]  ;;  %v566_v14 = vor.u32 %v564_v21, %v563_v24  ;;  %v645_v41 = vsel %vm7491_vm8, %v563_v24, 0 }
  0xbd   : > { %v568_v36 = vshrl.u32 %v458_v31, 16  ;;  %v3541_v47 = vsel %vm7783_vm11, %v6127_v49, %v3540_v12  ;;  %v1222_v3 = vrot.slane %v1221_v42, 4  ;;  %v1239_v22 = vshrl.u32 %v8037_v28, 16  ;;  %v2721_v8 = vld [vmem:[#allocation2 + $0x74] sm:$0x1] }
  0xbe   : > { %v1232_v29 = vrot.slane %v1231_v13, 4  ;;  %v1242_v44 = vshll.u32 %v8037_v28, 16  ;;  %6871 = vmatprep.mubr.msk.bf16.mxu0 %vm1367_vm4, %v6144_v33  ;;  %v1248_v56 = vshll.u32 %v8039_v25, 16  ;;  %v1252_v26 = vshrl.u32 %v8039_v25, 16  ;;  %v8072_v13 = vld [vmem:[#allocation2 + $0x7c] sm:$0xf] }
  0xbf   : > { %v1260_v45 = vrot.slane %v1258_v2, 5  ;;  %v629_v55 = vsel %vm7491_vm8, 0, %v566_v14  ;;  %v1227_v59 = vsel %vm7461_vm7, %v1222_v3, %v1226_v27  ;;  %v1241_v19 = vrot.slane %v1239_v22, 4  ;;  %v3434_v2 = vld [vmem:[#allocation2 + $0x78] sm:$0xe] }
  0xc0   : > { %v1237_v40 = vsel %vm7461_vm7, %v1232_v29, %v1236_v38  ;;  %v1244_v39 = vrot.slane %v1242_v44, 5  ;;  %v1250_v50 = vrot.slane %v1248_v56, 5  ;;  %v1254_v37 = vrot.slane %v1252_v26, 4  ;;  %v8082_v29 = vld [vmem:[#allocation2 + $0x80] sm:$0x1] }
  0xc1   : > { %v5945_v48 = vcombine.low %v1227_v59, %v1237_v40  ;;  %v5922_v43 = vcombine.low %v629_v55, %v629_v55  ;;  %v5923_v15 = vcombine.high %v629_v55, %v629_v55  ;;  %v5924_v52 = vcombine.low %v645_v41, %v645_v41 }
  0xc2   : > { %v1245_v49 = vor.u32 %v1244_v39, %v1241_v19  ;;  %v570_v60 = vrot.slane %v568_v36, 7  ;;  %v1255_v20 = vor.u32 %v1254_v37, %v1250_v50  ;;  %v571_v58 = vshll.u32 %v458_v31, 16 }
  0xc3   : > { %6713 = vmatprep.mubr.msk.bf16.mxu1 %vm1367_vm4, %v5945_v48  ;;  %864 = vst.msk [vmem:[#allocation2 + $0xa8] sm:$0xf] %vm460_vm0, %v5922_v43  ;;  %v3542_v18 = vrot.slane %v3540_v12, 4  ;;  %v3543_v62 = vrot.slane %v7857_v0, 5  ;;  %865 = vst.msk [vmem:[#allocation2 + $0xac] sm:$0xf] %vm460_vm0, %v5923_v15 }
  0xc4   : > { %v1246_v21 = vrot.slane %v1245_v49, 4  ;;  %866 = vst.msk [vmem:[#allocation2 + $0xb0] sm:$0x1] %vm463_vm1, %v5924_v52  ;;  %v646_v23 = vsel %vm7491_vm8, %v570_v60, 0  ;;  %v6128_v1 = vrot.slane %v3433_v34, 9  ;;  %v1256_v7 = vrot.slane %v1255_v20, 4 }
  0xc5   : > { %v573_v27 = vor.u32 %v571_v58, %v570_v60  ;;  %v5927_v9 = vcombine.low %v646_v23, %v646_v23  ;;  %v3544_v38 = vsel %vm7783_vm11, %v3542_v18, %v3543_v62  ;;  %v3547_v24 = vrot.slane %v2720_v10, 5  ;;  %v3435_v49 = vld [vmem:[#allocation2 + $0x84] sm:$0xe]  ;;  %v2727_v20 = vld [vmem:[#allocation2 + $0x8c] sm:$0x1] }
  0xc6   : > { %v1251_v0 = vsel %vm7461_vm7, %v1246_v21, %v1250_v50  ;;  %v6145_v12 = vcombine.low %v3541_v47, %v3544_v38  ;;  %v1261_v31 = vsel %vm7461_vm7, %v1256_v7, %v1260_v45  ;;  %v3550_v42 = vrot.slane %v2721_v8, 5  ;;  %v2726_v50 = vld [vmem:[#allocation2 + $0x88] sm:$0xf]  ;;  %v3436_v7 = vld [vmem:[#allocation2 + $0x90] sm:$0xe] }
  0xc7   : > { %v630_v61 = vsel %vm7491_vm8, 0, %v573_v27  ;;  %869 = vst.msk [vmem:[#allocation2 + $0xbc] sm:$0x1] %vm463_vm1, %v5927_v9  ;;  %v5946_v33 = vcombine.low %v1251_v0, %v1261_v31  ;;  %v3548_v36 = vsel %vm7783_vm11, %v6128_v1, %v3547_v24  ;;  %v3549_v47 = vrot.slane %v3547_v24, 4  ;;  %v8107_v0 = vld [vmem:[#allocation2] sm:$0xf] }
  0xc8   : > { %v5925_v14 = vcombine.low %v630_v61, %v630_v61  ;;  %v5926_v41 = vcombine.high %v630_v61, %v630_v61  ;;  %6872 = vmatmul.mubr.msk.bf16.gmra.mrb[12].mxu0 %vm1367_vm4, %v6145_v12  ;;  %v6129_v22 = vrot.slane %v3434_v2, 9  ;;  %v3554_v44 = vrot.slane %v8072_v13, 5  ;;  %v8109_v12 = vld [vmem:[#allocation2 + $0x4] sm:$0xf]  ;;  %v2730_v2 = vld [vmem:[#allocation2 + $0x98] sm:$0x1] }
  0xc9   : > { %6714 = vmatmul.mubr.msk.bf16.gmra.mrb[24].mxu1 %vm1367_vm4, %v5946_v33  ;;  %v3551_v59 = vsel %vm7783_vm11, %v3549_v47, %v3550_v42  ;;  %v3557_v34 = vrot.slane %v8082_v29, 5  ;;  %v6130_v8 = vrot.slane %v3435_v49, 9  ;;  %v3561_v1 = vrot.slane %v2726_v50, 5  ;;  %v2729_v42 = vld [vmem:[#allocation2 + $0x94] sm:$0xf] }
  0xca   : > { %v8078_v3 = vld [vmem:[#allocation2 + $0xa8] sm:$0xf]  ;;  %867 = vst.msk [vmem:[#allocation2 + $0xb4] sm:$0xf] %vm460_vm0, %v5925_v14  ;;  %868 = vst.msk [vmem:[#allocation2 + $0xb8] sm:$0xf] %vm460_vm0, %v5926_v41  ;;  %v6146_v48 = vcombine.low %v3548_v36, %v3551_v59  ;;  %v3555_v62 = vsel %vm7783_vm11, %v6129_v22, %v3554_v44  ;;  %v5966_v24 = vcombine.low %v8107_v0, %v8109_v12 }
  0xcb   : > { %v8085_v56 = vld [vmem:[#allocation2 + $0xac] sm:$0xf]  ;;  %v8087_v26 = vld [vmem:[#allocation2 + $0xb0] sm:$0x1]  ;;  %v1263_v45 = vshrl.u32 %v8078_v3, 16  ;;  %v1266_v55 = vshll.u32 %v8078_v3, 16 }
  0xcc   : > { %v1272_v40 = vshll.u32 %v8085_v56, 16  ;;  %v1276_v19 = vshrl.u32 %v8085_v56, 16  ;;  %v1282_v39 = vshll.u32 %v8087_v26, 16  ;;  %6875 = vmatprep.mubr.msk.bf16.mxu0 %vm1367_vm4, %v6146_v48  ;;  %v3556_v10 = vrot.slane %v3554_v44, 4  ;;  %v2732_v47 = vld [vmem:[#allocation2 + $0xa0] sm:$0xf] }
  0xcd   : > { %v1265_v37 = vrot.slane %v1263_v45, 4  ;;  %v1268_v43 = vrot.slane %v1266_v55, 5  ;;  %v3564_v61 = vrot.slane %v2727_v20, 5  ;;  %v3562_v55 = vsel %vm7783_vm11, %v6130_v8, %v3561_v1  ;;  %v3437_v59 = vld [vmem:[#allocation2 + $0x9c] sm:$0xe] }
  0xce   : > { %v1274_v15 = vrot.slane %v1272_v40, 5  ;;  %v1278_v52 = vrot.slane %v1276_v19, 4  ;;  %v8097_v60 = vld [vmem:[#allocation2 + $0xbc] sm:$0x1]  ;;  %v1284_v18 = vrot.slane %v1282_v39, 5  ;;  %v3558_v31 = vsel %vm7783_vm11, %v3556_v10, %v3557_v34 }
  0xcf   : > { %v1269_v58 = vor.u32 %v1268_v43, %v1265_v37  ;;  %v1306_v23 = vshll.u32 %v8097_v60, 16  ;;  %v6147_v45 = vcombine.low %v3555_v62, %v3558_v31  ;;  %v3563_v43 = vrot.slane %v3561_v1, 4  ;;  %v2735_v8 = vld [vmem:[#allocation2 + $0xac] sm:$0xf] }
  0xd0   : > { %v1279_v21 = vor.u32 %v1278_v52, %v1274_v15  ;;  %v6131_v34 = vrot.slane %v3436_v7, 9  ;;  %v3568_v52 = vrot.slane %v2729_v42, 5  ;;  %v3571_v20 = vrot.slane %v2730_v2, 5 }
  0xd1   : > { %v1270_v27 = vrot.slane %v1269_v58, 4  ;;  %v8103_v9 = vld [vmem:[#allocation2 + $0xb4] sm:$0xf]  ;;  %v8105_v38 = vld [vmem:[#allocation2 + $0xb8] sm:$0xf]  ;;  %6876 = vmatmul.mubr.msk.bf16.gmra.mrb[16].mxu0 %vm1367_vm4, %v6147_v45  ;;  %v6132_v10 = vrot.slane %v3437_v59, 9 }
  0xd2   : > { %v1280_v33 = vrot.slane %v1279_v21, 4  ;;  %v1287_v14 = vshrl.u32 %v8103_v9, 16  ;;  %v1290_v41 = vshll.u32 %v8103_v9, 16  ;;  %v1296_v36 = vshll.u32 %v8105_v38, 16  ;;  %v2733_v58 = vld [vmem:[#allocation2 + $0xa4] sm:$0x1] }
  0xd3   : > { %v1275_v22 = vsel %vm7461_vm7, %v1270_v27, %v1274_v15  ;;  %v1300_v44 = vshrl.u32 %v8105_v38, 16  ;;  %v1308_v15 = vrot.slane %v1306_v23, 5  ;;  %v3575_v21 = vrot.slane %v2732_v47, 5  ;;  %v3438_v27 = vld [vmem:[#allocation2 + $0xa8] sm:$0xe] }
  0xd4   : > { %v1285_v40 = vsel %vm7461_vm7, %v1280_v33, %v1284_v18  ;;  %v1289_v19 = vrot.slane %v1287_v14, 4  ;;  %v1292_v39 = vrot.slane %v1290_v41, 5  ;;  %v1298_v48 = vrot.slane %v1296_v36, 5  ;;  %v2736_v23 = vld [vmem:[#allocation2 + $0xb0] sm:$0x1] }
  0xd5   : > { %v5947_v50 = vcombine.low %v1275_v22, %v1285_v40  ;;  %v1302_v37 = vrot.slane %v1300_v44, 4  ;;  %v3565_v18 = vsel %vm7783_vm11, %v3563_v43, %v3564_v61  ;;  %v3569_v1 = vsel %vm7783_vm11, %v6131_v34, %v3568_v52  ;;  %v2738_v44 = vld [vmem:[#allocation2 + $0xb8] sm:$0xf]  ;;  %v3439_v45 = vld [vmem:[#allocation2 + $0xb4] sm:$0xe] }
  0xd6   : > { %v1293_v49 = vor.u32 %v1292_v39, %v1289_v19  ;;  %v6148_v33 = vcombine.low %v3562_v55, %v3565_v18  ;;  %v3570_v7 = vrot.slane %v3568_v52, 4  ;;  %v3576_v2 = vsel %vm7783_vm11, %v6132_v10, %v3575_v21  ;;  %v2739_v39 = vld [vmem:[#allocation2 + $0xbc] sm:$0x1] }
  0xd7   : > { %6717 = vmatprep.mubr.msk.bf16.mxu1 %vm1367_vm4, %v5947_v50  ;;  %v1303_v62 = vor.u32 %v1302_v37, %v1298_v48  ;;  %v3577_v14 = vrot.slane %v3575_v21, 4  ;;  %v3578_v41 = vrot.slane %v2733_v58, 5  ;;  %v6133_v47 = vrot.slane %v3438_v27, 9  ;;  %v6518_v50 = vld [vmem:[%s7441_s10 + $0x78] sm:$0xff]  }
  0xd8   : > { %v1294_v31 = vrot.slane %v1293_v49, 4  ;;  %6879 = vmatprep.mubr.msk.bf16.mxu0 %vm1367_vm4, %v6148_v33  ;;  %v3572_v36 = vsel %vm7783_vm11, %v3570_v7, %v3571_v20  ;;  %v3582_v22 = vrot.slane %v2735_v8, 5  ;;  %v3585_v19 = vrot.slane %v2736_v23, 5  ;;  %v7305_v33 = vld [vmem:[#allocation2 + $0xc] sm:$0xf] }
  0xd9   : > { %v1304_v42 = vrot.slane %v1303_v62, 4  ;;  %v6149_v59 = vcombine.low %v3569_v1, %v3572_v36  ;;  %v3579_v40 = vsel %vm7783_vm11, %v3577_v14, %v3578_v41  ;;  %v6134_v49 = vrot.slane %v3439_v45, 9  ;;  %v8160_v1 = vld [vmem:[#allocation2 + $0x10] sm:$0xf]  ;;  %v8181_v45 = vld [vmem:[#allocation2 + $0x28] sm:$0xf] }
  0xda   : > { %v1299_v61 = vsel %vm7461_vm7, %v1294_v31, %v1298_v48  ;;  %v6150_v37 = vcombine.low %v3576_v2, %v3579_v40  ;;  %v3584_v43 = vrot.slane %v3582_v22, 4  ;;  %v3583_v34 = vsel %vm7783_vm11, %v6133_v47, %v3582_v22  ;;  %v8165_v2 = vld [vmem:[#allocation2 + $0x1c] sm:$0xf]  ;;  %v7312_v40 = vld [vmem:[#allocation2 + $0x30] sm:$0xf] }
  0xdb   : > { %v1309_v55 = vsel %vm7461_vm7, %v1304_v42, %v1308_v15  ;;  %6880 = vmatmul.mubr.msk.bf16.gmra.mrb[20].mxu0 %vm1367_vm4, %v6149_v59  ;;  %v3589_v52 = vrot.slane %v2738_v44, 5  ;;  %v3592_v20 = vrot.slane %v2739_v39, 5  ;;  %v6422_v58 = vunpack.c.l.bf16 %v6518_v50  ;;  %v7307_v42 = vld [vmem:[#allocation2 + $0x18] sm:$0xf]  ;;  %v7310_v44 = vld [vmem:[#allocation2 + $0x24] sm:$0xf] }
  0xdc   : > { %v5948_v48 = vcombine.low %v1299_v61, %v1309_v55  ;;  %6883 = vmatprep.mubr.msk.bf16.mxu0 %vm1367_vm4, %v6150_v37  ;;  %v3586_v15 = vsel %vm7783_vm11, %v3584_v43, %v3585_v19  ;;  %v6423_v62 = vunpack.c.h.bf16 %v6518_v50  ;;  %v5967_v7 = vcombine.low %v7305_v33, %v8160_v1  ;;  %v8171_v61 = vld [vmem:[%s9383_s3 + $0x18] sm:$0xff]   ;;  %v8184_v19 = vld [vmem:[#allocation2 + $0x34] sm:$0xf] }
  0xdd   : > { %v3590_v18 = vsel %vm7783_vm11, %v6134_v49, %v3589_v52  ;;  %v3591_v10 = vrot.slane %v3589_v52, 4  ;;  %v372_v21 = vmul.f32 %v7808_v46, %v6422_v58  ;;  %v6151_v27 = vcombine.low %v3583_v34, %v3586_v15  ;;  %v7314_v52 = vld [vmem:[#allocation2 + $0x3c] sm:$0xf]  ;;  %v8196_v15 = vld [vmem:[#allocation2 + $0x40] sm:$0xf] }
  0xde   : > { %6718 = vmatmul.mubr.msk.bf16.gmra.mrb[28].mxu1 %vm1367_vm4, %v5948_v48  ;;  %v373_v8 = vmul.f32 %v7808_v46, %v6423_v62  ;;  %v5968_v14 = vcombine.low %v7307_v42, %v8165_v2  ;;  %v5969_v55 = vcombine.low %v7310_v44, %v8181_v45  ;;  %v5970_v39 = vcombine.low %v7312_v40, %v8184_v19  ;;  %v7316_v58 = vld [vmem:[#allocation2 + $0x48] sm:$0xf]  ;;  %v8199_v62 = vld [vmem:[#allocation2 + $0x4c] sm:$0xf]  ;;  %v7266_v44 = vld [vmem:[#allocation2 + $0x18] sm:$0xff]  }
  0xdf   : > { %6723 = vmatprep.mubr.msk.bf16.mxu1 %vm1367_vm4, %v5966_v24  ;;  %v3593_v31 = vsel %vm7783_vm11, %v3591_v10, %v3592_v20  ;;  %v410_v24 = vadd.f32 %v7844_v35, %v372_v21  ;;  %v5971_v20 = vcombine.low %v7314_v52, %v8196_v15  ;;  %v5972_v11 = vcombine.low %v7316_v58, %v8199_v62  ;;  %v1875_v58 = vld [vmem:[#allocation2 + $0x24] sm:$0xe] }
  0xe0   : > { %v6152_v0 = vcombine.low %v3590_v18, %v3593_v31  ;;  %v411_v23 = vadd.f32 %v7844_v35, %v373_v8  ;;  %v7309_v35 = vld [vmem:[%s9383_s3 + $0x10] sm:$0xff]   ;;  %v2969_v10 = vshll.u32 %v8072_v13, 16  ;;  %v2973_v21 = vshrl.u32 %v8072_v13, 16 }
  0xe1   : > { %v442_v46 = vmax.f32 %v410_v24, 0.0  ;;  %v8206_v24 = vld [vmem:[#allocation2 + $0x58] sm:$0xf]  ;;  %v1925_v40 = vrot.slane %v8109_v12, 5  ;;  %v5975_v12 = vcombine.low %v7869_v30, %v7871_v4  ;;  %v1876_v4 = vld [vmem:[#allocation2 + $0x30] sm:$0xe] }
  0xe2   : > { %v443_v41 = vmax.f32 %v411_v23, 0.0 }
  0xe3   : > { %6884 = vmatmul.mubr.msk.bf16.gmra.mrb[24].mxu0 %vm1367_vm4, %v6151_v27 }
  0xe4   : > { %6887 = vmatprep.mubr.msk.bf16.mxu0 %vm1367_vm4, %v6152_v0  ;;  %v459_v36 = vpack.c.bf16 %v443_v41, %v442_v46  ;;  %v7318_v0 = vld [vmem:[#allocation2 + $0x54] sm:$0xf]  ;;  %v7320_v46 = vld [vmem:[#allocation2 + $0x60] sm:$0xf]  ;;  %v8211_v41 = vld [vmem:[#allocation2 + $0x64] sm:$0xf] }
  0xe5   : > { %v5973_v23 = vcombine.low %v7318_v0, %v8206_v24  ;;  %v5974_v13 = vcombine.low %v7320_v46, %v8211_v41  ;;  %v7325_v0 = vld [vmem:[#allocation2 + $0x2c] sm:$0x1]  ;;  %v5978_v46 = vcombine.low %v8021_v16, %v8023_v6 }
  0xe6   : > { %6724 = vmatmul.mubr.msk.bf16.vlgmr.msra.gmra.mrb[0].mxu1 %vm1367_vm4, %v5967_v7  ;;  %v575_v47 = vshrl.u32 %v459_v36, 16  ;;  %v578_v22 = vshll.u32 %v459_v36, 16  ;;  %v8214_v36 = vrot.slane %v2969_v10, 5  ;;  %v1927_v10 = vrot.slane %v1925_v40, 4 }
  0xe7   : > { %6756 = vmatpush3.bf16.msra.mxu1 %v7309_v35  ;;  %6727 = vmatprep.mubr.msk.bf16.mxu1 %vm1367_vm4, %v5968_v14  ;;  %v2975_v35 = vrot.slane %v2973_v21, 4  ;;  %v1949_v30 = vrot.slane %v7325_v0, 5 }
  0xe8   : > { %6789 = vmatprep.subr.bf16.mxu1 %v8171_v61  ;;  %v577_v59 = vrot.slane %v575_v47, 7  ;;  %9411 = vst [vmem:[#allocation3_spill] sm:$0xff] %v8214_v36  ;;  %v1932_v47 = vrot.slane %v8160_v1, 5  ;;  %v1946_v1 = vrot.slane %v8181_v45, 5 }
  0xe9   : > { %v2976_v52 = vor.u32 %v2975_v35, %v8214_v36 }
  0xea   : > { %v580_v50 = vor.u32 %v578_v22, %v577_v59  ;;  %v647_v48 = vsel %vm7491_vm8, %v577_v59, 0  ;;  %v1934_v45 = vrot.slane %v1932_v47, 4 }
  0xeb   : > { %v5930_v37 = vcombine.low %v647_v48, %v647_v48 }
  0xec   : > { %v631_v43 = vsel %vm7491_vm8, 0, %v580_v50  ;;  %v7322_v50 = vld [vmem:[#allocation2 + $0x8] sm:$0x1] }
  0xed   : > { %v5928_v34 = vcombine.low %v631_v43, %v631_v43  ;;  %v5929_v49 = vcombine.high %v631_v43, %v631_v43  ;;  %872 = vst.msk [vmem:[#allocation2 + $0xc8] sm:$0x1] %vm463_vm1, %v5930_v37  ;;  %v1928_v48 = vrot.slane %v7322_v50, 5  ;;  %v1874_v37 = vld [vmem:[#allocation2 + $0x18] sm:$0xe]  ;;  %v1939_v43 = vrot.slane %v8165_v2, 5 }
  0xee   : > { %6728 = vmatmul.mubr.msk.bf16.gmra.mrb[4].mxu1 %vm1367_vm4, %v5969_v55  ;;  %v1872_v55 = vld [vmem:[#allocation2] sm:$0xe]  ;;  %v6001_v21 = vrot.slane %v1874_v37, 9 }
  0xef   : > { %6731 = vmatprep.mubr.msk.bf16.mxu1 %vm1367_vm4, %v5970_v39  ;;  %870 = vst.msk [vmem:[#allocation2 + $0xc0] sm:$0xf] %vm460_vm0, %v5928_v34  ;;  %871 = vst.msk [vmem:[#allocation2 + $0xc4] sm:$0xf] %vm460_vm0, %v5929_v49  ;;  %v1873_v39 = vld [vmem:[#allocation2 + $0xc] sm:$0xe] }
  0xf0   : > { %v7323_v34 = vld [vmem:[#allocation2 + $0x14] sm:$0x1]  ;;  %v5999_v2 = vrot.slane %v1872_v55, 9  ;;  %v7326_v55 = vld [vmem:[#allocation2 + $0x38] sm:$0x1] }
  0xf1   : > { %v1935_v49 = vrot.slane %v7323_v34, 5 }
  0xf3   : > { %v8251_v35 = vsel %vm7783_vm11, %v1934_v45, %v1935_v49  ;;  %v7270_v45 = vld [vmem:[#allocation2 + $0x3c] sm:$0xff]  }
  0xf4   : > { %v2742_v18 = vld [vmem:[#allocation2 + $0xc8] sm:$0x1] }
  0xf5   : > { %v3599_v7 = vrot.slane %v2742_v18, 5  ;;  %v6000_v18 = vrot.slane %v1873_v39, 9  ;;  %v8266_v39 = vsel %vm7783_vm11, %v6001_v21, %v1939_v43 }
  0xf6   : > { %6732 = vmatmul.mubr.msk.bf16.gmra.mrb[8].mxu1 %vm1367_vm4, %v5971_v20  ;;  %v2741_v8 = vld [vmem:[#allocation2 + $0xc4] sm:$0xf]  ;;  %v3440_v27 = vld [vmem:[#allocation2 + $0xc0] sm:$0xe]  ;;  %v2979_v20 = vshll.u32 %v8082_v29, 16  ;;  %v1953_v29 = vrot.slane %v8184_v19, 5  ;;  %v8243_v19 = vsel %vm7783_vm11, %v5999_v2, %v1925_v40 }
  0xf7   : > { %6735 = vmatprep.mubr.msk.bf16.mxu1 %vm1367_vm4, %v5972_v11  ;;  %v6135_v31 = vrot.slane %v3440_v27, 9  ;;  %v3596_v33 = vrot.slane %v2741_v8, 5  ;;  %v5976_v11 = vcombine.low %v7955_v5, %v7957_v53  ;;  %v7324_v8 = vld [vmem:[#allocation2 + $0x20] sm:$0x1]  ;;  %v7268_v5 = vld [vmem:[#allocation2 + $0x24] sm:$0xff]   ;;  %v5977_v53 = vcombine.low %v7968_v54, %v7970_v51 }
  0xf8   : > { %v1942_v27 = vrot.slane %v7324_v8, 5  ;;  %v8256_v54 = vsel %vm7783_vm11, %v1927_v10, %v1928_v48  ;;  %v6003_v51 = vrot.slane %v1876_v4, 9  ;;  %v1955_v16 = vrot.slane %v1953_v29, 4  ;;  %v1877_v40 = vld [vmem:[#allocation2 + $0x3c] sm:$0xe]  ;;  %v7271_v4 = vld [vmem:[#allocation2 + $0x48] sm:$0xff]  }
  0xf9   : > { %v3597_v42 = vsel %vm7783_vm11, %v6135_v31, %v3596_v33  ;;  %v3598_v14 = vrot.slane %v3596_v33, 4  ;;  %v1941_v31 = vrot.slane %v1939_v43, 4  ;;  %v6002_v33 = vrot.slane %v1875_v58, 9  ;;  %v7331_v10 = vld [vmem:[#allocation2 + $0x68] sm:$0x1] }
  0xfa   : > { %v6004_v58 = vrot.slane %v1877_v40, 9  ;;  %v8293_v2 = vsel %vm7783_vm11, %v6003_v51, %v1953_v29  ;;  %v1967_v29 = vrot.slane %v8199_v62, 5  ;;  %v1974_v51 = vrot.slane %v8206_v24, 5  ;;  %v4264_v62 = vld [vmem:[#allocation2 + $0x20] sm:$0x1] }
  0xfb   : > { %v3600_v22 = vsel %vm7783_vm11, %v3598_v14, %v3599_v7  ;;  %v1948_v7 = vrot.slane %v1946_v1, 4  ;;  %v7269_v14 = vld [vmem:[#allocation2 + $0x30] sm:$0xff]   ;;  %v8270_v50 = vsel %vm7783_vm11, %v1941_v31, %v1942_v27  ;;  %v8274_v48 = vsel %vm7783_vm11, %v6002_v33, %v1946_v1  ;;  %v1878_v27 = vld [vmem:[#allocation2 + $0x48] sm:$0xe] }
  0xfc   : > { %v6153_v59 = vcombine.low %v3597_v42, %v3600_v22  ;;  %v8235_v42 = vrot.slane %v2979_v20, 5  ;;  %v4262_v22 = vld [vmem:[#allocation2 + $0x18] sm:$0xf]  ;;  %v1879_v31 = vld [vmem:[#allocation2 + $0x54] sm:$0xe]  ;;  %v1981_v40 = vrot.slane %v8211_v41, 5 }
  0xfd   : > { %v8278_v37 = vsel %vm7783_vm11, %v1948_v7, %v1949_v30  ;;  %v4311_v34 = vshrl.u32 %v4262_v22, 16  ;;  %v4314_v49 = vshll.u32 %v4262_v22, 16  ;;  %v4265_v30 = vld [vmem:[#allocation2 + $0x24] sm:$0xf]  ;;  %v1969_v24 = vrot.slane %v1967_v29, 4 }
  0xfe   : > { %6736 = vmatmul.mubr.msk.bf16.gmra.mrb[12].mxu1 %vm1367_vm4, %v5973_v23  ;;  %6888 = vmatmul.mubr.msk.bf16.gmra.mrb[28].mxu0 %vm1367_vm4, %v6153_v59  ;;  %v8233_v23 = vrot.slane %v2976_v52, 4  ;;  %9413 = vst [vmem:[#allocation5_spill] sm:$0xff] %v8235_v42  ;;  %v1956_v59 = vrot.slane %v7326_v55, 5  ;;  %v7327_v22 = vld [vmem:[#allocation2 + $0x44] sm:$0x1]  ;;  %v6005_v55 = vrot.slane %v1878_v27, 9 }
  0xff   : > { %6739 = vmatprep.mubr.msk.bf16.mxu1 %vm1367_vm4, %v5974_v13  ;;  %6893 = vmatprep.mubr.msk.bf16.mxu0 %vm1367_vm4, %v7266_v44  ;;  %v8247_v13 = vsel %vm7783_vm11, %v6000_v18, %v1932_v47  ;;  %v4263_v44 = vld [vmem:[#allocation2 + $0x1c] sm:$0xf]  ;;  %v8261_v47 = vld [vmem:[%s9383_s3 + $0x40] sm:$0xff]   ;;  %v1960_v18 = vrot.slane %v8196_v15, 5  ;;  %v4313_v33 = vrot.slane %v4311_v34, 4  ;;  %v4316_v7 = vrot.slane %v4314_v49, 5 }
 0x100   : > { %9412 = vst [vmem:[#allocation4_spill] sm:$0xff] %v8233_v23  ;;  %9414 = vst [vmem:[#allocation6_spill] sm:$0xff] %v8261_v47  ;;  %v4320_v52 = vshll.u32 %v4263_v44, 16  ;;  %v4324_v20 = vshrl.u32 %v4263_v44, 16  ;;  %v1963_v44 = vrot.slane %v7327_v22, 5  ;;  %v4335_v8 = vshrl.u32 %v4265_v30, 16 }
 0x101   : > { %v7328_v34 = vld [vmem:[#allocation2 + $0x70] sm:$0xf]  ;;  %v4338_v22 = vshll.u32 %v4265_v30, 16  ;;  %v4317_v21 = vor.u32 %v4316_v7, %v4313_v33  ;;  %v4266_v27 = vld [vmem:[#allocation2 + $0x28] sm:$0xf]  ;;  %v1976_v41 = vrot.slane %v1974_v51, 4 }
 0x102   : > { %v8308_v0 = vrot.slane %v4320_v52, 5  ;;  %v4326_v15 = vrot.slane %v4324_v20, 4  ;;  %v1988_v49 = vrot.slane %v7328_v34, 5  ;;  %v7329_v52 = vld [vmem:[#allocation2 + $0x50] sm:$0x1]  ;;  %v4344_v33 = vshll.u32 %v4266_v27, 16 }
 0x103   : > { %v1970_v20 = vrot.slane %v7329_v52, 5  ;;  %v7330_v34 = vld [vmem:[#allocation2 + $0x5c] sm:$0x1]  ;;  %v1984_v52 = vrot.slane %v7331_v10, 5  ;;  %v7332_v30 = vld [vmem:[#allocation2 + $0x74] sm:$0x1]  ;;  %v8329_v10 = vsel %vm7783_vm11, %v6005_v55, %v1967_v29 }
 0x104   : > { %v1990_v1 = vrot.slane %v1988_v49, 4  ;;  %v1991_v43 = vrot.slane %v7332_v30, 5  ;;  %v4340_v36 = vrot.slane %v4338_v22, 5  ;;  %v4348_v7 = vshrl.u32 %v4266_v27, 16  ;;  %v4268_v55 = vld [vmem:[#allocation2 + $0x30] sm:$0xf] }
 0x105   : > { %v8369_v22 = vrot.slane %v4344_v33, 5  ;;  %v4359_v27 = vshrl.u32 %v4268_v55, 16  ;;  %v7333_v30 = vld [vmem:[#allocation2 + $0x7c] sm:$0xf] }
 0x106   : > { %6740 = vmatmul.mubr.msk.bf16.gmra.mrb[16].mxu1 %vm1367_vm4, %v5975_v12  ;;  %6894 = vmatmul.mubr.msk.bf16.vlgmr.msra.gmra.mrb[0].mxu0 %vm1367_vm4, %v7268_v5  ;;  %v1881_v5 = vld [vmem:[#allocation2 + $0x6c] sm:$0xe] }
 0x107   : > { %6743 = vmatprep.mubr.msk.bf16.mxu1 %vm1367_vm4, %v5976_v11  ;;  %6926 = vmatpush3.bf16.msra.mxu0 %v7906_v57  ;;  %v8297_v57 = vsel %vm7783_vm11, %v1955_v16, %v1956_v59  ;;  %v1962_v16 = vrot.slane %v1960_v18, 4  ;;  %v1880_v59 = vld [vmem:[#allocation2 + $0x60] sm:$0xe]  ;;  %v1977_v11 = vrot.slane %v7330_v34, 5  ;;  %v6008_v12 = vrot.slane %v1881_v5, 9 }
 0x108   : > { %6897 = vmatprep.mubr.msk.bf16.mxu0 %vm1367_vm4, %v7269_v14  ;;  %6959 = vmatprep.subr.bf16.mxu0 %v8261_v47  ;;  %v8314_v14 = vsel %vm7783_vm11, %v6004_v58, %v1960_v18  ;;  %v6006_v58 = vrot.slane %v1879_v31, 9  ;;  %v4330_v18 = vshll.u32 %v4264_v62, 16  ;;  %v1983_v31 = vrot.slane %v1981_v40, 4  ;;  %v1885_v47 = vld [vmem:[#allocation2 + $0x9c] sm:$0xe] }
 0x109   : > { %v8325_v62 = vsel %vm7783_vm11, %v1962_v16, %v1963_v44  ;;  %v8333_v5 = vsel %vm7783_vm11, %v1969_v24, %v1970_v20  ;;  %v8341_v44 = vsel %vm7783_vm11, %v1976_v41, %v1977_v11  ;;  %v8361_v11 = vsel %vm7783_vm11, %v1990_v1, %v1991_v43  ;;  %v4267_v20 = vld [vmem:[#allocation2 + $0x2c] sm:$0x1] }
 0x10a   : > { %v4332_v34 = vrot.slane %v4330_v18, 5  ;;  %v8353_v16 = vsel %vm7783_vm11, %v1983_v31, %v1984_v52  ;;  %v4350_v24 = vrot.slane %v4348_v7, 4  ;;  %v8386_v18 = vld [vmem:[#allocation2 + $0x34] sm:$0xf]  ;;  %v4362_v41 = vshll.u32 %v4268_v55, 16 }
 0x10b   : > { %9417 = vst [vmem:[#allocation7_spill] sm:$0xff] %v8386_v18  ;;  %v4354_v52 = vshll.u32 %v4267_v20, 16  ;;  %v4368_v55 = vshll.u32 %v8386_v18, 16  ;;  %v4372_v20 = vshrl.u32 %v8386_v18, 16 }
 0x10e   : > { %6744 = vmatmul.mubr.msk.bf16.gmra.mrb[20].mxu1 %vm1367_vm4, %v5977_v53  ;;  %6898 = vmatmul.mubr.msk.bf16.gmra.mrb[4].mxu0 %vm1367_vm4, %v7270_v45  ;;  %v4327_v53 = vor.u32 %v4326_v15, %v8308_v0  ;;  %v4337_v45 = vrot.slane %v4335_v8, 4  ;;  %v7272_v15 = vld [vmem:[#allocation2 + $0x54] sm:$0xff]   ;;  %v8337_v8 = vsel %vm7783_vm11, %v6006_v58, %v1974_v51  ;;  %v8357_v51 = vsel %vm7783_vm11, %v6008_v12, %v1988_v49 }
 0x10f   : > { %6747 = vmatprep.mubr.msk.bf16.mxu1 %vm1367_vm4, %v5978_v46  ;;  %6901 = vmatprep.mubr.msk.bf16.mxu0 %vm1367_vm4, %v7271_v4  ;;  %v6007_v46 = vrot.slane %v1880_v59, 9  ;;  %v4318_v4 = vrot.slane %v4317_v21, 4  ;;  %v7273_v59 = vld [vmem:[#allocation2 + $0x60] sm:$0xff]   ;;  %v9415_v21 = vcombine.low %v8037_v28, %v8039_v25  ;;  %v9416_v28 = vcombine.low %v8078_v3, %v8085_v56  ;;  %v1882_v12 = vld [vmem:[#allocation2 + $0x78] sm:$0xe] }
 0x110   : > { %v4328_v23 = vrot.slane %v4327_v53, 4  ;;  %v4341_v58 = vor.u32 %v4340_v36, %v4337_v45  ;;  %v6009_v31 = vrot.slane %v1882_v12, 9  ;;  %v7334_v45 = vld [vmem:[#allocation2 + $0x80] sm:$0x1]  ;;  %v7276_v53 = vld [vmem:[#allocation2 + $0x78] sm:$0xff]  }
 0x111   : > { %v8349_v29 = vsel %vm7783_vm11, %v6007_v46, %v1981_v40  ;;  %v4323_v3 = vsel %vm7461_vm7, %v4318_v4, %v8308_v0  ;;  %v4271_v46 = vld [vmem:[#allocation2 + $0x3c] sm:$0xf]  ;;  %v1995_v0 = vrot.slane %v7333_v30, 5  ;;  %v1998_v33 = vrot.slane %v7334_v45, 5  ;;  %v8395_v36 = vld [vmem:[#allocation2 + $0x38] sm:$0x1] }
 0x112   : > { %v4333_v49 = vsel %vm7461_vm7, %v4328_v23, %v4332_v34  ;;  %v4272_v23 = vld [vmem:[#allocation2 + $0x40] sm:$0xf]  ;;  %v4351_v4 = vor.u32 %v4350_v24, %v8369_v22  ;;  %v1883_v34 = vld [vmem:[#allocation2 + $0x84] sm:$0xe]  ;;  %v4383_v12 = vshrl.u32 %v4271_v46, 16  ;;  %v4386_v30 = vshll.u32 %v4271_v46, 16 }
 0x113   : > { %v8388_v7 = vcombine.low %v4323_v3, %v4333_v49  ;;  %9418 = vst [vmem:[#allocation8_spill] sm:$0xff] %v8395_v36  ;;  %v4361_v45 = vrot.slane %v4359_v27, 4  ;;  %v4364_v3 = vrot.slane %v4362_v41, 5  ;;  %v4392_v49 = vshll.u32 %v4272_v23, 16  ;;  %v8407_v46 = vld [vmem:[#allocation2 + $0x44] sm:$0x1] }
 0x114   : > { %v9419_v24 = vcombine.low %v8103_v9, %v8105_v38  ;;  %v8405_v1 = vsel %vm7783_vm11, %v6009_v31, %v1995_v0  ;;  %v1997_v43 = vrot.slane %v1995_v0, 4  ;;  %v6010_v40 = vrot.slane %v1883_v34, 9  ;;  %9420 = vst [vmem:[#allocation9_spill] sm:$0xff] %v8407_v46 }
 0x115   : > { %v9421_v27 = vcombine.low %v8243_v19, %v8256_v54  ;;  %v8417_v41 = vrot.slane %v4351_v4, 4  ;;  %v8420_v0 = vrot.slane %v4368_v55, 5  ;;  %v4374_v34 = vrot.slane %v4372_v20, 4  ;;  %v8422_v54 = vld [vmem:[#allocation2 + $0x4c] sm:$0xf] }
 0x116   : > { %6748 = vmatmul.mubr.msk.bf16.gmra.mrb[24].mxu1 %vm1367_vm4, %v9415_v21  ;;  %6902 = vmatmul.mubr.msk.bf16.gmra.mrb[8].mxu0 %vm1367_vm4, %v7272_v15  ;;  %v8390_v15 = vrot.slane %v4341_v58, 4  ;;  %v4396_v58 = vshrl.u32 %v4272_v23, 16  ;;  %v7336_v23 = vld [vmem:[#allocation2 + $0x8c] sm:$0x1]  ;;  %v4385_v18 = vrot.slane %v4383_v12, 4  ;;  %v4388_v19 = vrot.slane %v4386_v30, 5 }
 0x117   : > { %6751 = vmatprep.mubr.msk.bf16.mxu1 %vm1367_vm4, %v9416_v28  ;;  %6905 = vmatprep.mubr.msk.bf16.mxu0 %vm1367_vm4, %v7273_v59  ;;  %v7335_v59 = vld [vmem:[#allocation2 + $0x88] sm:$0xf]  ;;  %v7274_v28 = vld [vmem:[#allocation2 + $0x6c] sm:$0xff]   ;;  %v2005_v31 = vrot.slane %v7336_v23, 5  ;;  %9422 = vst [vmem:[#allocation10_spill] sm:$0xff] %v8422_v54  ;;  %v4378_v9 = vshll.u32 %v8395_v36, 16  ;;  %v8430_v23 = vsel %vm7783_vm11, %v1997_v43, %v1998_v33 }
 0x118   : > { %v2002_v21 = vrot.slane %v7335_v59, 5  ;;  %v8401_v59 = vrot.slane %v4354_v52, 5  ;;  %v8426_v4 = vrot.slane %v4392_v49, 5  ;;  %v4398_v42 = vrot.slane %v4396_v58, 4  ;;  %v1884_v30 = vld [vmem:[#allocation2 + $0x90] sm:$0xe] }
 0x119   : > { %v7277_v43 = vld [vmem:[#allocation2 + $0x84] sm:$0xff]   ;;  %v4375_v49 = vor.u32 %v4374_v34, %v8420_v0  ;;  %v4389_v58 = vor.u32 %v4388_v19, %v4385_v18  ;;  %v4277_v12 = vld [vmem:[#allocation2 + $0x54] sm:$0xf]  ;;  %v6011_v18 = vrot.slane %v1884_v30, 9 }
 0x11a   : > { %v2004_v52 = vrot.slane %v2002_v21, 4 }
 0x11b   : > { %v4390_v30 = vrot.slane %v4389_v58, 4 }
 0x11c   : > { %v8445_v33 = vsel %vm7783_vm11, %v2004_v52, %v2005_v31  ;;  %v9423_v52 = vcombine.low %v8247_v13, %v8251_v35  ;;  %v8470_v13 = vld [vmem:[#allocation2 + $0x58] sm:$0xf]  ;;  %v4431_v35 = vshrl.u32 %v4277_v12, 16 }
 0x11d   : > { %v4440_v58 = vshll.u32 %v8470_v13, 16 }
 0x11e   : > { %6752 = vmatmul.mubr.msk.bf16.gmra.mrb[28].mxu1 %vm1367_vm4, %v9419_v24  ;;  %v4274_v24 = vld [vmem:[#allocation2 + $0x48] sm:$0xf]  ;;  %6906 = vmatmul.mubr.msk.bf16.gmra.mrb[12].mxu0 %vm1367_vm4, %v7274_v28  ;;  %v4402_v28 = vshll.u32 %v8407_v46, 16  ;;  %v7278_v46 = vld [vmem:[#allocation2 + $0x90] sm:$0xff]  }
 0x11f   : > { %6757 = vmatprep.mubr.msk.bf16.mxu1 %vm1367_vm4, %v9421_v27  ;;  %6909 = vmatprep.mubr.msk.bf16.mxu0 %vm1367_vm4, %v7276_v53  ;;  %v4365_v27 = vor.u32 %v4364_v3, %v4361_v45  ;;  %v4407_v55 = vshrl.u32 %v4274_v24, 16  ;;  %v4410_v20 = vshll.u32 %v4274_v24, 16  ;;  %v8439_v53 = vsel %vm7783_vm11, %v6010_v40, %v2002_v21 }
 0x120   : > { %v4416_v45 = vshll.u32 %v8422_v54, 16  ;;  %v4420_v3 = vshrl.u32 %v8422_v54, 16  ;;  %v2009_v24 = vrot.slane %v8023_v6, 5  ;;  %v8451_v40 = vrot.slane %v4378_v9, 5  ;;  %v8461_v6 = vld [vmem:[#allocation2 + $0x50] sm:$0x1] }
 0x121   : > { %v8449_v36 = vrot.slane %v4365_v27, 4  ;;  %v4399_v21 = vor.u32 %v4398_v42, %v8426_v4  ;;  %v2016_v54 = vrot.slane %v8039_v25, 5  ;;  %v8459_v31 = vrot.slane %v4402_v28, 5 }
 0x122   : > { %v4409_v34 = vrot.slane %v4407_v55, 4  ;;  %v4412_v19 = vrot.slane %v4410_v20, 5  ;;  %v9424_v42 = vcombine.low %v8266_v39, %v8270_v50  ;;  %v8468_v25 = vrot.slane %v4416_v45, 5  ;;  %v7337_v20 = vld [vmem:[#allocation2 + $0x98] sm:$0x1] }
 0x123   : > { %v4422_v9 = vrot.slane %v4420_v3, 4  ;;  %v4434_v27 = vshll.u32 %v4277_v12, 16  ;;  %v4376_v28 = vrot.slane %v4375_v49, 4  ;;  %v2011_v55 = vrot.slane %v2009_v24, 4  ;;  %v8486_v49 = vld [vmem:[#allocation2 + $0x5c] sm:$0x1] }
 0x124   : > { %v4400_v39 = vrot.slane %v4399_v21, 4  ;;  %v6012_v50 = vrot.slane %v1885_v47, 9  ;;  %v2018_v45 = vrot.slane %v2016_v54, 4  ;;  %v2019_v12 = vrot.slane %v8032_v17, 5  ;;  %9426 = vst [vmem:[#allocation12_spill] sm:$0xff] %v8486_v49 }
 0x125   : > { %v4371_v3 = vsel %vm7461_vm7, %v8449_v36, %v8420_v0  ;;  %v4433_v47 = vrot.slane %v4431_v35, 4  ;;  %v4436_v21 = vrot.slane %v4434_v27, 5  ;;  %v4381_v17 = vsel %vm7461_vm7, %v4376_v28, %v8451_v40 }
 0x126   : > { %6758 = vmatmul.mubr.msk.bf16.vlgmr.msra.gmra.mrb[0].mxu1 %vm1367_vm4, %v9423_v52  ;;  %6910 = vmatmul.mubr.msk.bf16.gmra.mrb[16].mxu0 %vm1367_vm4, %v7277_v43  ;;  %v2012_v52 = vrot.slane %v7337_v20, 5  ;;  %v4426_v43 = vshll.u32 %v8461_v6, 16  ;;  %v4413_v20 = vor.u32 %v4412_v19, %v4409_v34  ;;  %v4395_v36 = vsel %vm7461_vm7, %v4390_v30, %v8426_v4  ;;  %v1886_v19 = vld [vmem:[#allocation2 + $0xa8] sm:$0xe] }
 0x127   : > { %6790 = vmatpush3.bf16.msra.mxu1 %v8171_v61  ;;  %6761 = vmatprep.mubr.msk.bf16.mxu1 %vm1367_vm4, %v9424_v42  ;;  %v8476_v61 = vld [vmem:[%s9383_s3 + $0x20] sm:$0xff]   ;;  %v4444_v42 = vshrl.u32 %v8470_v13, 16  ;;  %v8499_v0 = vsel %vm7783_vm11, %v6011_v18, %v2009_v24  ;;  %v4405_v35 = vsel %vm7461_vm7, %v4400_v39, %v8459_v31  ;;  %v8510_v40 = vsel %vm7783_vm11, %v6012_v50, %v2016_v54 }
 0x128   : > { %9425 = vst [vmem:[#allocation11_spill] sm:$0xff] %v8476_v61  ;;  %6993 = vmatprep.subr.bf16.mxu1 %v8476_v61  ;;  %6913 = vmatprep.mubr.msk.bf16.mxu0 %vm1367_vm4, %v7278_v46  ;;  %v4423_v46 = vor.u32 %v4422_v9, %v8468_v25  ;;  %v7279_v61 = vld [vmem:[#allocation2 + $0x9c] sm:$0xff]   ;;  %v8503_v34 = vsel %vm7783_vm11, %v2011_v55, %v2012_v52  ;;  %v7280_v9 = vld [vmem:[#allocation2 + $0xa8] sm:$0xff]   ;;  %9427 = vst [vmem:[#allocation13_spill] sm:$0xff] %v8510_v40  ;;  %v4450_v24 = vshll.u32 %v8486_v49, 16 }
 0x129   : > { %v8514_v4 = vsel %vm7783_vm11, %v2018_v45, %v2019_v12  ;;  %v9429_v18 = vcombine.low %v8274_v48, %v8278_v37  ;;  %v8521_v27 = vrot.slane %v4426_v43, 5  ;;  %v8523_v28 = vrot.slane %v4440_v58, 5  ;;  %v1887_v37 = vld [vmem:[#allocation2 + $0xb4] sm:$0xe]  ;;  %v8562_v43 = vld [vmem:[#allocation2 + $0x64] sm:$0xf] }
 0x12a   : > { %9428 = vst [vmem:[#allocation14_spill] sm:$0xff] %v8514_v4  ;;  %v4446_v31 = vrot.slane %v4444_v42, 4  ;;  %v2023_v30 = vrot.slane %v8085_v56, 5  ;;  %v9430_v54 = vcombine.low %v8293_v2, %v8297_v57  ;;  %v8530_v55 = vrot.slane %v4413_v20, 4  ;;  %9434 = vst [vmem:[#allocation16_spill] sm:$0xff] %v8562_v43 }
 0x12b   : > { %v8532_v52 = vrot.slane %v4423_v46, 4  ;;  %v4437_v39 = vor.u32 %v4436_v21, %v4433_v47  ;;  %v6013_v48 = vrot.slane %v1886_v19, 9  ;;  %v9431_v50 = vsel %vm7461_vm7, %v8417_v41, %v8401_v59  ;;  %v4280_v41 = vld [vmem:[#allocation2 + $0x60] sm:$0xf]  ;;  %v4283_v46 = vld [vmem:[#allocation2 + $0x6c] sm:$0xf] }
 0x12c   : > { %v9432_v56 = vsel %vm7461_vm7, %v8390_v15, %v8369_v22  ;;  %v8551_v12 = vcombine.low %v4371_v3, %v4381_v17  ;;  %v8560_v15 = vrot.slane %v4450_v24, 5  ;;  %v4447_v58 = vor.u32 %v4446_v31, %v8523_v28  ;;  %v7281_v47 = vld [vmem:[#allocation2 + $0xb4] sm:$0xff]   ;;  %v8622_v24 = vld [vmem:[#allocation2 + $0x88] sm:$0xf] }
 0x12d   : > { %v8545_v2 = vcombine.low %v9432_v56, %v9431_v50  ;;  %v2025_v42 = vrot.slane %v2023_v30, 4  ;;  %v2026_v3 = vrot.slane %v8087_v26, 5  ;;  %v6014_v20 = vrot.slane %v1887_v37, 9  ;;  %v8580_v26 = vld [vmem:[#allocation2 + $0x70] sm:$0xf]  ;;  %v7282_v37 = vld [vmem:[#allocation2 + $0xc0] sm:$0xff]  }
 0x12e   : > { %6762 = vmatmul.mubr.msk.bf16.gmra.mrb[4].mxu1 %vm1367_vm4, %v9429_v18  ;;  %6914 = vmatmul.mubr.msk.bf16.gmra.mrb[20].mxu0 %vm1367_vm4, %v7279_v61  ;;  %v8554_v61 = vcombine.low %v4395_v36, %v4405_v35  ;;  %v8574_v36 = vrot.slane %v4437_v39, 4  ;;  %v8578_v19 = vsel %vm7783_vm11, %v6013_v48, %v2023_v30  ;;  %9435 = vst [vmem:[#allocation17_spill] sm:$0xff] %v8580_v26  ;;  %v2030_v35 = vrot.slane %v8105_v38, 5 }
 0x12f   : > { %6765 = vmatprep.mubr.msk.bf16.mxu1 %vm1367_vm4, %v9430_v54  ;;  %6917 = vmatprep.mubr.msk.bf16.mxu0 %vm1367_vm4, %v7280_v9  ;;  %v4286_v9 = vld [vmem:[#allocation2 + $0x78] sm:$0xf]  ;;  %v4455_v18 = vshrl.u32 %v4280_v41, 16  ;;  %v4458_v31 = vshll.u32 %v4280_v41, 16  ;;  %v8584_v54 = vld [vmem:[#allocation2 + $0x7c] sm:$0xf]  ;;  %v9437_v30 = vcombine.low %v8314_v14, %v8325_v62  ;;  %v8596_v38 = vsel %vm7783_vm11, %v2025_v42, %v2026_v3 }
 0x130   : > { %9433 = vst [vmem:[#allocation15_spill] sm:$0xff] %v8554_v61  ;;  %9436 = vst [vmem:[#allocation18_spill] sm:$0xff] %v8584_v54  ;;  %v4464_v50 = vshll.u32 %v8562_v43, 16  ;;  %v4468_v39 = vshrl.u32 %v8562_v43, 16  ;;  %v4479_v56 = vshrl.u32 %v4283_v46, 16  ;;  %v4482_v22 = vshll.u32 %v4283_v46, 16 }
 0x131   : > { %v8592_v48 = vrot.slane %v4447_v58, 4  ;;  %v4488_v41 = vshll.u32 %v8580_v26, 16  ;;  %v4492_v59 = vshrl.u32 %v8580_v26, 16  ;;  %v9438_v45 = vcombine.low %v8329_v10, %v8333_v5  ;;  %v8604_v46 = vld [vmem:[#allocation2 + $0x68] sm:$0x1]  ;;  %9441 = vst [vmem:[#allocation21_spill] sm:$0xff] %v8622_v24 }
 0x132   : > { %9439 = vst [vmem:[#allocation19_spill] sm:$0xff] %v8604_v46  ;;  %v4503_v14 = vshrl.u32 %v4286_v9, 16  ;;  %v4506_v62 = vshll.u32 %v4286_v9, 16  ;;  %v4512_v58 = vshll.u32 %v8584_v54, 16  ;;  %v8615_v10 = vsel %vm7783_vm11, %v6014_v20, %v2030_v35  ;;  %v8617_v3 = vld [vmem:[#allocation2 + $0x74] sm:$0x1] }
 0x133   : > { %v4457_v5 = vrot.slane %v4455_v18, 4  ;;  %9440 = vst [vmem:[#allocation20_spill] sm:$0xff] %v8617_v3  ;;  %v4289_v9 = vld [vmem:[#allocation2 + $0x84] sm:$0xf]  ;;  %v8620_v21 = vrot.slane %v4464_v50, 5  ;;  %v4470_v17 = vrot.slane %v4468_v39, 4 }
 0x134   : > { %v4484_v57 = vrot.slane %v4482_v22, 5  ;;  %v2032_v42 = vrot.slane %v2030_v35, 4  ;;  %v4474_v4 = vshll.u32 %v8604_v46, 16  ;;  %v8625_v20 = vrot.slane %v4488_v41, 5  ;;  %v8629_v50 = vld [vmem:[#allocation2 + $0x94] sm:$0xf] }
 0x135   : > { %v4494_v18 = vrot.slane %v4492_v59, 4  ;;  %v4505_v40 = vrot.slane %v4503_v14, 4  ;;  %v4508_v26 = vrot.slane %v4506_v62, 5  ;;  %v8627_v43 = vrot.slane %v4512_v58, 5  ;;  %9442 = vst [vmem:[#allocation22_spill] sm:$0xff] %v8629_v50 }
 0x136   : > { %6766 = vmatmul.mubr.msk.bf16.gmra.mrb[8].mxu1 %vm1367_vm4, %v9437_v30  ;;  %v4516_v30 = vshrl.u32 %v8584_v54, 16  ;;  %6918 = vmatmul.mubr.msk.bf16.gmra.mrb[24].mxu0 %vm1367_vm4, %v7281_v47  ;;  %v4481_v47 = vrot.slane %v4479_v56, 4  ;;  %v7283_v54 = vld [vmem:[#allocation2 + $0xcc] sm:$0xff]   ;;  %v8631_v39 = vld [vmem:[#allocation2 + $0x80] sm:$0x1]  ;;  %v4527_v22 = vshrl.u32 %v4289_v9, 16  ;;  %v4471_v41 = vor.u32 %v4470_v17, %v8620_v21 }
 0x137   : > { %6769 = vmatprep.mubr.msk.bf16.mxu1 %vm1367_vm4, %v9438_v45  ;;  %v4460_v45 = vrot.slane %v4458_v31, 5  ;;  %6921 = vmatprep.mubr.msk.bf16.mxu0 %vm1367_vm4, %v7282_v37  ;;  %v4292_v31 = vld [vmem:[#allocation2 + $0x90] sm:$0xf]  ;;  %9443 = vst [vmem:[#allocation23_spill] sm:$0xff] %v8631_v39  ;;  %v4530_v56 = vshll.u32 %v4289_v9, 16  ;;  %v4536_v49 = vshll.u32 %v8622_v24, 16  ;;  %v9444_v62 = vcombine.low %v8337_v8, %v8341_v44 }
 0x138   : > { %v4518_v37 = vrot.slane %v4516_v30, 4  ;;  %v4540_v35 = vshrl.u32 %v8622_v24, 16  ;;  %v4485_v59 = vor.u32 %v4484_v57, %v4481_v47  ;;  %v4498_v14 = vshll.u32 %v8617_v3, 16 }
 0x139   : > { %v4461_v46 = vor.u32 %v4460_v45, %v4457_v5  ;;  %v4551_v58 = vshrl.u32 %v4292_v31, 16  ;;  %v4554_v30 = vshll.u32 %v4292_v31, 16  ;;  %v4560_v61 = vshll.u32 %v8629_v50, 16 }
 0x13a   : > { %v4564_v9 = vshrl.u32 %v8629_v50, 16  ;;  %v9445_v24 = vcombine.low %v8349_v29, %v8353_v16  ;;  %v4495_v57 = vor.u32 %v4494_v18, %v8625_v20  ;;  %v4509_v17 = vor.u32 %v4508_v26, %v4505_v40  ;;  %v8655_v18 = vld [vmem:[#allocation2 + $0x8c] sm:$0x1] }
 0x13b   : > { %v4519_v5 = vor.u32 %v4518_v37, %v8627_v43  ;;  %v4522_v8 = vshll.u32 %v8631_v39, 16  ;;  %v4529_v44 = vrot.slane %v4527_v22, 4  ;;  %v4532_v45 = vrot.slane %v4530_v56, 5 }
 0x13c   : > { %v8651_v47 = vrot.slane %v4536_v49, 5  ;;  %v4542_v31 = vrot.slane %v4540_v35, 4  ;;  %v4462_v29 = vrot.slane %v4461_v46, 4  ;;  %v4472_v16 = vrot.slane %v4471_v41, 4  ;;  %v8659_v35 = vld [vmem:[#allocation2 + $0x98] sm:$0x1] }
 0x13d   : > { %v4553_v40 = vrot.slane %v4551_v58, 4  ;;  %v4556_v26 = vrot.slane %v4554_v30, 5  ;;  %v8657_v37 = vrot.slane %v4560_v61, 5  ;;  %v4566_v50 = vrot.slane %v4564_v9, 4 }
 0x13e   : > { %6770 = vmatmul.mubr.msk.bf16.gmra.mrb[12].mxu1 %vm1367_vm4, %v9444_v62  ;;  %6922 = vmatmul.mubr.msk.bf16.gmra.mrb[28].mxu0 %vm1367_vm4, %v7283_v54  ;;  %v4500_v62 = vrot.slane %v4498_v14, 5  ;;  %v4295_v54 = vld [vmem:[#allocation2 + $0x9c] sm:$0xf]  ;;  %v4486_v22 = vrot.slane %v4485_v59, 4  ;;  %v4496_v56 = vrot.slane %v4495_v57, 4  ;;  %v4510_v49 = vrot.slane %v4509_v17, 4 }
 0x13f   : > { %6773 = vmatprep.mubr.msk.bf16.mxu1 %vm1367_vm4, %v9445_v24  ;;  %6927 = vmatprep.mubr.msk.bf16.mxu0 %vm1367_vm4, %v8388_v7  ;;  %v4476_v24 = vrot.slane %v4474_v4, 5  ;;  %v4524_v39 = vrot.slane %v4522_v8, 5  ;;  %v4520_v3 = vrot.slane %v4519_v5, 4  ;;  %v4533_v7 = vor.u32 %v4532_v45, %v4529_v44 }
 0x140   : > { %v4543_v46 = vor.u32 %v4542_v31, %v8651_v47  ;;  %v4546_v4 = vshll.u32 %v8655_v18, 16  ;;  %v4453_v61 = vsel %vm7461_vm7, %v8592_v48, %v8560_v15  ;;  %v9446_v41 = vrot.slane %v8097_v60, 5  ;;  %v8682_v48 = vld [vmem:[#allocation2 + $0xa0] sm:$0xf] }
 0x141   : > { %v4575_v14 = vshrl.u32 %v4295_v54, 16  ;;  %v4578_v58 = vshll.u32 %v4295_v54, 16  ;;  %v9447_v30 = vcombine.low %v8357_v51, %v8361_v11  ;;  %v4467_v9 = vsel %vm7461_vm7, %v4462_v29, %v8620_v21 }
 0x142   : > { %v8671_v59 = vsel %vm7783_vm11, %v2032_v42, %v9446_v41  ;;  %v4557_v57 = vor.u32 %v4556_v26, %v4553_v40  ;;  %v4567_v15 = vor.u32 %v4566_v50, %v8657_v37  ;;  %v4570_v60 = vshll.u32 %v8659_v35, 16  ;;  %v4298_v40 = vld [vmem:[#allocation2 + $0xa8] sm:$0xf] }
 0x143   : > { %v9448_v42 = vcombine.low %v8405_v1, %v8430_v23  ;;  %v4477_v51 = vsel %vm7461_vm7, %v4472_v16, %v4476_v24  ;;  %v4491_v11 = vsel %vm7461_vm7, %v4486_v22, %v8625_v20  ;;  %v4501_v21 = vsel %vm7461_vm7, %v4496_v56, %v4500_v62  ;;  %v9449_v20 = vld [vmem:[#allocation6_spill] sm:$0xff]  ;;  %v4996_v16 = vld [vmem:[#allocation2 + $0x48] sm:$0xe] }
 0x144   : > { %v4515_v50 = vsel %vm7461_vm7, %v4510_v49, %v8627_v43  ;;  %v4525_v1 = vsel %vm7461_vm7, %v4520_v3, %v4524_v39  ;;  %v8702_v23 = vrot.slane %v4533_v7, 4  ;;  %v8704_v17 = vrot.slane %v4543_v46, 4  ;;  %v4998_v7 = vld [vmem:[#allocation2 + $0x60] sm:$0xe] }
 0x145   : > { %v8706_v5 = vrot.slane %v4546_v4, 5  ;;  %v8711_v8 = vrot.slane %v4575_v14, 4  ;;  %v8713_v43 = vrot.slane %v4578_v58, 5  ;;  %v4588_v44 = vshrl.u32 %v8682_v48, 16  ;;  %v8777_v14 = vld [vmem:[#allocation2 + $0xac] sm:$0xf] }
 0x146   : > { %6774 = vmatmul.mubr.msk.bf16.gmra.mrb[16].mxu1 %vm1367_vm4, %v9447_v30  ;;  %6928 = vmatmul.mubr.msk.bf16.vlgmr.msra.gmra.mrb[0].mxu0 %vm1367_vm4, %v8545_v2  ;;  %v4584_v2 = vshll.u32 %v8682_v48, 16  ;;  %v9450_v3 = vsel %vm7461_vm7, %v8532_v52, %v8521_v27  ;;  %v9451_v39 = vsel %vm7461_vm7, %v8530_v55, %v8468_v25  ;;  %v8729_v31 = vrot.slane %v4567_v15, 4  ;;  %v8746_v52 = vld [vmem:[#allocation2 + $0xa4] sm:$0x1] }
 0x147   : > { %6777 = vmatprep.mubr.msk.bf16.mxu1 %vm1367_vm4, %v9448_v42  ;;  %6960 = vmatpush3.bf16.msra.mxu0 %v9449_v20  ;;  %v6212_v45 = vcombine.low %v9451_v39, %v9450_v3  ;;  %v8731_v29 = vrot.slane %v4570_v60, 5  ;;  %v9452_v24 = vsel %vm7461_vm7, %v8574_v36, %v8523_v28  ;;  %v6031_v27 = vcombine.low %v8578_v19, %v8596_v38  ;;  %v4997_v19 = vld [vmem:[#allocation2 + $0x54] sm:$0xe]  ;;  %v9456_v60 = vld [vmem:[#allocation15_spill] sm:$0xff]  ;;  %v4999_v20 = vld [vmem:[#allocation2 + $0x6c] sm:$0xe] }
 0x148   : > { %6931 = vmatprep.mubr.msk.bf16.mxu0 %vm1367_vm4, %v8551_v12  ;;  %v8727_v12 = vrot.slane %v4557_v57, 4  ;;  %v8738_v62 = vcombine.low %v9452_v24, %v4453_v61  ;;  %v6032_v25 = vcombine.low %v8615_v10, %v8671_v59  ;;  %v8744_v55 = vcombine.low %v4467_v9, %v4477_v51  ;;  %v9457_v51 = vld [vmem:[#allocation12_spill] sm:$0xff]  ;;  %v9469_v61 = vld [vmem:[#allocation21_spill] sm:$0xff] }
 0x149   : > { %v8748_v26 = vcombine.low %v4491_v11, %v4501_v21  ;;  %v8750_v54 = vcombine.low %v4515_v50, %v4525_v1  ;;  %v4581_v38 = vor.u32 %v8713_v43, %v8711_v8  ;;  %v8762_v22 = vrot.slane %v4584_v2, 5  ;;  %v9458_v50 = vld [vmem:[#allocation16_spill] sm:$0xff] }
 0x14a   : > { %v4590_v56 = vrot.slane %v4588_v44, 4  ;;  %v6245_v49 = vrot.slane %v4996_v16, 9  ;;  %v9453_v46 = vcombine.low %v8439_v53, %v8445_v33  ;;  %v4594_v41 = vshll.u32 %v8746_v52, 16  ;;  %v9455_v33 = vld [vmem:[#allocation10_spill] sm:$0xff]  ;;  %v9459_v44 = vld [vmem:[#allocation19_spill] sm:$0xff]  ;;  %v9460_v16 = vld [vmem:[#allocation17_spill] sm:$0xff] }
 0x14b   : > { %v4599_v58 = vshrl.u32 %v4298_v40, 16  ;;  %v9454_v53 = vcombine.low %v8499_v0, %v8503_v34  ;;  %v5086_v30 = vrot.slane %v9455_v33, 5  ;;  %v5089_v9 = vrot.slane %v8461_v6, 5  ;;  %v2722_v33 = vld [vmem:[#allocation2 + $0x78] sm:$0xf] }
 0x14c   : > { %v6246_v57 = vrot.slane %v4997_v19, 9  ;;  %v5093_v15 = vrot.slane %v8470_v13, 5  ;;  %v4602_v42 = vshll.u32 %v4298_v40, 16  ;;  %v5096_v11 = vrot.slane %v9457_v51, 5  ;;  %v9461_v40 = vld [vmem:[#allocation20_spill] sm:$0xff]  ;;  %v9463_v51 = vld [vmem:[#allocation14_spill] sm:$0xff] }
 0x14d   : > { %v6247_v21 = vrot.slane %v4998_v7, 9  ;;  %v5100_v1 = vrot.slane %v9458_v50, 5  ;;  %v4608_v0 = vshll.u32 %v8777_v14, 16  ;;  %v8794_v6 = vsel %vm7783_vm11, %v6245_v49, %v5086_v30  ;;  %v9468_v7 = vld [vmem:[#allocation23_spill] sm:$0xff] }
 0x14e   : > { %6778 = vmatmul.mubr.msk.bf16.gmra.mrb[20].mxu1 %vm1367_vm4, %v9453_v46  ;;  %6932 = vmatmul.mubr.msk.bf16.gmra.mrb[4].mxu0 %vm1367_vm4, %v9456_v60  ;;  %v5088_v34 = vrot.slane %v5086_v30, 4  ;;  %v8798_v13 = vsel %vm7783_vm11, %v6246_v57, %v5093_v15  ;;  %v5095_v8 = vrot.slane %v5093_v15, 4  ;;  %v5103_v3 = vrot.slane %v9459_v44, 5  ;;  %v8822_v30 = vld [vmem:[#allocation2 + $0xb0] sm:$0x1]  ;;  %v9462_v60 = vld [vmem:[#allocation13_spill] sm:$0xff] }
 0x14f   : > { %6781 = vmatprep.mubr.msk.bf16.mxu1 %vm1367_vm4, %v9454_v53  ;;  %6935 = vmatprep.mubr.msk.bf16.mxu0 %vm1367_vm4, %v6212_v45  ;;  %v8802_v43 = vsel %vm7783_vm11, %v6247_v21, %v5100_v1  ;;  %v5102_v2 = vrot.slane %v5100_v1, 4  ;;  %v6248_v45 = vrot.slane %v4999_v20, 9  ;;  %v5107_v24 = vrot.slane %v9460_v16, 5  ;;  %v8857_v16 = vld [vmem:[#allocation2 + $0xb8] sm:$0xf] }
 0x150   : > { %v8807_v39 = vsel %vm7783_vm11, %v5088_v34, %v5089_v9  ;;  %v5110_v19 = vrot.slane %v9461_v40, 5  ;;  %v4591_v49 = vor.u32 %v4590_v56, %v8762_v22  ;;  %v8816_v46 = vsel %vm7783_vm11, %v5095_v8, %v5096_v11  ;;  %v4301_v34 = vld [vmem:[#allocation2 + $0xb4] sm:$0xf]  ;;  %v4304_v56 = vld [vmem:[#allocation2 + $0xc0] sm:$0xf] }
 0x151   : > { %v8820_v53 = vsel %vm7783_vm11, %v5102_v2, %v5103_v3  ;;  %v8830_v57 = vsel %vm7783_vm11, %v6248_v45, %v5107_v24  ;;  %v5109_v15 = vrot.slane %v5107_v24, 4  ;;  %v9464_v11 = vcombine.low %v9462_v60, %v9463_v51  ;;  %v5000_v45 = vld [vmem:[#allocation2 + $0x78] sm:$0xe]  ;;  %v9467_v51 = vld [vmem:[#allocation18_spill] sm:$0xff] }
 0x152   : > { %v8836_v21 = vrot.slane %v4581_v38, 4  ;;  %v4601_v50 = vrot.slane %v4599_v58, 4  ;;  %v4604_v1 = vrot.slane %v4602_v42, 5  ;;  %v4612_v20 = vshrl.u32 %v8777_v14, 16 }
 0x153   : > { %v8840_v8 = vrot.slane %v4594_v41, 5  ;;  %v8844_v2 = vsel %vm7783_vm11, %v5109_v15, %v5110_v19  ;;  %v2960_v44 = vshrl.u32 %v2722_v33, 16  ;;  %v2963_v3 = vshll.u32 %v2722_v33, 16  ;;  %v5001_v41 = vld [vmem:[#allocation2 + $0x84] sm:$0xe]  ;;  %v9465_v33 = vld [vmem:[#allocation5_spill] sm:$0xff] }
 0x154   : > { %v8848_v38 = vrot.slane %v4591_v49, 4  ;;  %v8850_v58 = vrot.slane %v4608_v0, 5  ;;  %v4618_v42 = vshll.u32 %v8822_v30, 16  ;;  %v4623_v24 = vshrl.u32 %v4301_v34, 16 }
 0x155   : > { %v2962_v40 = vrot.slane %v2960_v44, 4  ;;  %v2965_v19 = vrot.slane %v2963_v3, 5  ;;  %v4605_v49 = vor.u32 %v4604_v1, %v4601_v50  ;;  %v4614_v15 = vrot.slane %v4612_v20, 4  ;;  %v8871_v1 = vld [vmem:[#allocation2 + $0xc4] sm:$0xf] }
 0x156   : > { %6782 = vmatmul.mubr.msk.bf16.gmra.mrb[24].mxu1 %vm1367_vm4, %v9464_v11  ;;  %6936 = vmatmul.mubr.msk.bf16.gmra.mrb[8].mxu0 %vm1367_vm4, %v8738_v62  ;;  %v9466_v62 = vld [vmem:[#allocation4_spill] sm:$0xff]  ;;  %v6249_v60 = vrot.slane %v5000_v45, 9  ;;  %v5114_v11 = vrot.slane %v9467_v51, 5  ;;  %v6250_v4 = vrot.slane %v5001_v41, 9  ;;  %v5121_v28 = vrot.slane %v9469_v61, 5 }
 0x157   : > { %6785 = vmatprep.mubr.msk.bf16.mxu1 %vm1367_vm4, %v6031_v27  ;;  %6939 = vmatprep.mubr.msk.bf16.mxu0 %vm1367_vm4, %v8744_v55  ;;  %v2982_v0 = vsel %vm7461_vm7, %v9466_v62, %v9465_v33  ;;  %v7285_v27 = vld [vmem:[#allocation2 + $0xc] sm:$0xff]   ;;  %v2966_v9 = vor.u32 %v2965_v19, %v2962_v40  ;;  %v5117_v55 = vrot.slane %v9468_v7, 5  ;;  %v4626_v44 = vshll.u32 %v4301_v34, 16  ;;  %v7286_v33 = vld [vmem:[#allocation2 + $0x18] sm:$0xff]  }
 0x158   : > { %v4632_v3 = vshll.u32 %v8857_v16, 16  ;;  %v8869_v36 = vsel %vm7783_vm11, %v6249_v60, %v5114_v11  ;;  %v5116_v50 = vrot.slane %v5114_v11, 4  ;;  %v8875_v45 = vsel %vm7783_vm11, %v6250_v4, %v5121_v28  ;;  %v8918_v60 = vld [vmem:[#allocation2 + $0xbc] sm:$0x1] }
 0x159   : > { %v2967_v20 = vrot.slane %v2966_v9, 4  ;;  %v5123_v40 = vrot.slane %v5121_v28, 4  ;;  %v5124_v7 = vrot.slane %v8655_v18, 5  ;;  %v4615_v61 = vor.u32 %v4614_v15, %v8850_v58  ;;  %v9470_v28 = vld [vmem:[#allocation3_spill] sm:$0xff] }
 0x15a   : > { %v4636_v34 = vshrl.u32 %v8857_v16, 16  ;;  %v4647_v41 = vshrl.u32 %v4304_v56, 16  ;;  %v8886_v9 = vsel %vm7783_vm11, %v5116_v50, %v5117_v55  ;;  %v4650_v4 = vshll.u32 %v4304_v56, 16 }
 0x15b   : > { %v2972_v18 = vsel %vm7461_vm7, %v2967_v20, %v9470_v28  ;;  %v6267_v10 = vcombine.low %v8869_v36, %v8886_v9  ;;  %v8896_v59 = vsel %vm7783_vm11, %v5123_v40, %v5124_v7  ;;  %v4660_v19 = vshrl.u32 %v8871_v1, 16  ;;  %v5002_v40 = vld [vmem:[#allocation2 + $0x90] sm:$0xe]  ;;  %v7287_v7 = vld [vmem:[#allocation2 + $0x24] sm:$0xff]  }
 0x15c   : > { %v6268_v56 = vcombine.low %v8875_v45, %v8896_v59  ;;  %v9471_v62 = vsel %vm7461_vm7, %v8704_v17, %v8706_v5  ;;  %v4625_v51 = vrot.slane %v4623_v24, 4  ;;  %v4628_v11 = vrot.slane %v4626_v44, 5 }
 0x15d   : > { %v4616_v55 = vrot.slane %v4615_v61, 4  ;;  %v4620_v50 = vrot.slane %v4618_v42, 5  ;;  %v8920_v20 = vrot.slane %v4632_v3, 5  ;;  %v9473_v17 = vsel %vm7461_vm7, %v8729_v31, %v8731_v29  ;;  %v8936_v42 = vld [vmem:[#allocation2 + $0xc8] sm:$0x1] }
 0x15e   : > { %6786 = vmatmul.mubr.msk.bf16.gmra.mrb[28].mxu1 %vm1367_vm4, %v6032_v25  ;;  %6940 = vmatmul.mubr.msk.bf16.gmra.mrb[12].mxu0 %vm1367_vm4, %v8748_v26  ;;  %v4656_v25 = vshll.u32 %v8871_v1, 16  ;;  %v9472_v26 = vsel %vm7461_vm7, %v8702_v23, %v8651_v47  ;;  %v9474_v47 = vsel %vm7461_vm7, %v8727_v12, %v8657_v37  ;;  %v4587_v5 = vsel %vm7461_vm7, %v8836_v21, %v8762_v22  ;;  %v4307_v12 = vld [vmem:[#allocation2 + $0xcc] sm:$0xf]  ;;  %v8948_v21 = vld [vmem:[#allocation2 + $0xd0] sm:$0xf] }
 0x15f   : > { %6791 = vmatprep.mubr.msk.bf16.mxu1 %vm1367_vm4, %v7285_v27  ;;  %v8902_v27 = vcombine.low %v2972_v18, %v2982_v0  ;;  %6943 = vmatprep.mubr.msk.bf16.mxu0 %vm1367_vm4, %v8750_v54  ;;  %v6217_v15 = vcombine.low %v9472_v26, %v9471_v62  ;;  %v4606_v0 = vrot.slane %v4605_v49, 4  ;;  %v4638_v54 = vrot.slane %v4636_v34, 4  ;;  %v9475_v34 = vld [vmem:[#allocation22_spill] sm:$0xff] }
 0x160   : > { %v6218_v23 = vcombine.low %v9474_v47, %v9473_v17  ;;  %v4649_v24 = vrot.slane %v4647_v41, 4  ;;  %v4652_v49 = vrot.slane %v4650_v4, 5  ;;  %v4597_v31 = vsel %vm7461_vm7, %v8848_v38, %v8840_v8  ;;  %v5003_v4 = vld [vmem:[#allocation2 + $0x9c] sm:$0xe] }
 0x161   : > { %v4642_v29 = vshll.u32 %v8918_v60, 16  ;;  %v8943_v44 = vrot.slane %v4656_v25, 5  ;;  %v4662_v37 = vrot.slane %v4660_v19, 4  ;;  %v4611_v3 = vsel %vm7461_vm7, %v4606_v0, %v8850_v58  ;;  %v9476_v25 = vld [vmem:[#allocation11_spill] sm:$0xff] }
 0x162   : > { %v4629_v22 = vor.u32 %v4628_v11, %v4625_v51  ;;  %v6251_v61 = vrot.slane %v5002_v40, 9  ;;  %v5128_v41 = vrot.slane %v9475_v34, 5  ;;  %v4621_v8 = vsel %vm7461_vm7, %v4616_v55, %v4620_v50  ;;  %v7288_v40 = vld [vmem:[#allocation2 + $0x30] sm:$0xff]  }
 0x163   : > { %v4639_v38 = vor.u32 %v4638_v54, %v8920_v20  ;;  %v4666_v28 = vshll.u32 %v8936_v42, 16  ;;  %v5131_v18 = vrot.slane %v8659_v35, 5  ;;  %v4653_v58 = vor.u32 %v4652_v49, %v4649_v24  ;;  %v7289_v24 = vld [vmem:[#allocation2 + $0x3c] sm:$0xff]  }
 0x164   : > { %v4671_v19 = vshrl.u32 %v4307_v12, 16  ;;  %v8961_v62 = vsel %vm7783_vm11, %v6251_v61, %v5128_v41  ;;  %v4663_v26 = vor.u32 %v4662_v37, %v8943_v44  ;;  %v4674_v0 = vshll.u32 %v4307_v12, 16 }
 0x165   : > { %v4680_v51 = vshll.u32 %v8948_v21, 16  ;;  %v6252_v11 = vrot.slane %v5003_v4, 9  ;;  %v4684_v35 = vshrl.u32 %v8948_v21, 16  ;;  %v5135_v50 = vrot.slane %v8682_v48, 5  ;;  %v8980_v4 = vld [vmem:[#allocation2 + $0xd4] sm:$0x1] }
 0x166   : > { %6792 = vmatmul.mubr.msk.bf16.vlgmr.msra.gmra.mrb[0].mxu1 %vm1367_vm4, %v7286_v33  ;;  %v5130_v33 = vrot.slane %v5128_v41, 4  ;;  %6944 = vmatmul.mubr.msk.bf16.gmra.mrb[16].mxu0 %vm1367_vm4, %v6217_v15  ;;  %v5138_v54 = vrot.slane %v8746_v52, 5  ;;  %v6219_v15 = vcombine.low %v4587_v5, %v4597_v31  ;;  %v4644_v17 = vrot.slane %v4642_v29, 5 }
 0x167   : > { %6994 = vmatpush3.bf16.msra.mxu1 %v9476_v25  ;;  %6795 = vmatprep.mubr.msk.bf16.mxu1 %vm1367_vm4, %v7287_v7  ;;  %v4630_v7 = vrot.slane %v4629_v22, 4  ;;  %v6220_v49 = vcombine.low %v4611_v3, %v4621_v8  ;;  %v8978_v37 = vsel %vm7783_vm11, %v6252_v11, %v5135_v50  ;;  %v5137_v12 = vrot.slane %v5135_v50, 4  ;;  %v5004_v22 = vld [vmem:[#allocation2 + $0xa8] sm:$0xe]  ;;  %v7339_v11 = vld [vmem:[#allocation2 + $0x1c] sm:$0xf] }
 0x168   : > { %6947 = vmatprep.mubr.msk.bf16.mxu0 %vm1367_vm4, %v6218_v23  ;;  %v8970_v55 = vsel %vm7783_vm11, %v5130_v33, %v5131_v18  ;;  %v4640_v23 = vrot.slane %v4639_v38, 4  ;;  %v4654_v61 = vrot.slane %v4653_v58, 4  ;;  %v4668_v34 = vrot.slane %v4666_v28, 5 }
 0x169   : > { %v6269_v47 = vcombine.low %v8961_v62, %v8970_v55  ;;  %v4673_v48 = vrot.slane %v4671_v19, 4  ;;  %v4676_v41 = vrot.slane %v4674_v0, 5  ;;  %v4664_v52 = vrot.slane %v4663_v26, 4  ;;  %v5005_v0 = vld [vmem:[#allocation2 + $0xb4] sm:$0xe] }
 0x16a   : > { %v8982_v5 = vrot.slane %v4680_v51, 5  ;;  %v4686_v31 = vrot.slane %v4684_v35, 4  ;;  %v8986_v29 = vsel %vm7783_vm11, %v5137_v12, %v5138_v54  ;;  %v4635_v8 = vsel %vm7461_vm7, %v4630_v7, %v8920_v20  ;;  %v4992_v20 = vld [vmem:[#allocation2 + $0x18] sm:$0xe]  ;;  %v7290_v51 = vld [vmem:[#allocation2 + $0x48] sm:$0xff]  }
 0x16b   : > { %v6270_v3 = vcombine.low %v8978_v37, %v8986_v29  ;;  %v4645_v38 = vsel %vm7461_vm7, %v4640_v23, %v4644_v17  ;;  %v4659_v28 = vsel %vm7461_vm7, %v4654_v61, %v8943_v44  ;;  %v4677_v18 = vor.u32 %v4676_v41, %v4673_v48  ;;  %v7291_v44 = vld [vmem:[#allocation2 + $0x54] sm:$0xff]   ;;  %v7340_v48 = vld [vmem:[#allocation2 + $0x20] sm:$0x1] }
 0x16c   : > { %v4690_v25 = vshll.u32 %v8980_v4, 16  ;;  %v4669_v58 = vsel %vm7461_vm7, %v4664_v52, %v4668_v34  ;;  %v4687_v19 = vor.u32 %v4686_v31, %v8982_v5  ;;  %v6253_v33 = vrot.slane %v5004_v22, 9 }
 0x16d   : > { %v5142_v26 = vrot.slane %v8777_v14, 5  ;;  %v5058_v35 = vrot.slane %v7339_v11, 5  ;;  %v6221_v50 = vcombine.low %v4635_v8, %v4645_v38  ;;  %v6222_v7 = vcombine.low %v4659_v28, %v4669_v58  ;;  %v7341_v8 = vld [vmem:[#allocation2 + $0x28] sm:$0xf] }
 0x16e   : > { %6796 = vmatmul.mubr.msk.bf16.gmra.mrb[4].mxu1 %vm1367_vm4, %v7288_v40  ;;  %6948 = vmatmul.mubr.msk.bf16.gmra.mrb[20].mxu0 %vm1367_vm4, %v6219_v15  ;;  %v5145_v15 = vrot.slane %v8822_v30, 5  ;;  %v4692_v17 = vrot.slane %v4690_v25, 5  ;;  %v4678_v23 = vrot.slane %v4677_v18, 4  ;;  %v4688_v12 = vrot.slane %v4687_v19, 4  ;;  %v9477_v18 = vld [vmem:[#allocation7_spill] sm:$0xff] }
 0x16f   : > { %6799 = vmatprep.mubr.msk.bf16.mxu1 %vm1367_vm4, %v7289_v24  ;;  %6951 = vmatprep.mubr.msk.bf16.mxu0 %vm1367_vm4, %v6220_v49  ;;  %v9009_v54 = vsel %vm7783_vm11, %v6253_v33, %v5142_v26  ;;  %v5144_v40 = vrot.slane %v5142_v26, 4  ;;  %v6241_v24 = vrot.slane %v4992_v20, 9  ;;  %v6254_v49 = vrot.slane %v5005_v0, 9  ;;  %v5006_v19 = vld [vmem:[#allocation2 + $0xc0] sm:$0xe] }
 0x170   : > { %v5149_v61 = vrot.slane %v8857_v16, 5  ;;  %v5060_v34 = vrot.slane %v5058_v35, 4  ;;  %v5061_v41 = vrot.slane %v7340_v48, 5  ;;  %v5152_v52 = vrot.slane %v8918_v60, 5  ;;  %v4993_v16 = vld [vmem:[#allocation2 + $0x24] sm:$0xe] }
 0x171   : > { %v9014_v14 = vsel %vm7783_vm11, %v5144_v40, %v5145_v15  ;;  %v5065_v38 = vrot.slane %v7341_v8, 5  ;;  %v4683_v28 = vsel %vm7461_vm7, %v4678_v23, %v8982_v5  ;;  %v4693_v60 = vsel %vm7461_vm7, %v4688_v12, %v4692_v17  ;;  %v7292_v20 = vld [vmem:[#allocation2 + $0x60] sm:$0xff]   ;;  %v4994_v0 = vld [vmem:[#allocation2 + $0x30] sm:$0xe]  ;;  %v7342_v40 = vld [vmem:[#allocation2 + $0x2c] sm:$0x1] }
 0x172   : > { %v6271_v30 = vcombine.low %v9009_v54, %v9014_v14  ;;  %v9024_v31 = vsel %vm7783_vm11, %v6254_v49, %v5149_v61  ;;  %v5151_v22 = vrot.slane %v5149_v61, 4  ;;  %v5072_v25 = vrot.slane %v9477_v18, 5  ;;  %v5007_v17 = vld [vmem:[#allocation2 + $0xcc] sm:$0xe]  ;;  %v9478_v61 = vld [vmem:[#allocation8_spill] sm:$0xff] }
 0x173   : > { %v5059_v33 = vsel %vm7783_vm11, %v6241_v24, %v5058_v35  ;;  %v5062_v26 = vsel %vm7783_vm11, %v5060_v34, %v5061_v41  ;;  %v6242_v11 = vrot.slane %v4993_v16, 9  ;;  %v5068_v15 = vrot.slane %v7342_v40, 5  ;;  %v2719_v18 = vld [vmem:[#allocation2 + $0x6c] sm:$0xf] }
 0x174   : > { %v9036_v58 = vsel %vm7783_vm11, %v5151_v22, %v5152_v52  ;;  %v6259_v49 = vcombine.low %v5059_v33, %v5062_v26  ;;  %v6243_v23 = vrot.slane %v4994_v0, 9  ;;  %v5074_v12 = vrot.slane %v5072_v25, 4  ;;  %v4995_v22 = vld [vmem:[#allocation2 + $0x3c] sm:$0xe] }
 0x175   : > { %v6272_v5 = vcombine.low %v9024_v31, %v9036_v58  ;;  %v5075_v35 = vrot.slane %v9478_v61, 5  ;;  %v5156_v24 = vrot.slane %v8871_v1, 5  ;;  %v5159_v34 = vrot.slane %v8936_v42, 5 }
 0x176   : > { %6800 = vmatmul.mubr.msk.bf16.gmra.mrb[8].mxu1 %vm1367_vm4, %v7290_v51  ;;  %6952 = vmatmul.mubr.msk.bf16.gmra.mrb[24].mxu0 %vm1367_vm4, %v6221_v50  ;;  %v7293_v51 = vld [vmem:[#allocation2 + $0x6c] sm:$0xff]   ;;  %v6223_v50 = vcombine.low %v4683_v28, %v4693_v60  ;;  %v5066_v48 = vsel %vm7783_vm11, %v6242_v11, %v5065_v38  ;;  %v6256_v41 = vrot.slane %v5007_v17, 9  ;;  %v5163_v1 = vrot.slane %v8948_v21, 5  ;;  %v7343_v28 = vld [vmem:[#allocation2 + $0x40] sm:$0xf] }
 0x177   : > { %6803 = vmatprep.mubr.msk.bf16.mxu1 %vm1367_vm4, %v7291_v44  ;;  %6955 = vmatprep.mubr.msk.bf16.mxu0 %vm1367_vm4, %v6222_v7  ;;  %v5067_v44 = vrot.slane %v5065_v38, 4  ;;  %v6255_v7 = vrot.slane %v5006_v19, 9  ;;  %v5158_v8 = vrot.slane %v5156_v24, 4  ;;  %v5073_v42 = vsel %vm7783_vm11, %v6243_v23, %v5072_v25  ;;  %v7295_v25 = vld [vmem:[#allocation2 + $0x84] sm:$0xff]  }
 0x178   : > { %v5076_v38 = vsel %vm7783_vm11, %v5074_v12, %v5075_v35  ;;  %v5079_v60 = vrot.slane %v7343_v28, 5  ;;  %v5166_v19 = vrot.slane %v8980_v4, 5  ;;  %v9071_v21 = vsel %vm7783_vm11, %v6256_v41, %v5163_v1  ;;  %v9479_v11 = vld [vmem:[#allocation9_spill] sm:$0xff] }
 0x179   : > { %v5069_v52 = vsel %vm7783_vm11, %v5067_v44, %v5068_v15  ;;  %v9056_v16 = vsel %vm7783_vm11, %v6255_v7, %v5156_v24  ;;  %v9067_v33 = vsel %vm7783_vm11, %v5158_v8, %v5159_v34  ;;  %v5165_v26 = vrot.slane %v5163_v1, 4  ;;  %v7297_v8 = vld [vmem:[#allocation2 + $0x9c] sm:$0xff]   ;;  %v2725_v1 = vld [vmem:[#allocation2 + $0x84] sm:$0xf] }
 0x17a   : > { %v6260_v0 = vcombine.low %v5066_v48, %v5069_v52  ;;  %v6273_v44 = vcombine.low %v9056_v16, %v9067_v33  ;;  %v6261_v40 = vcombine.low %v5073_v42, %v5076_v38  ;;  %v2936_v4 = vshrl.u32 %v2719_v18, 16 }
 0x17b   : > { %v2939_v15 = vshll.u32 %v2719_v18, 16  ;;  %v9078_v7 = vsel %vm7783_vm11, %v5165_v26, %v5166_v19  ;;  %v5081_v17 = vrot.slane %v5079_v60, 4  ;;  %v7345_v18 = vld [vmem:[#allocation2 + $0x74] sm:$0x1]  ;;  %v2987_v26 = vshll.u32 %v2725_v1, 16 }
 0x17c   : > { %v6274_v61 = vcombine.low %v9071_v21, %v9078_v7  ;;  %v2938_v35 = vrot.slane %v2936_v4, 4  ;;  %v2955_v19 = vshll.u32 %v7345_v18, 16  ;;  %v7298_v4 = vld [vmem:[#allocation2 + $0xa8] sm:$0xff]  }
 0x17d   : > { %v2941_v24 = vrot.slane %v2939_v15, 5  ;;  %v7299_v15 = vld [vmem:[#allocation2 + $0xb4] sm:$0xff]  }
 0x17e   : > { %6804 = vmatmul.mubr.msk.bf16.gmra.mrb[12].mxu1 %vm1367_vm4, %v7292_v20  ;;  %6956 = vmatmul.mubr.msk.bf16.gmra.mrb[28].mxu0 %vm1367_vm4, %v6223_v50  ;;  %v7294_v20 = vld [vmem:[#allocation2 + $0x78] sm:$0xff]   ;;  %v5082_v50 = vrot.slane %v9479_v11, 5  ;;  %v9480_v11 = vcombine.low %v8794_v6, %v8807_v39  ;;  %v7347_v39 = vld [vmem:[#allocation2 + $0x8c] sm:$0x1] }
 0x17f   : > { %6807 = vmatprep.mubr.msk.bf16.mxu1 %vm1367_vm4, %v7293_v51  ;;  %6961 = vmatprep.mubr.msk.bf16.mxu0 %vm1367_vm4, %v6259_v49  ;;  %v6244_v51 = vrot.slane %v4995_v22, 9  ;;  %v7344_v49 = vld [vmem:[#allocation2 + $0x70] sm:$0xf]  ;;  %v2942_v38 = vor.u32 %v2941_v24, %v2938_v35 }
 0x180   : > { %v2945_v23 = vshll.u32 %v7344_v49, 16  ;;  %v2949_v12 = vshrl.u32 %v7344_v49, 16  ;;  %v5083_v48 = vsel %vm7783_vm11, %v5081_v17, %v5082_v50  ;;  %v7296_v22 = vld [vmem:[#allocation2 + $0x90] sm:$0xff]  }
 0x181   : > { %v5080_v34 = vsel %vm7783_vm11, %v6244_v51, %v5079_v60  ;;  %v7346_v60 = vld [vmem:[#allocation2 + $0x88] sm:$0xf]  ;;  %v2943_v51 = vrot.slane %v2942_v38, 4 }
 0x182   : > { %v2947_v41 = vrot.slane %v2945_v23, 5  ;;  %v2951_v52 = vrot.slane %v2949_v12, 4  ;;  %v6262_v42 = vcombine.low %v5080_v34, %v5083_v48  ;;  %v2997_v63 = vshrl.u32 %v7346_v60, 16  ;;  %v2731_v34 = vld [vmem:[#allocation2 + $0x9c] sm:$0xf] }
 0x183   : > { %v2989_v23 = vrot.slane %v2987_v26, 5  ;;  %v3035_v38 = vshll.u32 %v2731_v34, 16 }
 0x184   : > { %v2952_v28 = vor.u32 %v2951_v52, %v2947_v41  ;;  %v2999_v35 = vrot.slane %v2997_v63, 4  ;;  %v2948_v48 = vsel %vm7461_vm7, %v2943_v51, %v2947_v41  ;;  %v3003_v52 = vshll.u32 %v7347_v39, 16  ;;  %v7300_v63 = vld [vmem:[#allocation2 + $0xc0] sm:$0xff]  }
 0x186   : > { %6808 = vmatmul.mubr.msk.bf16.gmra.mrb[16].mxu1 %vm1367_vm4, %v7294_v20  ;;  %6962 = vmatmul.mubr.msk.bf16.vlgmr.msra.gmra.mrb[0].mxu0 %vm1367_vm4, %v6260_v0  ;;  %v2984_v20 = vshrl.u32 %v2725_v1, 16  ;;  %v2993_v0 = vshll.u32 %v7346_v60, 16  ;;  %v2953_v50 = vrot.slane %v2952_v28, 4  ;;  %v7349_v28 = vld [vmem:[#allocation2 + $0xa0] sm:$0xf] }
 0x187   : > { %6811 = vmatprep.mubr.msk.bf16.mxu1 %vm1367_vm4, %v7295_v25  ;;  %6965 = vmatprep.mubr.msk.bf16.mxu0 %vm1367_vm4, %v6261_v40  ;;  %v2728_v25 = vld [vmem:[#allocation2 + $0x90] sm:$0xf]  ;;  %v2957_v40 = vrot.slane %v2955_v19, 5  ;;  %v3041_v18 = vshll.u32 %v7349_v28, 16  ;;  %v3045_v19 = vshrl.u32 %v7349_v28, 16 }
 0x188   : > { %v2986_v17 = vrot.slane %v2984_v20, 4  ;;  %v3008_v49 = vshrl.u32 %v2728_v25, 16  ;;  %v9097_v12 = vrot.slane %v2993_v0, 5  ;;  %v3011_v24 = vshll.u32 %v2728_v25, 16 }
 0x189   : > { %v2958_v6 = vsel %vm7461_vm7, %v2953_v50, %v2957_v40  ;;  %v9481_v0 = vcombine.low %v8798_v13, %v8816_v46  ;;  %v9482_v25 = vcombine.low %v8802_v43, %v8820_v53  ;;  %v7351_v53 = vld [vmem:[#allocation2 + $0xa4] sm:$0x1] }
 0x18a   : > { %v2990_v20 = vor.u32 %v2989_v23, %v2986_v17  ;;  %v3000_v41 = vor.u32 %v2999_v35, %v9097_v12  ;;  %v3010_v26 = vrot.slane %v3008_v49, 4  ;;  %v3013_v60 = vrot.slane %v3011_v24, 5  ;;  %v2734_v23 = vld [vmem:[#allocation2 + $0xa8] sm:$0xf]  ;;  %v7350_v24 = vld [vmem:[#allocation2 + $0x98] sm:$0x1] }
 0x18b   : > { %v6095_v51 = vcombine.low %v2948_v48, %v2958_v6  ;;  %v9116_v17 = vrot.slane %v3041_v18, 5  ;;  %v3047_v49 = vrot.slane %v3045_v19, 4  ;;  %v3051_v39 = vshll.u32 %v7351_v53, 16 }
 0x18c   : > { %v2991_v13 = vrot.slane %v2990_v20, 4  ;;  %v3001_v46 = vrot.slane %v3000_v41, 4  ;;  %v3014_v35 = vor.u32 %v3013_v60, %v3010_v26  ;;  %v3056_v48 = vshrl.u32 %v2734_v23, 16 }
 0x18d   : > { %v3059_v6 = vshll.u32 %v2734_v23, 16  ;;  %v9483_v41 = vcombine.low %v8830_v57, %v8844_v2 }
 0x18e   : > { %6812 = vmatmul.mubr.msk.bf16.gmra.mrb[20].mxu1 %vm1367_vm4, %v7296_v22  ;;  %6966 = vmatmul.mubr.msk.bf16.gmra.mrb[4].mxu0 %vm1367_vm4, %v6262_v42  ;;  %v7348_v22 = vld [vmem:[#allocation2 + $0x94] sm:$0xf]  ;;  %v3032_v42 = vshrl.u32 %v2731_v34, 16  ;;  %v3027_v34 = vshll.u32 %v7350_v24, 16  ;;  %v2996_v28 = vsel %vm7461_vm7, %v2991_v13, %v9097_v12  ;;  %v3015_v19 = vrot.slane %v3014_v35, 4 }
 0x18f   : > { %6815 = vmatprep.mubr.msk.bf16.mxu1 %vm1367_vm4, %v7297_v8  ;;  %6969 = vmatprep.mubr.msk.bf16.mxu0 %vm1367_vm4, %v9480_v11  ;;  %v3017_v8 = vshll.u32 %v7348_v22, 16  ;;  %v3021_v1 = vshrl.u32 %v7348_v22, 16  ;;  %v3005_v11 = vrot.slane %v3003_v52, 5  ;;  %v2737_v52 = vld [vmem:[#allocation2 + $0xb4] sm:$0xf] }
 0x190   : > { %v3029_v20 = vrot.slane %v3027_v34, 5  ;;  %v3080_v26 = vshrl.u32 %v2737_v52, 16  ;;  %v3083_v60 = vshll.u32 %v2737_v52, 16  ;;  %v2740_v24 = vld [vmem:[#allocation2 + $0xc0] sm:$0xf] }
 0x191   : > { %v9114_v50 = vrot.slane %v3017_v8, 5  ;;  %v3023_v40 = vrot.slane %v3021_v1, 4  ;;  %v3048_v8 = vor.u32 %v3047_v49, %v9116_v17  ;;  %v7352_v1 = vld [vmem:[#allocation2 + $0xac] sm:$0xf]  ;;  %v3006_v18 = vsel %vm7461_vm7, %v3001_v46, %v3005_v11  ;;  %v7355_v52 = vld [vmem:[#allocation2 + $0xc4] sm:$0xf] }
 0x192   : > { %v3058_v11 = vrot.slane %v3056_v48, 4  ;;  %v6097_v2 = vcombine.low %v2996_v28, %v3006_v18  ;;  %v3082_v23 = vrot.slane %v3080_v26, 4  ;;  %v3085_v13 = vrot.slane %v3083_v60, 5 }
 0x193   : > { %v3024_v43 = vor.u32 %v3023_v40, %v9114_v50  ;;  %v3061_v40 = vrot.slane %v3059_v6, 5  ;;  %v3020_v36 = vsel %vm7461_vm7, %v3015_v19, %v9114_v50  ;;  %v3104_v50 = vshrl.u32 %v2740_v24, 16 }
 0x194   : > { %v3107_v6 = vshll.u32 %v2740_v24, 16 }
 0x195   : > { %v3025_v12 = vrot.slane %v3024_v43, 4 }
 0x196   : > { %6816 = vmatmul.mubr.msk.bf16.gmra.mrb[24].mxu1 %vm1367_vm4, %v7298_v4  ;;  %6970 = vmatmul.mubr.msk.bf16.gmra.mrb[8].mxu0 %vm1367_vm4, %v9481_v0  ;;  %v3034_v4 = vrot.slane %v3032_v42, 4  ;;  %v3065_v42 = vshll.u32 %v7352_v1, 16  ;;  %v7353_v0 = vld [vmem:[#allocation2 + $0xb8] sm:$0xf]  ;;  %v3109_v26 = vrot.slane %v3107_v6, 5 }
 0x197   : > { %6819 = vmatprep.mubr.msk.bf16.mxu1 %vm1367_vm4, %v7299_v15  ;;  %6973 = vmatprep.mubr.msk.bf16.mxu0 %vm1367_vm4, %v9482_v25  ;;  %v3037_v15 = vrot.slane %v3035_v38, 5  ;;  %v3069_v38 = vshrl.u32 %v7352_v1, 16  ;;  %v3093_v25 = vshrl.u32 %v7353_v0, 16  ;;  %v3030_v9 = vsel %vm7461_vm7, %v3025_v12, %v3029_v20 }
 0x198   : > { %v3067_v49 = vrot.slane %v3065_v42, 5 }
 0x199   : > { %v3038_v22 = vor.u32 %v3037_v15, %v3034_v4  ;;  %v3049_v15 = vrot.slane %v3048_v8, 4  ;;  %v3071_v57 = vrot.slane %v3069_v38, 4  ;;  %v3095_v35 = vrot.slane %v3093_v25, 4  ;;  %v7357_v25 = vld [vmem:[#allocation2 + $0xc8] sm:$0x1] }
 0x19a   : > { %v3117_v8 = vshrl.u32 %v7355_v52, 16  ;;  %v6098_v38 = vcombine.low %v3020_v36, %v3030_v9  ;;  %v3123_v12 = vshll.u32 %v7357_v25, 16 }
 0x19b   : > { %v3039_v4 = vrot.slane %v3038_v22, 4  ;;  %v3072_v48 = vor.u32 %v3071_v57, %v3067_v49  ;;  %v3113_v22 = vshll.u32 %v7355_v52, 16 }
 0x19c   : > { %v3119_v45 = vrot.slane %v3117_v8, 4  ;;  %v3125_v57 = vrot.slane %v3123_v12, 5 }
 0x19d   : > { %v3044_v43 = vsel %vm7461_vm7, %v3039_v4, %v9116_v17  ;;  %v7356_v17 = vld [vmem:[#allocation2 + $0xbc] sm:$0x1]  ;;  %v3073_v19 = vrot.slane %v3072_v48, 4  ;;  %v3115_v60 = vrot.slane %v3113_v22, 5 }
 0x19e   : > { %6820 = vmatmul.mubr.msk.bf16.gmra.mrb[28].mxu1 %vm1367_vm4, %v7300_v63  ;;  %6974 = vmatmul.mubr.msk.bf16.gmra.mrb[12].mxu0 %vm1367_vm4, %v9483_v41  ;;  %v3089_v63 = vshll.u32 %v7353_v0, 16  ;;  %v3099_v42 = vshll.u32 %v7356_v17, 16  ;;  %v3106_v41 = vrot.slane %v3104_v50, 4 }
 0x19f   : > { %6841 = vmatprep.mubr.msk.bf16.mxu1 %vm1367_vm4, %v6095_v51  ;;  %6977 = vmatprep.mubr.msk.bf16.mxu0 %vm1367_vm4, %v6267_v10  ;;  %v3053_v51 = vrot.slane %v3051_v39, 5  ;;  %v7354_v10 = vld [vmem:[#allocation2 + $0xb0] sm:$0x1]  ;;  %v3062_v39 = vor.u32 %v3061_v40, %v3058_v11 }
 0x1a0   : > { %v3091_v46 = vrot.slane %v3089_v63, 5  ;;  %v3075_v34 = vshll.u32 %v7354_v10, 16  ;;  %v3101_v0 = vrot.slane %v3099_v42, 5  ;;  %v3110_v55 = vor.u32 %v3109_v26, %v3106_v41 }
 0x1a1   : > { %v3054_v53 = vsel %vm7461_vm7, %v3049_v15, %v3053_v51  ;;  %v3063_v18 = vrot.slane %v3062_v39, 4 }
 0x1a2   : > { %v3096_v1 = vor.u32 %v3095_v35, %v3091_v46  ;;  %v6099_v28 = vcombine.low %v3044_v43, %v3054_v53  ;;  %v3077_v20 = vrot.slane %v3075_v34, 5  ;;  %v3111_v15 = vrot.slane %v3110_v55, 4 }
 0x1a3   : > { %v3068_v63 = vsel %vm7461_vm7, %v3063_v18, %v3067_v49 }
 0x1a4   : > { %v3078_v62 = vsel %vm7461_vm7, %v3073_v19, %v3077_v20  ;;  %v3116_v37 = vsel %vm7461_vm7, %v3111_v15, %v3115_v60 }
 0x1a5   : > { %v6100_v40 = vcombine.low %v3068_v63, %v3078_v62 }
 0x1a6   : > { %6842 = vmatmul.mubr.msk.bf16.vlgmr.msra.gmra.mrb[16].mxu1 %vm1367_vm4, %v8902_v27  ;;  %6978 = vmatmul.mubr.msk.bf16.gmra.mrb[16].mxu0 %vm1367_vm4, %v6268_v56  ;;  %v3086_v27 = vor.u32 %v3085_v13, %v3082_v23  ;;  %v3097_v56 = vrot.slane %v3096_v1, 4 }
 0x1a7   : > { %6845 = vmatprep.mubr.msk.bf16.mxu1 %vm1367_vm4, %v6097_v2  ;;  %6981 = vmatprep.mubr.msk.bf16.mxu0 %vm1367_vm4, %v6269_v47  ;;  %v3120_v47 = vor.u32 %v3119_v45, %v3115_v60 }
 0x1a8   : > { %v3087_v59 = vrot.slane %v3086_v27, 4  ;;  %v3102_v11 = vsel %vm7461_vm7, %v3097_v56, %v3101_v0 }
 0x1a9   : > { %v3121_v49 = vrot.slane %v3120_v47, 4 }
 0x1aa   : > { %v3092_v51 = vsel %vm7461_vm7, %v3087_v59, %v3091_v46 }
 0x1ab   : > { %v6101_v4 = vcombine.low %v3092_v51, %v3102_v11  ;;  %v3126_v29 = vsel %vm7461_vm7, %v3121_v49, %v3125_v57 }
 0x1ae   : > { %6846 = vmatmul.mubr.msk.bf16.gmra.mrb[20].mxu1 %vm1367_vm4, %v6098_v38  ;;  %6982 = vmatmul.mubr.msk.bf16.gmra.mrb[20].mxu0 %vm1367_vm4, %v6270_v3  ;;  %v6102_v3 = vcombine.low %v3116_v37, %v3126_v29 }
 0x1af   : > { %6849 = vmatprep.mubr.msk.bf16.mxu1 %vm1367_vm4, %v6099_v28  ;;  %6985 = vmatprep.mubr.msk.bf16.mxu0 %vm1367_vm4, %v6271_v30 }
 0x1b6   : > { %6850 = vmatmul.mubr.msk.bf16.gmra.mrb[24].mxu1 %vm1367_vm4, %v6100_v40  ;;  %6986 = vmatmul.mubr.msk.bf16.gmra.mrb[24].mxu0 %vm1367_vm4, %v6272_v5 }
 0x1b7   : > { %6853 = vmatprep.mubr.msk.bf16.mxu1 %vm1367_vm4, %v6101_v4  ;;  %6989 = vmatprep.mubr.msk.bf16.mxu0 %vm1367_vm4, %v6273_v44 }
 0x1be   : > { %6854 = vmatmul.mubr.msk.bf16.gmra.mrb[28].mxu1 %vm1367_vm4, %v6102_v3  ;;  %6990 = vmatmul.mubr.msk.bf16.gmra.mrb[28].mxu0 %vm1367_vm4, %v6274_v61 }
 0x239   : > { %v6793_v32 = vpop.f32.mrb[0].mxu1 }
 0x23a   : > { %v2536_v54 = vpop.f32.mrb[1].mxu1 }
 0x23b   : > { %v6794_v14 = vpop.f32.mrb[2].mxu1 }
 0x23c   : > { %v2539_v30 = vpop.f32.mrb[3].mxu1 }
 0x241   : > { %v6797_v31 = vpop.f32.mrb[4].mxu1 }
 0x242   : > { %v2552_v58 = vpop.f32.mrb[5].mxu1 }
 0x243   : > { %v6798_v5 = vpop.f32.mrb[6].mxu1 }
 0x244   : > { %v2555_v2 = vpop.f32.mrb[7].mxu1 }
 0x249   : > { %v6801_v16 = vpop.f32.mrb[8].mxu1 }
 0x24a   : > { %v2568_v33 = vpop.f32.mrb[9].mxu1 }
 0x24b   : > { %v6802_v44 = vpop.f32.mrb[10].mxu1 }
 0x24c   : > { %v2571_v23 = vpop.f32.mrb[11].mxu1 }
 0x251   : > { %v6805_v13 = vpop.f32.mrb[12].mxu1 }
 0x252   : > { %v2584_v46 = vpop.f32.mrb[13].mxu1 }
 0x253   : > { %v6806_v35 = vpop.f32.mrb[14].mxu1 }
 0x254   : > { %v2587_v24 = vpop.f32.mrb[15].mxu1 }
 0x259   : > { %v6963_v21 = vpop.f32.mrb[0].mxu0 }
 0x25a   : > { %v9193_v7 = vadd.f32 %v6963_v21, %v6793_v32  ;;  %v5307_v61 = vpop.f32.mrb[1].mxu0 }
 0x25b   : > { %v9195_v36 = vadd.f32 %v5307_v61, %v2536_v54  ;;  %v6964_v9 = vpop.f32.mrb[2].mxu0 }
 0x25c   : > { %v9197_v10 = vadd.f32 %v6964_v9, %v6794_v14  ;;  %v5310_v34 = vpop.f32.mrb[3].mxu0 }
 0x25d   : > { %v9206_v43 = vadd.f32 %v5310_v34, %v2539_v30 }
 0x25e   : > { %v6432_v53 = vpack.c.bf16 %v9197_v10, %v9193_v7 }
 0x25f   : > { %v6427_v39 = vpack.c.bf16 %v9206_v43, %v9195_v36  ;;  %v5626_v48 = vadd.f32 %v9206_v43, %v9195_v36 }
 0x260   : > { %6519 = vst [vmem:[%s9204_s14 + $0x8] sm:$0xff] %v6432_v53  }
 0x261   : > { %6428 = vst [vmem:[%s9204_s14] sm:$0xff] %v6427_v39   ;;  %v5627_v50 = vadd.f32 %v9193_v7, %v5626_v48  ;;  %v6967_v6 = vpop.f32.mrb[4].mxu0 }
 0x262   : > { %v9217_v52 = vadd.f32 %v6967_v6, %v6797_v31  ;;  %v5323_v22 = vpop.f32.mrb[5].mxu0 }
 0x263   : > { %v9219_v8 = vadd.f32 %v5323_v22, %v2552_v58  ;;  %v5628_v27 = vadd.f32 %v9197_v10, %v5627_v50  ;;  %v6968_v1 = vpop.f32.mrb[6].mxu0 }
 0x264   : > { %v9222_v17 = vadd.f32 %v6968_v1, %v6798_v5  ;;  %v5326_v42 = vpop.f32.mrb[7].mxu0 }
 0x265   : > { %v5629_v38 = vadd.f32 %v9219_v8, %v5628_v27  ;;  %v9225_v28 = vadd.f32 %v5326_v42, %v2555_v2 }
 0x266   : > { %v6442_v18 = vpack.c.bf16 %v9222_v17, %v9217_v52 }
 0x267   : > { %v6437_v19 = vpack.c.bf16 %v9225_v28, %v9219_v8  ;;  %v5630_v20 = vadd.f32 %v9225_v28, %v5629_v38 }
 0x268   : > { %6521 = vst [vmem:[%s9204_s14 + $0x18] sm:$0xff] %v6442_v18  }
 0x269   : > { %6520 = vst [vmem:[%s9204_s14 + $0x10] sm:$0xff] %v6437_v19   ;;  %v5631_v41 = vadd.f32 %v9217_v52, %v5630_v20  ;;  %v6971_v26 = vpop.f32.mrb[8].mxu0 }
 0x26a   : > { %v9235_v60 = vadd.f32 %v6971_v26, %v6801_v16  ;;  %v5339_v45 = vpop.f32.mrb[9].mxu0 }
 0x26b   : > { %v9237_v59 = vadd.f32 %v5339_v45, %v2568_v33  ;;  %v5632_v56 = vadd.f32 %v9222_v17, %v5631_v41  ;;  %v6972_v0 = vpop.f32.mrb[10].mxu0 }
 0x26c   : > { %v9240_v63 = vadd.f32 %v6972_v0, %v6802_v44  ;;  %v5342_v62 = vpop.f32.mrb[11].mxu0 }
 0x26d   : > { %v5633_v55 = vadd.f32 %v9237_v59, %v5632_v56  ;;  %v9243_v47 = vadd.f32 %v5342_v62, %v2571_v23 }
 0x26e   : > { %v6452_v25 = vpack.c.bf16 %v9240_v63, %v9235_v60 }
 0x26f   : > { %v6447_v12 = vpack.c.bf16 %v9243_v47, %v9237_v59  ;;  %v5634_v51 = vadd.f32 %v9243_v47, %v5633_v55 }
 0x270   : > { %6523 = vst [vmem:[%s9204_s14 + $0x28] sm:$0xff] %v6452_v25  }
 0x271   : > { %6522 = vst [vmem:[%s9204_s14 + $0x20] sm:$0xff] %v6447_v12   ;;  %v5635_v11 = vadd.f32 %v9235_v60, %v5634_v51  ;;  %v6975_v40 = vpop.f32.mrb[12].mxu0 }
 0x272   : > { %v9253_v4 = vadd.f32 %v6975_v40, %v6805_v13  ;;  %v5355_v15 = vpop.f32.mrb[13].mxu0 }
 0x273   : > { %v9255_v49 = vadd.f32 %v5355_v15, %v2584_v46  ;;  %v5636_v57 = vadd.f32 %v9240_v63, %v5635_v11  ;;  %v6976_v37 = vpop.f32.mrb[14].mxu0 }
 0x274   : > { %v9258_v29 = vadd.f32 %v6976_v37, %v6806_v35  ;;  %v5358_v3 = vpop.f32.mrb[15].mxu0 }
 0x275   : > { %v5637_v32 = vadd.f32 %v9255_v49, %v5636_v57  ;;  %v9261_v54 = vadd.f32 %v5358_v3, %v2587_v24 }
 0x276   : > { %v6462_v14 = vpack.c.bf16 %v9258_v29, %v9253_v4 }
 0x277   : > { %v6457_v30 = vpack.c.bf16 %v9261_v54, %v9255_v49  ;;  %v5638_v31 = vadd.f32 %v9261_v54, %v5637_v32 }
 0x278   : > { %6525 = vst [vmem:[%s9204_s14 + $0x38] sm:$0xff] %v6462_v14  }
 0x279   : > { %v6843_v58 = vpop.f32.mrb[16].mxu1  ;;  %6524 = vst [vmem:[%s9204_s14 + $0x30] sm:$0xff] %v6457_v30   ;;  %v5639_v2 = vadd.f32 %v9253_v4, %v5638_v31  ;;  %v6979_v16 = vpop.f32.mrb[16].mxu0 }
 0x27a   : > { %v3330_v5 = vpop.f32.mrb[17].mxu1  ;;  %v9271_v44 = vadd.f32 %v6979_v16, %v6843_v58  ;;  %v5371_v23 = vpop.f32.mrb[17].mxu0 }
 0x27b   : > { %v6844_v33 = vpop.f32.mrb[18].mxu1  ;;  %v9273_v46 = vadd.f32 %v5371_v23, %v3330_v5  ;;  %v5640_v35 = vadd.f32 %v9258_v29, %v5639_v2  ;;  %v6980_v24 = vpop.f32.mrb[18].mxu0 }
 0x27c   : > { %v3333_v13 = vpop.f32.mrb[19].mxu1  ;;  %v9276_v21 = vadd.f32 %v6980_v24, %v6844_v33  ;;  %v5374_v61 = vpop.f32.mrb[19].mxu0 }
 0x27d   : > { %v5641_v9 = vadd.f32 %v9273_v46, %v5640_v35  ;;  %v9279_v34 = vadd.f32 %v5374_v61, %v3333_v13 }
 0x27e   : > { %v6472_v53 = vpack.c.bf16 %v9276_v21, %v9271_v44 }
 0x27f   : > { %v6467_v39 = vpack.c.bf16 %v9279_v34, %v9273_v46  ;;  %v5642_v48 = vadd.f32 %v9279_v34, %v5641_v9 }
 0x280   : > { %6527 = vst [vmem:[%s9204_s14 + $0x48] sm:$0xff] %v6472_v53  }
 0x281   : > { %v6847_v50 = vpop.f32.mrb[20].mxu1  ;;  %6526 = vst [vmem:[%s9204_s14 + $0x40] sm:$0xff] %v6467_v39   ;;  %v5643_v22 = vadd.f32 %v9271_v44, %v5642_v48  ;;  %v6983_v27 = vpop.f32.mrb[20].mxu0 }
 0x282   : > { %v3346_v6 = vpop.f32.mrb[21].mxu1  ;;  %v9289_v42 = vadd.f32 %v6983_v27, %v6847_v50  ;;  %v5387_v38 = vpop.f32.mrb[21].mxu0 }
 0x283   : > { %v6848_v1 = vpop.f32.mrb[22].mxu1  ;;  %v9291_v19 = vadd.f32 %v5387_v38, %v3346_v6  ;;  %v5644_v20 = vadd.f32 %v9276_v21, %v5643_v22  ;;  %v6984_v41 = vpop.f32.mrb[22].mxu0 }
 0x284   : > { %v3349_v18 = vpop.f32.mrb[23].mxu1  ;;  %v9294_v26 = vadd.f32 %v6984_v41, %v6848_v1  ;;  %v5390_v45 = vpop.f32.mrb[23].mxu0 }
 0x285   : > { %v5645_v56 = vadd.f32 %v9291_v19, %v5644_v20  ;;  %v9297_v0 = vadd.f32 %v5390_v45, %v3349_v18 }
 0x286   : > { %v6482_v62 = vpack.c.bf16 %v9294_v26, %v9289_v42 }
 0x287   : > { %v6477_v55 = vpack.c.bf16 %v9297_v0, %v9291_v19  ;;  %v5646_v25 = vadd.f32 %v9297_v0, %v5645_v56 }
 0x288   : > { %6529 = vst [vmem:[%s9204_s14 + $0x58] sm:$0xff] %v6482_v62  }
 0x289   : > { %v6851_v12 = vpop.f32.mrb[24].mxu1  ;;  %6528 = vst [vmem:[%s9204_s14 + $0x50] sm:$0xff] %v6477_v55   ;;  %v5647_v11 = vadd.f32 %v9289_v42, %v5646_v25  ;;  %v6987_v40 = vpop.f32.mrb[24].mxu0 }
 0x28a   : > { %v3362_v51 = vpop.f32.mrb[25].mxu1  ;;  %v9307_v57 = vadd.f32 %v6987_v40, %v6851_v12  ;;  %v5403_v37 = vpop.f32.mrb[25].mxu0 }
 0x28b   : > { %v6852_v15 = vpop.f32.mrb[26].mxu1  ;;  %v7020_v32 = vadd.f32 %v5403_v37, %v3362_v51  ;;  %v5648_v14 = vadd.f32 %v9294_v26, %v5647_v11  ;;  %v6988_v30 = vpop.f32.mrb[26].mxu0 }
 0x28c   : > { %v3365_v3 = vpop.f32.mrb[27].mxu1  ;;  %v7021_v31 = vadd.f32 %v6988_v30, %v6852_v15  ;;  %v5406_v58 = vpop.f32.mrb[27].mxu0 }
 0x28d   : > { %v5649_v5 = vadd.f32 %v7020_v32, %v5648_v14  ;;  %v7022_v2 = vadd.f32 %v5406_v58, %v3365_v3 }
 0x28e   : > { %v6492_v16 = vpack.c.bf16 %v7021_v31, %v9307_v57 }
 0x28f   : > { %v6487_v33 = vpack.c.bf16 %v7022_v2, %v7020_v32  ;;  %v5650_v23 = vadd.f32 %v7022_v2, %v5649_v5 }
 0x290   : > { %6531 = vst [vmem:[%s9204_s14 + $0x68] sm:$0xff] %v6492_v16  }
 0x291   : > { %v6855_v13 = vpop.f32.mrb[28].mxu1  ;;  %6530 = vst [vmem:[%s9204_s14 + $0x60] sm:$0xff] %v6487_v33   ;;  %v5651_v24 = vadd.f32 %v9307_v57, %v5650_v23  ;;  %v6991_v61 = vpop.f32.mrb[28].mxu0 }
 0x292   : > { %v3378_v35 = vpop.f32.mrb[29].mxu1  ;;  %v7023_v53 = vadd.f32 %v6991_v61, %v6855_v13  ;;  %v5419_v39 = vpop.f32.mrb[29].mxu0 }
 0x293   : > { %v6856_v9 = vpop.f32.mrb[30].mxu1  ;;  %v7024_v50 = vadd.f32 %v5419_v39, %v3378_v35  ;;  %v5652_v6 = vadd.f32 %v7021_v31, %v5651_v24  ;;  %v6992_v22 = vpop.f32.mrb[30].mxu0 }
 0x294   : > { %v3381_v48 = vpop.f32.mrb[31].mxu1  ;;  %v7025_v27 = vadd.f32 %v6992_v22, %v6856_v9  ;;  %v5422_v1 = vpop.f32.mrb[31].mxu0 }
 0x295   : > { %v5653_v38 = vadd.f32 %v7024_v50, %v5652_v6  ;;  %v7026_v18 = vadd.f32 %v5422_v1, %v3381_v48 }
 0x296   : > { %v6502_v20 = vpack.c.bf16 %v7025_v27, %v7023_v53 }
 0x297   : > { %v6497_v41 = vpack.c.bf16 %v7026_v18, %v7024_v50  ;;  %v5654_v45 = vadd.f32 %v7026_v18, %v5653_v38 }
 0x298   : > { %6533 = vst [vmem:[%s9204_s14 + $0x78] sm:$0xff] %v6502_v20  }
 0x299   : > { %6532 = vst [vmem:[%s9204_s14 + $0x70] sm:$0xff] %v6497_v41   ;;  %v5655_v56 = vadd.f32 %v7023_v53, %v5654_v45 }
 0x29b   : > { %v5656_v62 = vadd.f32 %v7025_v27, %v5655_v56 }
 0x29d   : > { %v5657_v55 = vrot.slane %v5656_v62, 4 }
 0x29f   : > { %v5658_v25 = vadd.f32 %v5657_v55, %v5656_v62 }
 0x2a1   : > { %v5659_v12 = vrot.slane %v5658_v25, 2 }
 0x2a3   : > { %v5660_v51 = vadd.f32 %v5659_v12, %v5658_v25 }
 0x2a5   : > { %v5661_v11 = vrot.slane %v5660_v51, 1 }
 0x2a7   : > { %v5662_v40 = vadd.f32 %v5661_v11, %v5660_v51 }
 0x2a9   : > { %v5663_v15 = vmul.f32 0.00390625, %v5662_v40  ;;  %5765 = vst [vmem:[%s265_s16] sm:$0x1] %v5662_v40 }
 0x2ab   : > { %v5672_v37 = vsub.f32 %v9237_v59, %v5663_v15  ;;  %v5673_v3 = vsub.f32 %v9243_v47, %v5663_v15  ;;  %v5674_v14 = vsub.f32 %v9235_v60, %v5663_v15  ;;  %v5675_v30 = vsub.f32 %v9240_v63, %v5663_v15 }
 0x2ac   : > { %v5676_v58 = vsub.f32 %v9255_v49, %v5663_v15  ;;  %v5677_v5 = vsub.f32 %v9261_v54, %v5663_v15  ;;  %v5678_v16 = vsub.f32 %v9253_v4, %v5663_v15  ;;  %v5679_v33 = vsub.f32 %v9258_v29, %v5663_v15 }
 0x2ad   : > { %v5680_v23 = vsub.f32 %v9273_v46, %v5663_v15  ;;  %v5681_v13 = vsub.f32 %v9279_v34, %v5663_v15  ;;  %v5682_v59 = vsub.f32 %v9271_v44, %v5663_v15  ;;  %v5683_v47 = vsub.f32 %v9276_v21, %v5663_v15 }
 0x2ae   : > { %v5684_v60 = vsub.f32 %v9291_v19, %v5663_v15  ;;  %v5685_v63 = vsub.f32 %v9297_v0, %v5663_v15  ;;  %v5686_v49 = vsub.f32 %v9289_v42, %v5663_v15  ;;  %v5687_v54 = vsub.f32 %v9294_v26, %v5663_v15 }
 0x2af   : > { %v5688_v35 = vsub.f32 %v7020_v32, %v5663_v15  ;;  %v9336_v4 = vsub.f32 %v7022_v2, %v5663_v15  ;;  %v9339_v29 = vsub.f32 %v9307_v57, %v5663_v15  ;;  %v9341_v46 = vsub.f32 %v7021_v31, %v5663_v15 }
 0x2b0   : > { %v9343_v34 = vsub.f32 %v7024_v50, %v5663_v15  ;;  %v9345_v44 = vsub.f32 %v7026_v18, %v5663_v15  ;;  %v9347_v21 = vsub.f32 %v7023_v53, %v5663_v15  ;;  %v9349_v19 = vsub.f32 %v7025_v27, %v5663_v15 }
 0x2b1   : > { %v5664_v42 = vsub.f32 %v9195_v36, %v5663_v15  ;;  %v5665_v26 = vsub.f32 %v9206_v43, %v5663_v15  ;;  %v5666_v0 = vsub.f32 %v9193_v7, %v5663_v15  ;;  %v5667_v57 = vsub.f32 %v9197_v10, %v5663_v15 }
 0x2b2   : > { %v5668_v31 = vsub.f32 %v9219_v8, %v5663_v15  ;;  %v5669_v9 = vsub.f32 %v9225_v28, %v5663_v15  ;;  %v5670_v48 = vsub.f32 %v9217_v52, %v5663_v15  ;;  %v5671_v43 = vsub.f32 %v9222_v17, %v5663_v15 }
 0x2b3   : > { %v5696_v32 = vmul.f32 %v5664_v42, %v5664_v42  ;;  %v5697_v2 = vmul.f32 %v5665_v26, %v5665_v26  ;;  %v5698_v24 = vmul.f32 %v5666_v0, %v5666_v0  ;;  %v5699_v53 = vmul.f32 %v5667_v57, %v5667_v57 }
 0x2b4   : > { %v5700_v50 = vmul.f32 %v5668_v31, %v5668_v31  ;;  %v5701_v6 = vmul.f32 %v5669_v9, %v5669_v9  ;;  %v5702_v22 = vmul.f32 %v5670_v48, %v5670_v48  ;;  %v5703_v1 = vmul.f32 %v5671_v43, %v5671_v43 }
 0x2b5   : > { %v5728_v61 = vadd.f32 %v5697_v2, %v5696_v32  ;;  %v5704_v38 = vmul.f32 %v5672_v37, %v5672_v37  ;;  %v5705_v18 = vmul.f32 %v5673_v3, %v5673_v3  ;;  %v5706_v41 = vmul.f32 %v5674_v14, %v5674_v14 }
 0x2b6   : > { %v5707_v45 = vmul.f32 %v5675_v30, %v5675_v30  ;;  %v5708_v62 = vmul.f32 %v5676_v58, %v5676_v58  ;;  %v5709_v55 = vmul.f32 %v5677_v5, %v5677_v5  ;;  %v5710_v12 = vmul.f32 %v5678_v16, %v5678_v16 }
 0x2b7   : > { %v5729_v39 = vadd.f32 %v5728_v61, %v5698_v24  ;;  %v5711_v51 = vmul.f32 %v5679_v33, %v5679_v33  ;;  %v5712_v40 = vmul.f32 %v5680_v23, %v5680_v23  ;;  %v5713_v42 = vmul.f32 %v5681_v13, %v5681_v13 }
 0x2b8   : > { %v5714_v37 = vmul.f32 %v5682_v59, %v5682_v59  ;;  %v5715_v3 = vmul.f32 %v5683_v47, %v5683_v47  ;;  %v5716_v14 = vmul.f32 %v5684_v60, %v5684_v60  ;;  %v5717_v30 = vmul.f32 %v5685_v63, %v5685_v63 }
 0x2b9   : > { %v5730_v36 = vadd.f32 %v5729_v39, %v5699_v53  ;;  %v5718_v58 = vmul.f32 %v5686_v49, %v5686_v49  ;;  %v5719_v5 = vmul.f32 %v5687_v54, %v5687_v54  ;;  %v5720_v16 = vmul.f32 %v5688_v35, %v5688_v35 }
 0x2ba   : > { %v5721_v33 = vmul.f32 %v9336_v4, %v9336_v4  ;;  %v5722_v13 = vmul.f32 %v9339_v29, %v9339_v29  ;;  %v5723_v47 = vmul.f32 %v9341_v46, %v9341_v46  ;;  %v5724_v63 = vmul.f32 %v9343_v34, %v9343_v34 }
 0x2bb   : > { %v5731_v7 = vadd.f32 %v5730_v36, %v5700_v50  ;;  %v5725_v54 = vmul.f32 %v9345_v44, %v9345_v44  ;;  %v5726_v4 = vmul.f32 %v9347_v21, %v9347_v21  ;;  %v5727_v29 = vmul.f32 %v9349_v19, %v9349_v19 }
 0x2bd   : > { %v5732_v27 = vadd.f32 %v5731_v7, %v5701_v6 }
 0x2bf   : > { %v5733_v10 = vadd.f32 %v5732_v27, %v5702_v22 }
 0x2c1   : > { %v5734_v8 = vadd.f32 %v5733_v10, %v5703_v1 }
 0x2c3   : > { %v5735_v20 = vadd.f32 %v5734_v8, %v5704_v38 }
 0x2c5   : > { %v5736_v28 = vadd.f32 %v5735_v20, %v5705_v18 }
 0x2c7   : > { %v5737_v56 = vadd.f32 %v5736_v28, %v5706_v41 }
 0x2c9   : > { %v5738_v52 = vadd.f32 %v5737_v56, %v5707_v45 }
 0x2cb   : > { %v5739_v25 = vadd.f32 %v5738_v52, %v5708_v62 }
 0x2cd   : > { %v5740_v17 = vadd.f32 %v5739_v25, %v5709_v55 }
 0x2cf   : > { %v5741_v11 = vadd.f32 %v5740_v17, %v5710_v12 }
 0x2d1   : > { %v5742_v15 = vadd.f32 %v5741_v11, %v5711_v51 }
 0x2d3   : > { %v5743_v26 = vadd.f32 %v5742_v15, %v5712_v40 }
 0x2d5   : > { %v5744_v0 = vadd.f32 %v5743_v26, %v5713_v42 }
 0x2d7   : > { %v5745_v32 = vadd.f32 %v5744_v0, %v5714_v37 }
 0x2d9   : > { %v5746_v2 = vadd.f32 %v5745_v32, %v5715_v3 }
 0x2db   : > { %v5747_v57 = vadd.f32 %v5746_v2, %v5716_v14 }
 0x2dd   : > { %v5748_v31 = vadd.f32 %v5747_v57, %v5717_v30 }
 0x2df   : > { %v5749_v24 = vadd.f32 %v5748_v31, %v5718_v58 }
 0x2e1   : > { %v5750_v61 = vadd.f32 %v5749_v24, %v5719_v5 }
 0x2e3   : > { %v5751_v23 = vadd.f32 %v5750_v61, %v5720_v16 }
 0x2e5   : > { %v5752_v59 = vadd.f32 %v5751_v23, %v5721_v33 }
 0x2e7   : > { %v5753_v60 = vadd.f32 %v5752_v59, %v5722_v13 }
 0x2e9   : > { %v5754_v49 = vadd.f32 %v5753_v60, %v5723_v47 }
 0x2eb   : > { %v5755_v35 = vadd.f32 %v5754_v49, %v5724_v63 }
 0x2ed   : > { %v5756_v9 = vadd.f32 %v5755_v35, %v5725_v54 }
 0x2ef   : > { %v5757_v53 = vadd.f32 %v5756_v9, %v5726_v4 }
 0x2f1   : > { %v5758_v39 = vadd.f32 %v5757_v53, %v5727_v29 }
 0x2f3   : > { %v5759_v46 = vrot.slane %v5758_v39, 4 }
 0x2f5   : > { %v5760_v48 = vadd.f32 %v5759_v46, %v5758_v39 }
 0x2f7   : > { %v5761_v50 = vrot.slane %v5760_v48, 2 }
 0x2f9   : > { %v5762_v36 = vadd.f32 %v5761_v50, %v5760_v48 }
 0x2fb   : > { %v5763_v43 = vrot.slane %v5762_v36, 1 }
 0x2fd   : > { %v5764_v34 = vadd.f32 %v5763_v43, %v5762_v36 }
 0x2ff   : > { %5766 = vst [vmem:[%s268_s19] sm:$0x1] %v5764_v34 }
 0x300 PF: > { %s17_s21 = sadd.s32 1, %s7364_s21  }
 0x301   : > { %p14_p4 = scmp.ge.s32.totalorder %s17_s21, 4  }
 0x303   :  { %16 = sbr.rel (!%p14_p4) target bundleno = 1 (0x1), region = 101 }

</bundles_post_ra>
